<compile_context>
chip_gen: v6e
topology: v6e:2x2x1
jax: 0.10.0
libtpu: 0.0.40
codegen_flags: <defaults>
</compile_context>

<pallas_src>
import functools

import jax
import jax.numpy as jnp
from jax.experimental import pallas as pl
from jax.experimental.pallas import tpu as pltpu


# --------------------- in-kernel 0/1 selection builders ---------------------

def _pool_row_sel(n_rows, n_cols, parity, dtype):
    """sel[r, s] = 1  iff  s == 2*r + parity   (row-wise 2x pooling select)."""
    r = jax.lax.broadcasted_iota(jnp.int32, (n_rows, n_cols), 0)
    s = jax.lax.broadcasted_iota(jnp.int32, (n_rows, n_cols), 1)
    return jnp.where(s == 2 * r + parity, 1.0, 0.0).astype(dtype)


def _pool_lane_sel(n_in, n_out, block, parity, dtype):
    """sel[i, j] = 1 iff i == (2*(j//block)+parity)*block + j%block.

    `block` is the channel count folded into the lane dim (power of two).
    """
    shift = block.bit_length() - 1
    i = jax.lax.broadcasted_iota(jnp.int32, (n_in, n_out), 0)
    j = jax.lax.broadcasted_iota(jnp.int32, (n_in, n_out), 1)
    src = ((j >> shift) * 2 + parity) * block + (j & (block - 1))
    return jnp.where(i == src, 1.0, 0.0).astype(dtype)


def _gather_row_sel(n_rows, n_cols, per_dst, per_src, offset, dtype):
    """sel[r, s] = 1 iff s == (r//per_dst)*per_src + r%per_dst + offset.

    per_dst is 1 or a power of two (only shifts/ands are used).
    """
    r = jax.lax.broadcasted_iota(jnp.int32, (n_rows, n_cols), 0)
    s = jax.lax.broadcasted_iota(jnp.int32, (n_rows, n_cols), 1)
    if per_dst == 1:
        b, k = r, 0
    else:
        shift = per_dst.bit_length() - 1
        b = r >> shift
        k = r & (per_dst - 1)
    return jnp.where(s == b * per_src + k + offset, 1.0, 0.0).astype(dtype)


# ------------------------------ fused kernel --------------------------------

def _cnn_kernel(x_ref, m1_ref, b1_ref, g2_ref, b2_ref,
                wf1_ref, bf1_ref, wf2_ref, bf2_ref, out_ref, *, n):
    f32 = jnp.float32
    bf16 = jnp.bfloat16

    # ---- conv1 (1->32, 5x5, valid): 5 banded matmuls on the MXU ----
    # acc1[n*24 + h, w*32 + c] = conv1(x)[n, c, h, w] + b1[c]
    acc1 = jnp.zeros((n * 24, 24 * 32), f32)
    for di in range(5):
        xs = x_ref[:, di:di + 24, :].reshape(n * 24, 28).astype(bf16)
        acc1 = acc1 + jnp.dot(xs, m1_ref[di], preferred_element_type=f32)
    acc1 = acc1 + b1_ref[...]

    # ---- maxpool1 (2x2): row-pool then lane-pool via selection matmuls ----
    a1 = acc1.astype(bf16)
    rmax1 = jnp.maximum(
        jnp.dot(_pool_row_sel(12 * n, 24 * n, 0, bf16), a1,
                preferred_element_type=f32),
        jnp.dot(_pool_row_sel(12 * n, 24 * n, 1, bf16), a1,
                preferred_element_type=f32))
    r1 = rmax1.astype(bf16)
    p1 = jnp.maximum(
        jnp.dot(r1, _pool_lane_sel(768, 384, 32, 0, bf16),
                preferred_element_type=f32),
        jnp.dot(r1, _pool_lane_sel(768, 384, 32, 1, bf16),
                preferred_element_type=f32))
    # p1[n*12 + h, w*32 + c] = pool1[n, c, h, w]

    # ---- conv2 (32->64, 5x5, valid): row-shift selects + banded matmuls ----
    p1b = p1.astype(bf16)
    acc2 = jnp.zeros((n * 8, 8 * 64), f32)
    for di in range(5):
        xd = jnp.dot(_gather_row_sel(8 * n, 12 * n, 8, 12, di, bf16), p1b,
                     preferred_element_type=f32).astype(bf16)     # (8n, 384)
        acc2 = acc2 + jnp.dot(xd, g2_ref[di], preferred_element_type=f32)
    acc2 = acc2 + b2_ref[...]
    # acc2[n*8 + h, w*64 + c] = conv2(pool1)[n, c, h, w] + b2[c]

    # ---- maxpool2 (2x2) ----
    a2 = acc2.astype(bf16)
    rmax2 = jnp.maximum(
        jnp.dot(_pool_row_sel(4 * n, 8 * n, 0, bf16), a2,
                preferred_element_type=f32),
        jnp.dot(_pool_row_sel(4 * n, 8 * n, 1, bf16), a2,
                preferred_element_type=f32))
    r2 = rmax2.astype(bf16)
    p2 = jnp.maximum(
        jnp.dot(r2, _pool_lane_sel(512, 256, 64, 0, bf16),
                preferred_element_type=f32),
        jnp.dot(r2, _pool_lane_sel(512, 256, 64, 1, bf16),
                preferred_element_type=f32))
    # p2[n*4 + h, w*64 + c] = pool2[n, c, h, w]

    # ---- fc1 (1024 -> 512) + ReLU.  The NCHW flatten is folded into the
    #      pre-permuted weight rows; 4 accumulated block matmuls. ----
    p2b = p2.astype(bf16)
    fc1 = jnp.zeros((n, 512), f32)
    for h in range(4):
        row = jnp.dot(_gather_row_sel(n, 4 * n, 1, 4, h, bf16), p2b,
                      preferred_element_type=f32).astype(bf16)    # (n, 256)
        fc1 = fc1 + jnp.dot(row, wf1_ref[h * 256:(h + 1) * 256, :],
                            preferred_element_type=f32)
    fc1 = jnp.maximum(fc1 + bf1_ref[...], 0.0)

    # ---- fc2 (512 -> 128 padded) + softmax over the BATCH axis (dim=0) ----
    logits = jnp.dot(fc1.astype(bf16), wf2_ref[...],
                     preferred_element_type=f32) + bf2_ref[...]
    mx = jnp.max(logits, axis=0, keepdims=True)
    e = jnp.exp(logits - mx)
    denom = jnp.sum(e, axis=0, keepdims=True)
    out_ref[...] = (e * pl.reciprocal(denom, approx=True)).astype(out_ref.dtype)


# -------------------------- wrapper / weight prep ---------------------------

def _prep_weights(params, dtype=jnp.bfloat16):
    """One-time re-layout of the PyTorch-style weights for the fused kernel."""
    w1, b1 = params["w1"], params["b1"]          # (32,1,5,5), (32,)
    w2, b2 = params["w2"], params["b2"]          # (64,32,5,5), (64,)
    wf1, bf1 = params["wf1"], params["bf1"]      # (1024,512), (512,)
    wf2, bf2 = params["wf2"], params["bf2"]      # (512,62),   (62,)
    f32 = jnp.float32

    # conv1 -> banded matrices  M1[di][wi, wo*32 + c] = w1[c,0,di,wi-wo]
    wi = jnp.arange(28)[:, None]
    wo = jnp.arange(24)[None, :]
    d1 = wi - wo
    valid1 = (d1 >= 0) & (d1 < 5)
    w1t = jnp.transpose(w1[:, 0], (1, 2, 0))     # (di, dj, c)
    m1 = []
    for di in range(5):
        blk = jnp.take(w1t[di], jnp.clip(d1, 0, 4), axis=0)       # (28,24,32)
        blk = jnp.where(valid1[:, :, None], blk, 0.0)
        m1.append(blk.reshape(28, 24 * 32))
    m1 = jnp.stack(m1)                                            # (5,28,768)

    # conv2 -> banded matrices  G2[di][wp*32+ci, w*64+co] = w2[co,ci,di,wp-w]
    wp = jnp.arange(12)[:, None]
    w2o = jnp.arange(8)[None, :]
    d2 = wp - w2o
    valid2 = (d2 >= 0) & (d2 < 5)
    w2t = jnp.transpose(w2, (2, 3, 1, 0))        # (di, dj, ci, co)
    g2 = []
    for di in range(5):
        blk = jnp.take(w2t[di], jnp.clip(d2, 0, 4), axis=0)       # (12,8,32,64)
        blk = jnp.where(valid2[:, :, None, None], blk, 0.0)
        g2.append(jnp.transpose(blk, (0, 2, 1, 3)).reshape(12 * 32, 8 * 64))
    g2 = jnp.stack(g2)                                            # (5,384,512)

    # fc1: reorder rows from torch NCHW-flatten (c*16+h*4+w) to NHWC blocks.
    wf1_p = wf1.reshape(64, 4, 4, 512).transpose(1, 2, 0, 3).reshape(1024, 512)

    # fc2: pad output to a lane-dense 128 columns (zeros sliced off later).
    wf2_p = jnp.zeros((512, 128), wf2.dtype).at[:, :62].set(wf2)
    bf2_p = jnp.zeros((128,), bf2.dtype).at[:62].set(bf2)

    return dict(
        m1=m1.astype(dtype),
        g2=g2.astype(dtype),
        wf1=wf1_p.astype(dtype),
        wf2=wf2_p.astype(dtype),
        b1row=jnp.tile(b1, 24).reshape(1, 768).astype(f32),
        b2row=jnp.tile(b2, 8).reshape(1, 512).astype(f32),
        bf1row=bf1.reshape(1, 512).astype(f32),
        bf2row=bf2_p.reshape(1, 128).astype(f32),
    )


@jax.jit
def cnn_forward(params, x_nchw):
    n = x_nchw.shape[0]
    prep = _prep_weights(params)
    x3 = x_nchw.reshape(n, 28, 28).astype(jnp.float32)

    out = pl.pallas_call(
        functools.partial(_cnn_kernel, n=n),
        out_shape=jax.ShapeDtypeStruct((n, 128), jnp.float32),
        grid=(1,),
        in_specs=[
            pl.BlockSpec((n, 28, 28), lambda i: (0, 0, 0)),    # x
            pl.BlockSpec((5, 28, 768), lambda i: (0, 0, 0)),   # conv1 banded W
            pl.BlockSpec((1, 768), lambda i: (0, 0)),          # b1 row
            pl.BlockSpec((5, 384, 512), lambda i: (0, 0, 0)),  # conv2 banded W
            pl.BlockSpec((1, 512), lambda i: (0, 0)),          # b2 row
            pl.BlockSpec((1024, 512), lambda i: (0, 0)),       # fc1 W (permuted)
            pl.BlockSpec((1, 512), lambda i: (0, 0)),          # fc1 b
            pl.BlockSpec((512, 128), lambda i: (0, 0)),        # fc2 W (padded)
            pl.BlockSpec((1, 128), lambda i: (0, 0)),          # fc2 b (padded)
        ],
        out_specs=pl.BlockSpec((n, 128), lambda i: (0, 0)),
        compiler_params=pltpu.CompilerParams(
            dimension_semantics=("arbitrary",),
            vmem_limit_bytes=32 * 1024 * 1024,
        ),
        cost_estimate=pl.CostEstimate(
            flops=42_000_000 * n,
            transcendentals=128 * n,
            bytes_accessed=3_400_000,
        ),
    )(x3, prep["m1"], prep["b1row"], prep["g2"], prep["b2row"],
      prep["wf1"], prep["bf1row"], prep["wf2"], prep["bf2row"])
    return out[:, :62]


# ----------------------------- params / reference ---------------------------

def init_params(key):
    ks = jax.random.split(key, 8)
    s = 0.05
    return dict(
        w1=jax.random.normal(ks[0], (32, 1, 5, 5), jnp.float32) * s,
        b1=jax.random.normal(ks[1], (32,), jnp.float32) * s,
        w2=jax.random.normal(ks[2], (64, 32, 5, 5), jnp.float32) * s,
        b2=jax.random.normal(ks[3], (64,), jnp.float32) * s,
        wf1=jax.random.normal(ks[4], (1024, 512), jnp.float32) * s,
        bf1=jax.random.normal(ks[5], (512,), jnp.float32) * s,
        wf2=jax.random.normal(ks[6], (512, 62), jnp.float32) * s,
        bf2=jax.random.normal(ks[7], (62,), jnp.float32) * s,
    )


def reference_forward(params, x_nchw):
    """Plain-JAX (f32) reference mirroring the PyTorch forward."""
    y = jax.lax.conv_general_dilated(
        x_nchw, params["w1"], (1, 1), "VALID",
        dimension_numbers=("NCHW", "OIHW", "NCHW")) + params["b1"][None, :, None, None]
    y = jax.lax.reduce_window(y, -jnp.inf, jax.lax.max, (1, 1, 2, 2), (1, 1, 2, 2), "VALID")
    y = jax.lax.conv_general_dilated(
        y, params["w2"], (1, 1), "VALID",
        dimension_numbers=("NCHW", "OIHW", "NCHW")) + params["b2"][None, :, None, None]
    y = jax.lax.reduce_window(y, -jnp.inf, jax.lax.max, (1, 1, 2, 2), (1, 1, 2, 2), "VALID")
    y = y.reshape(y.shape[0], -1)
    y = jnp.maximum(y @ params["wf1"] + params["bf1"], 0.0)
    y = y @ params["wf2"] + params["bf2"]
    return jax.nn.softmax(y, axis=0)


if __name__ == "__main__":
    key = jax.random.PRNGKey(0)
    k_x, k_p = jax.random.split(key)
    # Linear(1024, 512) implies 64*4*4 after the conv stack -> 28x28 input.
    x = jax.random.normal(k_x, (2, 1, 28, 28), jnp.float32)
    params = init_params(k_p)

    out = jax.block_until_ready(cnn_forward(params, x))
    ref = jax.block_until_ready(reference_forward(params, x))

    assert out.shape == (2, 62), out.shape
    # bf16 MXU operands vs a pure-f32 reference -> bf16-appropriate tolerance.
    assert bool(jnp.allclose(out, ref, rtol=2e-2, atol=2e-2)), "mismatch vs reference"
    print("KERNEL_OK")
</pallas_src>

<mosaic_0001>
module attributes {stable_mosaic.version = 11 : i64} {
  func.func @_cnn_kernel(%arg0: i32, %arg1: memref<2x28x28xf32, #tpu.memory_space<vmem>>, %arg2: memref<5x28x768xbf16, #tpu.memory_space<vmem>>, %arg3: memref<1x768xf32, #tpu.memory_space<vmem>>, %arg4: memref<5x384x512xbf16, #tpu.memory_space<vmem>>, %arg5: memref<1x512xf32, #tpu.memory_space<vmem>>, %arg6: memref<1024x512xbf16, #tpu.memory_space<vmem>>, %arg7: memref<1x512xf32, #tpu.memory_space<vmem>>, %arg8: memref<512x128xbf16, #tpu.memory_space<vmem>>, %arg9: memref<1x128xf32, #tpu.memory_space<vmem>>, %arg10: memref<2x128xf32, #tpu.memory_space<vmem>>) attributes {dimension_semantics = [#tpu.dimension_semantics<arbitrary>], iteration_bounds = array<i64: 1>, scalar_prefetch = 0 : i64, scratch_operands = 0 : i64, tpu.core_type = #tpu.core_type<tc>, window_params = [{pipeline_mode = #tpu.pipeline_mode<synchronous>, transform_indices = @transform_0, window_bounds = array<i64: 2, 28, 28>}, {pipeline_mode = #tpu.pipeline_mode<synchronous>, transform_indices = @transform_1, window_bounds = array<i64: 5, 28, 768>}, {pipeline_mode = #tpu.pipeline_mode<synchronous>, transform_indices = @transform_2, window_bounds = array<i64: 1, 768>}, {pipeline_mode = #tpu.pipeline_mode<synchronous>, transform_indices = @transform_3, window_bounds = array<i64: 5, 384, 512>}, {pipeline_mode = #tpu.pipeline_mode<synchronous>, transform_indices = @transform_4, window_bounds = array<i64: 1, 512>}, {pipeline_mode = #tpu.pipeline_mode<synchronous>, transform_indices = @transform_5, window_bounds = array<i64: 1024, 512>}, {pipeline_mode = #tpu.pipeline_mode<synchronous>, transform_indices = @transform_6, window_bounds = array<i64: 1, 512>}, {pipeline_mode = #tpu.pipeline_mode<synchronous>, transform_indices = @transform_7, window_bounds = array<i64: 512, 128>}, {pipeline_mode = #tpu.pipeline_mode<synchronous>, transform_indices = @transform_8, window_bounds = array<i64: 1, 128>}, {pipeline_mode = #tpu.pipeline_mode<synchronous>, transform_indices = @transform_9, window_bounds = array<i64: 2, 128>}]} {
    %cst = arith.constant 0.000000e+00 : f32
    %0 = vector.broadcast %cst : f32 to vector<48x768xf32>
    %c0 = arith.constant 0 : index
    %c0_0 = arith.constant 0 : index
    %c0_1 = arith.constant 0 : index
    %1 = vector.load %arg1[%c0, %c0_0, %c0_1] : memref<2x28x28xf32, #tpu.memory_space<vmem>>, vector<2x24x28xf32>
    %2 = vector.shape_cast %1 : vector<2x24x28xf32> to vector<48x28xf32>
    %3 = arith.truncf %2 : vector<48x28xf32> to vector<48x28xbf16>
    %c0_2 = arith.constant 0 : index
    %c0_3 = arith.constant 0 : index
    %c0_4 = arith.constant 0 : index
    %4 = vector.load %arg2[%c0_2, %c0_3, %c0_4] : memref<5x28x768xbf16, #tpu.memory_space<vmem>>, vector<1x28x768xbf16>
    %5 = vector.shape_cast %4 : vector<1x28x768xbf16> to vector<28x768xbf16>
    %cst_5 = arith.constant dense<0.000000e+00> : vector<48x768xf32>
    %6 = tpu.matmul %3, %5, %cst_5 {dimension_numbers = #tpu.dot_dimension_numbers<[1], [0], [0], [1], [0, 0, 1, 1], [], []>} : vector<48x28xbf16>, vector<28x768xbf16>, vector<48x768xf32> -> vector<48x768xf32>
    %7 = arith.addf %0, %6 : vector<48x768xf32>
    %c0_6 = arith.constant 0 : index
    %c1 = arith.constant 1 : index
    %c0_7 = arith.constant 0 : index
    %8 = vector.load %arg1[%c0_6, %c1, %c0_7] : memref<2x28x28xf32, #tpu.memory_space<vmem>>, vector<2x24x28xf32>
    %9 = vector.shape_cast %8 : vector<2x24x28xf32> to vector<48x28xf32>
    %10 = arith.truncf %9 : vector<48x28xf32> to vector<48x28xbf16>
    %c1_8 = arith.constant 1 : index
    %c0_9 = arith.constant 0 : index
    %c0_10 = arith.constant 0 : index
    %11 = vector.load %arg2[%c1_8, %c0_9, %c0_10] : memref<5x28x768xbf16, #tpu.memory_space<vmem>>, vector<1x28x768xbf16>
    %12 = vector.shape_cast %11 : vector<1x28x768xbf16> to vector<28x768xbf16>
    %cst_11 = arith.constant dense<0.000000e+00> : vector<48x768xf32>
    %13 = tpu.matmul %10, %12, %cst_11 {dimension_numbers = #tpu.dot_dimension_numbers<[1], [0], [0], [1], [0, 0, 1, 1], [], []>} : vector<48x28xbf16>, vector<28x768xbf16>, vector<48x768xf32> -> vector<48x768xf32>
    %14 = arith.addf %7, %13 : vector<48x768xf32>
    %c0_12 = arith.constant 0 : index
    %c2 = arith.constant 2 : index
    %c0_13 = arith.constant 0 : index
    %15 = vector.load %arg1[%c0_12, %c2, %c0_13] : memref<2x28x28xf32, #tpu.memory_space<vmem>>, vector<2x24x28xf32>
    %16 = vector.shape_cast %15 : vector<2x24x28xf32> to vector<48x28xf32>
    %17 = arith.truncf %16 : vector<48x28xf32> to vector<48x28xbf16>
    %c2_14 = arith.constant 2 : index
    %c0_15 = arith.constant 0 : index
    %c0_16 = arith.constant 0 : index
    %18 = vector.load %arg2[%c2_14, %c0_15, %c0_16] : memref<5x28x768xbf16, #tpu.memory_space<vmem>>, vector<1x28x768xbf16>
    %19 = vector.shape_cast %18 : vector<1x28x768xbf16> to vector<28x768xbf16>
    %cst_17 = arith.constant dense<0.000000e+00> : vector<48x768xf32>
    %20 = tpu.matmul %17, %19, %cst_17 {dimension_numbers = #tpu.dot_dimension_numbers<[1], [0], [0], [1], [0, 0, 1, 1], [], []>} : vector<48x28xbf16>, vector<28x768xbf16>, vector<48x768xf32> -> vector<48x768xf32>
    %21 = arith.addf %14, %20 : vector<48x768xf32>
    %c0_18 = arith.constant 0 : index
    %c3 = arith.constant 3 : index
    %c0_19 = arith.constant 0 : index
    %22 = vector.load %arg1[%c0_18, %c3, %c0_19] : memref<2x28x28xf32, #tpu.memory_space<vmem>>, vector<2x24x28xf32>
    %23 = vector.shape_cast %22 : vector<2x24x28xf32> to vector<48x28xf32>
    %24 = arith.truncf %23 : vector<48x28xf32> to vector<48x28xbf16>
    %c3_20 = arith.constant 3 : index
    %c0_21 = arith.constant 0 : index
    %c0_22 = arith.constant 0 : index
    %25 = vector.load %arg2[%c3_20, %c0_21, %c0_22] : memref<5x28x768xbf16, #tpu.memory_space<vmem>>, vector<1x28x768xbf16>
    %26 = vector.shape_cast %25 : vector<1x28x768xbf16> to vector<28x768xbf16>
    %cst_23 = arith.constant dense<0.000000e+00> : vector<48x768xf32>
    %27 = tpu.matmul %24, %26, %cst_23 {dimension_numbers = #tpu.dot_dimension_numbers<[1], [0], [0], [1], [0, 0, 1, 1], [], []>} : vector<48x28xbf16>, vector<28x768xbf16>, vector<48x768xf32> -> vector<48x768xf32>
    %28 = arith.addf %21, %27 : vector<48x768xf32>
    %c0_24 = arith.constant 0 : index
    %c4 = arith.constant 4 : index
    %c0_25 = arith.constant 0 : index
    %29 = vector.load %arg1[%c0_24, %c4, %c0_25] : memref<2x28x28xf32, #tpu.memory_space<vmem>>, vector<2x24x28xf32>
    %30 = vector.shape_cast %29 : vector<2x24x28xf32> to vector<48x28xf32>
    %31 = arith.truncf %30 : vector<48x28xf32> to vector<48x28xbf16>
    %c4_26 = arith.constant 4 : index
    %c0_27 = arith.constant 0 : index
    %c0_28 = arith.constant 0 : index
    %32 = vector.load %arg2[%c4_26, %c0_27, %c0_28] : memref<5x28x768xbf16, #tpu.memory_space<vmem>>, vector<1x28x768xbf16>
    %33 = vector.shape_cast %32 : vector<1x28x768xbf16> to vector<28x768xbf16>
    %cst_29 = arith.constant dense<0.000000e+00> : vector<48x768xf32>
    %34 = tpu.matmul %31, %33, %cst_29 {dimension_numbers = #tpu.dot_dimension_numbers<[1], [0], [0], [1], [0, 0, 1, 1], [], []>} : vector<48x28xbf16>, vector<28x768xbf16>, vector<48x768xf32> -> vector<48x768xf32>
    %35 = arith.addf %28, %34 : vector<48x768xf32>
    %c0_30 = arith.constant 0 : index
    %c0_31 = arith.constant 0 : index
    %36 = vector.load %arg3[%c0_30, %c0_31] : memref<1x768xf32, #tpu.memory_space<vmem>>, vector<1x768xf32>
    %37 = vector.broadcast %36 : vector<1x768xf32> to vector<48x768xf32>
    %38 = arith.addf %35, %37 : vector<48x768xf32>
    %39 = arith.truncf %38 : vector<48x768xf32> to vector<48x768xbf16>
    %40 = tpu.iota {dimensions = array<i32: 0>} : vector<24x48xi32>
    %41 = tpu.iota {dimensions = array<i32: 1>} : vector<24x48xi32>
    %c2_i32 = arith.constant 2 : i32
    %42 = vector.broadcast %c2_i32 : i32 to vector<24x48xi32>
    %43 = arith.muli %42, %40 : vector<24x48xi32>
    %c0_i32 = arith.constant 0 : i32
    %44 = vector.broadcast %c0_i32 : i32 to vector<24x48xi32>
    %45 = arith.addi %43, %44 : vector<24x48xi32>
    %46 = arith.cmpi eq, %41, %45 : vector<24x48xi32>
    %cst_32 = arith.constant 1.000000e+00 : f32
    %cst_33 = arith.constant 0.000000e+00 : f32
    %47 = vector.broadcast %cst_32 : f32 to vector<24x48xf32>
    %48 = vector.broadcast %cst_33 : f32 to vector<24x48xf32>
    %49 = arith.select %46, %47, %48 : vector<24x48xi1>, vector<24x48xf32>
    %50 = arith.truncf %49 : vector<24x48xf32> to vector<24x48xbf16>
    %cst_34 = arith.constant dense<0.000000e+00> : vector<24x768xf32>
    %51 = tpu.matmul %50, %39, %cst_34 {dimension_numbers = #tpu.dot_dimension_numbers<[1], [0], [0], [1], [0, 0, 1, 1], [], []>} : vector<24x48xbf16>, vector<48x768xbf16>, vector<24x768xf32> -> vector<24x768xf32>
    %52 = tpu.iota {dimensions = array<i32: 0>} : vector<24x48xi32>
    %53 = tpu.iota {dimensions = array<i32: 1>} : vector<24x48xi32>
    %c2_i32_35 = arith.constant 2 : i32
    %54 = vector.broadcast %c2_i32_35 : i32 to vector<24x48xi32>
    %55 = arith.muli %54, %52 : vector<24x48xi32>
    %c1_i32 = arith.constant 1 : i32
    %56 = vector.broadcast %c1_i32 : i32 to vector<24x48xi32>
    %57 = arith.addi %55, %56 : vector<24x48xi32>
    %58 = arith.cmpi eq, %53, %57 : vector<24x48xi32>
    %cst_36 = arith.constant 1.000000e+00 : f32
    %cst_37 = arith.constant 0.000000e+00 : f32
    %59 = vector.broadcast %cst_36 : f32 to vector<24x48xf32>
    %60 = vector.broadcast %cst_37 : f32 to vector<24x48xf32>
    %61 = arith.select %58, %59, %60 : vector<24x48xi1>, vector<24x48xf32>
    %62 = arith.truncf %61 : vector<24x48xf32> to vector<24x48xbf16>
    %cst_38 = arith.constant dense<0.000000e+00> : vector<24x768xf32>
    %63 = tpu.matmul %62, %39, %cst_38 {dimension_numbers = #tpu.dot_dimension_numbers<[1], [0], [0], [1], [0, 0, 1, 1], [], []>} : vector<24x48xbf16>, vector<48x768xbf16>, vector<24x768xf32> -> vector<24x768xf32>
    %64 = arith.maximumf %51, %63 : vector<24x768xf32>
    %65 = arith.truncf %64 : vector<24x768xf32> to vector<24x768xbf16>
    %66 = tpu.iota {dimensions = array<i32: 0>} : vector<768x384xi32>
    %67 = tpu.iota {dimensions = array<i32: 1>} : vector<768x384xi32>
    %c5_i32 = arith.constant 5 : i32
    %68 = vector.broadcast %c5_i32 : i32 to vector<768x384xi32>
    %69 = arith.shrsi %67, %68 : vector<768x384xi32>
    %c2_i32_39 = arith.constant 2 : i32
    %70 = vector.broadcast %c2_i32_39 : i32 to vector<768x384xi32>
    %71 = arith.muli %69, %70 : vector<768x384xi32>
    %c0_i32_40 = arith.constant 0 : i32
    %72 = vector.broadcast %c0_i32_40 : i32 to vector<768x384xi32>
    %73 = arith.addi %71, %72 : vector<768x384xi32>
    %c32_i32 = arith.constant 32 : i32
    %74 = vector.broadcast %c32_i32 : i32 to vector<768x384xi32>
    %75 = arith.muli %73, %74 : vector<768x384xi32>
    %c31_i32 = arith.constant 31 : i32
    %76 = vector.broadcast %c31_i32 : i32 to vector<768x384xi32>
    %77 = arith.andi %67, %76 : vector<768x384xi32>
    %78 = arith.addi %75, %77 : vector<768x384xi32>
    %79 = arith.cmpi eq, %66, %78 : vector<768x384xi32>
    %cst_41 = arith.constant 1.000000e+00 : f32
    %cst_42 = arith.constant 0.000000e+00 : f32
    %80 = vector.broadcast %cst_41 : f32 to vector<768x384xf32>
    %81 = vector.broadcast %cst_42 : f32 to vector<768x384xf32>
    %82 = arith.select %79, %80, %81 : vector<768x384xi1>, vector<768x384xf32>
    %83 = arith.truncf %82 : vector<768x384xf32> to vector<768x384xbf16>
    %cst_43 = arith.constant dense<0.000000e+00> : vector<24x384xf32>
    %84 = tpu.matmul %65, %83, %cst_43 {dimension_numbers = #tpu.dot_dimension_numbers<[1], [0], [0], [1], [0, 0, 1, 1], [], []>} : vector<24x768xbf16>, vector<768x384xbf16>, vector<24x384xf32> -> vector<24x384xf32>
    %85 = tpu.iota {dimensions = array<i32: 0>} : vector<768x384xi32>
    %86 = tpu.iota {dimensions = array<i32: 1>} : vector<768x384xi32>
    %c5_i32_44 = arith.constant 5 : i32
    %87 = vector.broadcast %c5_i32_44 : i32 to vector<768x384xi32>
    %88 = arith.shrsi %86, %87 : vector<768x384xi32>
    %c2_i32_45 = arith.constant 2 : i32
    %89 = vector.broadcast %c2_i32_45 : i32 to vector<768x384xi32>
    %90 = arith.muli %88, %89 : vector<768x384xi32>
    %c1_i32_46 = arith.constant 1 : i32
    %91 = vector.broadcast %c1_i32_46 : i32 to vector<768x384xi32>
    %92 = arith.addi %90, %91 : vector<768x384xi32>
    %c32_i32_47 = arith.constant 32 : i32
    %93 = vector.broadcast %c32_i32_47 : i32 to vector<768x384xi32>
    %94 = arith.muli %92, %93 : vector<768x384xi32>
    %c31_i32_48 = arith.constant 31 : i32
    %95 = vector.broadcast %c31_i32_48 : i32 to vector<768x384xi32>
    %96 = arith.andi %86, %95 : vector<768x384xi32>
    %97 = arith.addi %94, %96 : vector<768x384xi32>
    %98 = arith.cmpi eq, %85, %97 : vector<768x384xi32>
    %cst_49 = arith.constant 1.000000e+00 : f32
    %cst_50 = arith.constant 0.000000e+00 : f32
    %99 = vector.broadcast %cst_49 : f32 to vector<768x384xf32>
    %100 = vector.broadcast %cst_50 : f32 to vector<768x384xf32>
    %101 = arith.select %98, %99, %100 : vector<768x384xi1>, vector<768x384xf32>
    %102 = arith.truncf %101 : vector<768x384xf32> to vector<768x384xbf16>
    %cst_51 = arith.constant dense<0.000000e+00> : vector<24x384xf32>
    %103 = tpu.matmul %65, %102, %cst_51 {dimension_numbers = #tpu.dot_dimension_numbers<[1], [0], [0], [1], [0, 0, 1, 1], [], []>} : vector<24x768xbf16>, vector<768x384xbf16>, vector<24x384xf32> -> vector<24x384xf32>
    %104 = arith.maximumf %84, %103 : vector<24x384xf32>
    %105 = arith.truncf %104 : vector<24x384xf32> to vector<24x384xbf16>
    %cst_52 = arith.constant 0.000000e+00 : f32
    %106 = vector.broadcast %cst_52 : f32 to vector<16x512xf32>
    %107 = tpu.iota {dimensions = array<i32: 0>} : vector<16x24xi32>
    %108 = tpu.iota {dimensions = array<i32: 1>} : vector<16x24xi32>
    %c3_i32 = arith.constant 3 : i32
    %109 = vector.broadcast %c3_i32 : i32 to vector<16x24xi32>
    %110 = arith.shrsi %107, %109 : vector<16x24xi32>
    %c7_i32 = arith.constant 7 : i32
    %111 = vector.broadcast %c7_i32 : i32 to vector<16x24xi32>
    %112 = arith.andi %107, %111 : vector<16x24xi32>
    %c12_i32 = arith.constant 12 : i32
    %113 = vector.broadcast %c12_i32 : i32 to vector<16x24xi32>
    %114 = arith.muli %110, %113 : vector<16x24xi32>
    %115 = arith.addi %114, %112 : vector<16x24xi32>
    %c0_i32_53 = arith.constant 0 : i32
    %116 = vector.broadcast %c0_i32_53 : i32 to vector<16x24xi32>
    %117 = arith.addi %115, %116 : vector<16x24xi32>
    %118 = arith.cmpi eq, %108, %117 : vector<16x24xi32>
    %cst_54 = arith.constant 1.000000e+00 : f32
    %cst_55 = arith.constant 0.000000e+00 : f32
    %119 = vector.broadcast %cst_54 : f32 to vector<16x24xf32>
    %120 = vector.broadcast %cst_55 : f32 to vector<16x24xf32>
    %121 = arith.select %118, %119, %120 : vector<16x24xi1>, vector<16x24xf32>
    %122 = arith.truncf %121 : vector<16x24xf32> to vector<16x24xbf16>
    %cst_56 = arith.constant dense<0.000000e+00> : vector<16x384xf32>
    %123 = tpu.matmul %122, %105, %cst_56 {dimension_numbers = #tpu.dot_dimension_numbers<[1], [0], [0], [1], [0, 0, 1, 1], [], []>} : vector<16x24xbf16>, vector<24x384xbf16>, vector<16x384xf32> -> vector<16x384xf32>
    %124 = arith.truncf %123 : vector<16x384xf32> to vector<16x384xbf16>
    %c0_57 = arith.constant 0 : index
    %c0_58 = arith.constant 0 : index
    %c0_59 = arith.constant 0 : index
    %125 = vector.load %arg4[%c0_57, %c0_58, %c0_59] : memref<5x384x512xbf16, #tpu.memory_space<vmem>>, vector<1x384x512xbf16>
    %126 = vector.shape_cast %125 : vector<1x384x512xbf16> to vector<384x512xbf16>
    %cst_60 = arith.constant dense<0.000000e+00> : vector<16x512xf32>
    %127 = tpu.matmul %124, %126, %cst_60 {dimension_numbers = #tpu.dot_dimension_numbers<[1], [0], [0], [1], [0, 0, 1, 1], [], []>} : vector<16x384xbf16>, vector<384x512xbf16>, vector<16x512xf32> -> vector<16x512xf32>
    %128 = arith.addf %106, %127 : vector<16x512xf32>
    %129 = tpu.iota {dimensions = array<i32: 0>} : vector<16x24xi32>
    %130 = tpu.iota {dimensions = array<i32: 1>} : vector<16x24xi32>
    %c3_i32_61 = arith.constant 3 : i32
    %131 = vector.broadcast %c3_i32_61 : i32 to vector<16x24xi32>
    %132 = arith.shrsi %129, %131 : vector<16x24xi32>
    %c7_i32_62 = arith.constant 7 : i32
    %133 = vector.broadcast %c7_i32_62 : i32 to vector<16x24xi32>
    %134 = arith.andi %129, %133 : vector<16x24xi32>
    %c12_i32_63 = arith.constant 12 : i32
    %135 = vector.broadcast %c12_i32_63 : i32 to vector<16x24xi32>
    %136 = arith.muli %132, %135 : vector<16x24xi32>
    %137 = arith.addi %136, %134 : vector<16x24xi32>
    %c1_i32_64 = arith.constant 1 : i32
    %138 = vector.broadcast %c1_i32_64 : i32 to vector<16x24xi32>
    %139 = arith.addi %137, %138 : vector<16x24xi32>
    %140 = arith.cmpi eq, %130, %139 : vector<16x24xi32>
    %cst_65 = arith.constant 1.000000e+00 : f32
    %cst_66 = arith.constant 0.000000e+00 : f32
    %141 = vector.broadcast %cst_65 : f32 to vector<16x24xf32>
    %142 = vector.broadcast %cst_66 : f32 to vector<16x24xf32>
    %143 = arith.select %140, %141, %142 : vector<16x24xi1>, vector<16x24xf32>
    %144 = arith.truncf %143 : vector<16x24xf32> to vector<16x24xbf16>
    %cst_67 = arith.constant dense<0.000000e+00> : vector<16x384xf32>
    %145 = tpu.matmul %144, %105, %cst_67 {dimension_numbers = #tpu.dot_dimension_numbers<[1], [0], [0], [1], [0, 0, 1, 1], [], []>} : vector<16x24xbf16>, vector<24x384xbf16>, vector<16x384xf32> -> vector<16x384xf32>
    %146 = arith.truncf %145 : vector<16x384xf32> to vector<16x384xbf16>
    %c1_68 = arith.constant 1 : index
    %c0_69 = arith.constant 0 : index
    %c0_70 = arith.constant 0 : index
    %147 = vector.load %arg4[%c1_68, %c0_69, %c0_70] : memref<5x384x512xbf16, #tpu.memory_space<vmem>>, vector<1x384x512xbf16>
    %148 = vector.shape_cast %147 : vector<1x384x512xbf16> to vector<384x512xbf16>
    %cst_71 = arith.constant dense<0.000000e+00> : vector<16x512xf32>
    %149 = tpu.matmul %146, %148, %cst_71 {dimension_numbers = #tpu.dot_dimension_numbers<[1], [0], [0], [1], [0, 0, 1, 1], [], []>} : vector<16x384xbf16>, vector<384x512xbf16>, vector<16x512xf32> -> vector<16x512xf32>
    %150 = arith.addf %128, %149 : vector<16x512xf32>
    %151 = tpu.iota {dimensions = array<i32: 0>} : vector<16x24xi32>
    %152 = tpu.iota {dimensions = array<i32: 1>} : vector<16x24xi32>
    %c3_i32_72 = arith.constant 3 : i32
    %153 = vector.broadcast %c3_i32_72 : i32 to vector<16x24xi32>
    %154 = arith.shrsi %151, %153 : vector<16x24xi32>
    %c7_i32_73 = arith.constant 7 : i32
    %155 = vector.broadcast %c7_i32_73 : i32 to vector<16x24xi32>
    %156 = arith.andi %151, %155 : vector<16x24xi32>
    %c12_i32_74 = arith.constant 12 : i32
    %157 = vector.broadcast %c12_i32_74 : i32 to vector<16x24xi32>
    %158 = arith.muli %154, %157 : vector<16x24xi32>
    %159 = arith.addi %158, %156 : vector<16x24xi32>
    %c2_i32_75 = arith.constant 2 : i32
    %160 = vector.broadcast %c2_i32_75 : i32 to vector<16x24xi32>
    %161 = arith.addi %159, %160 : vector<16x24xi32>
    %162 = arith.cmpi eq, %152, %161 : vector<16x24xi32>
    %cst_76 = arith.constant 1.000000e+00 : f32
    %cst_77 = arith.constant 0.000000e+00 : f32
    %163 = vector.broadcast %cst_76 : f32 to vector<16x24xf32>
    %164 = vector.broadcast %cst_77 : f32 to vector<16x24xf32>
    %165 = arith.select %162, %163, %164 : vector<16x24xi1>, vector<16x24xf32>
    %166 = arith.truncf %165 : vector<16x24xf32> to vector<16x24xbf16>
    %cst_78 = arith.constant dense<0.000000e+00> : vector<16x384xf32>
    %167 = tpu.matmul %166, %105, %cst_78 {dimension_numbers = #tpu.dot_dimension_numbers<[1], [0], [0], [1], [0, 0, 1, 1], [], []>} : vector<16x24xbf16>, vector<24x384xbf16>, vector<16x384xf32> -> vector<16x384xf32>
    %168 = arith.truncf %167 : vector<16x384xf32> to vector<16x384xbf16>
    %c2_79 = arith.constant 2 : index
    %c0_80 = arith.constant 0 : index
    %c0_81 = arith.constant 0 : index
    %169 = vector.load %arg4[%c2_79, %c0_80, %c0_81] : memref<5x384x512xbf16, #tpu.memory_space<vmem>>, vector<1x384x512xbf16>
    %170 = vector.shape_cast %169 : vector<1x384x512xbf16> to vector<384x512xbf16>
    %cst_82 = arith.constant dense<0.000000e+00> : vector<16x512xf32>
    %171 = tpu.matmul %168, %170, %cst_82 {dimension_numbers = #tpu.dot_dimension_numbers<[1], [0], [0], [1], [0, 0, 1, 1], [], []>} : vector<16x384xbf16>, vector<384x512xbf16>, vector<16x512xf32> -> vector<16x512xf32>
    %172 = arith.addf %150, %171 : vector<16x512xf32>
    %173 = tpu.iota {dimensions = array<i32: 0>} : vector<16x24xi32>
    %174 = tpu.iota {dimensions = array<i32: 1>} : vector<16x24xi32>
    %c3_i32_83 = arith.constant 3 : i32
    %175 = vector.broadcast %c3_i32_83 : i32 to vector<16x24xi32>
    %176 = arith.shrsi %173, %175 : vector<16x24xi32>
    %c7_i32_84 = arith.constant 7 : i32
    %177 = vector.broadcast %c7_i32_84 : i32 to vector<16x24xi32>
    %178 = arith.andi %173, %177 : vector<16x24xi32>
    %c12_i32_85 = arith.constant 12 : i32
    %179 = vector.broadcast %c12_i32_85 : i32 to vector<16x24xi32>
    %180 = arith.muli %176, %179 : vector<16x24xi32>
    %181 = arith.addi %180, %178 : vector<16x24xi32>
    %c3_i32_86 = arith.constant 3 : i32
    %182 = vector.broadcast %c3_i32_86 : i32 to vector<16x24xi32>
    %183 = arith.addi %181, %182 : vector<16x24xi32>
    %184 = arith.cmpi eq, %174, %183 : vector<16x24xi32>
    %cst_87 = arith.constant 1.000000e+00 : f32
    %cst_88 = arith.constant 0.000000e+00 : f32
    %185 = vector.broadcast %cst_87 : f32 to vector<16x24xf32>
    %186 = vector.broadcast %cst_88 : f32 to vector<16x24xf32>
    %187 = arith.select %184, %185, %186 : vector<16x24xi1>, vector<16x24xf32>
    %188 = arith.truncf %187 : vector<16x24xf32> to vector<16x24xbf16>
    %cst_89 = arith.constant dense<0.000000e+00> : vector<16x384xf32>
    %189 = tpu.matmul %188, %105, %cst_89 {dimension_numbers = #tpu.dot_dimension_numbers<[1], [0], [0], [1], [0, 0, 1, 1], [], []>} : vector<16x24xbf16>, vector<24x384xbf16>, vector<16x384xf32> -> vector<16x384xf32>
    %190 = arith.truncf %189 : vector<16x384xf32> to vector<16x384xbf16>
    %c3_90 = arith.constant 3 : index
    %c0_91 = arith.constant 0 : index
    %c0_92 = arith.constant 0 : index
    %191 = vector.load %arg4[%c3_90, %c0_91, %c0_92] : memref<5x384x512xbf16, #tpu.memory_space<vmem>>, vector<1x384x512xbf16>
    %192 = vector.shape_cast %191 : vector<1x384x512xbf16> to vector<384x512xbf16>
    %cst_93 = arith.constant dense<0.000000e+00> : vector<16x512xf32>
    %193 = tpu.matmul %190, %192, %cst_93 {dimension_numbers = #tpu.dot_dimension_numbers<[1], [0], [0], [1], [0, 0, 1, 1], [], []>} : vector<16x384xbf16>, vector<384x512xbf16>, vector<16x512xf32> -> vector<16x512xf32>
    %194 = arith.addf %172, %193 : vector<16x512xf32>
    %195 = tpu.iota {dimensions = array<i32: 0>} : vector<16x24xi32>
    %196 = tpu.iota {dimensions = array<i32: 1>} : vector<16x24xi32>
    %c3_i32_94 = arith.constant 3 : i32
    %197 = vector.broadcast %c3_i32_94 : i32 to vector<16x24xi32>
    %198 = arith.shrsi %195, %197 : vector<16x24xi32>
    %c7_i32_95 = arith.constant 7 : i32
    %199 = vector.broadcast %c7_i32_95 : i32 to vector<16x24xi32>
    %200 = arith.andi %195, %199 : vector<16x24xi32>
    %c12_i32_96 = arith.constant 12 : i32
    %201 = vector.broadcast %c12_i32_96 : i32 to vector<16x24xi32>
    %202 = arith.muli %198, %201 : vector<16x24xi32>
    %203 = arith.addi %202, %200 : vector<16x24xi32>
    %c4_i32 = arith.constant 4 : i32
    %204 = vector.broadcast %c4_i32 : i32 to vector<16x24xi32>
    %205 = arith.addi %203, %204 : vector<16x24xi32>
    %206 = arith.cmpi eq, %196, %205 : vector<16x24xi32>
    %cst_97 = arith.constant 1.000000e+00 : f32
    %cst_98 = arith.constant 0.000000e+00 : f32
    %207 = vector.broadcast %cst_97 : f32 to vector<16x24xf32>
    %208 = vector.broadcast %cst_98 : f32 to vector<16x24xf32>
    %209 = arith.select %206, %207, %208 : vector<16x24xi1>, vector<16x24xf32>
    %210 = arith.truncf %209 : vector<16x24xf32> to vector<16x24xbf16>
    %cst_99 = arith.constant dense<0.000000e+00> : vector<16x384xf32>
    %211 = tpu.matmul %210, %105, %cst_99 {dimension_numbers = #tpu.dot_dimension_numbers<[1], [0], [0], [1], [0, 0, 1, 1], [], []>} : vector<16x24xbf16>, vector<24x384xbf16>, vector<16x384xf32> -> vector<16x384xf32>
    %212 = arith.truncf %211 : vector<16x384xf32> to vector<16x384xbf16>
    %c4_100 = arith.constant 4 : index
    %c0_101 = arith.constant 0 : index
    %c0_102 = arith.constant 0 : index
    %213 = vector.load %arg4[%c4_100, %c0_101, %c0_102] : memref<5x384x512xbf16, #tpu.memory_space<vmem>>, vector<1x384x512xbf16>
    %214 = vector.shape_cast %213 : vector<1x384x512xbf16> to vector<384x512xbf16>
    %cst_103 = arith.constant dense<0.000000e+00> : vector<16x512xf32>
    %215 = tpu.matmul %212, %214, %cst_103 {dimension_numbers = #tpu.dot_dimension_numbers<[1], [0], [0], [1], [0, 0, 1, 1], [], []>} : vector<16x384xbf16>, vector<384x512xbf16>, vector<16x512xf32> -> vector<16x512xf32>
    %216 = arith.addf %194, %215 : vector<16x512xf32>
    %c0_104 = arith.constant 0 : index
    %c0_105 = arith.constant 0 : index
    %217 = vector.load %arg5[%c0_104, %c0_105] : memref<1x512xf32, #tpu.memory_space<vmem>>, vector<1x512xf32>
    %218 = vector.broadcast %217 : vector<1x512xf32> to vector<16x512xf32>
    %219 = arith.addf %216, %218 : vector<16x512xf32>
    %220 = arith.truncf %219 : vector<16x512xf32> to vector<16x512xbf16>
    %221 = tpu.iota {dimensions = array<i32: 0>} : vector<8x16xi32>
    %222 = tpu.iota {dimensions = array<i32: 1>} : vector<8x16xi32>
    %c2_i32_106 = arith.constant 2 : i32
    %223 = vector.broadcast %c2_i32_106 : i32 to vector<8x16xi32>
    %224 = arith.muli %223, %221 : vector<8x16xi32>
    %c0_i32_107 = arith.constant 0 : i32
    %225 = vector.broadcast %c0_i32_107 : i32 to vector<8x16xi32>
    %226 = arith.addi %224, %225 : vector<8x16xi32>
    %227 = arith.cmpi eq, %222, %226 : vector<8x16xi32>
    %cst_108 = arith.constant 1.000000e+00 : f32
    %cst_109 = arith.constant 0.000000e+00 : f32
    %228 = vector.broadcast %cst_108 : f32 to vector<8x16xf32>
    %229 = vector.broadcast %cst_109 : f32 to vector<8x16xf32>
    %230 = arith.select %227, %228, %229 : vector<8x16xi1>, vector<8x16xf32>
    %231 = arith.truncf %230 : vector<8x16xf32> to vector<8x16xbf16>
    %cst_110 = arith.constant dense<0.000000e+00> : vector<8x512xf32>
    %232 = tpu.matmul %231, %220, %cst_110 {dimension_numbers = #tpu.dot_dimension_numbers<[1], [0], [0], [1], [0, 0, 1, 1], [], []>} : vector<8x16xbf16>, vector<16x512xbf16>, vector<8x512xf32> -> vector<8x512xf32>
    %233 = tpu.iota {dimensions = array<i32: 0>} : vector<8x16xi32>
    %234 = tpu.iota {dimensions = array<i32: 1>} : vector<8x16xi32>
    %c2_i32_111 = arith.constant 2 : i32
    %235 = vector.broadcast %c2_i32_111 : i32 to vector<8x16xi32>
    %236 = arith.muli %235, %233 : vector<8x16xi32>
    %c1_i32_112 = arith.constant 1 : i32
    %237 = vector.broadcast %c1_i32_112 : i32 to vector<8x16xi32>
    %238 = arith.addi %236, %237 : vector<8x16xi32>
    %239 = arith.cmpi eq, %234, %238 : vector<8x16xi32>
    %cst_113 = arith.constant 1.000000e+00 : f32
    %cst_114 = arith.constant 0.000000e+00 : f32
    %240 = vector.broadcast %cst_113 : f32 to vector<8x16xf32>
    %241 = vector.broadcast %cst_114 : f32 to vector<8x16xf32>
    %242 = arith.select %239, %240, %241 : vector<8x16xi1>, vector<8x16xf32>
    %243 = arith.truncf %242 : vector<8x16xf32> to vector<8x16xbf16>
    %cst_115 = arith.constant dense<0.000000e+00> : vector<8x512xf32>
    %244 = tpu.matmul %243, %220, %cst_115 {dimension_numbers = #tpu.dot_dimension_numbers<[1], [0], [0], [1], [0, 0, 1, 1], [], []>} : vector<8x16xbf16>, vector<16x512xbf16>, vector<8x512xf32> -> vector<8x512xf32>
    %245 = arith.maximumf %232, %244 : vector<8x512xf32>
    %246 = arith.truncf %245 : vector<8x512xf32> to vector<8x512xbf16>
    %247 = tpu.iota {dimensions = array<i32: 0>} : vector<512x256xi32>
    %248 = tpu.iota {dimensions = array<i32: 1>} : vector<512x256xi32>
    %c6_i32 = arith.constant 6 : i32
    %249 = vector.broadcast %c6_i32 : i32 to vector<512x256xi32>
    %250 = arith.shrsi %248, %249 : vector<512x256xi32>
    %c2_i32_116 = arith.constant 2 : i32
    %251 = vector.broadcast %c2_i32_116 : i32 to vector<512x256xi32>
    %252 = arith.muli %250, %251 : vector<512x256xi32>
    %c0_i32_117 = arith.constant 0 : i32
    %253 = vector.broadcast %c0_i32_117 : i32 to vector<512x256xi32>
    %254 = arith.addi %252, %253 : vector<512x256xi32>
    %c64_i32 = arith.constant 64 : i32
    %255 = vector.broadcast %c64_i32 : i32 to vector<512x256xi32>
    %256 = arith.muli %254, %255 : vector<512x256xi32>
    %c63_i32 = arith.constant 63 : i32
    %257 = vector.broadcast %c63_i32 : i32 to vector<512x256xi32>
    %258 = arith.andi %248, %257 : vector<512x256xi32>
    %259 = arith.addi %256, %258 : vector<512x256xi32>
    %260 = arith.cmpi eq, %247, %259 : vector<512x256xi32>
    %cst_118 = arith.constant 1.000000e+00 : f32
    %cst_119 = arith.constant 0.000000e+00 : f32
    %261 = vector.broadcast %cst_118 : f32 to vector<512x256xf32>
    %262 = vector.broadcast %cst_119 : f32 to vector<512x256xf32>
    %263 = arith.select %260, %261, %262 : vector<512x256xi1>, vector<512x256xf32>
    %264 = arith.truncf %263 : vector<512x256xf32> to vector<512x256xbf16>
    %cst_120 = arith.constant dense<0.000000e+00> : vector<8x256xf32>
    %265 = tpu.matmul %246, %264, %cst_120 {dimension_numbers = #tpu.dot_dimension_numbers<[1], [0], [0], [1], [0, 0, 1, 1], [], []>} : vector<8x512xbf16>, vector<512x256xbf16>, vector<8x256xf32> -> vector<8x256xf32>
    %266 = tpu.iota {dimensions = array<i32: 0>} : vector<512x256xi32>
    %267 = tpu.iota {dimensions = array<i32: 1>} : vector<512x256xi32>
    %c6_i32_121 = arith.constant 6 : i32
    %268 = vector.broadcast %c6_i32_121 : i32 to vector<512x256xi32>
    %269 = arith.shrsi %267, %268 : vector<512x256xi32>
    %c2_i32_122 = arith.constant 2 : i32
    %270 = vector.broadcast %c2_i32_122 : i32 to vector<512x256xi32>
    %271 = arith.muli %269, %270 : vector<512x256xi32>
    %c1_i32_123 = arith.constant 1 : i32
    %272 = vector.broadcast %c1_i32_123 : i32 to vector<512x256xi32>
    %273 = arith.addi %271, %272 : vector<512x256xi32>
    %c64_i32_124 = arith.constant 64 : i32
    %274 = vector.broadcast %c64_i32_124 : i32 to vector<512x256xi32>
    %275 = arith.muli %273, %274 : vector<512x256xi32>
    %c63_i32_125 = arith.constant 63 : i32
    %276 = vector.broadcast %c63_i32_125 : i32 to vector<512x256xi32>
    %277 = arith.andi %267, %276 : vector<512x256xi32>
    %278 = arith.addi %275, %277 : vector<512x256xi32>
    %279 = arith.cmpi eq, %266, %278 : vector<512x256xi32>
    %cst_126 = arith.constant 1.000000e+00 : f32
    %cst_127 = arith.constant 0.000000e+00 : f32
    %280 = vector.broadcast %cst_126 : f32 to vector<512x256xf32>
    %281 = vector.broadcast %cst_127 : f32 to vector<512x256xf32>
    %282 = arith.select %279, %280, %281 : vector<512x256xi1>, vector<512x256xf32>
    %283 = arith.truncf %282 : vector<512x256xf32> to vector<512x256xbf16>
    %cst_128 = arith.constant dense<0.000000e+00> : vector<8x256xf32>
    %284 = tpu.matmul %246, %283, %cst_128 {dimension_numbers = #tpu.dot_dimension_numbers<[1], [0], [0], [1], [0, 0, 1, 1], [], []>} : vector<8x512xbf16>, vector<512x256xbf16>, vector<8x256xf32> -> vector<8x256xf32>
    %285 = arith.maximumf %265, %284 : vector<8x256xf32>
    %286 = arith.truncf %285 : vector<8x256xf32> to vector<8x256xbf16>
    %cst_129 = arith.constant 0.000000e+00 : f32
    %287 = vector.broadcast %cst_129 : f32 to vector<2x512xf32>
    %288 = tpu.iota {dimensions = array<i32: 0>} : vector<2x8xi32>
    %289 = tpu.iota {dimensions = array<i32: 1>} : vector<2x8xi32>
    %c4_i32_130 = arith.constant 4 : i32
    %290 = vector.broadcast %c4_i32_130 : i32 to vector<2x8xi32>
    %291 = arith.muli %288, %290 : vector<2x8xi32>
    %c0_i32_131 = arith.constant 0 : i32
    %292 = vector.broadcast %c0_i32_131 : i32 to vector<2x8xi32>
    %293 = arith.addi %291, %292 : vector<2x8xi32>
    %c0_i32_132 = arith.constant 0 : i32
    %294 = vector.broadcast %c0_i32_132 : i32 to vector<2x8xi32>
    %295 = arith.addi %293, %294 : vector<2x8xi32>
    %296 = arith.cmpi eq, %289, %295 : vector<2x8xi32>
    %cst_133 = arith.constant 1.000000e+00 : f32
    %cst_134 = arith.constant 0.000000e+00 : f32
    %297 = vector.broadcast %cst_133 : f32 to vector<2x8xf32>
    %298 = vector.broadcast %cst_134 : f32 to vector<2x8xf32>
    %299 = arith.select %296, %297, %298 : vector<2x8xi1>, vector<2x8xf32>
    %300 = arith.truncf %299 : vector<2x8xf32> to vector<2x8xbf16>
    %cst_135 = arith.constant dense<0.000000e+00> : vector<2x256xf32>
    %301 = tpu.matmul %300, %286, %cst_135 {dimension_numbers = #tpu.dot_dimension_numbers<[1], [0], [0], [1], [0, 0, 1, 1], [], []>} : vector<2x8xbf16>, vector<8x256xbf16>, vector<2x256xf32> -> vector<2x256xf32>
    %302 = arith.truncf %301 : vector<2x256xf32> to vector<2x256xbf16>
    %c0_136 = arith.constant 0 : index
    %c0_137 = arith.constant 0 : index
    %303 = vector.load %arg6[%c0_136, %c0_137] : memref<1024x512xbf16, #tpu.memory_space<vmem>>, vector<256x512xbf16>
    %cst_138 = arith.constant dense<0.000000e+00> : vector<2x512xf32>
    %304 = tpu.matmul %302, %303, %cst_138 {dimension_numbers = #tpu.dot_dimension_numbers<[1], [0], [0], [1], [0, 0, 1, 1], [], []>} : vector<2x256xbf16>, vector<256x512xbf16>, vector<2x512xf32> -> vector<2x512xf32>
    %305 = arith.addf %287, %304 : vector<2x512xf32>
    %306 = tpu.iota {dimensions = array<i32: 0>} : vector<2x8xi32>
    %307 = tpu.iota {dimensions = array<i32: 1>} : vector<2x8xi32>
    %c4_i32_139 = arith.constant 4 : i32
    %308 = vector.broadcast %c4_i32_139 : i32 to vector<2x8xi32>
    %309 = arith.muli %306, %308 : vector<2x8xi32>
    %c0_i32_140 = arith.constant 0 : i32
    %310 = vector.broadcast %c0_i32_140 : i32 to vector<2x8xi32>
    %311 = arith.addi %309, %310 : vector<2x8xi32>
    %c1_i32_141 = arith.constant 1 : i32
    %312 = vector.broadcast %c1_i32_141 : i32 to vector<2x8xi32>
    %313 = arith.addi %311, %312 : vector<2x8xi32>
    %314 = arith.cmpi eq, %307, %313 : vector<2x8xi32>
    %cst_142 = arith.constant 1.000000e+00 : f32
    %cst_143 = arith.constant 0.000000e+00 : f32
    %315 = vector.broadcast %cst_142 : f32 to vector<2x8xf32>
    %316 = vector.broadcast %cst_143 : f32 to vector<2x8xf32>
    %317 = arith.select %314, %315, %316 : vector<2x8xi1>, vector<2x8xf32>
    %318 = arith.truncf %317 : vector<2x8xf32> to vector<2x8xbf16>
    %cst_144 = arith.constant dense<0.000000e+00> : vector<2x256xf32>
    %319 = tpu.matmul %318, %286, %cst_144 {dimension_numbers = #tpu.dot_dimension_numbers<[1], [0], [0], [1], [0, 0, 1, 1], [], []>} : vector<2x8xbf16>, vector<8x256xbf16>, vector<2x256xf32> -> vector<2x256xf32>
    %320 = arith.truncf %319 : vector<2x256xf32> to vector<2x256xbf16>
    %c256 = arith.constant 256 : index
    %c0_145 = arith.constant 0 : index
    %321 = vector.load %arg6[%c256, %c0_145] : memref<1024x512xbf16, #tpu.memory_space<vmem>>, vector<256x512xbf16>
    %cst_146 = arith.constant dense<0.000000e+00> : vector<2x512xf32>
    %322 = tpu.matmul %320, %321, %cst_146 {dimension_numbers = #tpu.dot_dimension_numbers<[1], [0], [0], [1], [0, 0, 1, 1], [], []>} : vector<2x256xbf16>, vector<256x512xbf16>, vector<2x512xf32> -> vector<2x512xf32>
    %323 = arith.addf %305, %322 : vector<2x512xf32>
    %324 = tpu.iota {dimensions = array<i32: 0>} : vector<2x8xi32>
    %325 = tpu.iota {dimensions = array<i32: 1>} : vector<2x8xi32>
    %c4_i32_147 = arith.constant 4 : i32
    %326 = vector.broadcast %c4_i32_147 : i32 to vector<2x8xi32>
    %327 = arith.muli %324, %326 : vector<2x8xi32>
    %c0_i32_148 = arith.constant 0 : i32
    %328 = vector.broadcast %c0_i32_148 : i32 to vector<2x8xi32>
    %329 = arith.addi %327, %328 : vector<2x8xi32>
    %c2_i32_149 = arith.constant 2 : i32
    %330 = vector.broadcast %c2_i32_149 : i32 to vector<2x8xi32>
    %331 = arith.addi %329, %330 : vector<2x8xi32>
    %332 = arith.cmpi eq, %325, %331 : vector<2x8xi32>
    %cst_150 = arith.constant 1.000000e+00 : f32
    %cst_151 = arith.constant 0.000000e+00 : f32
    %333 = vector.broadcast %cst_150 : f32 to vector<2x8xf32>
    %334 = vector.broadcast %cst_151 : f32 to vector<2x8xf32>
    %335 = arith.select %332, %333, %334 : vector<2x8xi1>, vector<2x8xf32>
    %336 = arith.truncf %335 : vector<2x8xf32> to vector<2x8xbf16>
    %cst_152 = arith.constant dense<0.000000e+00> : vector<2x256xf32>
    %337 = tpu.matmul %336, %286, %cst_152 {dimension_numbers = #tpu.dot_dimension_numbers<[1], [0], [0], [1], [0, 0, 1, 1], [], []>} : vector<2x8xbf16>, vector<8x256xbf16>, vector<2x256xf32> -> vector<2x256xf32>
    %338 = arith.truncf %337 : vector<2x256xf32> to vector<2x256xbf16>
    %c512 = arith.constant 512 : index
    %c0_153 = arith.constant 0 : index
    %339 = vector.load %arg6[%c512, %c0_153] : memref<1024x512xbf16, #tpu.memory_space<vmem>>, vector<256x512xbf16>
    %cst_154 = arith.constant dense<0.000000e+00> : vector<2x512xf32>
    %340 = tpu.matmul %338, %339, %cst_154 {dimension_numbers = #tpu.dot_dimension_numbers<[1], [0], [0], [1], [0, 0, 1, 1], [], []>} : vector<2x256xbf16>, vector<256x512xbf16>, vector<2x512xf32> -> vector<2x512xf32>
    %341 = arith.addf %323, %340 : vector<2x512xf32>
    %342 = tpu.iota {dimensions = array<i32: 0>} : vector<2x8xi32>
    %343 = tpu.iota {dimensions = array<i32: 1>} : vector<2x8xi32>
    %c4_i32_155 = arith.constant 4 : i32
    %344 = vector.broadcast %c4_i32_155 : i32 to vector<2x8xi32>
    %345 = arith.muli %342, %344 : vector<2x8xi32>
    %c0_i32_156 = arith.constant 0 : i32
    %346 = vector.broadcast %c0_i32_156 : i32 to vector<2x8xi32>
    %347 = arith.addi %345, %346 : vector<2x8xi32>
    %c3_i32_157 = arith.constant 3 : i32
    %348 = vector.broadcast %c3_i32_157 : i32 to vector<2x8xi32>
    %349 = arith.addi %347, %348 : vector<2x8xi32>
    %350 = arith.cmpi eq, %343, %349 : vector<2x8xi32>
    %cst_158 = arith.constant 1.000000e+00 : f32
    %cst_159 = arith.constant 0.000000e+00 : f32
    %351 = vector.broadcast %cst_158 : f32 to vector<2x8xf32>
    %352 = vector.broadcast %cst_159 : f32 to vector<2x8xf32>
    %353 = arith.select %350, %351, %352 : vector<2x8xi1>, vector<2x8xf32>
    %354 = arith.truncf %353 : vector<2x8xf32> to vector<2x8xbf16>
    %cst_160 = arith.constant dense<0.000000e+00> : vector<2x256xf32>
    %355 = tpu.matmul %354, %286, %cst_160 {dimension_numbers = #tpu.dot_dimension_numbers<[1], [0], [0], [1], [0, 0, 1, 1], [], []>} : vector<2x8xbf16>, vector<8x256xbf16>, vector<2x256xf32> -> vector<2x256xf32>
    %356 = arith.truncf %355 : vector<2x256xf32> to vector<2x256xbf16>
    %c768 = arith.constant 768 : index
    %c0_161 = arith.constant 0 : index
    %357 = vector.load %arg6[%c768, %c0_161] : memref<1024x512xbf16, #tpu.memory_space<vmem>>, vector<256x512xbf16>
    %cst_162 = arith.constant dense<0.000000e+00> : vector<2x512xf32>
    %358 = tpu.matmul %356, %357, %cst_162 {dimension_numbers = #tpu.dot_dimension_numbers<[1], [0], [0], [1], [0, 0, 1, 1], [], []>} : vector<2x256xbf16>, vector<256x512xbf16>, vector<2x512xf32> -> vector<2x512xf32>
    %359 = arith.addf %341, %358 : vector<2x512xf32>
    %c0_163 = arith.constant 0 : index
    %c0_164 = arith.constant 0 : index
    %360 = vector.load %arg7[%c0_163, %c0_164] : memref<1x512xf32, #tpu.memory_space<vmem>>, vector<1x512xf32>
    %361 = vector.broadcast %360 : vector<1x512xf32> to vector<2x512xf32>
    %362 = arith.addf %359, %361 : vector<2x512xf32>
    %cst_165 = arith.constant 0.000000e+00 : f32
    %363 = vector.broadcast %cst_165 : f32 to vector<2x512xf32>
    %364 = arith.maximumf %362, %363 : vector<2x512xf32>
    %365 = arith.truncf %364 : vector<2x512xf32> to vector<2x512xbf16>
    %c0_166 = arith.constant 0 : index
    %c0_167 = arith.constant 0 : index
    %366 = vector.load %arg8[%c0_166, %c0_167] : memref<512x128xbf16, #tpu.memory_space<vmem>>, vector<512x128xbf16>
    %cst_168 = arith.constant dense<0.000000e+00> : vector<2x128xf32>
    %367 = tpu.matmul %365, %366, %cst_168 {dimension_numbers = #tpu.dot_dimension_numbers<[1], [0], [0], [1], [0, 0, 1, 1], [], []>} : vector<2x512xbf16>, vector<512x128xbf16>, vector<2x128xf32> -> vector<2x128xf32>
    %c0_169 = arith.constant 0 : index
    %c0_170 = arith.constant 0 : index
    %368 = vector.load %arg9[%c0_169, %c0_170] : memref<1x128xf32, #tpu.memory_space<vmem>>, vector<1x128xf32>
    %369 = vector.broadcast %368 : vector<1x128xf32> to vector<2x128xf32>
    %370 = arith.addf %367, %369 : vector<2x128xf32>
    %cst_171 = arith.constant dense<0xFF800000> : vector<128xf32>
    %371 = vector.multi_reduction <maximumf>, %370, %cst_171 [0] : vector<2x128xf32> to vector<128xf32>
    %372 = vector.shape_cast %371 : vector<128xf32> to vector<1x128xf32>
    %373 = vector.broadcast %372 : vector<1x128xf32> to vector<2x128xf32>
    %374 = arith.subf %370, %373 : vector<2x128xf32>
    %375 = math.exp %374 : vector<2x128xf32>
    %cst_172 = arith.constant dense<0.000000e+00> : vector<128xf32>
    %376 = vector.multi_reduction <add>, %375, %cst_172 [0] : vector<2x128xf32> to vector<128xf32>
    %377 = vector.shape_cast %376 : vector<128xf32> to vector<1x128xf32>
    %378 = tpu.reciprocal %377 {approx = true} : vector<1x128xf32> -> vector<1x128xf32>
    %379 = vector.broadcast %378 : vector<1x128xf32> to vector<2x128xf32>
    %380 = arith.mulf %375, %379 : vector<2x128xf32>
    %c0_173 = arith.constant 0 : index
    %c0_174 = arith.constant 0 : index
    %381 = vector.load %arg10[%c0_173, %c0_174] : memref<2x128xf32, #tpu.memory_space<vmem>>, vector<2x128xf32>
    tpu.vector_store %arg10[%c0_173, %c0_174], %380 {strides = array<i32>} : memref<2x128xf32, #tpu.memory_space<vmem>>, vector<2x128xf32>,
    return
  }
  func.func @transform_0(%arg0: i32) -> (i32, i32, i32) {
    %c0_i32 = arith.constant 0 : i32
    %c0_i32_0 = arith.constant 0 : i32
    %c0_i32_1 = arith.constant 0 : i32
    %c0_i32_2 = arith.constant 0 : i32
    return %c0_i32, %c0_i32_0, %c0_i32_1 : i32, i32, i32
  }
  func.func @transform_1(%arg0: i32) -> (i32, i32, i32) {
    %c0_i32 = arith.constant 0 : i32
    %c0_i32_0 = arith.constant 0 : i32
    %c0_i32_1 = arith.constant 0 : i32
    %c0_i32_2 = arith.constant 0 : i32
    return %c0_i32, %c0_i32_0, %c0_i32_1 : i32, i32, i32
  }
  func.func @transform_2(%arg0: i32) -> (i32, i32) {
    %c0_i32 = arith.constant 0 : i32
    %c0_i32_0 = arith.constant 0 : i32
    %c0_i32_1 = arith.constant 0 : i32
    return %c0_i32, %c0_i32_0 : i32, i32
  }
  func.func @transform_3(%arg0: i32) -> (i32, i32, i32) {
    %c0_i32 = arith.constant 0 : i32
    %c0_i32_0 = arith.constant 0 : i32
    %c0_i32_1 = arith.constant 0 : i32
    %c0_i32_2 = arith.constant 0 : i32
    return %c0_i32, %c0_i32_0, %c0_i32_1 : i32, i32, i32
  }
  func.func @transform_4(%arg0: i32) -> (i32, i32) {
    %c0_i32 = arith.constant 0 : i32
    %c0_i32_0 = arith.constant 0 : i32
    %c0_i32_1 = arith.constant 0 : i32
    return %c0_i32, %c0_i32_0 : i32, i32
  }
  func.func @transform_5(%arg0: i32) -> (i32, i32) {
    %c0_i32 = arith.constant 0 : i32
    %c0_i32_0 = arith.constant 0 : i32
    %c0_i32_1 = arith.constant 0 : i32
    return %c0_i32, %c0_i32_0 : i32, i32
  }
  func.func @transform_6(%arg0: i32) -> (i32, i32) {
    %c0_i32 = arith.constant 0 : i32
    %c0_i32_0 = arith.constant 0 : i32
    %c0_i32_1 = arith.constant 0 : i32
    return %c0_i32, %c0_i32_0 : i32, i32
  }
  func.func @transform_7(%arg0: i32) -> (i32, i32) {
    %c0_i32 = arith.constant 0 : i32
    %c0_i32_0 = arith.constant 0 : i32
    %c0_i32_1 = arith.constant 0 : i32
    return %c0_i32, %c0_i32_0 : i32, i32
  }
  func.func @transform_8(%arg0: i32) -> (i32, i32) {
    %c0_i32 = arith.constant 0 : i32
    %c0_i32_0 = arith.constant 0 : i32
    %c0_i32_1 = arith.constant 0 : i32
    return %c0_i32, %c0_i32_0 : i32, i32
  }
  func.func @transform_9(%arg0: i32) -> (i32, i32) {
    %c0_i32 = arith.constant 0 : i32
    %c0_i32_0 = arith.constant 0 : i32
    %c0_i32_1 = arith.constant 0 : i32
    return %c0_i32, %c0_i32_0 : i32, i32
  }
}

</mosaic_0001>

<bundles_post_ra>
// kernel: tile.13
= control target key start
LH: loop header
LB: loop body
LE: loop exit
PB: predicated region body
PF: predicated region fallthrough
CT: control target
= control target key end

     0   :  { %s34_s0 = inlined_call_operand.vmem [shape: f32[32], index: 0, kind: input, shape index: {}]   ;;  %s35_s1 = inlined_call_operand.vmem [shape: f32[24,32], index: 1, kind: output, shape index: {}]  }
   0x1   :  { %v4_v0 = vld [vmem:[%s34_s0] ss:$0 sm:$0xff] }
   0x2   :  { %5 = vst [vmem:[%s35_s1] sm:$0xff] %v4_v0  ;;  %10 = vst [vmem:[%s35_s1 + $0x8] sm:$0xff] %v4_v0 }
   0x3   :  { %11 = vst [vmem:[%s35_s1 + $0x10] sm:$0xff] %v4_v0 }

// kernel: tile.14
= control target key start
LH: loop header
LB: loop body
LE: loop exit
PB: predicated region body
PF: predicated region fallthrough
CT: control target
= control target key end

     0   :  { %s84_s8 = smov 96   ;;  %vm3_vm0 = vcmask 261120   ;;  %s86_s15 = smov 64   ;;  %vm10_vm1 = vcmask 1048320   ;;  %vm17_vm2 = vcmask 785920   ;;  %vm24_vm3 = vcmask 523520   ;;  %s127_s0 = inlined_call_operand.vmem [shape: f32[24,32], index: 0, kind: input, shape index: {}]   ;;  %s128_s1 = inlined_call_operand.vmem [shape: f32[1,768], index: 1, kind: output, shape index: {}]  }
   0x1   :  { %v73_v0 = vld [vmem:[%s127_s0 + $0x3] ss:$4 sm:$0x3f]   ;;  %v74_v1 = vld [vmem:[%s127_s0 + $0x2] ss:$4 sm:$0x3f]  }
   0x2   :  { %8 = vrot.lane.b32.xlu0 %v73_v0, %s84_s8  ;;  %v75_v2 = vld [vmem:[%s127_s0 + $0x1] ss:$4 sm:$0x3f]   ;;  %v2_v3 = vld [vmem:[%s127_s0] ss:$4 sm:$0x3f]  }
   0x3   :  { %s85_s0 = smov 32   ;;  %4 = vst.msk [vmem:[#allocation0] ss:$8 sm:$0xf] %vm3_vm0, %v2_v3  }
   0x4   :  { %22 = vrot.lane.b32.xlu1 %v75_v2, %s85_s0  ;;  %5 = vst.msk [vmem:[#allocation0] ss:$8 sm:$0x30] %vm3_vm0, %v2_v3  }
   0x6   :  { %15 = vrot.lane.b32.xlu0 %v74_v1, %s86_s15 }
  0x74   :  { %v9_v4 = vpop.permute.xlu0 %8  }
  0x75   :  { %11 = vst.msk [vmem:[#allocation0] ss:$8 sm:$0xf] %vm10_vm1, %v9_v4   ;;  %12 = vst.msk [vmem:[#allocation0] ss:$8 sm:$0x30] %vm10_vm1, %v9_v4  }
  0x76   :  { %v23_v5 = vpop.permute.xlu1 %22  }
  0x78   :  { %v16_v6 = vpop.permute.xlu0 %15  }
  0x79   :  { %18 = vst.msk [vmem:[#allocation0] ss:$8 sm:$0xf] %vm17_vm2, %v16_v6   ;;  %19 = vst.msk [vmem:[#allocation0] ss:$8 sm:$0x30] %vm17_vm2, %v16_v6  }
  0x7a   :  { %25 = vst.msk [vmem:[#allocation0] ss:$8 sm:$0xf] %vm24_vm3, %v23_v5   ;;  %26 = vst.msk [vmem:[#allocation0] ss:$8 sm:$0x30] %vm24_vm3, %v23_v5  }
  0x81   :  { %v31_v7 = vld [vmem:[#allocation0] sm:$0x1]  ;;  %v36_v8 = vld [vmem:[#allocation0 + $0x8] sm:$0x1]  ;;  %v42_v9 = vld [vmem:[#allocation0 + $0x10] sm:$0x1] }
  0x82   :  { %34 = vst [vmem:[%s128_s1] sm:$0x1] %v31_v7  ;;  %76 = vst [vmem:[%s128_s1 + $0x1] sm:$0x1] %v36_v8  ;;  %v49_v10 = vld [vmem:[#allocation0 + $0x18] sm:$0x1] }
  0x83   :  { %77 = vst [vmem:[%s128_s1 + $0x2] sm:$0x1] %v42_v9  ;;  %v56_v11 = vld [vmem:[#allocation0 + $0x20] sm:$0x1]  ;;  %v63_v12 = vld [vmem:[#allocation0 + $0x28] sm:$0x1] }
  0x84   :  { %78 = vst [vmem:[%s128_s1 + $0x3] sm:$0x1] %v49_v10  ;;  %79 = vst [vmem:[%s128_s1 + $0x4] sm:$0x1] %v56_v11 }
  0x85   :  { %80 = vst [vmem:[%s128_s1 + $0x5] sm:$0x1] %v63_v12 }

// kernel: tile.18
= control target key start
LH: loop header
LB: loop body
LE: loop exit
PB: predicated region body
PF: predicated region fallthrough
CT: control target
= control target key end

     0   :  { %s22_s0 = inlined_call_operand.vmem [shape: f32[64], index: 0, kind: input, shape index: {}]   ;;  %s23_s1 = inlined_call_operand.vmem [shape: f32[8,64], index: 1, kind: output, shape index: {}]  }
   0x1   :  { %v4_v0 = vld [vmem:[%s22_s0] ss:$0 sm:$0xff] }
   0x2   :  { %5 = vst [vmem:[%s23_s1] sm:$0xff] %v4_v0 }

// kernel: tile.19
= control target key start
LH: loop header
LB: loop body
LE: loop exit
PB: predicated region body
PF: predicated region fallthrough
CT: control target
= control target key end

     0   :  { %vm3_vm0 = vcmask 523264   ;;  %s46_s8 = smov 64   ;;  %vm9_vm1 = vcmask 1048064   ;;  %s75_s0 = inlined_call_operand.vmem [shape: f32[8,64], index: 0, kind: input, shape index: {}]   ;;  %s76_s1 = inlined_call_operand.vmem [shape: f32[1,512], index: 1, kind: output, shape index: {}]  }
   0x1   :  { %v41_v0 = vld [vmem:[%s75_s0 + $0x1] ss:$2 sm:$0xf]   ;;  %v2_v1 = vld [vmem:[%s75_s0] ss:$2 sm:$0xf]  }
   0x2   :  { %7 = vrot.lane.b32.xlu0 %v41_v0, %s46_s8  ;;  %4 = vst.msk [vmem:[#allocation0] ss:$8 sm:$0xf] %vm3_vm0, %v2_v1  }
  0x74   :  { %v8_v2 = vpop.permute.xlu0 %7  }
  0x75   :  { %10 = vst.msk [vmem:[#allocation0] ss:$8 sm:$0xf] %vm9_vm1, %v8_v2  }
  0x7c   :  { %v15_v3 = vld [vmem:[#allocation0] sm:$0x1]  ;;  %v20_v4 = vld [vmem:[#allocation0 + $0x8] sm:$0x1]  ;;  %v26_v5 = vld [vmem:[#allocation0 + $0x10] sm:$0x1] }
  0x7d   :  { %18 = vst [vmem:[%s76_s1] sm:$0x1] %v15_v3  ;;  %42 = vst [vmem:[%s76_s1 + $0x1] sm:$0x1] %v20_v4  ;;  %v33_v6 = vld [vmem:[#allocation0 + $0x18] sm:$0x1] }
  0x7e   :  { %43 = vst [vmem:[%s76_s1 + $0x2] sm:$0x1] %v26_v5  ;;  %44 = vst [vmem:[%s76_s1 + $0x3] sm:$0x1] %v33_v6 }

// kernel: cnn_forward.1
= control target key start
LH: loop header
LB: loop body
LE: loop exit
PB: predicated region body
PF: predicated region fallthrough
CT: control target
= control target key end

     0   :  { %vm141_vm0 = vcmask 1045504   ;;  %v22620_v3 = vmov 0   ;;  %vm131_vm1 = vcmask 228352   ;;  %s22610_s0 = inlined_call_operand.vmem [shape: f32[2,28,28], index: 0, kind: input, shape index: {}]   ;;  %s22611_s1 = inlined_call_operand.vmem [shape: bf16[5,28,768], index: 1, kind: input, shape index: {}]   ;;  %s22612_s2 = inlined_call_operand.vmem [shape: f32[1,768], index: 2, kind: input, shape index: {}]   ;;  %s22613_s3 = inlined_call_operand.vmem [shape: bf16[5,384,512], index: 3, kind: input, shape index: {}]   ;;  %s22614_s4 = inlined_call_operand.vmem [shape: f32[1,512], index: 4, kind: input, shape index: {}]   ;;  %s22615_s5 = inlined_call_operand.vmem [shape: bf16[1024,512], index: 5, kind: input, shape index: {}]   ;;  %s22616_s6 = inlined_call_operand.vmem [shape: f32[1,512], index: 6, kind: input, shape index: {}]   ;;  %s22617_s7 = inlined_call_operand.vmem [shape: bf16[512,128], index: 7, kind: input, shape index: {}]   ;;  %s22618_s8 = inlined_call_operand.vmem [shape: f32[1,128], index: 8, kind: input, shape index: {}]   ;;  %s22619_s9 = inlined_call_operand.hbm [shape: f32[2,128], index: 9, kind: output, shape index: {}]  }
   0x1   :  { %v14498_v0 = vld [vmem:[%s22611_s1 + $0x94] ss:$24 sps:$4 sm:$0x3f]   ;;  %v14502_v2 = vld [vmem:[%s22611_s1 + $0x90] ss:$24 sps:$4 sm:$0x3f]   ;;  %192 = vmatprep.mubr.bf16.mxu0 %v22620_v3  ;;  %255 = vmatprep.mubr.bf16.mxu1 %v22620_v3 }
   0x2   :  { %12058 = vmatprep.subr.msk.bf16.mxu0 %vm141_vm0, %v14498_v0  ;;  %v14500_v1 = vld [vmem:[%s22611_s1 + $0x9c] ss:$24 sps:$4 sm:$0x3f]   ;;  %v14503_v4 = vld [vmem:[%s22611_s1 + $0x98] ss:$24 sps:$4 sm:$0x3f]  }
   0x3   :  { %v14504_v5 = vld [vmem:[%s22611_s1 + $0x64] ss:$24 sps:$4 sm:$0xff]   ;;  %12062 = vmatprep.subr.msk.bf16.mxu1 %vm141_vm0, %v14500_v1  ;;  %v143_v6 = vsel %vm141_vm0, %v14502_v2, 0  ;;  %v149_v8 = vsel %vm141_vm0, %v14503_v4, 0  ;;  %v14508_v9 = vld [vmem:[%s22611_s1 + $0x60] ss:$24 sps:$4 sm:$0xff]  }
   0x4   :  { %v14506_v7 = vld [vmem:[%s22611_s1 + $0x6c] ss:$24 sps:$4 sm:$0xff]   ;;  %173 = vmatpush1.bf16.msra.mxu0 %v143_v6  ;;  %236 = vmatpush1.bf16.msra.mxu1 %v149_v8  ;;  %v14509_v11 = vld [vmem:[%s22611_s1 + $0x68] ss:$24 sps:$4 sm:$0xff]   ;;  %v57_v22 = vld [vmem:[%s22610_s0 + $0x11] sm:$0xff] }
   0x5   :  { %v55_v10 = vld [vmem:[%s22610_s0 + $0x1] sm:$0xff]  ;;  %174 = vmatprep.subr.bf16.mxu0 %v14504_v5  ;;  %v56_v12 = vld [vmem:[%s22610_s0 + $0x9] sm:$0xff]  ;;  %237 = vmatprep.subr.bf16.mxu1 %v14506_v7  ;;  %v14522_v26 = vld [vmem:[%s22611_s1 + $0x3c] ss:$24 sps:$4 sm:$0x3f]  }
   0x6   :  { %v14510_v13 = vld [vmem:[%s22611_s1 + $0xa4] ss:$24 sps:$4 sm:$0x3f]   ;;  %v61_v14 = vpack.c.bf16 %v56_v12, %v55_v10  ;;  %v14512_v15 = vld [vmem:[%s22611_s1 + $0xa0] ss:$24 sps:$4 sm:$0x3f]  }
   0x7   :  { %v14513_v16 = vld [vmem:[%s22611_s1 + $0x34] ss:$24 sps:$4 sm:$0x3f]   ;;  %v14515_v17 = vld [vmem:[%s22611_s1 + $0x30] ss:$24 sps:$4 sm:$0x3f]  }
   0x8   :  { %175 = vmatpush1.bf16.msra.mxu0 %v14508_v9  ;;  %238 = vmatpush1.bf16.msra.mxu1 %v14509_v11  ;;  %v155_v18 = vsel %vm141_vm0, %v14512_v15, 0  ;;  %v14518_v19 = vld [vmem:[%s22611_s1 + $0x74] ss:$24 sps:$4 sm:$0xff]   ;;  %v413_v20 = vsel %vm141_vm0, %v14515_v17, 0  ;;  %v14521_v21 = vld [vmem:[%s22611_s1 + $0x4] ss:$24 sps:$4 sm:$0xff]  }
   0x9   :  { %12066 = vmatprep.subr.msk.bf16.mxu0 %vm141_vm0, %v14510_v13  ;;  %12082 = vmatprep.subr.msk.bf16.mxu1 %vm141_vm0, %v14513_v16  ;;  %v58_v23 = vld [vmem:[%s22610_s0 + $0x21] sm:$0xff]  ;;  %v59_v29 = vld [vmem:[%s22610_s0 + $0x29] sm:$0xff]  ;;  %v60_v30 = vld [vmem:[%s22610_s0 + $0x31] sm:$0xff] }
   0xa   :  { %v14516_v24 = vld [vmem:[%s22611_s1 + $0x70] ss:$24 sps:$4 sm:$0xff]   ;;  %v14519_v25 = vld [vmem:[%s22611_s1] ss:$24 sps:$4 sm:$0xff]   ;;  %v62_v27 = vpack.c.bf16 %v58_v23, %v57_v22  ;;  %v63_v31 = vpack.c.bf16 %v60_v30, %v59_v29  ;;  %v14530_v38 = vld [vmem:[%s22611_s1 + $0xc] ss:$24 sps:$4 sm:$0xff]  }
   0xb   :  { %12059 = vmatmul.mubr.msk.bf16.vlgmr.msra.gmra.mxu0 %vm131_vm1, %v61_v14  ;;  %12063 = vmatmul.mubr.msk.bf16.vlgmr.msra.gmra.mxu1 %vm131_vm1, %v61_v14  ;;  %v14525_v28 = vld [vmem:[%s22611_s1 + $0x44] ss:$24 sps:$4 sm:$0x3f]   ;;  %v35_v33 = vld [vmem:[%s22610_s0 + $0x8] sm:$0xff]  ;;  %v36_v41 = vld [vmem:[%s22610_s0 + $0x10] sm:$0xff] }
   0xc   :  { %202 = vmatprep.mubr.bf16.mxu0 %v22620_v3  ;;  %265 = vmatprep.mubr.bf16.mxu1 %v22620_v3  ;;  %v34_v32 = vld [vmem:[%s22610_s0] sm:$0xff]  ;;  %v14524_v34 = vld [vmem:[%s22611_s1 + $0x38] ss:$24 sps:$4 sm:$0x3f]   ;;  %v14533_v40 = vld [vmem:[%s22611_s1 + $0x14] ss:$24 sps:$4 sm:$0xff]  }
   0xd   :  { %299 = vmatpush1.bf16.msra.mxu0 %v155_v18  ;;  %443 = vmatpush1.bf16.msra.mxu1 %v413_v20  ;;  %v14527_v35 = vld [vmem:[%s22611_s1 + $0x40] ss:$24 sps:$4 sm:$0x3f]   ;;  %v40_v36 = vpack.c.bf16 %v35_v33, %v34_v32  ;;  %v419_v37 = vsel %vm141_vm0, %v14524_v34, 0  ;;  %v14531_v44 = vld [vmem:[%s22611_s1 + $0x10] ss:$24 sps:$4 sm:$0xff]  }
   0xe   :  { %300 = vmatprep.subr.bf16.mxu0 %v14518_v19  ;;  %444 = vmatprep.subr.bf16.mxu1 %v14521_v21  ;;  %v425_v39 = vsel %vm141_vm0, %v14527_v35, 0  ;;  %v37_v42 = vld [vmem:[%s22610_s0 + $0x20] sm:$0xff]  ;;  %v14534_v45 = vld [vmem:[%s22611_s1 + $0xf4] ss:$24 sps:$4 sm:$0x3f]  }
   0xf   :  { %v14528_v43 = vld [vmem:[%s22611_s1 + $0x8] ss:$24 sps:$4 sm:$0xff]   ;;  %v14537_v46 = vld [vmem:[%s22611_s1 + $0xfc] ss:$24 sps:$4 sm:$0x3f]   ;;  %v41_v47 = vpack.c.bf16 %v37_v42, %v36_v41 }
  0x10   :  { %v38_v48 = vld [vmem:[%s22610_s0 + $0x28] sm:$0xff]  ;;  %v39_v49 = vld [vmem:[%s22610_s0 + $0x30] sm:$0xff]  ;;  %v14542_v53 = vld [vmem:[%s22611_s1 + $0xc4] ss:$24 sps:$4 sm:$0xff]  }
  0x11   :  { %301 = vmatpush1.bf16.msra.mxu0 %v14516_v24  ;;  %445 = vmatpush1.bf16.msra.mxu1 %v14519_v25  ;;  %v42_v50 = vpack.c.bf16 %v39_v49, %v38_v48  ;;  %v14536_v51 = vld [vmem:[%s22611_s1 + $0xf0] ss:$24 sps:$4 sm:$0x3f]   ;;  %v14545_v54 = vld [vmem:[%s22611_s1 + $0xcc] ss:$24 sps:$4 sm:$0xff]  }
  0x12   :  { %12086 = vmatprep.subr.msk.bf16.mxu0 %vm141_vm0, %v14522_v26  ;;  %12090 = vmatprep.subr.msk.bf16.mxu1 %vm141_vm0, %v14525_v28  ;;  %v14539_v52 = vld [vmem:[%s22611_s1 + $0xf8] ss:$24 sps:$4 sm:$0x3f]   ;;  %v705_v55 = vsel %vm141_vm0, %v14536_v51, 0  ;;  %v14543_v58 = vld [vmem:[%s22611_s1 + $0xc8] ss:$24 sps:$4 sm:$0xff]  }
  0x13   :  { %12060 = vmatmul.mubr.msk.bf16.gmra.mxu0 %vm131_vm1, %v62_v27  ;;  %12064 = vmatmul.mubr.msk.bf16.gmra.mxu1 %vm131_vm1, %v62_v27  ;;  %v711_v56 = vsel %vm141_vm0, %v14539_v52, 0  ;;  %v14540_v57 = vld [vmem:[%s22611_s1 + $0xc0] ss:$24 sps:$4 sm:$0xff]   ;;  %v14546_v59 = vld [vmem:[%s22611_s1 + $0x104] ss:$24 sps:$4 sm:$0x3f]  }
  0x14   :  { %212 = vmatprep.mubr.bf16.mxu0 %v22620_v3  ;;  %275 = vmatprep.mubr.bf16.mxu1 %v22620_v3  ;;  %v14549_v60 = vld [vmem:[%s22611_s1 + $0x154] ss:$24 sps:$4 sm:$0x3f]   ;;  %v619_v61 = vld [vmem:[%s22610_s0 + $0x2] sm:$0xff] }
  0x15   :  { %v620_v62 = vld [vmem:[%s22610_s0 + $0xa] sm:$0xff]  ;;  %v14548_v63 = vld [vmem:[%s22611_s1 + $0x100] ss:$24 sps:$4 sm:$0x3f]   ;;  %v14557_v4 = vld [vmem:[%s22611_s1 + $0x124] ss:$24 sps:$4 sm:$0xff]  }
  0x16   :  { %v14551_v0 = vld [vmem:[%s22611_s1 + $0x150] ss:$24 sps:$4 sm:$0x3f]   ;;  %v625_v1 = vpack.c.bf16 %v620_v62, %v619_v61  ;;  %v14554_v2 = vld [vmem:[%s22611_s1 + $0xd4] ss:$24 sps:$4 sm:$0xff]   ;;  %v717_v7 = vsel %vm141_vm0, %v14548_v63, 0 }
  0x17   :  { %v621_v5 = vld [vmem:[%s22610_s0 + $0x12] sm:$0xff]  ;;  %v622_v6 = vld [vmem:[%s22610_s0 + $0x22] sm:$0xff]  ;;  %v1033_v8 = vsel %vm141_vm0, %v14551_v0, 0 }
  0x18   :  { %v14552_v9 = vld [vmem:[%s22611_s1 + $0xd0] ss:$24 sps:$4 sm:$0xff]   ;;  %v14555_v10 = vld [vmem:[%s22611_s1 + $0x120] ss:$24 sps:$4 sm:$0xff]   ;;  %v626_v13 = vpack.c.bf16 %v622_v6, %v621_v5  ;;  %v14566_v22 = vld [vmem:[%s22611_s1 + $0x12c] ss:$24 sps:$4 sm:$0xff]  }
  0x19   :  { %v14558_v11 = vld [vmem:[%s22611_s1 + $0x15c] ss:$24 sps:$4 sm:$0x3f]   ;;  %v947_v17 = vld [vmem:[%s22610_s0 + $0x3] sm:$0xff]  ;;  %v948_v18 = vld [vmem:[%s22610_s0 + $0xb] sm:$0xff] }
  0x1a   :  { %v14561_v12 = vld [vmem:[%s22611_s1 + $0x164] ss:$24 sps:$4 sm:$0x3f]   ;;  %v624_v15 = vld [vmem:[%s22610_s0 + $0x32] sm:$0xff]  ;;  %v953_v21 = vpack.c.bf16 %v948_v18, %v947_v17  ;;  %v14564_v28 = vld [vmem:[%s22611_s1 + $0x128] ss:$24 sps:$4 sm:$0xff]  }
  0x1b   :  { %12061 = vmatmul.mubr.msk.bf16.gmra.mxu0 %vm131_vm1, %v63_v31  ;;  %12065 = vmatmul.mubr.msk.bf16.gmra.mxu1 %vm131_vm1, %v63_v31  ;;  %v14560_v19 = vld [vmem:[%s22611_s1 + $0x158] ss:$24 sps:$4 sm:$0x3f]   ;;  %v14569_v23 = vld [vmem:[%s22611_s1 + $0x134] ss:$24 sps:$4 sm:$0xff]   ;;  %v950_v26 = vld [vmem:[%s22610_s0 + $0x23] sm:$0xff] }
  0x1c   :  { %318 = vmatprep.mubr.bf16.mxu0 %v22620_v3  ;;  %462 = vmatprep.mubr.bf16.mxu1 %v22620_v3  ;;  %v14563_v20 = vld [vmem:[%s22611_s1 + $0x160] ss:$24 sps:$4 sm:$0x3f]   ;;  %v1039_v24 = vsel %vm141_vm0, %v14560_v19, 0  ;;  %v14567_v29 = vld [vmem:[%s22611_s1 + $0x130] ss:$24 sps:$4 sm:$0xff]  }
  0x1d   :  { %v949_v25 = vld [vmem:[%s22610_s0 + $0x13] sm:$0xff]  ;;  %v951_v33 = vld [vmem:[%s22610_s0 + $0x2b] sm:$0xff] }
  0x1e   :  { %v14570_v30 = vld [vmem:[%s22611_s1 + $0x1b4] ss:$24 sps:$4 sm:$0x3f]   ;;  %v954_v32 = vpack.c.bf16 %v950_v26, %v949_v25  ;;  %v14576_v42 = vld [vmem:[%s22611_s1 + $0x180] ss:$24 sps:$4 sm:$0xff]   ;;  %v1278_v51 = vld [vmem:[%s22610_s0 + $0x24] sm:$0xff] }
  0x1f   :  { %v952_v34 = vld [vmem:[%s22610_s0 + $0x33] sm:$0xff] }
  0x20   :  { %v955_v35 = vpack.c.bf16 %v952_v34, %v951_v33  ;;  %v14587_v49 = vld [vmem:[%s22611_s1 + $0x194] ss:$24 sps:$4 sm:$0xff]  }
  0x23   :  { %12067 = vmatmul.mubr.msk.bf16.vlgmr.msra.gmra.mxu0 %vm131_vm1, %v61_v14  ;;  %12083 = vmatmul.mubr.msk.bf16.vlgmr.msra.gmra.mxu1 %vm131_vm1, %v40_v36  ;;  %v623_v14 = vld [vmem:[%s22610_s0 + $0x2a] sm:$0xff] }
  0x24   :  { %328 = vmatprep.mubr.bf16.mxu0 %v22620_v3  ;;  %472 = vmatprep.mubr.bf16.mxu1 %v22620_v3  ;;  %v627_v16 = vpack.c.bf16 %v624_v15, %v623_v14 }
  0x25   :  { %506 = vmatpush1.bf16.msra.mxu0 %v419_v37  ;;  %569 = vmatpush1.bf16.msra.mxu1 %v425_v39  ;;  %v14575_v37 = vld [vmem:[%s22611_s1 + $0x1b8] ss:$24 sps:$4 sm:$0x3f]   ;;  %v14581_v39 = vld [vmem:[%s22611_s1 + $0x18c] ss:$24 sps:$4 sm:$0xff]  }
  0x26   :  { %507 = vmatprep.subr.bf16.mxu0 %v14530_v38  ;;  %570 = vmatprep.subr.bf16.mxu1 %v14533_v40  ;;  %v14578_v38 = vld [vmem:[%s22611_s1 + $0x184] ss:$24 sps:$4 sm:$0xff]   ;;  %v1367_v41 = vsel %vm141_vm0, %v14575_v37, 0 }
  0x29   :  { %508 = vmatpush1.bf16.msra.mxu0 %v14528_v43  ;;  %571 = vmatpush1.bf16.msra.mxu1 %v14531_v44  ;;  %v14579_v43 = vld [vmem:[%s22611_s1 + $0x188] ss:$24 sps:$4 sm:$0xff]   ;;  %v14582_v44 = vld [vmem:[%s22611_s1 + $0x1c4] ss:$24 sps:$4 sm:$0x3f]  }
  0x2a   :  { %12118 = vmatprep.subr.msk.bf16.mxu0 %vm141_vm0, %v14534_v45  ;;  %12122 = vmatprep.subr.msk.bf16.mxu1 %vm141_vm0, %v14537_v46  ;;  %v1275_v45 = vld [vmem:[%s22610_s0 + $0x4] sm:$0xff]  ;;  %v1276_v46 = vld [vmem:[%s22610_s0 + $0xc] sm:$0xff] }
  0x2b   :  { %12068 = vmatmul.mubr.msk.bf16.gmra.mxu0 %vm131_vm1, %v62_v27  ;;  %12084 = vmatmul.mubr.msk.bf16.gmra.mxu1 %vm131_vm1, %v41_v47  ;;  %v1045_v27 = vsel %vm141_vm0, %v14563_v20, 0  ;;  %v1281_v48 = vpack.c.bf16 %v1276_v46, %v1275_v45 }
  0x2c   :  { %338 = vmatprep.mubr.bf16.mxu0 %v22620_v3  ;;  %482 = vmatprep.mubr.bf16.mxu1 %v22620_v3 }
  0x33   :  { %12069 = vmatmul.mubr.msk.bf16.gmra.mxu0 %vm131_vm1, %v63_v31  ;;  %12085 = vmatmul.mubr.msk.bf16.gmra.mxu1 %vm131_vm1, %v42_v50  ;;  %v14573_v31 = vld [vmem:[%s22611_s1 + $0x1bc] ss:$24 sps:$4 sm:$0x3f]  }
  0x34   :  { %525 = vmatprep.mubr.bf16.mxu0 %v22620_v3  ;;  %588 = vmatprep.mubr.bf16.mxu1 %v22620_v3 }
  0x3b   :  { %12087 = vmatmul.mubr.msk.bf16.vlgmr.msra.gmra.mxu0 %vm131_vm1, %v40_v36  ;;  %12091 = vmatmul.mubr.msk.bf16.vlgmr.msra.gmra.mxu1 %vm131_vm1, %v40_v36  ;;  %v14572_v36 = vld [vmem:[%s22611_s1 + $0x1b0] ss:$24 sps:$4 sm:$0x3f]  }
  0x3c   :  { %535 = vmatprep.mubr.bf16.mxu0 %v22620_v3  ;;  %598 = vmatprep.mubr.bf16.mxu1 %v22620_v3  ;;  %v1361_v40 = vsel %vm141_vm0, %v14572_v36, 0 }
  0x3d   :  { %735 = vmatpush1.bf16.msra.mxu0 %v705_v55  ;;  %798 = vmatpush1.bf16.msra.mxu1 %v711_v56  ;;  %v1279_v55 = vld [vmem:[%s22610_s0 + $0x2c] sm:$0xff]  ;;  %v1280_v56 = vld [vmem:[%s22610_s0 + $0x34] sm:$0xff] }
  0x3e   :  { %736 = vmatprep.subr.bf16.mxu0 %v14542_v53  ;;  %799 = vmatprep.subr.bf16.mxu1 %v14545_v54  ;;  %v14585_v53 = vld [vmem:[%s22611_s1 + $0x190] ss:$24 sps:$4 sm:$0xff]  }
  0x41   :  { %737 = vmatpush1.bf16.msra.mxu0 %v14540_v57  ;;  %800 = vmatpush1.bf16.msra.mxu1 %v14543_v58  ;;  %v1283_v57 = vpack.c.bf16 %v1280_v56, %v1279_v55 }
  0x42   :  { %12126 = vmatprep.subr.msk.bf16.mxu0 %vm141_vm0, %v14546_v59  ;;  %12154 = vmatprep.subr.msk.bf16.mxu1 %vm141_vm0, %v14549_v60 }
  0x43   :  { %12088 = vmatmul.mubr.msk.bf16.gmra.mxu0 %vm131_vm1, %v41_v47  ;;  %12092 = vmatmul.mubr.msk.bf16.gmra.mxu1 %vm131_vm1, %v41_v47  ;;  %v14584_v47 = vld [vmem:[%s22611_s1 + $0x1c0] ss:$24 sps:$4 sm:$0x3f]  }
  0x44   :  { %545 = vmatprep.mubr.bf16.mxu0 %v22620_v3  ;;  %608 = vmatprep.mubr.bf16.mxu1 %v22620_v3  ;;  %v1373_v52 = vsel %vm141_vm0, %v14584_v47, 0 }
  0x4b   :  { %12089 = vmatmul.mubr.msk.bf16.gmra.mxu0 %vm131_vm1, %v42_v50  ;;  %12093 = vmatmul.mubr.msk.bf16.gmra.mxu1 %vm131_vm1, %v42_v50  ;;  %v1277_v50 = vld [vmem:[%s22610_s0 + $0x14] sm:$0xff] }
  0x4c   :  { %754 = vmatprep.mubr.bf16.mxu0 %v22620_v3  ;;  %817 = vmatprep.mubr.bf16.mxu1 %v22620_v3  ;;  %v1282_v54 = vpack.c.bf16 %v1278_v51, %v1277_v50 }
  0x53   :  { %12119 = vmatmul.mubr.msk.bf16.vlgmr.msra.gmra.mxu0 %vm131_vm1, %v625_v1  ;;  %12123 = vmatmul.mubr.msk.bf16.vlgmr.msra.gmra.mxu1 %vm131_vm1, %v625_v1 }
  0x54   :  { %764 = vmatprep.mubr.bf16.mxu0 %v22620_v3  ;;  %827 = vmatprep.mubr.bf16.mxu1 %v22620_v3 }
  0x55   :  { %861 = vmatpush1.bf16.msra.mxu0 %v717_v7  ;;  %1063 = vmatpush1.bf16.msra.mxu1 %v1033_v8 }
  0x56   :  { %862 = vmatprep.subr.bf16.mxu0 %v14554_v2  ;;  %1064 = vmatprep.subr.bf16.mxu1 %v14557_v4 }
  0x59   :  { %863 = vmatpush1.bf16.msra.mxu0 %v14552_v9  ;;  %1065 = vmatpush1.bf16.msra.mxu1 %v14555_v10 }
  0x5a   :  { %12158 = vmatprep.subr.msk.bf16.mxu0 %vm141_vm0, %v14558_v11  ;;  %12162 = vmatprep.subr.msk.bf16.mxu1 %vm141_vm0, %v14561_v12 }
  0x5b   :  { %12120 = vmatmul.mubr.msk.bf16.gmra.mxu0 %vm131_vm1, %v626_v13  ;;  %12124 = vmatmul.mubr.msk.bf16.gmra.mxu1 %vm131_vm1, %v626_v13 }
  0x5c   :  { %774 = vmatprep.mubr.bf16.mxu0 %v22620_v3  ;;  %837 = vmatprep.mubr.bf16.mxu1 %v22620_v3 }
  0x63   :  { %12121 = vmatmul.mubr.msk.bf16.gmra.mxu0 %vm131_vm1, %v627_v16  ;;  %12125 = vmatmul.mubr.msk.bf16.gmra.mxu1 %vm131_vm1, %v627_v16 }
  0x64   :  { %880 = vmatprep.mubr.bf16.mxu0 %v22620_v3  ;;  %1082 = vmatprep.mubr.bf16.mxu1 %v22620_v3 }
  0x6b   :  { %12127 = vmatmul.mubr.msk.bf16.vlgmr.msra.gmra.mxu0 %vm131_vm1, %v625_v1  ;;  %12155 = vmatmul.mubr.msk.bf16.vlgmr.msra.gmra.mxu1 %vm131_vm1, %v953_v21 }
  0x6c   :  { %890 = vmatprep.mubr.bf16.mxu0 %v22620_v3  ;;  %1092 = vmatprep.mubr.bf16.mxu1 %v22620_v3 }
  0x6d   :  { %1126 = vmatpush1.bf16.msra.mxu0 %v1039_v24  ;;  %1189 = vmatpush1.bf16.msra.mxu1 %v1045_v27 }
  0x6e   :  { %1127 = vmatprep.subr.bf16.mxu0 %v14566_v22  ;;  %1190 = vmatprep.subr.bf16.mxu1 %v14569_v23 }
  0x71   :  { %1128 = vmatpush1.bf16.msra.mxu0 %v14564_v28  ;;  %1191 = vmatpush1.bf16.msra.mxu1 %v14567_v29 }
  0x72   :  { %12190 = vmatprep.subr.msk.bf16.mxu0 %vm141_vm0, %v14570_v30  ;;  %12194 = vmatprep.subr.msk.bf16.mxu1 %vm141_vm0, %v14573_v31 }
  0x73   :  { %12128 = vmatmul.mubr.msk.bf16.gmra.mxu0 %vm131_vm1, %v626_v13  ;;  %12156 = vmatmul.mubr.msk.bf16.gmra.mxu1 %vm131_vm1, %v954_v32 }
  0x74   :  { %900 = vmatprep.mubr.bf16.mxu0 %v22620_v3  ;;  %1102 = vmatprep.mubr.bf16.mxu1 %v22620_v3 }
  0x7b   :  { %12129 = vmatmul.mubr.msk.bf16.gmra.mxu0 %vm131_vm1, %v627_v16  ;;  %12157 = vmatmul.mubr.msk.bf16.gmra.mxu1 %vm131_vm1, %v955_v35 }
  0x7c   :  { %1145 = vmatprep.mubr.bf16.mxu0 %v22620_v3  ;;  %1208 = vmatprep.mubr.bf16.mxu1 %v22620_v3 }
  0x83   :  { %12159 = vmatmul.mubr.msk.bf16.vlgmr.msra.gmra.mxu0 %vm131_vm1, %v953_v21  ;;  %12163 = vmatmul.mubr.msk.bf16.vlgmr.msra.gmra.mxu1 %vm131_vm1, %v953_v21 }
  0x84   :  { %1155 = vmatprep.mubr.bf16.mxu0 %v22620_v3  ;;  %1218 = vmatprep.mubr.bf16.mxu1 %v22620_v3 }
  0x85   :  { %1391 = vmatpush1.bf16.msra.mxu0 %v1361_v40  ;;  %1454 = vmatpush1.bf16.msra.mxu1 %v1367_v41 }
  0x86   :  { %1392 = vmatprep.subr.bf16.mxu0 %v14578_v38  ;;  %1455 = vmatprep.subr.bf16.mxu1 %v14581_v39 }
  0x89   :  { %1393 = vmatpush1.bf16.msra.mxu0 %v14576_v42  ;;  %1456 = vmatpush1.bf16.msra.mxu1 %v14579_v43 }
  0x8a   :  { %12198 = vmatprep.subr.msk.bf16.mxu0 %vm141_vm0, %v14582_v44 }
  0x8b   :  { %12160 = vmatmul.mubr.msk.bf16.gmra.mxu0 %vm131_vm1, %v954_v32  ;;  %12164 = vmatmul.mubr.msk.bf16.gmra.mxu1 %vm131_vm1, %v954_v32 }
  0x8c   :  { %1165 = vmatprep.mubr.bf16.mxu0 %v22620_v3  ;;  %1228 = vmatprep.mubr.bf16.mxu1 %v22620_v3 }
  0x93   :  { %12161 = vmatmul.mubr.msk.bf16.gmra.mxu0 %vm131_vm1, %v955_v35  ;;  %12165 = vmatmul.mubr.msk.bf16.gmra.mxu1 %vm131_vm1, %v955_v35 }
  0x94   :  { %1410 = vmatprep.mubr.bf16.mxu0 %v22620_v3  ;;  %1473 = vmatprep.mubr.bf16.mxu1 %v22620_v3 }
  0x9b   :  { %12191 = vmatmul.mubr.msk.bf16.vlgmr.msra.gmra.mxu0 %vm131_vm1, %v1281_v48  ;;  %12195 = vmatmul.mubr.msk.bf16.vlgmr.msra.gmra.mxu1 %vm131_vm1, %v1281_v48 }
  0x9c   :  { %1420 = vmatprep.mubr.bf16.mxu0 %v22620_v3  ;;  %1483 = vmatprep.mubr.bf16.mxu1 %v22620_v3 }
  0x9d   :  { %1517 = vmatpush1.bf16.msra.mxu0 %v1373_v52 }
  0x9e   :  { %1518 = vmatprep.subr.bf16.mxu0 %v14587_v49 }
  0xa1   :  { %1519 = vmatpush1.bf16.msra.mxu0 %v14585_v53 }
  0xa3   :  { %12192 = vmatmul.mubr.msk.bf16.gmra.mxu0 %vm131_vm1, %v1282_v54  ;;  %12196 = vmatmul.mubr.msk.bf16.gmra.mxu1 %vm131_vm1, %v1282_v54 }
  0xa4   :  { %1430 = vmatprep.mubr.bf16.mxu0 %v22620_v3  ;;  %1493 = vmatprep.mubr.bf16.mxu1 %v22620_v3 }
  0xab   :  { %12193 = vmatmul.mubr.msk.bf16.gmra.mxu0 %vm131_vm1, %v1283_v57  ;;  %12197 = vmatmul.mubr.msk.bf16.gmra.mxu1 %vm131_vm1, %v1283_v57 }
  0xac   :  { %1536 = vmatprep.mubr.bf16.mxu0 %v22620_v3  ;;  %1745 = vmatprep.mubr.bf16.mxu1 %v22620_v3 }
  0xb3   :  { %12199 = vmatmul.mubr.msk.bf16.vlgmr.msra.gmra.mxu0 %vm131_vm1, %v1281_v48 }
  0xb4   :  { %1546 = vmatprep.mubr.bf16.mxu0 %v22620_v3 }
  0xbb   :  { %12200 = vmatmul.mubr.msk.bf16.gmra.mxu0 %vm131_vm1, %v1282_v54 }
  0xbc   :  { %1556 = vmatprep.mubr.bf16.mxu0 %v22620_v3 }
  0xc3   :  { %12201 = vmatmul.mubr.msk.bf16.gmra.mxu0 %vm131_vm1, %v1283_v57 }
  0xc4   :  { %1847 = vmatprep.mubr.bf16.mxu0 %v22620_v3 }
  0xcb   :  { %v194_v58 = vpop.f32.mrf.mxu0  ;;  %v257_v59 = vpop.f32.mrf.mxu1 }
  0xcd   :  { %v196_v60 = vpop.f32.mrf.mxu0  ;;  %v259_v61 = vpop.f32.mrf.mxu1 }
  0xcf   :  { %v198_v62 = vpop.f32.mrf.mxu0  ;;  %v261_v63 = vpop.f32.mrf.mxu1 }
  0xd1   :  { %v16197_v0 = vpop.f32.mrf.mxu0  ;;  %v16199_v1 = vpop.f32.mrf.mxu1 }
  0xd2   :  { %22883 = vst [vmem:[#allocation5_spill] sm:$0xff] %v16199_v1 }
  0xd3   :  { %v204_v2 = vpop.f32.mrf.mxu0  ;;  %v16201_v4 = vpop.f32.mrf.mxu1 }
  0xd5   :  { %v206_v5 = vpop.f32.mrf.mxu0  ;;  %v16203_v6 = vpop.f32.mrf.mxu1 }
  0xd7   :  { %v208_v7 = vpop.f32.mrf.mxu0  ;;  %v16205_v8 = vpop.f32.mrf.mxu1 }
  0xd9   :  { %v16207_v9 = vpop.f32.mrf.mxu0  ;;  %v16209_v10 = vpop.f32.mrf.mxu1 }
  0xdb   :  { %v214_v11 = vpop.f32.mrf.mxu0  ;;  %v16211_v12 = vpop.f32.mrf.mxu1 }
  0xdd   :  { %v216_v13 = vpop.f32.mrf.mxu0  ;;  %v16213_v14 = vpop.f32.mrf.mxu1 }
  0xdf   :  { %v218_v15 = vpop.f32.mrf.mxu0  ;;  %v16215_v16 = vpop.f32.mrf.mxu1 }
  0xe1   :  { %v16217_v17 = vpop.f32.mrf.mxu0  ;;  %v16219_v18 = vpop.f32.mrf.mxu1 }
  0xe3   :  { %v320_v19 = vpop.f32.mrf.mxu0  ;;  %v464_v20 = vpop.f32.mrf.mxu1 }
  0xe4   :  { %v16221_v21 = vadd.f32 %v464_v20, %v194_v58 }
  0xe5   :  { %v322_v22 = vpop.f32.mrf.mxu0  ;;  %v466_v23 = vpop.f32.mrf.mxu1 }
  0xe6   :  { %v16223_v24 = vadd.f32 %v466_v23, %v196_v60 }
  0xe7   :  { %v324_v25 = vpop.f32.mrf.mxu0  ;;  %v468_v26 = vpop.f32.mrf.mxu1 }
  0xe8   :  { %v16225_v27 = vadd.f32 %v468_v26, %v198_v62 }
  0xe9   :  { %v16227_v28 = vpop.f32.mrf.mxu0  ;;  %v16229_v29 = vpop.f32.mrf.mxu1 }
  0xea   :  { %22884 = vst [vmem:[#allocation6_spill] sm:$0xff] %v16227_v28 }
  0xeb   :  { %v330_v30 = vpop.f32.mrf.mxu0  ;;  %v474_v31 = vpop.f32.mrf.mxu1 }
  0xec   :  { %v16231_v32 = vadd.f32 %v474_v31, %v204_v2 }
  0xed   :  { %v332_v33 = vpop.f32.mrf.mxu0  ;;  %v476_v34 = vpop.f32.mrf.mxu1 }
  0xee   :  { %v16233_v35 = vadd.f32 %v476_v34, %v206_v5 }
  0xef   :  { %v334_v36 = vpop.f32.mrf.mxu0  ;;  %v478_v37 = vpop.f32.mrf.mxu1 }
  0xf0   :  { %v16235_v38 = vadd.f32 %v478_v37, %v208_v7 }
  0xf1   :  { %v16237_v39 = vpop.f32.mrf.mxu0  ;;  %v16239_v40 = vpop.f32.mrf.mxu1 }
  0xf2   :  { %22885 = vst [vmem:[#allocation7_spill] sm:$0xff] %v16237_v39 }
  0xf3   :  { %v340_v41 = vpop.f32.mrf.mxu0  ;;  %v484_v42 = vpop.f32.mrf.mxu1 }
  0xf4   :  { %v16241_v43 = vadd.f32 %v484_v42, %v214_v11 }
  0xf5   :  { %v16243_v44 = vpop.f32.mrf.mxu0  ;;  %v486_v45 = vpop.f32.mrf.mxu1 }
  0xf6   :  { %v16245_v46 = vadd.f32 %v486_v45, %v216_v13 }
  0xf7   :  { %v16247_v47 = vpop.f32.mrf.mxu0  ;;  %v488_v48 = vpop.f32.mrf.mxu1 }
  0xf8   :  { %v16249_v49 = vadd.f32 %v488_v48, %v218_v15 }
  0xf9   :  { %v16251_v50 = vpop.f32.mrf.mxu0  ;;  %v16253_v51 = vpop.f32.mrf.mxu1 }
  0xfa   :  { %22886 = vst [vmem:[#allocation8_spill] sm:$0xff] %v16251_v50 }
  0xfb   :  { %v527_v52 = vpop.f32.mrf.mxu0  ;;  %v590_v54 = vpop.f32.mrf.mxu1 }
  0xfc   :  { %v16255_v53 = vadd.f32 %v527_v52, %v257_v59  ;;  %v16257_v55 = vadd.f32 %v590_v54, %v320_v19  ;;  %v22622_v59 = vlaneseq }
  0xfd   :  { %v529_v56 = vpop.f32.mrf.mxu0  ;;  %v592_v58 = vpop.f32.mrf.mxu1 }
  0xfe   :  { %v16259_v57 = vadd.f32 %v529_v56, %v259_v61  ;;  %v16261_v60 = vadd.f32 %v592_v58, %v322_v22  ;;  %v16275_v20 = vand.u32 127, %v22622_v59 }
  0xff   :  { %v531_v62 = vpop.f32.mrf.mxu0  ;;  %v594_v5 = vpop.f32.mrf.mxu1 }
 0x100   :  { %v16263_v2 = vadd.f32 %v531_v62, %v261_v63  ;;  %v16265_v7 = vadd.f32 %v594_v5, %v324_v25  ;;  %22889 = vst [vmem:[#allocation11_spill] sm:$0xff] %v16275_v20  ;;  %v16283_v26 = vadd.s32 128, %v16275_v20  ;;  %v16286_v31 = vadd.s32 256, %v16275_v20 }
 0x101   :  { %v16267_v11 = vpop.f32.mrf.mxu0  ;;  %v16269_v13 = vpop.f32.mrf.mxu1 }
 0x102   :  { %22887 = vst [vmem:[#allocation9_spill] sm:$0xff] %v16267_v11  ;;  %22888 = vst [vmem:[#allocation10_spill] sm:$0xff] %v16269_v13  ;;  %v2162_v45 = vshra.s32 %v16283_v26, 5 }
 0x103   :  { %v537_v15 = vpop.f32.mrf.mxu0  ;;  %v600_v61 = vpop.f32.mrf.mxu1  ;;  %22890 = vst [vmem:[#allocation12_spill] sm:$0xff] %v16283_v26  ;;  %22891 = vst [vmem:[#allocation13_spill] sm:$0xff] %v16286_v31 }
 0x104   :  { %v16272_v19 = vadd.f32 %v537_v15, %v16201_v4  ;;  %v16277_v22 = vadd.f32 %v600_v61, %v330_v30  ;;  %v2161_v4 = vshra.s32 %v16275_v20, 5  ;;  %v16304_v58 = vmul.u32 2, %v2162_v45 }
 0x105   :  { %v539_v63 = vpop.f32.mrf.mxu0  ;;  %v602_v25 = vpop.f32.mrf.mxu1  ;;  %v8720_v15 = vshra.s32 %v16283_v26, 6 }
 0x106   :  { %v16280_v23 = vadd.f32 %v539_v63, %v16203_v6  ;;  %v16289_v34 = vadd.f32 %v602_v25, %v332_v33  ;;  %v2163_v6 = vshra.s32 %v16286_v31, 5  ;;  %v16296_v48 = vmul.u32 2, %v2161_v4  ;;  %22894 = vst [vmem:[#allocation16_spill] sm:$0xff] %v16304_v58 }
 0x107   :  { %v541_v37 = vpop.f32.mrf.mxu0  ;;  %v604_v30 = vpop.f32.mrf.mxu1  ;;  %v3194_v25 = vadd.s32 1, %v16304_v58 }
 0x108   :  { %v16292_v42 = vadd.f32 %v541_v37, %v16205_v8  ;;  %22892 = vst [vmem:[#allocation14_spill] sm:$0xff] %v16296_v48  ;;  %v16298_v52 = vadd.f32 %v604_v30, %v334_v36  ;;  %v3193_v33 = vadd.s32 1, %v16296_v48  ;;  %v8719_v8 = vshra.s32 %v16275_v20, 6 }
 0x109   :  { %v16300_v54 = vpop.f32.mrf.mxu0  ;;  %v16302_v56 = vpop.f32.mrf.mxu1  ;;  %v16308_v5 = vmul.u32 2, %v2163_v6  ;;  %v16331_v30 = vmul.u32 2, %v8720_v15 }
 0x10a   :  { %22893 = vst [vmem:[#allocation15_spill] sm:$0xff] %v16302_v56  ;;  %v3196_v3 = vmul.u32 32, %v3193_v33 }
 0x10b   :  { %v547_v62 = vpop.f32.mrf.mxu0  ;;  %22895 = vst [vmem:[#allocation17_spill] sm:$0xff] %v16308_v5  ;;  %v610_v36 = vpop.f32.mrf.mxu1  ;;  %v3195_v45 = vadd.s32 1, %v16308_v5  ;;  %22899 = vst [vmem:[#allocation20_spill] sm:$0xff] %v16331_v30  ;;  %v9132_v15 = vadd.s32 1, %v16331_v30 }
 0x10c   :  { %v16312_v61 = vadd.f32 %v547_v62, %v16211_v12  ;;  %v16316_v4 = vadd.f32 %v610_v36, %v340_v41  ;;  %v3197_v12 = vmul.u32 32, %v3194_v25  ;;  %v16322_v62 = vmul.u32 2, %v8719_v8 }
 0x10d   :  { %v549_v37 = vpop.f32.mrf.mxu0  ;;  %v612_v59 = vpop.f32.mrf.mxu1  ;;  %v3198_v41 = vmul.u32 32, %v3195_v45  ;;  %v22897_v36 = vand.u32 31, %v16275_v20  ;;  %v22902_v25 = vand.u32 31, %v16286_v31 }
 0x10e   :  { %v550_v6 = vadd.f32 %v549_v37, %v16213_v14  ;;  %22896 = vst [vmem:[#allocation18_spill] sm:$0xff] %v16322_v62  ;;  %v16325_v63 = vadd.f32 %v612_v59, %v16243_v44  ;;  %v22900_v37 = vand.u32 31, %v16283_v26  ;;  %v9131_v8 = vadd.s32 1, %v16322_v62 }
 0x10f   :  { %v551_v58 = vpop.f32.mrf.mxu0  ;;  %v16329_v13 = vadd.s32 %v3196_v3, %v22897_v36  ;;  %v614_v14 = vpop.f32.mrf.mxu1  ;;  %v16346_v3 = vadd.s32 %v3198_v41, %v22902_v25  ;;  %v22629_v36 = vand.u32 63, %v16283_v26 }
 0x110   :  { %v552_v33 = vadd.f32 %v551_v58, %v16215_v16  ;;  %v16336_v48 = vadd.s32 %v3197_v12, %v22900_v37  ;;  %v16340_v44 = vadd.f32 %v614_v14, %v16247_v47  ;;  %v22628_v16 = vand.u32 63, %v16275_v20 }
 0x111   :  { %22898 = vst [vmem:[#allocation19_spill] sm:$0xff] %v16329_v13  ;;  %v16342_v59 = vpop.f32.mrf.mxu0  ;;  %22903 = vst [vmem:[#allocation22_spill] sm:$0xff] %v16346_v3  ;;  %v16349_v45 = vpop.f32.mrf.mxu1  ;;  %v9133_v58 = vmul.u32 64, %v9131_v8  ;;  %v9134_v37 = vmul.u32 64, %v9132_v15 }
 0x112   :  { %22901 = vst [vmem:[#allocation21_spill] sm:$0xff] %v16336_v48  ;;  %22904 = vst [vmem:[#allocation23_spill] sm:$0xff] %v16349_v45 }
 0x113   :  { %v756_v12 = vpop.f32.mrf.mxu0  ;;  %v819_v14 = vpop.f32.mrf.mxu1  ;;  %v16356_v62 = vadd.s32 %v9133_v58, %v22628_v16  ;;  %v16363_v30 = vadd.s32 %v9134_v37, %v22629_v36 }
 0x114   :  { %v911_v47 = vadd.f32 %v756_v12, %v16221_v21  ;;  %v16359_v41 = vadd.f32 %v819_v14, %v16255_v53 }
 0x115   :  { %22905 = vst [vmem:[#allocation24_spill] sm:$0xff] %v16356_v62  ;;  %v758_v25 = vpop.f32.mrf.mxu0  ;;  %22906 = vst [vmem:[#allocation25_spill] sm:$0xff] %v16363_v30  ;;  %v821_v3 = vpop.f32.mrf.mxu1 }
 0x116   :  { %v16366_v8 = vadd.f32 %v758_v25, %v16223_v24  ;;  %v16369_v15 = vadd.f32 %v821_v3, %v16259_v57 }
 0x117   :  { %v760_v21 = vpop.f32.mrf.mxu0  ;;  %v823_v58 = vpop.f32.mrf.mxu1 }
 0x118   :  { %22907 = vst [vmem:[#allocation26_spill] sm:$0xff] %v16369_v15  ;;  %v16372_v12 = vadd.f32 %v760_v21, %v16225_v27  ;;  %v16375_v53 = vadd.f32 %v823_v58, %v16263_v2 }
 0x119   :  { %v16377_v14 = vpop.f32.mrf.mxu0  ;;  %v16379_v16 = vpop.f32.mrf.mxu1 }
 0x11a   :  { %22908 = vst [vmem:[#allocation27_spill] sm:$0xff] %v16379_v16 }
 0x11b   :  { %v766_v37 = vpop.f32.mrf.mxu0  ;;  %v829_v25 = vpop.f32.mrf.mxu1 }
 0x11c   :  { %v16382_v24 = vadd.f32 %v766_v37, %v16231_v32  ;;  %v16385_v57 = vadd.f32 %v829_v25, %v16272_v19 }
 0x11d   :  { %v768_v3 = vpop.f32.mrf.mxu0  ;;  %v831_v21 = vpop.f32.mrf.mxu1 }
 0x11e   :  { %v16388_v27 = vadd.f32 %v768_v3, %v16233_v35  ;;  %v16391_v2 = vadd.f32 %v831_v21, %v16280_v23 }
 0x11f   :  { %v770_v58 = vpop.f32.mrf.mxu0  ;;  %v833_v62 = vpop.f32.mrf.mxu1 }
 0x120   :  { %22909 = vst [vmem:[#allocation28_spill] sm:$0xff] %v16391_v2  ;;  %v16394_v36 = vadd.f32 %v770_v58, %v16235_v38  ;;  %v16397_v32 = vadd.f32 %v833_v62, %v16292_v42 }
 0x121   :  { %v16399_v37 = vpop.f32.mrf.mxu0  ;;  %v16401_v19 = vpop.f32.mrf.mxu1 }
 0x122   :  { %22910 = vst [vmem:[#allocation29_spill] sm:$0xff] %v16401_v19 }
 0x123   :  { %v776_v25 = vpop.f32.mrf.mxu0  ;;  %v839_v3 = vpop.f32.mrf.mxu1 }
 0x124   :  { %v16404_v35 = vadd.f32 %v776_v25, %v16241_v43  ;;  %v16407_v23 = vadd.f32 %v839_v3, %v16312_v61 }
 0x125   :  { %v778_v21 = vpop.f32.mrf.mxu0  ;;  %v841_v58 = vpop.f32.mrf.mxu1 }
 0x126   :  { %v16410_v38 = vadd.f32 %v778_v21, %v16245_v46  ;;  %v16412_v30 = vadd.f32 %v841_v58, %v550_v6 }
 0x127   :  { %v780_v42 = vpop.f32.mrf.mxu0  ;;  %v843_v13 = vpop.f32.mrf.mxu1 }
 0x128   :  { %22911 = vst [vmem:[#allocation30_spill] sm:$0xff] %v16412_v30  ;;  %v16415_v62 = vadd.f32 %v780_v42, %v16249_v49  ;;  %v16417_v48 = vadd.f32 %v843_v13, %v552_v33 }
 0x129   :  { %v16419_v43 = vpop.f32.mrf.mxu0  ;;  %v16421_v25 = vpop.f32.mrf.mxu1 }
 0x12b   :  { %v882_v61 = vpop.f32.mrf.mxu0  ;;  %v1084_v31 = vpop.f32.mrf.mxu1 }
 0x12c   :  { %v915_v3 = vadd.f32 %v882_v61, %v16257_v55  ;;  %v16424_v46 = vadd.f32 %v1084_v31, %v911_v47 }
 0x12d   :  { %v884_v21 = vpop.f32.mrf.mxu0  ;;  %v16429_v58 = vpop.f32.mrf.mxu1 }
 0x12e   :  { %v16427_v6 = vadd.f32 %v884_v21, %v16261_v60 }
 0x12f   :  { %v886_v49 = vpop.f32.mrf.mxu0  ;;  %v1088_v33 = vpop.f32.mrf.mxu1 }
 0x130   :  { %22912 = vst [vmem:[#allocation31_spill] sm:$0xff] %v16427_v6  ;;  %v16432_v13 = vadd.f32 %v886_v49, %v16265_v7 }
 0x131   :  { %v16434_v42 = vpop.f32.mrf.mxu0  ;;  %v16436_v5 = vpop.f32.mrf.mxu1 }
 0x132   :  { %22913 = vst [vmem:[#allocation32_spill] sm:$0xff] %v16434_v42 }
 0x133   :  { %v892_v26 = vpop.f32.mrf.mxu0  ;;  %v16441_v31 = vpop.f32.mrf.mxu1 }
 0x134   :  { %v16439_v55 = vadd.f32 %v892_v26, %v16277_v22 }
 0x135   :  { %v894_v47 = vpop.f32.mrf.mxu0  ;;  %v16446_v61 = vpop.f32.mrf.mxu1 }
 0x136   :  { %22914 = vst [vmem:[#allocation33_spill] sm:$0xff] %v16439_v55  ;;  %v16444_v60 = vadd.f32 %v894_v47, %v16289_v34 }
 0x137   :  { %v896_v21 = vpop.f32.mrf.mxu0  ;;  %v16451_v49 = vpop.f32.mrf.mxu1 }
 0x138   :  { %22915 = vst [vmem:[#allocation34_spill] sm:$0xff] %v16444_v60  ;;  %v16449_v7 = vadd.f32 %v896_v21, %v16298_v52 }
 0x139   :  { %v16453_v6 = vpop.f32.mrf.mxu0  ;;  %v16455_v42 = vpop.f32.mrf.mxu1 }
 0x13a   :  { %22916 = vst [vmem:[#allocation35_spill] sm:$0xff] %v16449_v7  ;;  %22917 = vst [vmem:[#allocation36_spill] sm:$0xff] %v16453_v6 }
 0x13b   :  { %v902_v22 = vpop.f32.mrf.mxu0  ;;  %v16460_v28 = vpop.f32.mrf.mxu1 }
 0x13c   :  { %v16458_v26 = vadd.f32 %v902_v22, %v16316_v4 }
 0x13d   :  { %v904_v34 = vpop.f32.mrf.mxu0  ;;  %v16465_v60 = vpop.f32.mrf.mxu1 }
 0x13e   :  { %22918 = vst [vmem:[#allocation37_spill] sm:$0xff] %v16458_v26  ;;  %v16463_v47 = vadd.f32 %v904_v34, %v16325_v63 }
 0x13f   :  { %v906_v52 = vpop.f32.mrf.mxu0  ;;  %v16470_v45 = vpop.f32.mrf.mxu1 }
 0x140   :  { %22919 = vst [vmem:[#allocation38_spill] sm:$0xff] %v16463_v47  ;;  %v16468_v21 = vadd.f32 %v906_v52, %v16340_v44 }
 0x141   :  { %v16472_v6 = vpop.f32.mrf.mxu0  ;;  %v16474_v50 = vpop.f32.mrf.mxu1 }
 0x142   :  { %22920 = vst [vmem:[#allocation39_spill] sm:$0xff] %v16468_v21  ;;  %22921 = vst [vmem:[#allocation40_spill] sm:$0xff] %v16472_v6 }
 0x143   :  { %v1147_v4 = vpop.f32.mrf.mxu0  ;;  %v1210_v26 = vpop.f32.mrf.mxu1 }
 0x144   :  { %v1241_v22 = vadd.f32 %v1147_v4, %v16359_v41  ;;  %v16477_v56 = vadd.f32 %v1210_v26, %v915_v3 }
 0x145   :  { %v16479_v63 = vpop.f32.mrf.mxu0  ;;  %v16481_v34 = vpop.f32.mrf.mxu1 }
 0x146   :  { %22922 = vst [vmem:[#allocation41_spill] sm:$0xff] %v16477_v56  ;;  %22923 = vst [vmem:[#allocation42_spill] sm:$0xff] %v16479_v63 }
 0x147   :  { %22924 = vst [vmem:[#allocation43_spill] sm:$0xff] %v16481_v34  ;;  %v1151_v47 = vpop.f32.mrf.mxu0  ;;  %v16483_v39 = vpop.f32.mrf.mxu1 }
 0x148   :  { %22925 = vst [vmem:[#allocation44_spill] sm:$0xff] %v16483_v39 }
 0x149   :  { %v16485_v44 = vpop.f32.mrf.mxu0  ;;  %v16487_v52 = vpop.f32.mrf.mxu1 }
 0x14a   :  { %22926 = vst [vmem:[#allocation45_spill] sm:$0xff] %v16485_v44  ;;  %22927 = vst [vmem:[#allocation46_spill] sm:$0xff] %v16487_v52 }
 0x14b   :  { %v1157_v21 = vpop.f32.mrf.mxu0  ;;  %v16489_v6 = vpop.f32.mrf.mxu1 }
 0x14c   :  { %22928 = vst [vmem:[#allocation47_spill] sm:$0xff] %v16489_v6 }
 0x14d   :  { %v16491_v15 = vpop.f32.mrf.mxu0  ;;  %v16493_v41 = vpop.f32.mrf.mxu1 }
 0x14e   :  { %22929 = vst [vmem:[#allocation48_spill] sm:$0xff] %v16491_v15  ;;  %22930 = vst [vmem:[#allocation49_spill] sm:$0xff] %v16493_v41 }
 0x14f   :  { %v1161_v3 = vpop.f32.mrf.mxu0  ;;  %v16495_v26 = vpop.f32.mrf.mxu1 }
 0x150   :  { %22931 = vst [vmem:[#allocation50_spill] sm:$0xff] %v16495_v26 }
 0x151   :  { %v16497_v4 = vpop.f32.mrf.mxu0 }
 0x152   :  { %22932 = vst [vmem:[#allocation51_spill] sm:$0xff] %v16497_v4 }
 0x153   :  { %14 = vsyncpa [#allocation3], 0  ;;  %v16499_v34 = vpop.f32.mrf.mxu1  ;;  %v16501_v63 = vpop.f32.mrf.mxu0  ;;  %v22937_v2 = vlaneseq  ;;  %vm22642_vm5 = vcmask 392192  }
 0x154   :  { %22933 = vst [vmem:[#allocation52_spill] sm:$0xff] %v16499_v34 }
 0x155   :  { %v16503_v7 = vpop.f32.mrf.mxu1  ;;  %v16505_v52 = vpop.f32.mrf.mxu0  ;;  %v16510_v15 = vshrl.u32 %v22937_v2, 7 }
 0x156   :  { %22934 = vst [vmem:[#allocation53_spill] sm:$0xff] %v16503_v7  ;;  %22935 = vst [vmem:[#allocation54_spill] sm:$0xff] %v16505_v52  ;;  %v16526_v7 = vld [vmem:[%s22612_s2] sm:$0x3f]  ;;  %v1247_v52 = vadd.f32 %v1151_v47, %v16375_v53 }
 0x157   :  { %v16507_v44 = vpop.f32.mrf.mxu1  ;;  %22938 = vst [vmem:[#allocation56_spill] sm:$0xff] %v16510_v15  ;;  %v16512_v41 = vpop.f32.mrf.mxu0  ;;  %v16521_v34 = vsub.s32 0, %v16510_v15  ;;  %v16529_v2 = vsub.s32 2, %v16510_v15 }
 0x158   :  { %22936 = vst [vmem:[#allocation55_spill] sm:$0xff] %v16507_v44 }
 0x159   :  { %v16514_v6 = vpop.f32.mrf.mxu1  ;;  %v16516_v26 = vpop.f32.mrf.mxu0  ;;  %22942 = vst [vmem:[#allocation60_spill] sm:$0xff] %v16521_v34  ;;  %22943 = vst [vmem:[#allocation61_spill] sm:$0xff] %v16529_v2  ;;  %v16544_v19 = vrot.slane %v16526_v7, %v16529_v2  ;;  %v16569_v2 = vadd.s32 8, %v16510_v15 }
 0x15a   :  { %22939 = vst [vmem:[#allocation57_spill] sm:$0xff] %v16514_v6  ;;  %22940 = vst [vmem:[#allocation58_spill] sm:$0xff] %v16516_v26  ;;  %v1245_v6 = vadd.f32 %v1088_v33, %v16372_v12 }
 0x15b   :  { %v16518_v55 = vpop.f32.mrf.mxu1  ;;  %v1412_v16 = vpop.f32.mrf.mxu0  ;;  %22946 = vst [vmem:[#allocation64_spill] sm:$0xff] %v16569_v2 }
 0x15c   :  { %22941 = vst [vmem:[#allocation59_spill] sm:$0xff] %v16518_v55  ;;  %v1567_v11 = vadd.f32 %v1412_v16, %v16424_v46  ;;  %v16537_v55 = vrot.slane %v16526_v7, %v16521_v34 }
 0x15d   :  { %v1475_v44 = vpop.f32.mrf.mxu1  ;;  %v16531_v4 = vpop.f32.mrf.mxu0 }
 0x15e   :  { %22944 = vst [vmem:[#allocation62_spill] sm:$0xff] %v16531_v4  ;;  %v1569_v30 = vadd.f32 %v1475_v44, %v1241_v22  ;;  %v1635_v16 = vadd.f32 %v16537_v55, %v1567_v11  ;;  %v1251_v22 = vadd.f32 %v16441_v31, %v16382_v24  ;;  %v1259_v24 = vadd.f32 %v1161_v3, %v16397_v32 }
 0x15f   :  { %v16539_v1 = vpop.f32.mrf.mxu1  ;;  %v1416_v56 = vpop.f32.mrf.mxu0 }
 0x160   :  { %v1573_v26 = vadd.f32 %v1416_v56, %v1245_v6  ;;  %v1637_v34 = vadd.f32 %v16544_v19, %v1569_v30  ;;  %v1253_v6 = vadd.f32 %v1157_v21, %v16385_v57  ;;  %v1257_v30 = vadd.f32 %v16451_v49, %v16394_v36 }
 0x161   :  { %v1479_v4 = vpop.f32.mrf.mxu1  ;;  %v16546_v12 = vpop.f32.mrf.mxu0  ;;  %v16580_v49 = vsub.s32 3, %v16510_v15 }
 0x162   :  { %v1575_v39 = vadd.f32 %v1479_v4, %v1247_v52  ;;  %v1641_v46 = vadd.f32 %v16537_v55, %v1573_v26  ;;  %v16560_v52 = vsub.s32 1, %v16510_v15 }
 0x163   :  { %v16550_v33 = vpop.f32.mrf.mxu1  ;;  %v1422_v47 = vpop.f32.mrf.mxu0  ;;  %22947 = vst [vmem:[#allocation65_spill] sm:$0xff] %v16580_v49 }
 0x164   :  { %v1643_v53 = vadd.f32 %v16544_v19, %v1575_v39  ;;  %v16556_v44 = vpack.c.bf16 %v1641_v46, %v1635_v16  ;;  %22945 = vst [vmem:[#allocation63_spill] sm:$0xff] %v16560_v52  ;;  %v1579_v4 = vadd.f32 %v1422_v47, %v1251_v22  ;;  %v1623_v46 = vsub.s32 4, %v16510_v15 }
 0x165   :  { %v1485_v56 = vpop.f32.mrf.mxu1  ;;  %v1424_v26 = vpop.f32.mrf.mxu0  ;;  %v16577_v36 = vrot.slane %v16526_v7, %v16560_v52  ;;  %v17366_v52 = vadd.s32 416, %v16510_v15 }
 0x166   :  { %v16562_v11 = vpack.c.bf16 %v1643_v53, %v1637_v34  ;;  %v1581_v31 = vadd.f32 %v1485_v56, %v1253_v6  ;;  %v481_v34 = vadd.f32 %v16239_v40, %v16207_v9  ;;  %v1647_v32 = vadd.f32 %v16537_v55, %v1579_v4 }
 0x167   :  { %v16566_v39 = vpop.f32.mrf.mxu1  ;;  %v1426_v16 = vpop.f32.mrf.mxu0  ;;  %v471_v9 = vadd.f32 %v16229_v29, %v16197_v0  ;;  %v491_v40 = vadd.f32 %v16253_v51, %v16217_v17  ;;  %v16600_v6 = vrot.slane %v16526_v7, %v1623_v46  ;;  %v554_v0 = vadd.f32 %v16342_v59, %v16219_v18  ;;  %23067 = vst [vmem:[#allocation68_spill] sm:$0xff] %v17366_v52 }
 0x168   :  { %v1585_v57 = vadd.f32 %v1426_v16, %v1257_v30  ;;  %v1649_v30 = vadd.f32 %v16544_v19, %v1581_v31  ;;  %v930_v4 = vadd.f32 %v16399_v37, %v481_v34  ;;  %v1265_v29 = vadd.f32 %v16501_v63, %v16407_v23 }
 0x169   :  { %v1489_v21 = vpop.f32.mrf.mxu1  ;;  %v1428_v47 = vpop.f32.mrf.mxu0  ;;  %v942_v17 = vadd.f32 %v16419_v43, %v491_v40  ;;  %v22948_v18 = vmul.u32 2, %v16510_v15  ;;  %v22951_v23 = vmul.u32 2, %v16569_v2 }
 0x16a   :  { %v1587_v53 = vadd.f32 %v1489_v21, %v1259_v24  ;;  %v1653_v3 = vadd.f32 %v16537_v55, %v1585_v57  ;;  %v1263_v57 = vadd.f32 %v16460_v28, %v16404_v35  ;;  %v1258_v31 = vadd.f32 %v16455_v42, %v930_v4 }
 0x16b   :  { %v16584_v22 = vpop.f32.mrf.mxu1  ;;  %v1432_v16 = vpop.f32.mrf.mxu0  ;;  %v1264_v28 = vadd.f32 %v16465_v60, %v16410_v38  ;;  %v1269_v35 = vadd.f32 %v16470_v45, %v16415_v62  ;;  %vm16617_vm2 = vcmp.eq.s32.totalorder %v16275_v20, %v22948_v18  ;;  %vm16624_vm3 = vcmp.eq.s32.totalorder %v16275_v20, %v22951_v23  ;;  %v22958_v23 = vld [vmem:[#allocation29_spill] sm:$0xff] }
 0x16c   :  { %v1655_v24 = vadd.f32 %v16544_v19, %v1587_v53  ;;  %v16597_v21 = vpack.c.bf16 %v1653_v3, %v1647_v32  ;;  %v1591_v46 = vadd.f32 %v1432_v16, %v1263_v57  ;;  %v918_v38 = vadd.f32 %v16377_v14, %v471_v9 }
 0x16d   :  { %v1495_v56 = vpop.f32.mrf.mxu1  ;;  %v1434_v37 = vpop.f32.mrf.mxu0  ;;  %v1252_v45 = vadd.f32 %v16446_v61, %v16388_v27  ;;  %v1271_v62 = vadd.f32 %v16512_v41, %v16417_v48  ;;  %v1270_v63 = vadd.f32 %v16474_v50, %v942_v17  ;;  %v1586_v53 = vadd.f32 %v1428_v47, %v1258_v31 }
 0x16e   :  { %v16607_v51 = vpack.c.bf16 %v1655_v24, %v1649_v30  ;;  %v1593_v42 = vadd.f32 %v1495_v56, %v1265_v29  ;;  %v1592_v32 = vadd.f32 %v1434_v37, %v1264_v28  ;;  %v944_v30 = vadd.f32 %v16421_v25, %v554_v0  ;;  %v22956_v37 = vld [vmem:[#allocation62_spill] sm:$0xff] }
 0x16f   :  { %v1497_v34 = vpop.f32.mrf.mxu1  ;;  %v1436_v60 = vpop.f32.mrf.mxu0  ;;  %v1246_v24 = vadd.f32 %v16436_v5, %v918_v38  ;;  %v1580_v9 = vadd.f32 %v1424_v26, %v1252_v45  ;;  %v1659_v27 = vadd.f32 %v16537_v55, %v1591_v46  ;;  %v1240_v41 = vadd.f32 %v16429_v58, %v16366_v8  ;;  %v22954_v8 = vld [vmem:[#allocation44_spill] sm:$0xff]  ;;  %v22960_v38 = vld [vmem:[#allocation54_spill] sm:$0xff] }
 0x170   :  { %v1597_v3 = vadd.f32 %v1436_v60, %v1269_v35  ;;  %v1661_v47 = vadd.f32 %v16544_v19, %v1593_v42  ;;  %v1654_v5 = vadd.f32 %v16577_v36, %v1586_v53  ;;  %v1660_v4 = vadd.f32 %v16577_v36, %v1592_v32  ;;  %v22957_v35 = vld [vmem:[#allocation41_spill] sm:$0xff] }
 0x171   :  { %v1499_v40 = vpop.f32.mrf.mxu1  ;;  %v1438_v14 = vpop.f32.mrf.mxu0  ;;  %v1574_v50 = vadd.f32 %v16546_v12, %v1246_v24  ;;  %v1249_v58 = vadd.f32 %v22954_v8, %v16432_v13  ;;  %v22955_v12 = vld [vmem:[#allocation58_spill] sm:$0xff]  ;;  %v1568_v31 = vadd.f32 %v22956_v37, %v1240_v41  ;;  %v1648_v28 = vadd.f32 %v16577_v36, %v1580_v9  ;;  %v22964_v24 = vld [vmem:[#allocation51_spill] sm:$0xff] }
 0x172   :  { %v1599_v16 = vadd.f32 %v1499_v40, %v1271_v62  ;;  %v1665_v61 = vadd.f32 %v16537_v55, %v1597_v3  ;;  %v1598_v48 = vadd.f32 %v1438_v14, %v1270_v63  ;;  %v544_v55 = vadd.f32 %v16300_v54, %v16209_v10  ;;  %v22959_v54 = vld [vmem:[#allocation30_spill] sm:$0xff]  ;;  %v22962_v3 = vld [vmem:[#allocation5_spill] sm:$0xff] }
 0x173   :  { %v1538_v25 = vpop.f32.mrf.mxu0  ;;  %v1272_v0 = vadd.f32 %v22955_v12, %v944_v30  ;;  %v1266_v13 = vadd.f32 %v22960_v38, %v22959_v54  ;;  %v16667_v45 = vrot.slane %v16526_v7, %v16580_v49  ;;  %v16670_v42 = vadd.s32 16, %v16510_v15  ;;  %v22963_v40 = vld [vmem:[#allocation9_spill] sm:$0xff]  ;;  %v22975_v38 = vld [vmem:[#allocation42_spill] sm:$0xff] }
 0x174   :  { %v1667_v56 = vadd.f32 %v16544_v19, %v1599_v16  ;;  %v16645_v26 = vpack.c.bf16 %v1665_v61, %v1659_v27  ;;  %v1666_v57 = vadd.f32 %v16577_v36, %v1598_v48  ;;  %v1501_v19 = vpop.f32.mrf.mxu1  ;;  %v1571_v46 = vadd.f32 %v1538_v25, %v22957_v35  ;;  %v22973_v35 = vld [vmem:[#allocation50_spill] sm:$0xff] }
 0x175   :  { %v16655_v29 = vpop.f32.mrf.mxu0  ;;  %v932_v10 = vadd.f32 %v22958_v23, %v544_v55  ;;  %22961 = vst [vmem:[#allocation44_spill] sm:$0xff] %v16670_v42  ;;  %v1642_v60 = vadd.f32 %v16577_v36, %v1574_v50  ;;  %v1600_v63 = vadd.f32 %v1501_v19, %v1272_v0  ;;  %v16674_v32 = vpack.c.bf16 %v1654_v5, %v1648_v28  ;;  %v22967_v5 = vld [vmem:[#allocation33_spill] sm:$0xff]  ;;  %v22970_v55 = vld [vmem:[#allocation48_spill] sm:$0xff]  ;;  %v22972_v28 = vld [vmem:[#allocation35_spill] sm:$0xff] }
 0x176   :  { %v16653_v17 = vpack.c.bf16 %v1667_v56, %v1661_v47  ;;  %v16660_v18 = vpack.c.bf16 %v1666_v57, %v1660_v4  ;;  %v534_v30 = vadd.f32 %v22963_v40, %v22962_v3  ;;  %v22643_v9 = vmov 0.0   ;;  %v22966_v56 = vld [vmem:[#allocation27_spill] sm:$0xff]  ;;  %v22969_v57 = vld [vmem:[#allocation28_spill] sm:$0xff]  ;;  %v22971_v19 = vld [vmem:[#allocation45_spill] sm:$0xff] }
 0x177   :  { %v1542_v62 = vpop.f32.mrf.mxu0  ;;  %v1260_v16 = vadd.f32 %v22964_v24, %v932_v10  ;;  %v16685_v27 = vsel %vm16617_vm2, 1.0, %v22643_v9  ;;  %v1702_v61 = vsel %vm16624_vm3, 1.0, %v22643_v9  ;;  %v1636_v48 = vadd.f32 %v16577_v36, %v1568_v31  ;;  %v22968_v4 = vld [vmem:[#allocation47_spill] sm:$0xff] }
 0x178   :  { %v1577_v53 = vadd.f32 %v1542_v62, %v1249_v58  ;;  %1723 = vmatprep.subr.bf16.mxu1 %v16660_v18  ;;  %22965 = vst [vmem:[#allocation58_spill] sm:$0xff] %v16685_v27  ;;  %v1594_v41 = vadd.f32 %v1497_v34, %v1266_v13  ;;  %v1639_v50 = vadd.f32 %v16600_v6, %v1571_v46  ;;  %v1697_v43 = vmul.u32 2, %v16670_v42  ;;  %v22979_v24 = vld [vmem:[#allocation15_spill] sm:$0xff] }
 0x179   :  { %v16679_v14 = vpop.f32.mrf.mxu0  ;;  %1724 = vmatpush1.bf16.msra.mxu1 %v16645_v26  ;;  %v920_v25 = vadd.f32 %v22966_v56, %v534_v30  ;;  %v1255_v59 = vadd.f32 %v22968_v4, %v22967_v5  ;;  %v1254_v8 = vadd.f32 %v22970_v55, %v22969_v57  ;;  %v1588_v36 = vadd.f32 %v16584_v22, %v1260_v16  ;;  %v22974_v22 = vld [vmem:[#allocation26_spill] sm:$0xff]  ;;  %v22978_v30 = vld [vmem:[#allocation7_spill] sm:$0xff]  ;;  %v22982_v5 = vld [vmem:[#allocation36_spill] sm:$0xff] }
 0x17a   :  { %v1645_v47 = vadd.f32 %v16600_v6, %v1577_v53  ;;  %1725 = vmatprep.subr.bf16.mxu1 %v16674_v32  ;;  %v1668_v34 = vadd.f32 %v16667_v45, %v1600_v63  ;;  %v16704_v0 = vpack.c.bf16 %v1642_v60, %v1636_v48  ;;  %v1261_v46 = vadd.f32 %v22973_v35, %v22972_v28  ;;  %v22981_v56 = vld [vmem:[#allocation23_spill] sm:$0xff]  ;;  %v22983_v55 = vld [vmem:[#allocation37_spill] sm:$0xff]  ;;  %v22987_v35 = vld [vmem:[#allocation40_spill] sm:$0xff] }
 0x17b   :  { %v1548_v58 = vpop.f32.mrf.mxu0  ;;  %v1248_v37 = vadd.f32 %v22971_v19, %v920_v25  ;;  %v1582_v23 = vadd.f32 %v16566_v39, %v1254_v8  ;;  %v1662_v10 = vadd.f32 %v16667_v45, %v1594_v41  ;;  %v1242_v13 = vadd.f32 %v22975_v38, %v22974_v22  ;;  %v22985_v19 = vld [vmem:[#allocation6_spill] sm:$0xff] }
 0x17c   :  { %v16702_v12 = vpack.c.bf16 %v1645_v47, %v1639_v50  ;;  %v1583_v54 = vadd.f32 %v1548_v58, %v1255_v59  ;;  %v16716_v60 = vpack.c.bf16 %v1702_v61, %v16685_v27  ;;  %vm16721_vm4 = vcmp.eq.s32.totalorder %v16275_v20, %v1697_v43  ;;  %v22980_v47 = vld [vmem:[#allocation8_spill] sm:$0xff] }
 0x17d   :  { %v1550_v31 = vpop.f32.mrf.mxu0  ;;  %1726 = vmatpush1.bf16.msra.mxu1 %v16597_v21  ;;  %v1576_v39 = vadd.f32 %v16550_v33, %v1248_v37  ;;  %v1656_v53 = vadd.f32 %v16667_v45, %v1588_v36  ;;  %v16727_v40 = vpack.c.bf16 %v1668_v34, %v1662_v10  ;;  %v607_v16 = vadd.f32 %v22979_v24, %v22978_v30  ;;  %v22986_v37 = vld [vmem:[#allocation10_spill] sm:$0xff] }
 0x17e   :  { %1727 = vmatprep.subr.bf16.mxu1 %v16704_v0  ;;  %v1570_v61 = vadd.f32 %v16539_v1, %v1242_v13  ;;  %v1650_v41 = vadd.f32 %v16667_v45, %v1582_v23  ;;  %v1651_v50 = vadd.f32 %v16600_v6, %v1583_v54  ;;  %v617_v25 = vadd.f32 %v22981_v56, %v22980_v47  ;;  %v22984_v1 = vld [vmem:[#allocation53_spill] sm:$0xff]  ;;  %v22988_v23 = vld [vmem:[#allocation52_spill] sm:$0xff]  ;;  %v22990_v13 = vld [vmem:[#allocation38_spill] sm:$0xff] }
 0x17f   :  { %v1552_v62 = vpop.f32.mrf.mxu0  ;;  %v934_v4 = vadd.f32 %v22982_v5, %v607_v16  ;;  %v1703_v57 = vsel %vm16721_vm4, 1.0, %v22643_v9  ;;  %v1267_v8 = vadd.f32 %v22984_v1, %v22983_v55  ;;  %v1644_v58 = vadd.f32 %v16667_v45, %v1576_v39  ;;  %v22992_v39 = vld [vmem:[#allocation39_spill] sm:$0xff]  ;;  %v22994_v16 = vld [vmem:[#allocation32_spill] sm:$0xff] }
 0x180   :  { %v1589_v3 = vadd.f32 %v1552_v62, %v1261_v46  ;;  %v16750_v34 = vpack.c.bf16 %v1656_v53, %v1650_v41  ;;  %v597_v28 = vadd.f32 %v22986_v37, %v22985_v19  ;;  %v946_v46 = vadd.f32 %v22987_v35, %v617_v25  ;;  %v22991_v62 = vld [vmem:[#allocation55_spill] sm:$0xff]  ;;  %v22993_v53 = vld [vmem:[#allocation57_spill] sm:$0xff]  ;;  %v22998_v35 = vld [vmem:[#allocation46_spill] sm:$0xff] }
 0x181   :  { %v1554_v48 = vpop.f32.mrf.mxu0  ;;  %1728 = vmatpush1.bf16.msra.mxu1 %v16556_v44  ;;  %v1262_v10 = vadd.f32 %v22988_v23, %v934_v4  ;;  %v1627_v54 = vsub.s32 5, %v16510_v15  ;;  %v22989_v38 = vmov 0   ;;  %v1268_v63 = vadd.f32 %v22991_v62, %v22990_v13  ;;  %v22997_v56 = vld [vmem:[#allocation59_spill] sm:$0xff] }
 0x182   :  { %v1657_v33 = vadd.f32 %v16600_v6, %v1589_v3  ;;  %1774 = vmatprep.subr.bf16.mxu1 %v16727_v40  ;;  %v1273_v3 = vadd.f32 %v22993_v53, %v22992_v39  ;;  %v1638_v30 = vadd.f32 %v16667_v45, %v1570_v61  ;;  %v922_v41 = vadd.f32 %v22994_v16, %v597_v28 }
 0x183   :  { %v1558_v59 = vpop.f32.mrf.mxu0  ;;  %v1274_v25 = vadd.f32 %v22997_v56, %v946_v46  ;;  %v16769_v4 = vpack.c.bf16 %v1703_v57, %v1703_v57  ;;  %v1590_v55 = vadd.f32 %v1554_v48, %v1262_v10  ;;  %v1628_v61 = vrot.slane %v16526_v7, %v1627_v54  ;;  %v22999_v48 = vld [vmem:[#allocation31_spill] sm:$0xff] }
 0x184   :  { %v16746_v36 = vpack.c.bf16 %v1657_v33, %v1651_v50  ;;  %12202 = vmatmul.mubr.msk.bf16.vlgmr.msra.gmra.mxu1 %vm22642_vm5, %v16716_v60  ;;  %v1595_v24 = vadd.f32 %v1558_v59, %v1267_v8  ;;  %v22995_v50 = vld [vmem:[#allocation34_spill] sm:$0xff]  ;;  %v22996_v33 = vld [vmem:[#allocation49_spill] sm:$0xff]  ;;  %v16771_v37 = vpack.c.bf16 %v1644_v58, %v1638_v30  ;;  %v1250_v45 = vadd.f32 %v22998_v35, %v922_v41  ;;  %v23000_v57 = vld [vmem:[#allocation43_spill] sm:$0xff] }
 0x185   :  { %v1560_v22 = vpop.f32.mrf.mxu0  ;;  %1775 = vmatpush1.bf16.msra.mxu1 %v16653_v17  ;;  %1755 = vmatprep.mubr.bf16.mxu1 %v22989_v38  ;;  %v1256_v47 = vadd.f32 %v22996_v33, %v22995_v50  ;;  %v1244_v10 = vadd.f32 %v23000_v57, %v22999_v48  ;;  %v16823_v50 = vadd.s32 120, %v16510_v15  ;;  %v16908_v35 = vadd.s32 352, %v16510_v15 }
 0x186   :  { %1776 = vmatprep.subr.bf16.mxu1 %v16750_v34  ;;  %v1596_v1 = vadd.f32 %v1560_v22, %v1268_v63  ;;  %v1663_v28 = vadd.f32 %v16600_v6, %v1595_v24  ;;  %v1578_v58 = vadd.f32 %v16679_v14, %v1250_v45  ;;  %v1658_v22 = vadd.f32 %v1628_v61, %v1590_v55  ;;  %v23003_v24 = vld [vmem:[#allocation16_spill] sm:$0xff] }
 0x187   :  { %v1562_v5 = vpop.f32.mrf.mxu0  ;;  %v1584_v8 = vadd.f32 %v1550_v31, %v1256_v47  ;;  %v2168_v16 = vmul.u32 32, %v23003_v24  ;;  %v16853_v47 = vadd.s32 104, %v16510_v15  ;;  %v16878_v55 = vadd.s32 80, %v16510_v15  ;;  %23017 = vst [vmem:[#allocation30_spill] sm:$0xff] %v16908_v35 }
 0x188   :  { %v1601_v19 = vadd.f32 %v1562_v5, %v1273_v3  ;;  %v1664_v13 = vadd.f32 %v1628_v61, %v1596_v1  ;;  %v1646_v63 = vadd.f32 %v1628_v61, %v1578_v58  ;;  %v23002_v3 = vmul.u32 2, %v16569_v2 }
 0x189   :  { %v1564_v59 = vpop.f32.mrf.mxu0  ;;  %1777 = vmatpush1.bf16.msra.mxu1 %v16607_v51  ;;  %v1652_v31 = vadd.f32 %v1628_v61, %v1584_v8  ;;  %v16861_v5 = vadd.s32 376, %v16510_v15  ;;  %v16881_v1 = vadd.s32 88, %v16510_v15  ;;  %v16911_v45 = vadd.s32 360, %v16510_v15 }
 0x18a   :  { %v1669_v46 = vadd.f32 %v16600_v6, %v1601_v19  ;;  %v1602_v23 = vadd.f32 %v1564_v59, %v1274_v25  ;;  %1778 = vmatprep.subr.bf16.mxu1 %v16771_v37  ;;  %v1572_v6 = vadd.f32 %v16655_v29, %v1244_v10  ;;  %v23001_v29 = vmul.u32 2, %v16510_v15 }
 0x18b   :  { %v1682_v14 = vpack.c.bf16 %v1658_v22, %v1652_v31  ;;  %v1867_v30 = vadd.s32 1, %v23002_v3  ;;  %v16858_v25 = vadd.s32 368, %v16510_v15  ;;  %23010 = vst [vmem:[#allocation29_spill] sm:$0xff] %v16861_v5  ;;  %23018 = vst [vmem:[#allocation54_spill] sm:$0xff] %v16911_v45  ;;  %v16923_v59 = vadd.s32 72, %v16510_v15 }
 0x18c   :  { %v1687_v62 = vpack.c.bf16 %v1669_v46, %v1663_v28  ;;  %v1670_v7 = vadd.f32 %v1628_v61, %v1602_v23  ;;  %12203 = vmatmul.mubr.msk.bf16.gmra.mxu1 %vm22642_vm5, %v16769_v4  ;;  %v1640_v39 = vadd.f32 %v1628_v61, %v1572_v6  ;;  %v16920_v61 = vadd.s32 64, %v16510_v15 }
 0x18d   :  { %1779 = vmatpush1.bf16.msra.mxu1 %v16562_v11  ;;  %1796 = vmatprep.mubr.bf16.mxu1 %v22989_v38  ;;  %vm1870_vm7 = vcmp.eq.s32.totalorder %v16275_v20, %v1867_v30  ;;  %23009 = vst [vmem:[#allocation41_spill] sm:$0xff] %v16858_v25  ;;  %v16957_v8 = vadd.s32 344, %v16510_v15  ;;  %v16968_v46 = vadd.s32 48, %v16510_v15  ;;  %v16971_v23 = vadd.s32 56, %v16510_v15 }
 0x18e   :  { %1893 = vmatprep.subr.bf16.mxu1 %v16660_v18  ;;  %v1688_v54 = vpack.c.bf16 %v1670_v7, %v1664_v13  ;;  %v1676_v53 = vpack.c.bf16 %v1646_v63, %v1640_v39  ;;  %v1866_v18 = vadd.s32 1, %v23001_v29  ;;  %v17000_v10 = vadd.s32 320, %v16510_v15 }
 0x18f   :  { %23020 = vst [vmem:[#allocation9_spill] sm:$0xff] %v16957_v8  ;;  %v17003_v58 = vadd.s32 328, %v16510_v15  ;;  %v17019_v13 = vadd.s32 32, %v16510_v15  ;;  %v17082_v7 = vadd.s32 24, %v16510_v15  ;;  %v17085_v6 = vadd.s32 304, %v16510_v15 }
 0x190   :  { %1825 = vmatprep.subr.bf16.mxu0 %v1688_v54  ;;  %vm1869_vm6 = vcmp.eq.s32.totalorder %v16275_v20, %v1866_v18  ;;  %23027 = vst [vmem:[#allocation51_spill] sm:$0xff] %v17000_v10  ;;  %v17088_v31 = vadd.s32 312, %v16510_v15  ;;  %v17113_v63 = vadd.s32 296, %v16510_v15  ;;  %v17139_v39 = vadd.s32 248, %v16510_v15 }
 0x191   :  { %1826 = vmatpush1.bf16.msra.mxu0 %v1687_v62  ;;  %23028 = vst [vmem:[#allocation27_spill] sm:$0xff] %v17003_v58  ;;  %23032 = vst [vmem:[#allocation33_spill] sm:$0xff] %v17082_v7  ;;  %v17145_v29 = vadd.s32 280, %v16510_v15  ;;  %v17168_v18 = vadd.s32 224, %v16510_v15  ;;  %v17171_v3 = vadd.s32 232, %v16510_v15  ;;  %v17174_v30 = vadd.s32 256, %v16510_v15 }
 0x192   :  { %1827 = vmatprep.subr.bf16.mxu0 %v1682_v14  ;;  %23033 = vst [vmem:[#allocation47_spill] sm:$0xff] %v17085_v6  ;;  %23034 = vst [vmem:[#allocation28_spill] sm:$0xff] %v17088_v31  ;;  %v17177_v24 = vadd.s32 264, %v16510_v15  ;;  %v17270_v19 = vadd.s32 464, %v16510_v15  ;;  %v17299_v28 = vadd.s32 168, %v16510_v15  ;;  %v17302_v48 = vadd.s32 448, %v16510_v15 }
 0x193   :  { %23036 = vst [vmem:[#allocation45_spill] sm:$0xff] %v17113_v63  ;;  %23038 = vst [vmem:[#allocation50_spill] sm:$0xff] %v17139_v39  ;;  %v17305_v57 = vadd.s32 456, %v16510_v15  ;;  %v17328_v22 = vadd.s32 144, %v16510_v15  ;;  %v17334_v49 = vadd.s32 432, %v16510_v15  ;;  %v17360_v27 = vadd.s32 128, %v16510_v15 }
 0x194   :  { %12204 = vmatmul.mubr.msk.bf16.vlgmr.msra.gmra.mxu1 %vm22642_vm5, %v16716_v60  ;;  %23040 = vst [vmem:[#allocation42_spill] sm:$0xff] %v17145_v29  ;;  %23041 = vst [vmem:[#allocation7_spill] sm:$0xff] %v17168_v18 }
 0x195   :  { %1894 = vmatpush1.bf16.msra.mxu1 %v16645_v26  ;;  %1828 = vmatpush1.bf16.msra.mxu0 %v16746_v36  ;;  %v23004_v26 = vld [vmem:[#allocation12_spill] sm:$0xff]  ;;  %23042 = vst [vmem:[#allocation15_spill] sm:$0xff] %v17171_v3  ;;  %23043 = vst [vmem:[#allocation8_spill] sm:$0xff] %v17174_v30 }
 0x196   :  { %1895 = vmatprep.subr.bf16.mxu1 %v16674_v32  ;;  %1829 = vmatprep.subr.bf16.mxu0 %v1676_v53  ;;  %v23005_v32 = vand.u32 31, %v23004_v26  ;;  %23044 = vst [vmem:[#allocation23_spill] sm:$0xff] %v17177_v24  ;;  %23055 = vst [vmem:[#allocation57_spill] sm:$0xff] %v17270_v19  ;;  %v17363_v26 = vadd.s32 136, %v16510_v15 }
 0x197   :  { %1806 = vmatprep.mubr.bf16.mxu1 %v22989_v38  ;;  %23058 = vst [vmem:[#allocation49_spill] sm:$0xff] %v17299_v28  ;;  %23059 = vst [vmem:[#allocation59_spill] sm:$0xff] %v17302_v48 }
 0x198   :  { %v16807_v41 = vadd.s32 %v23005_v32, %v2168_v16  ;;  %v17200_v16 = vadd.s32 208, %v16510_v15  ;;  %v17203_v32 = vadd.s32 216, %v16510_v15  ;;  %23060 = vst [vmem:[#allocation46_spill] sm:$0xff] %v17305_v57  ;;  %23061 = vst [vmem:[#allocation31_spill] sm:$0xff] %v17328_v22 }
 0x199   :  { %1896 = vmatpush1.bf16.msra.mxu1 %v16597_v21  ;;  %1830 = vmatpush1.bf16.msra.mxu0 %v16702_v12  ;;  %v16816_v21 = vsel %vm1869_vm6, 1.0, %v22643_v9  ;;  %23063 = vst [vmem:[#allocation16_spill] sm:$0xff] %v17334_v49  ;;  %23065 = vst [vmem:[#allocation66_spill] sm:$0xff] %v17360_v27 }
 0x19a   :  { %1897 = vmatprep.subr.bf16.mxu1 %v16704_v0  ;;  %1944 = vmatprep.subr.bf16.mxu0 %v16727_v40  ;;  %23006 = vst [vmem:[#allocation62_spill] sm:$0xff] %v16816_v21  ;;  %v1873_v0 = vsel %vm1870_vm7, 1.0, %v22643_v9  ;;  %v16820_v40 = vadd.s32 112, %v16510_v15  ;;  %vm2222_vm9 = vcmp.eq.s32.totalorder %v16823_v50, %v16807_v41  ;;  %vm2216_vm15 = vcmp.eq.s32.totalorder %v16853_v47, %v16807_v41 }
 0x19b   :  { %vm2315_vm0 = vcmp.eq.s32.totalorder %v16858_v25, %v16807_v41  ;;  %vm2318_vm1 = vcmp.eq.s32.totalorder %v16861_v5, %v16807_v41  ;;  %23045 = vst [vmem:[#allocation36_spill] sm:$0xff] %v17200_v16  ;;  %23046 = vst [vmem:[#allocation37_spill] sm:$0xff] %v17203_v32 }
 0x19c   :  { %12205 = vmatmul.mubr.msk.bf16.gmra.mxu1 %vm22642_vm5, %v16769_v4  ;;  %12206 = vmatmul.mubr.msk.bf16.vlgmr.msra.gmra.mxu0 %vm22642_vm5, %v16716_v60  ;;  %v1868_v60 = vadd.s32 1, %v1697_v43  ;;  %vm2219_vm8 = vcmp.eq.s32.totalorder %v16820_v40, %v16807_v41  ;;  %v23008_v43 = vand.u32 31, %v16275_v20  ;;  %vm16903_vm7 = vmpackc.low %vm2318_vm1, %vm2315_vm0  ;;  %vm2309_vm0 = vcmp.eq.s32.totalorder %v16908_v35, %v16807_v41  ;;  %23066 = vst [vmem:[#allocation67_spill] sm:$0xff] %v17363_v26 }
 0x19d   :  { %1898 = vmatpush1.bf16.msra.mxu1 %v16556_v44  ;;  %1945 = vmatpush1.bf16.msra.mxu0 %v16653_v17  ;;  %v23007_v44 = vld [vmem:[#allocation14_spill] sm:$0xff]  ;;  %v16832_v17 = vpack.c.bf16 %v1873_v0, %v16816_v21  ;;  %vm12214_vm11 = vmpackc.low %vm2222_vm9, %vm2219_vm8  ;;  %vm2207_vm8 = vcmp.eq.s32.totalorder %v16878_v55, %v16807_v41  ;;  %vm2210_vm9 = vcmp.eq.s32.totalorder %v16881_v1, %v16807_v41  ;;  %v17206_v0 = vadd.s32 496, %v16510_v15 }
 0x19e   :  { %1995 = vmatprep.subr.bf16.mxu1 %v1688_v54  ;;  %1946 = vmatprep.subr.bf16.mxu0 %v16750_v34  ;;  %v2167_v33 = vmul.u32 32, %v23007_v44  ;;  %vm1871_vm10 = vcmp.eq.s32.totalorder %v16275_v20, %v1868_v60  ;;  %vm2312_vm1 = vcmp.eq.s32.totalorder %v16911_v45, %v16807_v41  ;;  %v17110_v54 = vadd.s32 288, %v16510_v15 }
 0x19f   :  { %1857 = vmatprep.mubr.bf16.mxu0 %v22989_v38  ;;  %1915 = vmatprep.mubr.bf16.mxu1 %v22989_v38  ;;  %v1874_v56 = vsel %vm1871_vm10, 1.0, %v22643_v9  ;;  %23047 = vst [vmem:[#allocation53_spill] sm:$0xff] %v17206_v0  ;;  %v17209_v60 = vadd.s32 504, %v16510_v15  ;;  %v17232_v44 = vadd.s32 192, %v16510_v15  ;;  %v17331_v9 = vadd.s32 152, %v16510_v15 }
 0x1a0   :  { %v16843_v34 = vadd.s32 %v23008_v43, %v2167_v33  ;;  %23035 = vst [vmem:[#allocation48_spill] sm:$0xff] %v17110_v54  ;;  %v17235_v33 = vadd.s32 200, %v16510_v15  ;;  %v17241_v43 = vadd.s32 488, %v16510_v15  ;;  %v17337_v21 = vadd.s32 440, %v16510_v15 }
 0x1a1   :  { %1947 = vmatpush1.bf16.msra.mxu0 %v16607_v51  ;;  %v16850_v51 = vadd.s32 96, %v16510_v15  ;;  %23048 = vst [vmem:[#allocation6_spill] sm:$0xff] %v17209_v60  ;;  %23049 = vst [vmem:[#allocation10_spill] sm:$0xff] %v17232_v44  ;;  %v17369_v20 = vadd.s32 424, %v16510_v15 }
 0x1a2   :  { %1948 = vmatprep.subr.bf16.mxu0 %v16771_v37  ;;  %vm2218_vm12 = vcmp.eq.s32.totalorder %v16820_v40, %v16843_v34  ;;  %vm2221_vm13 = vcmp.eq.s32.totalorder %v16823_v50, %v16843_v34  ;;  %vm2215_vm6 = vcmp.eq.s32.totalorder %v16853_v47, %v16843_v34  ;;  %vm2206_vm10 = vcmp.eq.s32.totalorder %v16878_v55, %v16843_v34 }
 0x1a3   :  { %vm2213_vm14 = vcmp.eq.s32.totalorder %v16850_v51, %v16807_v41  ;;  %vm16887_vm2 = vmpackc.low %vm2221_vm13, %vm2218_vm12  ;;  %vm2212_vm4 = vcmp.eq.s32.totalorder %v16850_v51, %v16843_v34  ;;  %vm2314_vm13 = vcmp.eq.s32.totalorder %v16858_v25, %v16843_v34  ;;  %23050 = vst [vmem:[#allocation40_spill] sm:$0xff] %v17235_v33  ;;  %v17273_v37 = vadd.s32 472, %v16510_v15 }
 0x1a4   :  { %12207 = vmatmul.mubr.msk.bf16.gmra.mxu0 %vm22642_vm5, %v16769_v4  ;;  %12208 = vmatmul.mubr.msk.bf16.vlgmr.msra.gmra.mxu1 %vm22642_vm5, %v16832_v17  ;;  %v22692_v4 = vmov 1.0|1.0   ;;  %vm16891_vm3 = vmpackc.low %vm2216_vm15, %vm2213_vm14  ;;  %vm2317_vm14 = vcmp.eq.s32.totalorder %v16861_v5, %v16843_v34  ;;  %23052 = vst [vmem:[#allocation38_spill] sm:$0xff] %v17241_v43  ;;  %v17477_v5 = vadd.s32 616, %v16510_v15 }
 0x1a5   :  { %1996 = vmatpush1.bf16.msra.mxu1 %v1687_v62  ;;  %1949 = vmatpush1.bf16.msra.mxu0 %v16562_v11  ;;  %v16870_v11 = vpack.c.bf16 %v1874_v56, %v1874_v56  ;;  %vm12220_vm12 = vmpackc.low %vm2215_vm6, %vm2212_vm4  ;;  %vm2204_vm4 = vcmp.eq.s32.totalorder %v16923_v59, %v16807_v41  ;;  %v17022_v62 = vadd.s32 40, %v16510_v15  ;;  %v17264_v56 = vadd.s32 176, %v16510_v15  ;;  %23056 = vst [vmem:[#allocation32_spill] sm:$0xff] %v17273_v37 }
 0x1a6   :  { %1997 = vmatprep.subr.bf16.mxu1 %v1682_v14  ;;  %1925 = vmatprep.mubr.bf16.mxu1 %v22989_v38  ;;  %vm12222_vm15 = vmpackc.low %vm2210_vm9, %vm2207_vm8  ;;  %vm2203_vm8 = vcmp.eq.s32.totalorder %v16923_v59, %v16843_v34  ;;  %v17136_v14 = vadd.s32 240, %v16510_v15  ;;  %23062 = vst [vmem:[#allocation43_spill] sm:$0xff] %v17331_v9 }
 0x1a7   :  { %1966 = vmatprep.mubr.bf16.mxu0 %v22989_v38  ;;  %12215 = vmatprep.subr.msk.bf16.mxu0 %vm12214_vm11, %v22692_v4  ;;  %vm2209_vm11 = vcmp.eq.s32.totalorder %v16881_v1, %v16843_v34  ;;  %vm12280_vm6 = vmpackc.low %vm2317_vm14, %vm2314_vm13  ;;  %vm2306_vm14 = vcmp.eq.s32.totalorder %v16957_v8, %v16807_v41  ;;  %23053 = vst [vmem:[#allocation55_spill] sm:$0xff] %v17264_v56 }
 0x1a8   :  { %vm16979_vm9 = vmpackc.low %vm2312_vm1, %vm2309_vm0  ;;  %vm2195_vm0 = vcmp.eq.s32.totalorder %v16968_v46, %v16807_v41  ;;  %vm2198_vm1 = vcmp.eq.s32.totalorder %v16971_v23, %v16807_v41  ;;  %23037 = vst [vmem:[#allocation35_spill] sm:$0xff] %v17136_v14 }
 0x1a9   :  { %1998 = vmatpush1.bf16.msra.mxu1 %v16746_v36  ;;  %v17296_v36 = vadd.s32 160, %v16510_v15  ;;  %23064 = vst [vmem:[#allocation14_spill] sm:$0xff] %v17337_v21  ;;  %23068 = vst [vmem:[#allocation69_spill] sm:$0xff] %v17369_v20 }
 0x1aa   :  { %1999 = vmatprep.subr.bf16.mxu1 %v1676_v53  ;;  %v17142_v53 = vadd.s32 272, %v16510_v15  ;;  %23081 = vst [vmem:[#allocation77_spill] sm:$0xff] %v17477_v5 }
 0x1ab   :  { %23057 = vst [vmem:[#allocation34_spill] sm:$0xff] %v17296_v36 }
 0x1ac   :  { %12209 = vmatmul.mubr.msk.bf16.gmra.mxu1 %vm22642_vm5, %v16870_v11  ;;  %12210 = vmatmul.mubr.msk.bf16.vlgmr.msra.gmra.mxu0 %vm22642_vm5, %v16832_v17  ;;  %23039 = vst [vmem:[#allocation26_spill] sm:$0xff] %v17142_v53 }
 0x1ad   :  { %2000 = vmatpush1.bf16.msra.mxu1 %v16702_v12  ;;  %1976 = vmatprep.mubr.bf16.mxu0 %v22989_v38  ;;  %v16954_v12 = vadd.s32 336, %v16510_v15 }
 0x1ae   :  { %2017 = vmatprep.mubr.bf16.mxu1 %v22989_v38  ;;  %12217 = vmatpush1.bf16.msk.msra.mxu0 %vm16887_vm2, %v22692_v4  ;;  %vm16959_vm2 = vmpackc.low %vm2209_vm11, %vm2206_vm10  ;;  %vm2308_vm10 = vcmp.eq.s32.totalorder %v16908_v35, %v16843_v34  ;;  %vm2311_vm11 = vcmp.eq.s32.totalorder %v16911_v45, %v16843_v34 }
 0x1af   :  { %12219 = vmatprep.subr.msk.bf16.mxu0 %vm16891_vm3, %v22692_v4  ;;  %12279 = vmatprep.subr.msk.bf16.mxu1 %vm16903_vm7, %v22692_v4  ;;  %23019 = vst [vmem:[#allocation5_spill] sm:$0xff] %v16954_v12  ;;  %vm2201_vm3 = vcmp.eq.s32.totalorder %v16920_v61, %v16807_v41  ;;  %vm2200_vm7 = vcmp.eq.s32.totalorder %v16920_v61, %v16843_v34 }
 0x1b0   :  { %vm2303_vm13 = vcmp.eq.s32.totalorder %v16954_v12, %v16807_v41 }
 0x1b2   :  { %12221 = vmatpush1.bf16.msk.msra.mxu0 %vm12220_vm12, %v22692_v4  ;;  %vm16991_vm12 = vmpackc.low %vm2204_vm4, %vm2201_vm3  ;;  %vm2194_vm4 = vcmp.eq.s32.totalorder %v16968_v46, %v16843_v34 }
 0x1b3   :  { %12223 = vmatprep.subr.msk.bf16.mxu0 %vm12222_vm15, %v22692_v4  ;;  %vm17010_vm15 = vmpackc.low %vm2203_vm8, %vm2200_vm7  ;;  %vm2302_vm7 = vcmp.eq.s32.totalorder %v16954_v12, %v16843_v34  ;;  %vm2305_vm8 = vcmp.eq.s32.totalorder %v16957_v8, %v16843_v34 }
 0x1b4   :  { %12211 = vmatmul.mubr.msk.bf16.gmra.mxu0 %vm22642_vm5, %v16870_v11  ;;  %12212 = vmatmul.mubr.msk.bf16.vlgmr.msra.gmra.mxu1 %vm22642_vm5, %v16832_v17  ;;  %vm12284_vm3 = vmpackc.low %vm2311_vm11, %vm2308_vm10  ;;  %vm2297_vm10 = vcmp.eq.s32.totalorder %v17000_v10, %v16807_v41  ;;  %vm2300_vm11 = vcmp.eq.s32.totalorder %v17003_v58, %v16807_v41  ;;  %vm2189_vm5 = vcmp.eq.s32.totalorder %v17019_v13, %v16807_v41  ;;  %v17238_v17 = vadd.s32 480, %v16510_v15 }
 0x1b5   :  { %2027 = vmatprep.mubr.bf16.mxu1 %v22989_v38  ;;  %12281 = vmatpush1.bf16.msk.msra.mxu1 %vm12280_vm6, %v22692_v4  ;;  %vm2197_vm6 = vcmp.eq.s32.totalorder %v16971_v23, %v16843_v34  ;;  %v17392_v38 = vadd.s32 400, %v16510_v15 }
 0x1b6   :  { %12225 = vmatpush1.bf16.msk.msra.mxu0 %vm16959_vm2, %v22692_v4  ;;  %12283 = vmatprep.subr.msk.bf16.mxu1 %vm16979_vm9, %v22692_v4  ;;  %vm12286_vm2 = vmpackc.low %vm2306_vm14, %vm2303_vm13  ;;  %vm2192_vm13 = vcmp.eq.s32.totalorder %v17022_v62, %v16807_v41  ;;  %23051 = vst [vmem:[#allocation52_spill] sm:$0xff] %v17238_v17 }
 0x1b7   :  { %12227 = vmatprep.subr.msk.bf16.mxu0 %vm16991_vm12, %v22692_v4  ;;  %vm12230_vm9 = vmpackc.low %vm2198_vm1, %vm2195_vm0  ;;  %vm23031_vm1 = vcmask 392192   ;;  %23069 = vst [vmem:[#allocation70_spill] sm:$0xff] %v17392_v38 }
 0x1b8   :  { %vm12232_vm12 = vmpackc.low %vm2197_vm6, %vm2194_vm4  ;;  %vm2191_vm4 = vcmp.eq.s32.totalorder %v17022_v62, %v16843_v34  ;;  %vm2296_vm6 = vcmp.eq.s32.totalorder %v17000_v10, %v16843_v34 }
 0x1b9   :  { %12285 = vmatpush1.bf16.msk.msra.mxu1 %vm12284_vm3, %v22692_v4  ;;  %vm12288_vm14 = vmpackc.low %vm2305_vm8, %vm2302_vm7  ;;  %vm2183_vm8 = vcmp.eq.s32.totalorder %v16670_v42, %v16807_v41 }
 0x1ba   :  { %12229 = vmatpush1.bf16.msk.msra.mxu0 %vm17010_vm15, %v22692_v4  ;;  %12287 = vmatprep.subr.msk.bf16.mxu1 %vm12286_vm2, %v22692_v4  ;;  %vm12290_vm0 = vmpackc.low %vm2300_vm11, %vm2297_vm10  ;;  %vm2188_vm15 = vcmp.eq.s32.totalorder %v17019_v13, %v16843_v34  ;;  %vm2291_vm10 = vcmp.eq.s32.totalorder %v17085_v6, %v16807_v41  ;;  %vm2294_vm11 = vcmp.eq.s32.totalorder %v17088_v31, %v16807_v41 }
 0x1bb   :  { %12231 = vmatprep.subr.msk.bf16.mxu0 %vm12230_vm9, %v22692_v4  ;;  %vm12234_vm3 = vmpackc.low %vm2192_vm13, %vm2189_vm5  ;;  %vm2299_vm5 = vcmp.eq.s32.totalorder %v17003_v58, %v16843_v34  ;;  %vm2186_vm9 = vcmp.eq.s32.totalorder %v17082_v7, %v16807_v41  ;;  %vm2182_vm13 = vcmp.eq.s32.totalorder %v16670_v42, %v16843_v34 }
 0x1bc   :  { %12213 = vmatmul.mubr.msk.bf16.gmra.mxu1 %vm23031_vm1, %v16870_v11  ;;  %vm12236_vm2 = vmpackc.low %vm2191_vm4, %vm2188_vm15  ;;  %vm2293_vm1 = vcmp.eq.s32.totalorder %v17088_v31, %v16843_v34  ;;  %v17267_v11 = vadd.s32 184, %v16510_v15 }
 0x1bd   :  { %12289 = vmatpush1.bf16.msk.msra.mxu1 %vm12288_vm14, %v22692_v4  ;;  %vm12292_vm7 = vmpackc.low %vm2299_vm5, %vm2296_vm6  ;;  %vm2185_vm14 = vcmp.eq.s32.totalorder %v17082_v7, %v16843_v34  ;;  %vm2177_vm6 = vcmp.eq.s32.totalorder %v16510_v15, %v16807_v41  ;;  %vm2180_vm5 = vcmp.eq.s32.totalorder %v16569_v2, %v16807_v41 }
 0x1be   :  { %12233 = vmatpush1.bf16.msk.msra.mxu0 %vm12232_vm12, %v22692_v4  ;;  %12291 = vmatprep.subr.msk.bf16.mxu1 %vm12290_vm0, %v22692_v4  ;;  %vm12238_vm12 = vmpackc.low %vm2186_vm9, %vm2183_vm8  ;;  %vm2290_vm0 = vcmp.eq.s32.totalorder %v17085_v6, %v16843_v34  ;;  %vm2176_vm9 = vcmp.eq.s32.totalorder %v16510_v15, %v16843_v34  ;;  %23054 = vst [vmem:[#allocation39_spill] sm:$0xff] %v17267_v11 }
 0x1bf   :  { %12235 = vmatprep.subr.msk.bf16.mxu0 %vm12234_vm3, %v22692_v4  ;;  %vm12294_vm3 = vmpackc.low %vm2294_vm11, %vm2291_vm10  ;;  %vm2179_vm10 = vcmp.eq.s32.totalorder %v16569_v2, %v16843_v34  ;;  %vm2284_vm11 = vcmp.eq.s32.totalorder %v17110_v54, %v16843_v34 }
 0x1c0   :  { %vm12240_vm15 = vmpackc.low %vm2185_vm14, %vm2182_vm13 }
 0x1c1   :  { %12293 = vmatpush1.bf16.msk.msra.mxu1 %vm12292_vm7, %v22692_v4  ;;  %vm12296_vm4 = vmpackc.low %vm2293_vm1, %vm2290_vm0  ;;  %vm2288_vm7 = vcmp.eq.s32.totalorder %v17113_v63, %v16807_v41  ;;  %vm2267_vm1 = vcmp.eq.s32.totalorder %v17136_v14, %v16807_v41 }
 0x1c2   :  { %12237 = vmatpush1.bf16.msk.msra.mxu0 %vm12236_vm2, %v22692_v4  ;;  %12295 = vmatprep.subr.msk.bf16.mxu1 %vm12294_vm3, %v22692_v4  ;;  %vm2285_vm2 = vcmp.eq.s32.totalorder %v17110_v54, %v16807_v41  ;;  %vm12242_vm8 = vmpackc.low %vm2180_vm5, %vm2177_vm6  ;;  %vm2270_vm3 = vcmp.eq.s32.totalorder %v17139_v39, %v16807_v41  ;;  %vm2266_vm5 = vcmp.eq.s32.totalorder %v17136_v14, %v16843_v34  ;;  %v17424_v54 = vadd.s32 392, %v16510_v15 }
 0x1c3   :  { %12239 = vmatprep.subr.msk.bf16.mxu0 %vm12238_vm12, %v22692_v4  ;;  %vm2287_vm12 = vcmp.eq.s32.totalorder %v17113_v63, %v16843_v34  ;;  %vm12298_vm13 = vmpackc.low %vm2288_vm7, %vm2285_vm2  ;;  %vm2269_vm2 = vcmp.eq.s32.totalorder %v17139_v39, %v16843_v34  ;;  %vm2278_vm7 = vcmp.eq.s32.totalorder %v17142_v53, %v16843_v34 }
 0x1c4   :  { %vm12244_vm14 = vmpackc.low %vm2179_vm10, %vm2176_vm9  ;;  %23075 = vst [vmem:[#allocation74_spill] sm:$0xff] %v17424_v54 }
 0x1c5   :  { %12297 = vmatpush1.bf16.msk.msra.mxu1 %vm12296_vm4, %v22692_v4  ;;  %vm12300_vm0 = vmpackc.low %vm2287_vm12, %vm2284_vm11  ;;  %vm2282_vm4 = vcmp.eq.s32.totalorder %v17145_v29, %v16807_v41  ;;  %vm2261_vm12 = vcmp.eq.s32.totalorder %v17168_v18, %v16807_v41 }
 0x1c6   :  { %12241 = vmatpush1.bf16.msk.msra.mxu0 %vm12240_vm15, %v22692_v4  ;;  %12299 = vmatprep.subr.msk.bf16.mxu1 %vm12298_vm13, %v22692_v4  ;;  %vm2279_vm15 = vcmp.eq.s32.totalorder %v17142_v53, %v16807_v41  ;;  %vm12246_vm6 = vmpackc.low %vm2270_vm3, %vm2267_vm1  ;;  %vm2264_vm13 = vcmp.eq.s32.totalorder %v17171_v3, %v16807_v41  ;;  %vm2260_vm3 = vcmp.eq.s32.totalorder %v17168_v18, %v16843_v34  ;;  %v23073_v53 = vld [vmem:[#allocation17_spill] sm:$0xff] }
 0x1c7   :  { %12243 = vmatprep.subr.msk.bf16.mxu0 %vm12242_vm8, %v22692_v4  ;;  %vm2281_vm8 = vcmp.eq.s32.totalorder %v17145_v29, %v16843_v34  ;;  %vm12302_vm9 = vmpackc.low %vm2282_vm4, %vm2279_vm15  ;;  %vm2263_vm15 = vcmp.eq.s32.totalorder %v17171_v3, %v16843_v34  ;;  %vm2272_vm4 = vcmp.eq.s32.totalorder %v17174_v30, %v16843_v34  ;;  %v17401_v29 = vadd.s32 632, %v16510_v15 }
 0x1c8   :  { %vm12248_vm10 = vmpackc.low %vm2269_vm2, %vm2266_vm5  ;;  %v2169_v63 = vmul.u32 32, %v23073_v53  ;;  %v17421_v53 = vadd.s32 384, %v16510_v15 }
 0x1c9   :  { %12301 = vmatpush1.bf16.msk.msra.mxu1 %vm12300_vm0, %v22692_v4  ;;  %vm12304_vm11 = vmpackc.low %vm2281_vm8, %vm2278_vm7  ;;  %vm2276_vm0 = vcmp.eq.s32.totalorder %v17177_v24, %v16807_v41  ;;  %vm2255_vm8 = vcmp.eq.s32.totalorder %v17200_v16, %v16807_v41  ;;  %23072 = vst [vmem:[#allocation73_spill] sm:$0xff] %v17401_v29 }
 0x1ca   :  { %12245 = vmatpush1.bf16.msk.msra.mxu0 %vm12244_vm14, %v22692_v4  ;;  %12303 = vmatprep.subr.msk.bf16.mxu1 %vm12302_vm9, %v22692_v4  ;;  %vm2273_vm14 = vcmp.eq.s32.totalorder %v17174_v30, %v16807_v41  ;;  %vm12250_vm1 = vmpackc.low %vm2264_vm13, %vm2261_vm12  ;;  %vm2258_vm9 = vcmp.eq.s32.totalorder %v17203_v32, %v16807_v41  ;;  %vm2254_vm13 = vcmp.eq.s32.totalorder %v17200_v16, %v16843_v34  ;;  %v17398_v30 = vadd.s32 624, %v16510_v15 }
 0x1cb   :  { %12247 = vmatprep.subr.msk.bf16.mxu0 %vm12246_vm6, %v22692_v4  ;;  %vm2275_vm6 = vcmp.eq.s32.totalorder %v17177_v24, %v16843_v34  ;;  %vm12306_vm5 = vmpackc.low %vm2276_vm0, %vm2273_vm14  ;;  %vm2257_vm14 = vcmp.eq.s32.totalorder %v17203_v32, %v16843_v34  ;;  %vm2362_vm0 = vcmp.eq.s32.totalorder %v17206_v0, %v16843_v34  ;;  %v17395_v24 = vadd.s32 408, %v16510_v15  ;;  %23074 = vst [vmem:[#allocation17_spill] sm:$0xff] %v17421_v53 }
 0x1cc   :  { %vm12252_vm2 = vmpackc.low %vm2263_vm15, %vm2260_vm3  ;;  %23071 = vst [vmem:[#allocation72_spill] sm:$0xff] %v17398_v30 }
 0x1cd   :  { %12305 = vmatpush1.bf16.msk.msra.mxu1 %vm12304_vm11, %v22692_v4  ;;  %vm12308_vm7 = vmpackc.low %vm2275_vm6, %vm2272_vm4  ;;  %vm2366_vm11 = vcmp.eq.s32.totalorder %v17209_v60, %v16807_v41  ;;  %vm2249_vm6 = vcmp.eq.s32.totalorder %v17232_v44, %v16807_v41  ;;  %23070 = vst [vmem:[#allocation71_spill] sm:$0xff] %v17395_v24 }
 0x1ce   :  { %12249 = vmatpush2.bf16.msk.msra.mxu0 %vm12248_vm10, %v22692_v4  ;;  %12307 = vmatprep.subr.msk.bf16.mxu1 %vm12306_vm5, %v22692_v4  ;;  %vm2363_vm10 = vcmp.eq.s32.totalorder %v17206_v0, %v16807_v41  ;;  %vm12254_vm12 = vmpackc.low %vm2258_vm9, %vm2255_vm8  ;;  %vm2252_vm5 = vcmp.eq.s32.totalorder %v17235_v33, %v16807_v41  ;;  %vm2248_vm9 = vcmp.eq.s32.totalorder %v17232_v44, %v16843_v34 }
 0x1cf   :  { %12251 = vmatprep.subr.msk.bf16.mxu0 %vm12250_vm1, %v22692_v4  ;;  %vm2365_vm1 = vcmp.eq.s32.totalorder %v17209_v60, %v16843_v34  ;;  %vm12310_vm3 = vmpackc.low %vm2366_vm11, %vm2363_vm10  ;;  %vm2251_vm10 = vcmp.eq.s32.totalorder %v17235_v33, %v16843_v34  ;;  %vm2356_vm11 = vcmp.eq.s32.totalorder %v17238_v17, %v16843_v34 }
 0x1d0   :  { %vm12256_vm15 = vmpackc.low %vm2257_vm14, %vm2254_vm13 }
 0x1d1   :  { %12309 = vmatpush1.bf16.msk.msra.mxu1 %vm12308_vm7, %v22692_v4  ;;  %vm12312_vm4 = vmpackc.low %vm2365_vm1, %vm2362_vm0  ;;  %vm2360_vm7 = vcmp.eq.s32.totalorder %v17241_v43, %v16807_v41  ;;  %vm2243_vm1 = vcmp.eq.s32.totalorder %v17264_v56, %v16807_v41 }
 0x1d2   :  { %12253 = vmatpush2.bf16.msk.msra.mxu0 %vm12252_vm2, %v22692_v4  ;;  %12311 = vmatprep.subr.msk.bf16.mxu1 %vm12310_vm3, %v22692_v4  ;;  %vm2357_vm2 = vcmp.eq.s32.totalorder %v17238_v17, %v16807_v41  ;;  %vm12258_vm8 = vmpackc.low %vm2252_vm5, %vm2249_vm6  ;;  %vm2246_vm3 = vcmp.eq.s32.totalorder %v17267_v11, %v16807_v41  ;;  %vm2242_vm5 = vcmp.eq.s32.totalorder %v17264_v56, %v16843_v34  ;;  %v17474_v17 = vadd.s32 608, %v16510_v15 }
 0x1d3   :  { %12255 = vmatprep.subr.msk.bf16.mxu0 %vm12254_vm12, %v22692_v4  ;;  %vm2359_vm12 = vcmp.eq.s32.totalorder %v17241_v43, %v16843_v34  ;;  %vm12314_vm13 = vmpackc.low %vm2360_vm7, %vm2357_vm2  ;;  %vm2245_vm2 = vcmp.eq.s32.totalorder %v17267_v11, %v16843_v34  ;;  %vm2350_vm7 = vcmp.eq.s32.totalorder %v17270_v19, %v16843_v34 }
 0x1d4   :  { %vm12260_vm14 = vmpackc.low %vm2251_vm10, %vm2248_vm9  ;;  %23080 = vst [vmem:[#allocation76_spill] sm:$0xff] %v17474_v17 }
 0x1d5   :  { %12313 = vmatpush2.bf16.msk.msra.mxu1 %vm12312_vm4, %v22692_v4  ;;  %vm12316_vm0 = vmpackc.low %vm2359_vm12, %vm2356_vm11  ;;  %vm2354_vm4 = vcmp.eq.s32.totalorder %v17273_v37, %v16807_v41  ;;  %vm2237_vm12 = vcmp.eq.s32.totalorder %v17296_v36, %v16807_v41 }
 0x1d6   :  { %12257 = vmatpush2.bf16.msk.msra.mxu0 %vm12256_vm15, %v22692_v4  ;;  %12315 = vmatprep.subr.msk.bf16.mxu1 %vm12314_vm13, %v22692_v4  ;;  %vm2351_vm15 = vcmp.eq.s32.totalorder %v17270_v19, %v16807_v41  ;;  %vm12262_vm6 = vmpackc.low %vm2246_vm3, %vm2243_vm1  ;;  %vm2240_vm13 = vcmp.eq.s32.totalorder %v17299_v28, %v16807_v41  ;;  %vm2236_vm3 = vcmp.eq.s32.totalorder %v17296_v36, %v16843_v34 }
 0x1d7   :  { %12259 = vmatprep.subr.msk.bf16.mxu0 %vm12258_vm8, %v22692_v4  ;;  %vm2353_vm8 = vcmp.eq.s32.totalorder %v17273_v37, %v16843_v34  ;;  %vm12318_vm9 = vmpackc.low %vm2354_vm4, %vm2351_vm15  ;;  %vm2239_vm15 = vcmp.eq.s32.totalorder %v17299_v28, %v16843_v34  ;;  %vm2344_vm4 = vcmp.eq.s32.totalorder %v17302_v48, %v16843_v34 }
 0x1d8   :  { %vm12264_vm10 = vmpackc.low %vm2245_vm2, %vm2242_vm5 }
 0x1d9   :  { %12317 = vmatpush2.bf16.msk.msra.mxu1 %vm12316_vm0, %v22692_v4  ;;  %vm12320_vm11 = vmpackc.low %vm2353_vm8, %vm2350_vm7  ;;  %vm2348_vm0 = vcmp.eq.s32.totalorder %v17305_v57, %v16807_v41  ;;  %vm2231_vm8 = vcmp.eq.s32.totalorder %v17328_v22, %v16807_v41 }
 0x1da   :  { %12261 = vmatpush2.bf16.msk.msra.mxu0 %vm12260_vm14, %v22692_v4  ;;  %12319 = vmatprep.subr.msk.bf16.mxu1 %vm12318_vm9, %v22692_v4  ;;  %vm2345_vm14 = vcmp.eq.s32.totalorder %v17302_v48, %v16807_v41  ;;  %vm12266_vm1 = vmpackc.low %vm2240_vm13, %vm2237_vm12  ;;  %vm2234_vm9 = vcmp.eq.s32.totalorder %v17331_v9, %v16807_v41  ;;  %vm2230_vm13 = vcmp.eq.s32.totalorder %v17328_v22, %v16843_v34 }
 0x1db   :  { %12263 = vmatprep.subr.msk.bf16.mxu0 %vm12262_vm6, %v22692_v4  ;;  %vm2347_vm6 = vcmp.eq.s32.totalorder %v17305_v57, %v16843_v34  ;;  %vm12322_vm5 = vmpackc.low %vm2348_vm0, %vm2345_vm14  ;;  %vm2233_vm14 = vcmp.eq.s32.totalorder %v17331_v9, %v16843_v34  ;;  %vm2338_vm0 = vcmp.eq.s32.totalorder %v17334_v49, %v16843_v34 }
 0x1dc   :  { %vm12268_vm2 = vmpackc.low %vm2239_vm15, %vm2236_vm3 }
 0x1dd   :  { %12321 = vmatpush2.bf16.msk.msra.mxu1 %vm12320_vm11, %v22692_v4  ;;  %vm12324_vm7 = vmpackc.low %vm2347_vm6, %vm2344_vm4  ;;  %vm2342_vm11 = vcmp.eq.s32.totalorder %v17337_v21, %v16807_v41  ;;  %vm2225_vm6 = vcmp.eq.s32.totalorder %v17360_v27, %v16807_v41 }
 0x1de   :  { %12265 = vmatpush2.bf16.msk.msra.mxu0 %vm12264_vm10, %v22692_v4  ;;  %12323 = vmatprep.subr.msk.bf16.mxu1 %vm12322_vm5, %v22692_v4  ;;  %vm2339_vm10 = vcmp.eq.s32.totalorder %v17334_v49, %v16807_v41  ;;  %vm12270_vm12 = vmpackc.low %vm2234_vm9, %vm2231_vm8  ;;  %vm2228_vm5 = vcmp.eq.s32.totalorder %v17363_v26, %v16807_v41  ;;  %vm2224_vm9 = vcmp.eq.s32.totalorder %v17360_v27, %v16843_v34 }
 0x1df   :  { %12267 = vmatprep.subr.msk.bf16.mxu0 %vm12266_vm1, %v22692_v4  ;;  %vm2341_vm1 = vcmp.eq.s32.totalorder %v17337_v21, %v16843_v34  ;;  %vm12326_vm3 = vmpackc.low %vm2342_vm11, %vm2339_vm10  ;;  %vm2227_vm10 = vcmp.eq.s32.totalorder %v17363_v26, %v16843_v34  ;;  %vm2332_vm11 = vcmp.eq.s32.totalorder %v17366_v52, %v16843_v34 }
 0x1e0   :  { %vm12272_vm15 = vmpackc.low %vm2233_vm14, %vm2230_vm13 }
 0x1e1   :  { %12325 = vmatpush2.bf16.msk.msra.mxu1 %vm12324_vm7, %v22692_v4  ;;  %vm12328_vm4 = vmpackc.low %vm2341_vm1, %vm2338_vm0  ;;  %vm2336_vm7 = vcmp.eq.s32.totalorder %v17369_v20, %v16807_v41  ;;  %vm2327_vm1 = vcmp.eq.s32.totalorder %v17392_v38, %v16807_v41 }
 0x1e2   :  { %12269 = vmatpush2.bf16.msk.msra.mxu0 %vm12268_vm2, %v22692_v4  ;;  %12327 = vmatprep.subr.msk.bf16.mxu1 %vm12326_vm3, %v22692_v4  ;;  %vm2333_vm2 = vcmp.eq.s32.totalorder %v17366_v52, %v16807_v41  ;;  %vm12274_vm8 = vmpackc.low %vm2228_vm5, %vm2225_vm6  ;;  %vm2330_vm3 = vcmp.eq.s32.totalorder %v17395_v24, %v16807_v41  ;;  %vm2326_vm5 = vcmp.eq.s32.totalorder %v17392_v38, %v16843_v34 }
 0x1e3   :  { %12271 = vmatprep.subr.msk.bf16.mxu0 %vm12270_vm12, %v22692_v4  ;;  %vm2335_vm12 = vcmp.eq.s32.totalorder %v17369_v20, %v16843_v34  ;;  %vm12330_vm13 = vmpackc.low %vm2336_vm7, %vm2333_vm2  ;;  %vm2329_vm2 = vcmp.eq.s32.totalorder %v17395_v24, %v16843_v34  ;;  %v23076_v20 = vld [vmem:[#allocation13_spill] sm:$0xff] }
 0x1e4   :  { %vm12276_vm14 = vmpackc.low %vm2227_vm10, %vm2224_vm9  ;;  %v23077_v52 = vand.u32 31, %v23076_v20  ;;  %vm2321_vm9 = vcmp.eq.s32.totalorder %v17421_v53, %v16807_v41  ;;  %vm2324_vm10 = vcmp.eq.s32.totalorder %v17424_v54, %v16807_v41 }
 0x1e5   :  { %12329 = vmatpush2.bf16.msk.msra.mxu1 %vm12328_vm4, %v22692_v4  ;;  %vm12332_vm0 = vmpackc.low %vm2335_vm12, %vm2332_vm11  ;;  %vm2414_vm4 = vcmp.eq.s32.totalorder %v17401_v29, %v16807_v41  ;;  %vm2320_vm12 = vcmp.eq.s32.totalorder %v17421_v53, %v16843_v34 }
 0x1e6   :  { %12273 = vmatpush2.bf16.msk.msra.mxu0 %vm12272_vm15, %v22692_v4  ;;  %12331 = vmatprep.subr.msk.bf16.mxu1 %vm12330_vm13, %v22692_v4  ;;  %vm2411_vm15 = vcmp.eq.s32.totalorder %v17398_v30, %v16807_v41  ;;  %vm12334_vm6 = vmpackc.low %vm2330_vm3, %vm2327_vm1  ;;  %v17429_v31 = vadd.s32 %v23077_v52, %v2169_v63  ;;  %vm2323_vm13 = vcmp.eq.s32.totalorder %v17424_v54, %v16843_v34 }
 0x1e7   :  { %12275 = vmatprep.subr.msk.bf16.mxu0 %vm12274_vm8, %v22692_v4  ;;  %vm12342_vm7 = vmpackc.low %vm2414_vm4, %vm2411_vm15  ;;  %vm2410_vm15 = vcmp.eq.s32.totalorder %v17398_v30, %v16843_v34  ;;  %vm2413_vm4 = vcmp.eq.s32.totalorder %v17401_v29, %v16843_v34 }
 0x1e8   :  { %vm12336_vm8 = vmpackc.low %vm2329_vm2, %vm2326_vm5  ;;  %vm2271_vm1 = vcmp.eq.s32.totalorder %v17139_v39, %v17429_v31  ;;  %vm2408_vm5 = vcmp.eq.s32.totalorder %v17477_v5, %v16807_v41 }
 0x1e9   :  { %12333 = vmatpush2.bf16.msk.msra.mxu1 %vm12332_vm0, %v22692_v4  ;;  %vm12338_vm11 = vmpackc.low %vm2324_vm10, %vm2321_vm9  ;;  %vm2268_vm0 = vcmp.eq.s32.totalorder %v17136_v14, %v17429_v31  ;;  %vm2407_vm9 = vcmp.eq.s32.totalorder %v17477_v5, %v16843_v34 }
 0x1ea   :  { %12277 = vmatpush2.bf16.msk.msra.mxu0 %vm12276_vm14, %v22692_v4  ;;  %12335 = vmatprep.subr.msk.bf16.mxu1 %vm12334_vm6, %v22692_v4  ;;  %vm12340_vm14 = vmpackc.low %vm2323_vm13, %vm2320_vm12  ;;  %vm2405_vm6 = vcmp.eq.s32.totalorder %v17474_v17, %v16807_v41 }
 0x1eb   :  { %12343 = vmatprep.subr.msk.bf16.mxu0 %vm12342_vm7, %v22692_v4  ;;  %vm12422_vm3 = vmpackc.low %vm2271_vm1, %vm2268_vm0  ;;  %vm2223_vm0 = vcmp.eq.s32.totalorder %v16823_v50, %v17429_v31 }
 0x1ec   :  { %vm17500_vm2 = vmpackc.low %vm2413_vm4, %vm2410_vm15 }
 0x1ed   :  { %12337 = vmatpush2.bf16.msk.msra.mxu1 %vm12336_vm8, %v22692_v4  ;;  %vm17511_vm7 = vmpackc.low %vm2408_vm5, %vm2405_vm6  ;;  %vm2404_vm8 = vcmp.eq.s32.totalorder %v17474_v17, %v16843_v34  ;;  %vm2262_vm6 = vcmp.eq.s32.totalorder %v17168_v18, %v17429_v31  ;;  %vm2265_vm5 = vcmp.eq.s32.totalorder %v17171_v3, %v17429_v31 }
 0x1ee   :  { %12339 = vmatprep.subr.msk.bf16.mxu1 %vm12338_vm11, %v22692_v4  ;;  %vm17554_vm1 = vmpackc.low %vm2407_vm9, %vm2404_vm8  ;;  %vm2214_vm9 = vcmp.eq.s32.totalorder %v16850_v51, %v17429_v31 }
 0x1f1   :  { %12341 = vmatpush2.bf16.msk.msra.mxu1 %vm12340_vm14, %v22692_v4  ;;  %vm2220_vm14 = vcmp.eq.s32.totalorder %v16820_v40, %v17429_v31 }
 0x1f2   :  { %14226 = vmatprep.subr.msk.bf16.mxu1 %vm12422_vm3, %v22692_v4 }
 0x244   :  { %v1747_v20 = vpop.f32.mrf.mxu1 }
 0x246   :  { %v1749_v52 = vpop.f32.mrf.mxu1 }
 0x248   :  { %v1751_v63 = vpop.f32.mrf.mxu1 }
 0x24a   :  { %v1753_v53 = vpop.f32.mrf.mxu1 }
 0x24c   :  { %v17447_v24 = vpop.f32.mrf.mxu1 }
 0x24e   :  { %v1759_v54 = vpop.f32.mrf.mxu1 }
 0x250   :  { %v1761_v38 = vpop.f32.mrf.mxu1 }
 0x252   :  { %v1762_v6 = vpop.f32.mrf.mxu1 }
 0x254   :  { %v17449_v21 = vpop.f32.mrf.mxu1 }
 0x256   :  { %v17451_v14 = vpop.f32.mrf.mxu1 }
 0x258   :  { %v17453_v49 = vpop.f32.mrf.mxu1 }
 0x25a   :  { %v17455_v39 = vpop.f32.mrf.mxu1 }
 0x25c   :  { %v17457_v58 = vpop.f32.mrf.mxu1  ;;  %v17459_v4 = vpop.f32.mrf.mxu0 }
 0x25e   :  { %v17461_v10 = vpop.f32.mrf.mxu1  ;;  %v17463_v57 = vpop.f32.mrf.mxu0 }
 0x260   :  { %v1812_v48 = vpop.f32.mrf.mxu1  ;;  %v17465_v8 = vpop.f32.mrf.mxu0 }
 0x262   :  { %v1813_v38 = vpop.f32.mrf.mxu1  ;;  %v17467_v6 = vpop.f32.mrf.mxu0 }
 0x264   :  { %v17469_v12 = vpop.f32.mrf.mxu0  ;;  %v1917_v37 = vpop.f32.mrf.mxu1 }
 0x265   :  { %23078 = vst [vmem:[#allocation13_spill] sm:$0xff] %v17469_v12 }
 0x266   :  { %v17471_v19 = vpop.f32.mrf.mxu0  ;;  %v1919_v45 = vpop.f32.mrf.mxu1 }
 0x267   :  { %23079 = vst [vmem:[#allocation75_spill] sm:$0xff] %v17471_v19  ;;  %v2037_v38 = vmax.f32 %v1749_v52, %v1919_v45  ;;  %v2036_v19 = vmax.f32 %v1747_v20, %v1917_v37  ;;  %v17505_v20 = vadd.s32 576, %v16510_v15  ;;  %v17508_v52 = vadd.s32 584, %v16510_v15 }
 0x268   :  { %v1863_v35 = vpop.f32.mrf.mxu0  ;;  %v1921_v43 = vpop.f32.mrf.mxu1 }
 0x269   :  { %v2042_v48 = vmax.f32 %v1751_v63, %v1921_v43  ;;  %v17484_v35 = vadd.s32 592, %v16510_v15  ;;  %23087 = vst [vmem:[#allocation81_spill] sm:$0xff] %v17505_v20  ;;  %23088 = vst [vmem:[#allocation82_spill] sm:$0xff] %v17508_v52  ;;  %vm2393_vm3 = vcmp.eq.s32.totalorder %v17505_v20, %v16807_v41  ;;  %vm2396_vm15 = vcmp.eq.s32.totalorder %v17508_v52, %v16807_v41 }
 0x26a   :  { %v1864_v25 = vpop.f32.mrf.mxu0  ;;  %v1923_v60 = vpop.f32.mrf.mxu1  ;;  %vm2395_vm8 = vcmp.eq.s32.totalorder %v17508_v52, %v16843_v34 }
 0x26b   :  { %v2043_v12 = vmax.f32 %v1753_v53, %v1923_v60  ;;  %23082 = vst [vmem:[#allocation78_spill] sm:$0xff] %v17484_v35  ;;  %v17491_v25 = vadd.s32 600, %v16510_v15  ;;  %v17495_v60 = vpack.c.bf16 %v2042_v48, %v2036_v19  ;;  %vm2399_vm10 = vcmp.eq.s32.totalorder %v17484_v35, %v16807_v41 }
 0x26c   :  { %v1927_v0 = vpop.f32.mrf.mxu1  ;;  %v1968_v2 = vpop.f32.mrf.mxu0  ;;  %vm2398_vm12 = vcmp.eq.s32.totalorder %v17484_v35, %v16843_v34 }
 0x26d   :  { %23083 = vst [vmem:[#allocation79_spill] sm:$0xff] %v17491_v25  ;;  %v17493_v45 = vpack.c.bf16 %v2043_v12, %v2037_v38  ;;  %23084 = vst [vmem:[#allocation80_spill] sm:$0xff] %v17495_v60  ;;  %vm2402_vm11 = vcmp.eq.s32.totalorder %v17491_v25, %v16807_v41  ;;  %vm2401_vm13 = vcmp.eq.s32.totalorder %v17491_v25, %v16843_v34  ;;  %v23092_v38 = vmov 1.0|1.0  }
 0x26e   :  { %v1929_v43 = vpop.f32.mrf.mxu1  ;;  %v1970_v53 = vpop.f32.mrf.mxu0  ;;  %v2048_v29 = vmax.f32 %v17447_v24, %v1927_v0  ;;  %vm17571_vm4 = vmpackc.low %vm2402_vm11, %vm2399_vm10  ;;  %vm2217_vm11 = vcmp.eq.s32.totalorder %v16853_v47, %v17429_v31  ;;  %v17732_v0 = vadd.s32 536, %v16510_v15 }
 0x26f   :  { %v2049_v63 = vmax.f32 %v1759_v54, %v1929_v43  ;;  %2928 = vmatprep.mubr.bf16.mxu0 %v17493_v45  ;;  %v17538_v43 = vadd.s32 560, %v16510_v15  ;;  %vm17607_vm10 = vmpackc.low %vm2223_vm0, %vm2220_vm14 }
 0x270   :  { %v1931_v19 = vpop.f32.mrf.mxu1  ;;  %v1972_v48 = vpop.f32.mrf.mxu0  ;;  %2929 = vmatmul.mubr.bf16.vlgmr.msra.gmra.mxu0 %v17495_v60  ;;  %v17617_v12 = vpack.c.bf16 %v2048_v29, %v2048_v29  ;;  %vm17630_vm14 = vmpackc.low %vm2396_vm15, %vm2393_vm3  ;;  %v17635_v29 = vadd.s32 544, %v16510_v15  ;;  %vm2259_vm3 = vcmp.eq.s32.totalorder %v17203_v32, %v17429_v31  ;;  %vm2211_vm15 = vcmp.eq.s32.totalorder %v16881_v1, %v17429_v31 }
 0x271   :  { %v17530_v54 = vpack.c.bf16 %v2049_v63, %v2049_v63  ;;  %12345 = vmatpush1.bf16.msk.msra.mxu0 %vm17500_vm2, %v23092_v38  ;;  %v17541_v19 = vadd.s32 568, %v16510_v15  ;;  %v2044_v30 = vmax.f32 %v17453_v49, %v1972_v48  ;;  %v2039_v49 = vmax.f32 %v17451_v14, %v1970_v53  ;;  %vm17586_vm2 = vmpackc.low %vm2401_vm13, %vm2398_vm12 }
 0x272   :  { %v1932_v60 = vpop.f32.mrf.mxu1  ;;  %v1974_v63 = vpop.f32.mrf.mxu0  ;;  %12347 = vmatprep.subr.msk.bf16.mxu0 %vm17511_vm7, %v23092_v38  ;;  %v2038_v14 = vmax.f32 %v17449_v21, %v1968_v2  ;;  %vm2392_vm7 = vcmp.eq.s32.totalorder %v17505_v20, %v16843_v34  ;;  %vm2387_vm12 = vcmp.eq.s32.totalorder %v17538_v43, %v16807_v41  ;;  %23103 = vst [vmem:[#allocation86_spill] sm:$0xff] %v17617_v12  ;;  %vm17648_vm0 = vmpackc.low %vm2265_vm5, %vm2262_vm6  ;;  %v18078_v32 = vadd.s32 680, %v16510_v15 }
 0x273   :  { %23091 = vst [vmem:[#allocation83_spill] sm:$0xff] %v17530_v54  ;;  %23093 = vst [vmem:[#allocation84_spill] sm:$0xff] %v17541_v19  ;;  %v2045_v24 = vmax.f32 %v17455_v39, %v1974_v63  ;;  %2938 = vmatprep.mubr.bf16.mxu0 %v17530_v54  ;;  %vm2390_vm13 = vcmp.eq.s32.totalorder %v17541_v19, %v16807_v41  ;;  %vm2389_vm6 = vcmp.eq.s32.totalorder %v17541_v19, %v16843_v34 }
 0x274   :  { %v1978_v39 = vpop.f32.mrf.mxu0  ;;  %v2019_v60 = vpop.f32.mrf.mxu1  ;;  %v17619_v48 = vpack.c.bf16 %v2044_v30, %v2038_v14  ;;  %v17638_v30 = vadd.s32 552, %v16510_v15  ;;  %vm2208_vm5 = vcmp.eq.s32.totalorder %v16878_v55, %v17429_v31  ;;  %v23156_v14 = vld [vmem:[#allocation53_spill] sm:$0xff] }
 0x275   :  { %v17596_v2 = vpack.c.bf16 %v2045_v24, %v2039_v49  ;;  %12349 = vmatpush1.bf16.msk.msra.mxu0 %vm17554_vm1, %v23092_v38  ;;  %vm2256_vm1 = vcmp.eq.s32.totalorder %v17200_v16, %v17429_v31  ;;  %v2040_v3 = vmax.f32 %v17459_v4, %v2019_v60  ;;  %v17810_v4 = vadd.s32 512, %v16510_v15  ;;  %v23173_v16 = vld [vmem:[#allocation57_spill] sm:$0xff] }
 0x276   :  { %23104 = vst [vmem:[#allocation87_spill] sm:$0xff] %v17619_v48  ;;  %v1980_v63 = vpop.f32.mrf.mxu0  ;;  %v2021_v37 = vpop.f32.mrf.mxu1  ;;  %12351 = vmatprep.subr.msk.bf16.mxu0 %vm17571_vm4, %v23092_v38  ;;  %vm17666_vm4 = vmpackc.low %vm2395_vm8, %vm2392_vm7  ;;  %vm2381_vm8 = vcmp.eq.s32.totalorder %v17635_v29, %v16807_v41 }
 0x277   :  { %23100 = vst [vmem:[#allocation85_spill] sm:$0xff] %v17596_v2  ;;  %v2051_v24 = vmax.f32 %v17461_v10, %v1980_v63  ;;  %2979 = vmatprep.mubr.bf16.mxu1 %v17596_v2  ;;  %vm17692_vm7 = vmpackc.low %vm2217_vm11, %vm2214_vm9  ;;  %vm2384_vm9 = vcmp.eq.s32.totalorder %v17638_v30, %v16807_v41  ;;  %v2041_v21 = vmax.f32 %v17463_v57, %v2021_v37 }
 0x278   :  { %v2023_v10 = vpop.f32.mrf.mxu1  ;;  %2939 = vmatmul.mubr.bf16.gmra.mxu0 %v17617_v12  ;;  %2980 = vmatmul.mubr.bf16.vlgmr.msra.gmra.mxu1 %v17619_v48  ;;  %v1982_v63 = vpop.f32.mrf.mxu0  ;;  %vm23116_vm11 = vcmp.eq.s32.totalorder %v17538_v43, %v16843_v34 }
 0x279   :  { %v17677_v18 = vpack.c.bf16 %v2051_v24, %v2051_v24  ;;  %v2046_v48 = vmax.f32 %v17465_v8, %v2023_v10  ;;  %12353 = vmatpush1.bf16.msk.msra.mxu0 %vm17586_vm2, %v23092_v38  ;;  %14227 = vmatpush3.bf16.msk.msra.mxu1 %vm17607_vm10, %v23092_v38  ;;  %v2050_v8 = vmax.f32 %v17457_v58, %v1978_v39  ;;  %vm17709_vm2 = vmpackc.low %vm2390_vm13, %vm2387_vm12  ;;  %v17718_v58 = vadd.s32 528, %v16510_v15 }
 0x27a   :  { %v2025_v60 = vpop.f32.mrf.mxu1  ;;  %12355 = vmatprep.subr.msk.bf16.mxu0 %vm17630_vm14, %v23092_v38  ;;  %14228 = vmatprep.subr.msk.bf16.mxu1 %vm17648_vm0, %v23092_v38  ;;  %v1983_v39 = vpop.f32.mrf.mxu0  ;;  %vm12426_vm10 = vmpackc.low %vm2259_vm3, %vm2256_vm1  ;;  %vm2250_vm13 = vcmp.eq.s32.totalorder %v17232_v44, %v17429_v31  ;;  %vm2253_vm14 = vcmp.eq.s32.totalorder %v17235_v33, %v17429_v31  ;;  %vm2380_vm1 = vcmp.eq.s32.totalorder %v17635_v29, %v16843_v34  ;;  %v17964_v63 = vadd.s32 720, %v16510_v15  ;;  %v23177_v33 = vld [vmem:[#allocation5_spill] sm:$0xff] }
 0x27b   :  { %v17721_v49 = vpack.c.bf16 %v2046_v48, %v2040_v3  ;;  %v2047_v24 = vmax.f32 %v17467_v6, %v2025_v60  ;;  %2989 = vmatprep.mubr.bf16.mxu1 %v17677_v18  ;;  %vm17742_vm12 = vmpackc.low %vm2389_vm6, %vm23116_vm11  ;;  %vm2383_vm3 = vcmp.eq.s32.totalorder %v17638_v30, %v16843_v34  ;;  %v17772_v48 = vpack.c.bf16 %v2050_v8, %v2050_v8 }
 0x27c   :  { %v17734_v10 = vpop.f32.mrf.mxu1  ;;  %vm17764_vm0 = vmpackc.low %vm2211_vm15, %vm2208_vm5  ;;  %vm2205_vm6 = vcmp.eq.s32.totalorder %v16923_v59, %v17429_v31  ;;  %v17813_v8 = vadd.s32 520, %v16510_v15  ;;  %v17876_v3 = vadd.s32 752, %v16510_v15  ;;  %v17879_v6 = vadd.s32 760, %v16510_v15  ;;  %23147 = vst [vmem:[#allocation93_spill] sm:$0xff] %v17964_v63 }
 0x27d   :  { %23115 = vst [vmem:[#allocation88_spill] sm:$0xff] %v17721_v49  ;;  %v17750_v57 = vpack.c.bf16 %v2047_v24, %v2041_v21  ;;  %12357 = vmatpush1.bf16.msk.msra.mxu0 %vm17666_vm4, %v23092_v38  ;;  %14229 = vmatpush3.bf16.msk.msra.mxu1 %vm17692_vm7, %v23092_v38  ;;  %vm17786_vm15 = vmpackc.low %vm2384_vm9, %vm2381_vm8  ;;  %vm2202_vm4 = vcmp.eq.s32.totalorder %v16920_v61, %v17429_v31  ;;  %v17923_v39 = vadd.s32 744, %v16510_v15  ;;  %v17967_v60 = vadd.s32 728, %v16510_v15  ;;  %v23153_v21 = vld [vmem:[#allocation64_spill] sm:$0xff] }
 0x27e   :  { %v17774_v37 = vpop.f32.mrf.mxu1  ;;  %12359 = vmatprep.subr.msk.bf16.mxu0 %vm17709_vm2, %v23092_v38  ;;  %14230 = vmatprep.subr.msk.bf16.mxu1 %vm12426_vm10, %v23092_v38  ;;  %vm17801_vm5 = vmpackc.low %vm2253_vm14, %vm2250_vm13  ;;  %vm2375_vm7 = vcmp.eq.s32.totalorder %v17718_v58, %v16807_v41  ;;  %vm2378_vm2 = vcmp.eq.s32.totalorder %v17732_v0, %v16807_v41  ;;  %vm2244_vm9 = vcmp.eq.s32.totalorder %v17264_v56, %v17429_v31  ;;  %v23165_v56 = vld [vmem:[#allocation38_spill] sm:$0xff]  ;;  %v18075_v44 = vadd.s32 672, %v16510_v15 }
 0x27f   :  { %3030 = vmatprep.mubr.bf16.mxu0 %v17750_v57  ;;  %vm17822_vm8 = vmpackc.low %vm2383_vm3, %vm2380_vm1  ;;  %vm2247_vm10 = vcmp.eq.s32.totalorder %v17267_v11, %v17429_v31  ;;  %vm2374_vm13 = vcmp.eq.s32.totalorder %v17718_v58, %v16843_v34  ;;  %vm2377_vm14 = vcmp.eq.s32.totalorder %v17732_v0, %v16843_v34  ;;  %vm2199_vm1 = vcmp.eq.s32.totalorder %v16971_v23, %v17429_v31  ;;  %v23164_v11 = vld [vmem:[#allocation52_spill] sm:$0xff] }
 0x280   :  { %2990 = vmatmul.mubr.bf16.gmra.mxu1 %v17772_v48  ;;  %v2033_v53 = vpop.f32.mrf.mxu1  ;;  %vm17839_vm11 = vmpackc.low %vm2205_vm6, %vm2202_vm4  ;;  %vm2372_vm4 = vcmp.eq.s32.totalorder %v17813_v8, %v16807_v41  ;;  %23131 = vst [vmem:[#allocation89_spill] sm:$0xff] %v17876_v3 }
 0x281   :  { %12361 = vmatpush1.bf16.msk.msra.mxu0 %vm17742_vm12, %v23092_v38  ;;  %14231 = vmatpush3.bf16.msk.msra.mxu1 %vm17764_vm0, %v23092_v38  ;;  %vm17857_vm12 = vmpackc.low %vm2378_vm2, %vm2375_vm7  ;;  %vm2196_vm0 = vcmp.eq.s32.totalorder %v16968_v46, %v17429_v31  ;;  %23132 = vst [vmem:[#allocation90_spill] sm:$0xff] %v17879_v6  ;;  %vm2241_vm7 = vcmp.eq.s32.totalorder %v17299_v28, %v17429_v31  ;;  %v17920_v53 = vadd.s32 736, %v16510_v15  ;;  %v18015_v28 = vadd.s32 712, %v16510_v15 }
 0x282   :  { %3081 = vmatprep.mubr.bf16.mxu1 %v17493_v45  ;;  %12363 = vmatprep.subr.msk.bf16.mxu0 %vm17786_vm15, %v23092_v38  ;;  %v2034_v24 = vpop.f32.mrf.mxu1  ;;  %vm12430_vm3 = vmpackc.low %vm2247_vm10, %vm2244_vm9  ;;  %vm2369_vm15 = vcmp.eq.s32.totalorder %v17810_v4, %v16807_v41  ;;  %vm2368_vm9 = vcmp.eq.s32.totalorder %v17810_v4, %v16843_v34  ;;  %vm2371_vm10 = vcmp.eq.s32.totalorder %v17813_v8, %v16843_v34 }
 0x283   :  { %14232 = vmatprep.subr.msk.bf16.mxu1 %vm17801_vm5, %v23092_v38  ;;  %vm17881_vm6 = vmpackc.low %vm2377_vm14, %vm2374_vm13  ;;  %vm2238_vm5 = vcmp.eq.s32.totalorder %v17296_v36, %v17429_v31  ;;  %vm2193_vm13 = vcmp.eq.s32.totalorder %v17022_v62, %v17429_v31  ;;  %23139 = vst [vmem:[#allocation91_spill] sm:$0xff] %v17920_v53  ;;  %v23154_v24 = vmov 0  ;;  %v23188_v36 = vld [vmem:[#allocation27_spill] sm:$0xff] }
 0x284   :  { %vm17895_vm2 = vmpackc.low %vm2199_vm1, %vm2196_vm0  ;;  %vm2459_vm0 = vcmp.eq.s32.totalorder %v17876_v3, %v16807_v41  ;;  %vm2462_vm1 = vcmp.eq.s32.totalorder %v17879_v6, %v16807_v41  ;;  %23140 = vst [vmem:[#allocation92_spill] sm:$0xff] %v17923_v39 }
 0x285   :  { %12365 = vmatpush1.bf16.msk.msra.mxu0 %vm17822_vm8, %v23092_v38  ;;  %14233 = vmatpush3.bf16.msk.msra.mxu1 %vm17839_vm11, %v23092_v38  ;;  %vm17907_vm8 = vmpackc.low %vm2372_vm4, %vm2369_vm15  ;;  %vm2190_vm11 = vcmp.eq.s32.totalorder %v17019_v13, %v17429_v31  ;;  %vm2235_vm15 = vcmp.eq.s32.totalorder %v17331_v9, %v17429_v31  ;;  %23148 = vst [vmem:[#allocation94_spill] sm:$0xff] %v17967_v60  ;;  %v23159_v9 = vld [vmem:[#allocation41_spill] sm:$0xff] }
 0x286   :  { %12367 = vmatprep.subr.msk.bf16.mxu0 %vm17857_vm12, %v23092_v38  ;;  %14234 = vmatprep.subr.msk.bf16.mxu1 %vm12430_vm3, %v23092_v38  ;;  %vm12432_vm14 = vmpackc.low %vm2241_vm7, %vm2238_vm5  ;;  %vm2232_vm3 = vcmp.eq.s32.totalorder %v17328_v22, %v17429_v31  ;;  %vm2458_vm5 = vcmp.eq.s32.totalorder %v17876_v3, %v16843_v34  ;;  %vm2461_vm7 = vcmp.eq.s32.totalorder %v17879_v6, %v16843_v34  ;;  %v23151_v22 = vmov 0 }
 0x287   :  { %vm17925_vm12 = vmpackc.low %vm2371_vm10, %vm2368_vm9  ;;  %vm2187_vm9 = vcmp.eq.s32.totalorder %v17082_v7, %v17429_v31 }
 0x288   :  { %vm17939_vm4 = vmpackc.low %vm2193_vm13, %vm2190_vm11  ;;  %vm2453_vm11 = vcmp.eq.s32.totalorder %v17920_v53, %v16807_v41  ;;  %vm2456_vm13 = vcmp.eq.s32.totalorder %v17923_v39, %v16807_v41 }
 0x289   :  { %12369 = vmatpush1.bf16.msk.msra.mxu0 %vm17881_vm6, %v23092_v38  ;;  %14235 = vmatpush3.bf16.msk.msra.mxu1 %vm17895_vm2, %v23092_v38  ;;  %vm17951_vm6 = vmpackc.low %vm2462_vm1, %vm2459_vm0  ;;  %vm2184_vm2 = vcmp.eq.s32.totalorder %v16670_v42, %v17429_v31  ;;  %vm2229_vm0 = vcmp.eq.s32.totalorder %v17363_v26, %v17429_v31  ;;  %v23157_v26 = vld [vmem:[#allocation6_spill] sm:$0xff] }
 0x28a   :  { %12371 = vmatprep.subr.msk.bf16.mxu0 %vm17907_vm8, %v23092_v38  ;;  %14236 = vmatprep.subr.msk.bf16.mxu1 %vm12432_vm14, %v23092_v38  ;;  %vm12434_vm10 = vmpackc.low %vm2235_vm15, %vm2232_vm3  ;;  %vm2226_vm14 = vcmp.eq.s32.totalorder %v17360_v27, %v17429_v31  ;;  %vm2452_vm3 = vcmp.eq.s32.totalorder %v17920_v53, %v16843_v34  ;;  %vm2455_vm15 = vcmp.eq.s32.totalorder %v17923_v39, %v16843_v34  ;;  %v18012_v27 = vadd.s32 704, %v16510_v15 }
 0x28b   :  { %vm17969_vm8 = vmpackc.low %vm2461_vm7, %vm2458_vm5  ;;  %vm2181_vm5 = vcmp.eq.s32.totalorder %v23153_v21, %v17429_v31  ;;  %v23174_v21 = vld [vmem:[#allocation32_spill] sm:$0xff] }
 0x28c   :  { %vm17983_vm1 = vmpackc.low %vm2187_vm9, %vm2184_vm2  ;;  %vm2447_vm2 = vcmp.eq.s32.totalorder %v17964_v63, %v16807_v41  ;;  %vm2450_vm9 = vcmp.eq.s32.totalorder %v17967_v60, %v16807_v41 }
 0x28d   :  { %12373 = vmatpush1.bf16.msk.msra.mxu0 %vm17925_vm12, %v23092_v38  ;;  %14237 = vmatpush3.bf16.msk.msra.mxu1 %vm17939_vm4, %v23092_v38  ;;  %v23152_v22 = vsel %vm17983_vm1, 4294967295, %v23151_v22  ;;  %vm12378_vm12 = vmpackc.low %vm2456_vm13, %vm2453_vm11  ;;  %vm2178_vm4 = vcmp.eq.s32.totalorder %v16510_v15, %v17429_v31 }
 0x28e   :  { %12375 = vmatprep.subr.msk.bf16.mxu0 %vm17951_vm6, %v23092_v38  ;;  %14238 = vmatprep.subr.msk.bf16.mxu1 %vm12434_vm10, %v23092_v38  ;;  %vm12436_vm7 = vmpackc.low %vm2229_vm0, %vm2226_vm14  ;;  %vm2364_vm6 = vcmp.eq.s32.totalorder %v23156_v14, %v17429_v31  ;;  %vm2367_vm10 = vcmp.eq.s32.totalorder %v23157_v26, %v17429_v31  ;;  %vm23158_vm11 = vnez %v23152_v22  ;;  %vm2446_vm0 = vcmp.eq.s32.totalorder %v17964_v63, %v16843_v34  ;;  %v23160_v26 = vld [vmem:[#allocation29_spill] sm:$0xff] }
 0x28f   :  { %vm18003_vm1 = vmpackc.low %vm2455_vm15, %vm2452_vm3  ;;  %vm2449_vm3 = vcmp.eq.s32.totalorder %v17967_v60, %v16843_v34  ;;  %v18038_v22 = vadd.s32 688, %v16510_v15  ;;  %v18041_v14 = vadd.s32 696, %v16510_v15 }
 0x290   :  { %v23155_v24 = vsel %vm18003_vm1, 4294967295, %v23154_v24  ;;  %vm12420_vm13 = vmpackc.low %vm2181_vm5, %vm2178_vm4  ;;  %vm2319_vm1 = vcmp.eq.s32.totalorder %v23160_v26, %v17429_v31  ;;  %vm2441_vm4 = vcmp.eq.s32.totalorder %v18012_v27, %v16807_v41 }
 0x291   :  { %12377 = vmatpush2.bf16.msk.msra.mxu0 %vm17969_vm8, %v23092_v38  ;;  %14239 = vmatpush3.bf16.msk.msra.mxu1 %vm23158_vm11, %v23092_v38  ;;  %vm12382_vm14 = vmpackc.low %vm2450_vm9, %vm2447_vm2  ;;  %vm2316_vm8 = vcmp.eq.s32.totalorder %v23159_v9, %v17429_v31  ;;  %vm23161_vm5 = vnez %v23155_v24  ;;  %vm2358_vm2 = vcmp.eq.s32.totalorder %v23164_v11, %v17429_v31  ;;  %vm2361_vm9 = vcmp.eq.s32.totalorder %v23165_v56, %v17429_v31  ;;  %v23168_v24 = vld [vmem:[#allocation30_spill] sm:$0xff]  ;;  %v23170_v11 = vld [vmem:[#allocation80_spill] sm:$0xff] }
 0x292   :  { %12379 = vmatprep.subr.msk.bf16.mxu0 %vm12378_vm12, %v23092_v38  ;;  %14240 = vmatprep.subr.msk.bf16.mxu1 %vm12436_vm7, %v23092_v38  ;;  %vm12454_vm15 = vmpackc.low %vm2367_vm10, %vm2364_vm6  ;;  %vm2444_vm12 = vcmp.eq.s32.totalorder %v18015_v28, %v16807_v41  ;;  %vm2440_vm10 = vcmp.eq.s32.totalorder %v18012_v27, %v16843_v34  ;;  %vm2443_vm11 = vcmp.eq.s32.totalorder %v18015_v28, %v16843_v34  ;;  %v23169_v56 = vld [vmem:[#allocation54_spill] sm:$0xff] }
 0x293   :  { %vm18047_vm7 = vmpackc.low %vm2449_vm3, %vm2446_vm0  ;;  %vm2310_vm0 = vcmp.eq.s32.totalorder %v23168_v24, %v17429_v31  ;;  %vm2313_vm3 = vcmp.eq.s32.totalorder %v23169_v56, %v17429_v31  ;;  %v23184_v56 = vld [vmem:[#allocation46_spill] sm:$0xff]  ;;  %v23193_v24 = vld [vmem:[#allocation47_spill] sm:$0xff] }
 0x294   :  { %vm18057_vm6 = vmpackc.low %vm2319_vm1, %vm2316_vm8  ;;  %vm2435_vm1 = vcmp.eq.s32.totalorder %v18038_v22, %v16807_v41 }
 0x295   :  { %12381 = vmatpush2.bf16.msk.msra.mxu0 %vm23161_vm5, %v23092_v38  ;;  %14241 = vmatpush3.bf16.msk.msra.mxu1 %vm12420_vm13, %v23092_v38  ;;  %vm12386_vm13 = vmpackc.low %vm2444_vm12, %vm2441_vm4  ;;  %vm2352_vm4 = vcmp.eq.s32.totalorder %v23173_v16, %v17429_v31  ;;  %vm2355_vm12 = vcmp.eq.s32.totalorder %v23174_v21, %v17429_v31  ;;  %v18120_v21 = vadd.s32 656, %v16510_v15  ;;  %v18123_v16 = vadd.s32 664, %v16510_v15 }
 0x296   :  { %12383 = vmatprep.subr.msk.bf16.mxu0 %vm12382_vm14, %v23092_v38  ;;  %14254 = vmatprep.subr.msk.bf16.mxu1 %vm12454_vm15, %v23092_v38  ;;  %vm12456_vm14 = vmpackc.low %vm2361_vm9, %vm2358_vm2  ;;  %vm2438_vm15 = vcmp.eq.s32.totalorder %v18041_v14, %v16807_v41  ;;  %vm2437_vm2 = vcmp.eq.s32.totalorder %v18041_v14, %v16843_v34 }
 0x297   :  { %vm18084_vm8 = vmpackc.low %vm2443_vm11, %vm2440_vm10  ;;  %23179 = vst [vmem:[#allocation95_spill] sm:$0xff] %v18120_v21 }
 0x298   :  { %3082 = vmatmul.mubr.bf16.vlgmr.msra.gmra.mxu1 %v23170_v11  ;;  %vm18099_vm5 = vmpackc.low %vm2313_vm3, %vm2310_vm0  ;;  %vm2432_vm0 = vcmp.eq.s32.totalorder %v18078_v32, %v16807_v41  ;;  %23180 = vst [vmem:[#allocation96_spill] sm:$0xff] %v18123_v16  ;;  %v23187_v11 = vld [vmem:[#allocation51_spill] sm:$0xff] }
 0x299   :  { %12385 = vmatpush2.bf16.msk.msra.mxu0 %vm18047_vm7, %v23092_v38  ;;  %3089 = vmatprep.mubr.bf16.mxu1 %v17530_v54  ;;  %vm2434_vm7 = vcmp.eq.s32.totalorder %v18038_v22, %v16843_v34  ;;  %vm12390_vm9 = vmpackc.low %vm2438_vm15, %vm2435_vm1  ;;  %v23178_v54 = vld [vmem:[#allocation9_spill] sm:$0xff]  ;;  %vm2349_vm1 = vcmp.eq.s32.totalorder %v23184_v56, %v17429_v31  ;;  %v18159_v56 = vadd.s32 640, %v16510_v15 }
 0x29a   :  { %14255 = vmatpush3.bf16.msk.msra.mxu1 %vm18057_vm6, %v23092_v38  ;;  %12387 = vmatprep.subr.msk.bf16.mxu0 %vm12386_vm13, %v23092_v38  ;;  %vm2304_vm6 = vcmp.eq.s32.totalorder %v23177_v33, %v17429_v31  ;;  %vm2307_vm10 = vcmp.eq.s32.totalorder %v23178_v54, %v17429_v31  ;;  %vm12458_vm11 = vmpackc.low %vm2355_vm12, %vm2352_vm4  ;;  %vm2429_vm13 = vcmp.eq.s32.totalorder %v18075_v44, %v16807_v41  ;;  %v23183_v54 = vld [vmem:[#allocation59_spill] sm:$0xff]  ;;  %v23194_v33 = vld [vmem:[#allocation28_spill] sm:$0xff] }
 0x29b   :  { %14256 = vmatprep.subr.msk.bf16.mxu1 %vm12456_vm14, %v23092_v38  ;;  %vm18128_vm3 = vmpackc.low %vm2437_vm2, %vm2434_vm7  ;;  %vm2346_vm14 = vcmp.eq.s32.totalorder %v23183_v54, %v17429_v31  ;;  %vm2431_vm4 = vcmp.eq.s32.totalorder %v18078_v32, %v16843_v34  ;;  %vm2298_vm7 = vcmp.eq.s32.totalorder %v23187_v11, %v17429_v31  ;;  %23189 = vst [vmem:[#allocation97_spill] sm:$0xff] %v18159_v56  ;;  %v18162_v54 = vadd.s32 648, %v16510_v15 }
 0x29c   :  { %vm18140_vm15 = vmpackc.low %vm2307_vm10, %vm2304_vm6  ;;  %vm2426_vm6 = vcmp.eq.s32.totalorder %v18123_v16, %v16807_v41 }
 0x29d   :  { %12389 = vmatpush2.bf16.msk.msra.mxu0 %vm18084_vm8, %v23092_v38  ;;  %vm2428_vm8 = vcmp.eq.s32.totalorder %v18075_v44, %v16843_v34  ;;  %vm12394_vm12 = vmpackc.low %vm2432_vm0, %vm2429_vm13  ;;  %23190 = vst [vmem:[#allocation98_spill] sm:$0xff] %v18162_v54 }
 0x29e   :  { %14257 = vmatpush3.bf16.msk.msra.mxu1 %vm18099_vm5, %v23092_v38  ;;  %12391 = vmatprep.subr.msk.bf16.mxu0 %vm12390_vm9, %v23092_v38  ;;  %vm2301_vm5 = vcmp.eq.s32.totalorder %v23188_v36, %v17429_v31  ;;  %vm12460_vm2 = vmpackc.low %vm2349_vm1, %vm2346_vm14  ;;  %vm2423_vm9 = vcmp.eq.s32.totalorder %v18120_v21, %v16807_v41  ;;  %v23192_v36 = vld [vmem:[#allocation14_spill] sm:$0xff]  ;;  %vm2425_vm14 = vcmp.eq.s32.totalorder %v18123_v16, %v16843_v34 }
 0x29f   :  { %14258 = vmatprep.subr.msk.bf16.mxu1 %vm12458_vm11, %v23092_v38  ;;  %vm12396_vm10 = vmpackc.low %vm2431_vm4, %vm2428_vm8  ;;  %vm2343_vm13 = vcmp.eq.s32.totalorder %v23192_v36, %v17429_v31  ;;  %vm2295_vm8 = vcmp.eq.s32.totalorder %v23194_v33, %v17429_v31  ;;  %v23195_v36 = vld [vmem:[#allocation68_spill] sm:$0xff] }
 0x2a0   :  { %3090 = vmatmul.mubr.bf16.gmra.mxu1 %v17617_v12  ;;  %v23191_v12 = vld [vmem:[#allocation16_spill] sm:$0xff]  ;;  %vm12444_vm0 = vmpackc.low %vm2301_vm5, %vm2298_vm7  ;;  %vm2420_vm7 = vcmp.eq.s32.totalorder %v18162_v54, %v16807_v41 }
 0x2a1   :  { %12393 = vmatpush2.bf16.msk.msra.mxu0 %vm18128_vm3, %v23092_v38  ;;  %3129 = vmatprep.mubr.bf16.mxu1 %v17596_v2  ;;  %vm2340_vm11 = vcmp.eq.s32.totalorder %v23191_v12, %v17429_v31  ;;  %vm2422_vm3 = vcmp.eq.s32.totalorder %v18120_v21, %v16843_v34  ;;  %vm12398_vm1 = vmpackc.low %vm2426_vm6, %vm2423_vm9  ;;  %v23196_v12 = vld [vmem:[#allocation69_spill] sm:$0xff] }
 0x2a2   :  { %14259 = vmatpush3.bf16.msk.msra.mxu1 %vm18140_vm15, %v23092_v38  ;;  %12395 = vmatprep.subr.msk.bf16.mxu0 %vm12394_vm12, %v23092_v38  ;;  %vm2292_vm15 = vcmp.eq.s32.totalorder %v23193_v24, %v17429_v31  ;;  %vm12462_vm4 = vmpackc.low %vm2343_vm13, %vm2340_vm11  ;;  %vm2417_vm12 = vcmp.eq.s32.totalorder %v18159_v56, %v16807_v41  ;;  %vm2337_vm9 = vcmp.eq.s32.totalorder %v23196_v12, %v17429_v31  ;;  %v23197_v41 = vld [vmem:[#allocation48_spill] sm:$0xff]  ;;  %v23201_v12 = vld [vmem:[#allocation70_spill] sm:$0xff] }
 0x2a3   :  { %14260 = vmatprep.subr.msk.bf16.mxu1 %vm12460_vm2, %v23092_v38  ;;  %vm12400_vm5 = vmpackc.low %vm2425_vm14, %vm2422_vm3  ;;  %vm2334_vm2 = vcmp.eq.s32.totalorder %v23195_v36, %v17429_v31  ;;  %vm2416_vm11 = vcmp.eq.s32.totalorder %v18159_v56, %v16843_v34  ;;  %vm2419_vm13 = vcmp.eq.s32.totalorder %v18162_v54, %v16843_v34  ;;  %vm2286_vm3 = vcmp.eq.s32.totalorder %v23197_v41, %v17429_v31  ;;  %v23198_v36 = vld [vmem:[#allocation45_spill] sm:$0xff]  ;;  %v23202_v41 = vld [vmem:[#allocation71_spill] sm:$0xff] }
 0x2a4   :  { %vm12446_vm6 = vmpackc.low %vm2295_vm8, %vm2292_vm15  ;;  %vm2289_vm14 = vcmp.eq.s32.totalorder %v23198_v36, %v17429_v31  ;;  %vm2463_vm15 = vcmp.eq.s32.totalorder %v17879_v6, %v17429_v31  ;;  %v23204_v6 = vld [vmem:[#allocation42_spill] sm:$0xff]  ;;  %v23205_v36 = vld [vmem:[#allocation75_spill] sm:$0xff] }
 0x2a5   :  { %12397 = vmatpush2.bf16.msk.msra.mxu0 %vm12396_vm10, %v23092_v38  ;;  %vm12402_vm10 = vmpackc.low %vm2420_vm7, %vm2417_vm12  ;;  %vm2331_vm12 = vcmp.eq.s32.totalorder %v23202_v41, %v17429_v31  ;;  %v2053_v2 = vmax.f32 %v23205_v36, %v17774_v37  ;;  %v23207_v41 = vld [vmem:[#allocation73_spill] sm:$0xff]  ;;  %v23213_v34 = vld [vmem:[#allocation23_spill] sm:$0xff] }
 0x2a6   :  { %14261 = vmatpush3.bf16.msk.msra.mxu1 %vm12444_vm0, %v23092_v38  ;;  %12399 = vmatprep.subr.msk.bf16.mxu0 %vm12398_vm1, %v23092_v38  ;;  %vm12464_vm0 = vmpackc.low %vm2337_vm9, %vm2334_vm2  ;;  %vm2460_vm1 = vcmp.eq.s32.totalorder %v17876_v3, %v17429_v31  ;;  %v23203_v3 = vld [vmem:[#allocation26_spill] sm:$0xff]  ;;  %v23210_v36 = vld [vmem:[#allocation17_spill] sm:$0xff] }
 0x2a7   :  { %14262 = vmatprep.subr.msk.bf16.mxu1 %vm12462_vm4, %v23092_v38  ;;  %vm18216_vm8 = vmpackc.low %vm2419_vm13, %vm2416_vm11  ;;  %vm2328_vm4 = vcmp.eq.s32.totalorder %v23201_v12, %v17429_v31  ;;  %vm2280_vm2 = vcmp.eq.s32.totalorder %v23203_v3, %v17429_v31  ;;  %v23206_v12 = vld [vmem:[#allocation72_spill] sm:$0xff]  ;;  %v23228_v37 = vld [vmem:[#allocation5_spill] sm:$0xff] }
 0x2a8   :  { %vm12448_vm7 = vmpackc.low %vm2289_vm14, %vm2286_vm3  ;;  %vm2412_vm11 = vcmp.eq.s32.totalorder %v23206_v12, %v17429_v31  ;;  %vm2457_vm3 = vcmp.eq.s32.totalorder %v17923_v39, %v17429_v31  ;;  %v23212_v39 = vld [vmem:[#allocation8_spill] sm:$0xff] }
 0x2a9   :  { %12401 = vmatpush2.bf16.msk.msra.mxu0 %vm12400_vm5, %v23092_v38  ;;  %vm2283_vm5 = vcmp.eq.s32.totalorder %v23204_v6, %v17429_v31  ;;  %vm12486_vm9 = vmpackc.low %vm2463_vm15, %vm2460_vm1 }
 0x2aa   :  { %14263 = vmatpush3.bf16.msk.msra.mxu1 %vm12446_vm6, %v23092_v38  ;;  %12403 = vmatprep.subr.msk.bf16.mxu0 %vm12402_vm10, %v23092_v38  ;;  %vm2415_vm6 = vcmp.eq.s32.totalorder %v23207_v41, %v17429_v31  ;;  %vm12466_vm13 = vmpackc.low %vm2331_vm12, %vm2328_vm4  ;;  %vm2454_vm10 = vcmp.eq.s32.totalorder %v17920_v53, %v17429_v31  ;;  %v23211_v41 = vld [vmem:[#allocation74_spill] sm:$0xff]  ;;  %vm2274_vm4 = vcmp.eq.s32.totalorder %v23212_v39, %v17429_v31 }
 0x2ab   :  { %14264 = vmatprep.subr.msk.bf16.mxu1 %vm12464_vm0, %v23092_v38  ;;  %vm18244_vm14 = vmpackc.low %vm2283_vm5, %vm2280_vm2  ;;  %vm2322_vm0 = vcmp.eq.s32.totalorder %v23210_v36, %v17429_v31  ;;  %vm2325_vm1 = vcmp.eq.s32.totalorder %v23211_v41, %v17429_v31  ;;  %v18258_v53 = vpack.c.bf16 %v2053_v2, %v2053_v2  ;;  %vm2406_vm2 = vcmp.eq.s32.totalorder %v17474_v17, %v17429_v31  ;;  %v23217_v41 = vld [vmem:[#allocation21_spill] sm:$0xff] }
 0x2ac   :  { %vm12470_vm15 = vmpackc.low %vm2415_vm6, %vm2412_vm11  ;;  %vm2451_vm11 = vcmp.eq.s32.totalorder %v17967_v60, %v17429_v31  ;;  %v23215_v2 = vmov 0  ;;  %v23218_v36 = vld [vmem:[#allocation13_spill] sm:$0xff]  ;;  %v23219_v60 = vld [vmem:[#allocation19_spill] sm:$0xff] }
 0x2ad   :  { %12405 = vmatpush2.bf16.msk.msra.mxu0 %vm18216_vm8, %v23092_v38  ;;  %vm2277_vm8 = vcmp.eq.s32.totalorder %v23213_v34, %v17429_v31  ;;  %23214 = vst [vmem:[#allocation75_spill] sm:$0xff] %v18258_v53  ;;  %vm12488_vm12 = vmpackc.low %vm2457_vm3, %vm2454_vm10  ;;  %vm3248_vm10 = vcmp.eq.s32.totalorder %v16823_v50, %v23217_v41 }
 0x2ae   :  { %14265 = vmatpush3.bf16.msk.msra.mxu1 %vm12448_vm7, %v23092_v38  ;;  %14282 = vmatprep.subr.msk.bf16.mxu0 %vm12486_vm9, %v23092_v38  ;;  %vm2409_vm7 = vcmp.eq.s32.totalorder %v17477_v5, %v17429_v31  ;;  %vm12468_vm5 = vmpackc.low %vm2325_vm1, %vm2322_vm0  ;;  %vm2448_vm9 = vcmp.eq.s32.totalorder %v17964_v63, %v17429_v31  ;;  %v2052_v63 = vmax.f32 %v23218_v36, %v17734_v10  ;;  %v23226_v36 = vld [vmem:[#allocation54_spill] sm:$0xff] }
 0x2af   :  { %14266 = vmatprep.subr.msk.bf16.mxu1 %vm12466_vm13, %v23092_v38  ;;  %vm18272_vm6 = vmpackc.low %vm2277_vm8, %vm2274_vm4  ;;  %vm3245_vm13 = vcmp.eq.s32.totalorder %v16820_v40, %v23217_v41  ;;  %vm2400_vm1 = vcmp.eq.s32.totalorder %v17484_v35, %v17429_v31  ;;  %vm3244_vm8 = vcmp.eq.s32.totalorder %v16820_v40, %v23219_v60 }
 0x2b0   :  { %3031 = vmatmul.mubr.bf16.vlgmr.msra.gmra.mxu0 %v17721_v49  ;;  %v23216_v2 = vsel %vm18272_vm6, 4294967295, %v23215_v2  ;;  %vm12472_vm3 = vmpackc.low %vm2409_vm7, %vm2406_vm2  ;;  %vm3247_vm6 = vcmp.eq.s32.totalorder %v16823_v50, %v23219_v60  ;;  %v18300_v10 = vpack.c.bf16 %v2052_v63, %v2052_v63  ;;  %v23224_v63 = vld [vmem:[#allocation87_spill] sm:$0xff] }
 0x2b1   :  { %3040 = vmatprep.mubr.bf16.mxu0 %v18258_v53  ;;  %14283 = vmatpush3.bf16.msk.msra.mxu0 %vm12470_vm15, %v23092_v38  ;;  %vm12490_vm0 = vmpackc.low %vm2451_vm11, %vm2448_vm9  ;;  %vm2403_vm15 = vcmp.eq.s32.totalorder %v17491_v25, %v17429_v31  ;;  %vm23221_vm2 = vnez %v23216_v2  ;;  %vm3242_vm9 = vcmp.eq.s32.totalorder %v16853_v47, %v23217_v41  ;;  %v23227_v2 = vld [vmem:[#allocation64_spill] sm:$0xff] }
 0x2b2   :  { %14267 = vmatpush3.bf16.msk.msra.mxu1 %vm18244_vm14, %v23092_v38  ;;  %14284 = vmatprep.subr.msk.bf16.mxu0 %vm12488_vm12, %v23092_v38  ;;  %vm12502_vm4 = vmpackc.low %vm3248_vm10, %vm3245_vm13  ;;  %vm2442_vm14 = vcmp.eq.s32.totalorder %v18012_v27, %v17429_v31  ;;  %vm2445_vm12 = vcmp.eq.s32.totalorder %v18015_v28, %v17429_v31  ;;  %23220 = vst [vmem:[#allocation21_spill] sm:$0xff] %v18300_v10 }
 0x2b3   :  { %14268 = vmatprep.subr.msk.bf16.mxu1 %vm12468_vm5, %v23092_v38  ;;  %vm12474_vm7 = vmpackc.low %vm2403_vm15, %vm2400_vm1  ;;  %vm3239_vm5 = vcmp.eq.s32.totalorder %v16850_v51, %v23217_v41  ;;  %vm2394_vm13 = vcmp.eq.s32.totalorder %v17505_v20, %v17429_v31  ;;  %vm2397_vm10 = vcmp.eq.s32.totalorder %v17508_v52, %v17429_v31  ;;  %vm2439_vm1 = vcmp.eq.s32.totalorder %v18041_v14, %v17429_v31 }
 0x2b4   :  { %vm18311_vm11 = vmpackc.low %vm3247_vm6, %vm3244_vm8  ;;  %vm3238_vm15 = vcmp.eq.s32.totalorder %v16850_v51, %v23219_v60 }
 0x2b5   :  { %14285 = vmatpush3.bf16.msk.msra.mxu0 %vm12472_vm3, %v23092_v38  ;;  %vm12492_vm3 = vmpackc.low %vm2445_vm12, %vm2442_vm14  ;;  %vm3233_vm14 = vcmp.eq.s32.totalorder %v16878_v55, %v23217_v41  ;;  %vm3236_vm12 = vcmp.eq.s32.totalorder %v16881_v1, %v23217_v41 }
 0x2b6   :  { %14269 = vmatpush3.bf16.msk.msra.mxu1 %vm23221_vm2, %v23092_v38  ;;  %14286 = vmatprep.subr.msk.bf16.mxu0 %vm12490_vm0, %v23092_v38  ;;  %vm2436_vm0 = vcmp.eq.s32.totalorder %v18038_v22, %v17429_v31  ;;  %vm12506_vm6 = vmpackc.low %vm3242_vm9, %vm3239_vm5  ;;  %vm2391_vm5 = vcmp.eq.s32.totalorder %v17541_v19, %v17429_v31 }
 0x2b7   :  { %12503 = vmatprep.subr.msk.bf16.mxu1 %vm12502_vm4, %v23092_v38  ;;  %vm3241_vm4 = vcmp.eq.s32.totalorder %v16853_v47, %v23219_v60  ;;  %vm12476_vm8 = vmpackc.low %vm2397_vm10, %vm2394_vm13  ;;  %vm2430_vm13 = vcmp.eq.s32.totalorder %v18075_v44, %v17429_v31  ;;  %vm2433_vm10 = vcmp.eq.s32.totalorder %v18078_v32, %v17429_v31 }
 0x2b8   :  { %3041 = vmatmul.mubr.bf16.gmra.mxu0 %v18300_v10  ;;  %vm12494_vm2 = vmpackc.low %vm2439_vm1, %vm2436_vm0  ;;  %vm3235_vm0 = vcmp.eq.s32.totalorder %v16881_v1, %v23219_v60 }
 0x2b9   :  { %3130 = vmatmul.mubr.bf16.vlgmr.msra.gmra.mxu1 %v23224_v63  ;;  %14287 = vmatpush3.bf16.msk.msra.mxu0 %vm12474_vm7, %v23092_v38  ;;  %vm2388_vm7 = vcmp.eq.s32.totalorder %v17538_v43, %v17429_v31  ;;  %vm12508_vm9 = vmpackc.low %vm3241_vm4, %vm3238_vm15  ;;  %vm3230_vm15 = vcmp.eq.s32.totalorder %v16923_v59, %v23217_v41 }
 0x2ba   :  { %3137 = vmatprep.mubr.bf16.mxu1 %v17677_v18  ;;  %3177 = vmatprep.mubr.bf16.mxu0 %v17750_v57  ;;  %vm12478_vm1 = vmpackc.low %vm2391_vm5, %vm2388_vm7  ;;  %vm2427_vm7 = vcmp.eq.s32.totalorder %v18123_v16, %v17429_v31  ;;  %v23251_v16 = vld [vmem:[#allocation38_spill] sm:$0xff] }
 0x2bb   :  { %12505 = vmatpush1.bf16.msk.msra.mxu1 %vm18311_vm11, %v23092_v38  ;;  %14288 = vmatprep.subr.msk.bf16.mxu0 %vm12492_vm3, %v23092_v38  ;;  %vm12510_vm11 = vmpackc.low %vm3236_vm12, %vm3233_vm14  ;;  %vm3232_vm3 = vcmp.eq.s32.totalorder %v16878_v55, %v23219_v60  ;;  %vm2385_vm14 = vcmp.eq.s32.totalorder %v17638_v30, %v17429_v31 }
 0x2bc   :  { %12507 = vmatprep.subr.msk.bf16.mxu1 %vm12506_vm6, %v23092_v38  ;;  %vm3227_vm6 = vcmp.eq.s32.totalorder %v16920_v61, %v23217_v41  ;;  %vm12496_vm4 = vmpackc.low %vm2433_vm10, %vm2430_vm13  ;;  %vm3229_vm13 = vcmp.eq.s32.totalorder %v16923_v59, %v23219_v60 }
 0x2bd   :  { %14289 = vmatpush3.bf16.msk.msra.mxu0 %vm12476_vm8, %v23092_v38  ;;  %vm2382_vm8 = vcmp.eq.s32.totalorder %v17635_v29, %v17429_v31  ;;  %vm12512_vm12 = vmpackc.low %vm3235_vm0, %vm3232_vm3  ;;  %vm3224_vm3 = vcmp.eq.s32.totalorder %v16971_v23, %v23217_v41 }
 0x2be   :  { %14290 = vmatprep.subr.msk.bf16.mxu0 %vm12494_vm2, %v23092_v38  ;;  %vm2424_vm2 = vcmp.eq.s32.totalorder %v18120_v21, %v17429_v31  ;;  %vm12514_vm5 = vmpackc.low %vm3230_vm15, %vm3227_vm6  ;;  %vm2379_vm6 = vcmp.eq.s32.totalorder %v17732_v0, %v17429_v31  ;;  %v23252_v21 = vld [vmem:[#allocation66_spill] sm:$0xff] }
 0x2bf   :  { %12509 = vmatpush1.bf16.msk.msra.mxu1 %vm12508_vm9, %v23092_v38  ;;  %vm3226_vm9 = vcmp.eq.s32.totalorder %v16920_v61, %v23219_v60  ;;  %vm12480_vm10 = vmpackc.low %vm2385_vm14, %vm2382_vm8  ;;  %vm2421_vm8 = vcmp.eq.s32.totalorder %v18162_v54, %v17429_v31  ;;  %v23229_v54 = vld [vmem:[#allocation9_spill] sm:$0xff] }
 0x2c0   :  { %12511 = vmatprep.subr.msk.bf16.mxu1 %vm12510_vm11, %v23092_v38  ;;  %vm3221_vm11 = vcmp.eq.s32.totalorder %v16968_v46, %v23217_v41  ;;  %vm12498_vm0 = vmpackc.low %vm2427_vm7, %vm2424_vm2  ;;  %vm3223_vm2 = vcmp.eq.s32.totalorder %v16971_v23, %v23219_v60 }
 0x2c1   :  { %3138 = vmatmul.mubr.bf16.gmra.mxu1 %v17772_v48  ;;  %14291 = vmatpush3.bf16.msk.msra.mxu0 %vm12478_vm1, %v23092_v38  ;;  %vm2376_vm1 = vcmp.eq.s32.totalorder %v17718_v58, %v17429_v31  ;;  %vm12516_vm15 = vmpackc.low %vm3229_vm13, %vm3226_vm9  ;;  %vm3218_vm9 = vcmp.eq.s32.totalorder %v17022_v62, %v23217_v41 }
 0x2c2   :  { %3954 = vmatprep.mubr.bf16.mxu1 %v17493_v45  ;;  %14292 = vmatprep.subr.msk.bf16.mxu0 %vm12496_vm4, %v23092_v38  ;;  %vm2418_vm4 = vcmp.eq.s32.totalorder %v18159_v56, %v17429_v31  ;;  %vm12518_vm14 = vmpackc.low %vm3224_vm3, %vm3221_vm11  ;;  %vm2373_vm11 = vcmp.eq.s32.totalorder %v17813_v8, %v17429_v31  ;;  %v23246_v56 = vld [vmem:[#allocation53_spill] sm:$0xff] }
 0x2c3   :  { %12513 = vmatpush1.bf16.msk.msra.mxu1 %vm12512_vm12, %v23092_v38  ;;  %vm3220_vm12 = vcmp.eq.s32.totalorder %v16968_v46, %v23219_v60  ;;  %vm12482_vm7 = vmpackc.low %vm2379_vm6, %vm2376_vm1  ;;  %vm3344_vm1 = vcmp.eq.s32.totalorder %v23160_v26, %v23217_v41 }
 0x2c4   :  { %12515 = vmatprep.subr.msk.bf16.mxu1 %vm12514_vm5, %v23092_v38  ;;  %vm3215_vm5 = vcmp.eq.s32.totalorder %v17019_v13, %v23217_v41  ;;  %vm12500_vm13 = vmpackc.low %vm2421_vm8, %vm2418_vm4  ;;  %vm3217_vm4 = vcmp.eq.s32.totalorder %v17022_v62, %v23219_v60 }
 0x2c5   :  { %14293 = vmatpush3.bf16.msk.msra.mxu0 %vm12480_vm10, %v23092_v38  ;;  %vm2370_vm10 = vcmp.eq.s32.totalorder %v17810_v4, %v17429_v31  ;;  %vm12520_vm3 = vmpackc.low %vm3223_vm2, %vm3220_vm12  ;;  %vm3212_vm12 = vcmp.eq.s32.totalorder %v17082_v7, %v23217_v41  ;;  %v23225_v31 = vld [vmem:[#allocation30_spill] sm:$0xff] }
 0x2c6   :  { %14294 = vmatprep.subr.msk.bf16.mxu0 %vm12498_vm0, %v23092_v38  ;;  %vm3341_vm0 = vcmp.eq.s32.totalorder %v23159_v9, %v23217_v41  ;;  %vm12522_vm6 = vmpackc.low %vm3218_vm9, %vm3215_vm5  ;;  %vm3343_vm5 = vcmp.eq.s32.totalorder %v23160_v26, %v23219_v60  ;;  %v23247_v26 = vld [vmem:[#allocation6_spill] sm:$0xff] }
 0x2c7   :  { %12517 = vmatpush1.bf16.msk.msra.mxu1 %vm12516_vm15, %v23092_v38  ;;  %vm3214_vm15 = vcmp.eq.s32.totalorder %v17019_v13, %v23219_v60  ;;  %vm12484_vm8 = vmpackc.low %vm2373_vm11, %vm2370_vm10  ;;  %vm3338_vm10 = vcmp.eq.s32.totalorder %v23226_v36, %v23217_v41 }
 0x2c8   :  { %12519 = vmatprep.subr.msk.bf16.mxu1 %vm12518_vm14, %v23092_v38  ;;  %vm3209_vm14 = vcmp.eq.s32.totalorder %v16670_v42, %v23217_v41  ;;  %vm12566_vm2 = vmpackc.low %vm3344_vm1, %vm3341_vm0  ;;  %vm3211_vm0 = vcmp.eq.s32.totalorder %v17082_v7, %v23219_v60 }
 0x2c9   :  { %14295 = vmatpush3.bf16.msk.msra.mxu0 %vm12482_vm7, %v23092_v38  ;;  %vm3340_vm7 = vcmp.eq.s32.totalorder %v23159_v9, %v23219_v60  ;;  %vm12524_vm9 = vmpackc.low %vm3217_vm4, %vm3214_vm15  ;;  %vm3206_vm15 = vcmp.eq.s32.totalorder %v23227_v2, %v23217_v41  ;;  %v23250_v9 = vld [vmem:[#allocation52_spill] sm:$0xff] }
 0x2ca   :  { %14296 = vmatprep.subr.msk.bf16.mxu0 %vm12500_vm13, %v23092_v38  ;;  %vm3335_vm13 = vcmp.eq.s32.totalorder %v23225_v31, %v23217_v41  ;;  %vm12526_vm11 = vmpackc.low %vm3212_vm12, %vm3209_vm14  ;;  %vm3337_vm14 = vcmp.eq.s32.totalorder %v23226_v36, %v23219_v60  ;;  %v23231_v36 = vld [vmem:[#allocation50_spill] sm:$0xff] }
 0x2cb   :  { %12521 = vmatpush1.bf16.msk.msra.mxu1 %vm12520_vm3, %v23092_v38  ;;  %vm3208_vm3 = vcmp.eq.s32.totalorder %v16670_v42, %v23219_v60  ;;  %vm12568_vm1 = vmpackc.low %vm3343_vm5, %vm3340_vm7  ;;  %vm3332_vm7 = vcmp.eq.s32.totalorder %v23229_v54, %v23217_v41 }
 0x2cc   :  { %12523 = vmatprep.subr.msk.bf16.mxu1 %vm12522_vm6, %v23092_v38  ;;  %vm3203_vm6 = vcmp.eq.s32.totalorder %v16510_v15, %v23217_v41  ;;  %vm12570_vm4 = vmpackc.low %vm3338_vm10, %vm3335_vm13  ;;  %vm3205_vm13 = vcmp.eq.s32.totalorder %v23227_v2, %v23219_v60  ;;  %v23255_v2 = vld [vmem:[#allocation32_spill] sm:$0xff] }
 0x2cd   :  { %14297 = vmatpush3.bf16.msk.msra.mxu0 %vm12484_vm8, %v23092_v38  ;;  %vm3334_vm8 = vcmp.eq.s32.totalorder %v23225_v31, %v23219_v60  ;;  %vm12528_vm12 = vmpackc.low %vm3211_vm0, %vm3208_vm3  ;;  %vm3296_vm3 = vcmp.eq.s32.totalorder %v23231_v36, %v23217_v41  ;;  %v23235_v31 = vld [vmem:[#allocation85_spill] sm:$0xff] }
 0x2ce   :  { %12567 = vmatprep.subr.msk.bf16.mxu0 %vm12566_vm2, %v23092_v38  ;;  %vm3329_vm2 = vcmp.eq.s32.totalorder %v23228_v37, %v23217_v41  ;;  %vm12530_vm5 = vmpackc.low %vm3206_vm15, %vm3203_vm6  ;;  %vm3331_vm6 = vcmp.eq.s32.totalorder %v23229_v54, %v23219_v60  ;;  %v23233_v54 = vld [vmem:[#allocation7_spill] sm:$0xff] }
 0x2cf   :  { %12525 = vmatpush1.bf16.msk.msra.mxu1 %vm12524_vm9, %v23092_v38  ;;  %vm3202_vm9 = vcmp.eq.s32.totalorder %v16510_v15, %v23219_v60  ;;  %vm12572_vm10 = vmpackc.low %vm3337_vm14, %vm3334_vm8  ;;  %v23258_v15 = vld [vmem:[#allocation46_spill] sm:$0xff] }
 0x2d0   :  { %3178 = vmatmul.mubr.bf16.vlgmr.msra.gmra.mxu0 %v17721_v49  ;;  %12527 = vmatprep.subr.msk.bf16.mxu1 %vm12526_vm11, %v23092_v38  ;;  %v23230_v49 = vld [vmem:[#allocation35_spill] sm:$0xff]  ;;  %vm12574_vm0 = vmpackc.low %vm3332_vm7, %vm3329_vm2  ;;  %vm3295_vm2 = vcmp.eq.s32.totalorder %v23231_v36, %v23219_v60 }
 0x2d1   :  { %3185 = vmatprep.mubr.bf16.mxu0 %v18258_v53  ;;  %12569 = vmatpush1.bf16.msk.msra.mxu0 %vm12568_vm1, %v23092_v38  ;;  %vm3293_vm11 = vcmp.eq.s32.totalorder %v23230_v49, %v23217_v41  ;;  %vm3328_vm1 = vcmp.eq.s32.totalorder %v23228_v37, %v23219_v60  ;;  %vm12532_vm15 = vmpackc.low %vm3205_vm13, %vm3202_vm9  ;;  %v23232_v53 = vld [vmem:[#allocation27_spill] sm:$0xff] }
 0x2d2   :  { %12571 = vmatprep.subr.msk.bf16.mxu0 %vm12570_vm4, %v23092_v38  ;;  %vm3323_vm4 = vcmp.eq.s32.totalorder %v23187_v11, %v23217_v41  ;;  %vm3326_vm8 = vcmp.eq.s32.totalorder %v23232_v53, %v23217_v41  ;;  %vm12534_vm14 = vmpackc.low %vm3296_vm3, %vm3293_vm11  ;;  %v23234_v37 = vld [vmem:[#allocation15_spill] sm:$0xff]  ;;  %vm3325_vm11 = vcmp.eq.s32.totalorder %v23232_v53, %v23219_v60  ;;  %v23237_v53 = vld [vmem:[#allocation37_spill] sm:$0xff] }
 0x2d3   :  { %12529 = vmatpush1.bf16.msk.msra.mxu1 %vm12528_vm12, %v23092_v38  ;;  %vm3292_vm12 = vcmp.eq.s32.totalorder %v23230_v49, %v23219_v60  ;;  %vm12576_vm7 = vmpackc.low %vm3331_vm6, %vm3328_vm1  ;;  %vm3290_vm9 = vcmp.eq.s32.totalorder %v23234_v37, %v23217_v41  ;;  %vm3320_vm1 = vcmp.eq.s32.totalorder %v23194_v33, %v23217_v41 }
 0x2d4   :  { %12531 = vmatprep.subr.msk.bf16.mxu1 %vm12530_vm5, %v23092_v38  ;;  %vm3287_vm5 = vcmp.eq.s32.totalorder %v23233_v54, %v23217_v41  ;;  %vm12578_vm13 = vmpackc.low %vm3326_vm8, %vm3323_vm4  ;;  %vm3289_vm4 = vcmp.eq.s32.totalorder %v23234_v37, %v23219_v60 }
 0x2d5   :  { %12573 = vmatpush1.bf16.msk.msra.mxu0 %vm12572_vm10, %v23092_v38  ;;  %vm3322_vm10 = vcmp.eq.s32.totalorder %v23187_v11, %v23219_v60  ;;  %vm12536_vm3 = vmpackc.low %vm3295_vm2, %vm3292_vm12  ;;  %vm3284_vm12 = vcmp.eq.s32.totalorder %v23237_v53, %v23217_v41  ;;  %v23239_v11 = vld [vmem:[#allocation45_spill] sm:$0xff] }
 0x2d6   :  { %12575 = vmatprep.subr.msk.bf16.mxu0 %vm12574_vm0, %v23092_v38  ;;  %vm3317_vm0 = vcmp.eq.s32.totalorder %v23193_v24, %v23217_v41  ;;  %vm12538_vm6 = vmpackc.low %vm3290_vm9, %vm3287_vm5  ;;  %vm3319_vm5 = vcmp.eq.s32.totalorder %v23194_v33, %v23219_v60  ;;  %v23240_v33 = vld [vmem:[#allocation10_spill] sm:$0xff] }
 0x2d7   :  { %12533 = vmatpush1.bf16.msk.msra.mxu1 %vm12532_vm15, %v23092_v38  ;;  %vm3286_vm15 = vcmp.eq.s32.totalorder %v23233_v54, %v23219_v60  ;;  %vm12580_vm8 = vmpackc.low %vm3325_vm11, %vm3322_vm10  ;;  %vm3314_vm10 = vcmp.eq.s32.totalorder %v23239_v11, %v23217_v41 }
 0x2d8   :  { %3186 = vmatmul.mubr.bf16.gmra.mxu0 %v18300_v10  ;;  %12535 = vmatprep.subr.msk.bf16.mxu1 %vm12534_vm14, %v23092_v38  ;;  %v23236_v10 = vld [vmem:[#allocation36_spill] sm:$0xff]  ;;  %vm12582_vm2 = vmpackc.low %vm3320_vm1, %vm3317_vm0  ;;  %vm3283_vm0 = vcmp.eq.s32.totalorder %v23237_v53, %v23219_v60 }
 0x2d9   :  { %12577 = vmatpush1.bf16.msk.msra.mxu0 %vm12576_vm7, %v23092_v38  ;;  %4005 = vmatprep.mubr.bf16.mxu0 %v23235_v31  ;;  %vm3281_vm14 = vcmp.eq.s32.totalorder %v23236_v10, %v23217_v41  ;;  %vm3316_vm7 = vcmp.eq.s32.totalorder %v23193_v24, %v23219_v60  ;;  %vm12540_vm9 = vmpackc.low %vm3289_vm4, %vm3286_vm15  ;;  %v23238_v31 = vld [vmem:[#allocation48_spill] sm:$0xff] }
 0x2da   :  { %12579 = vmatprep.subr.msk.bf16.mxu0 %vm12578_vm13, %v23092_v38  ;;  %vm3311_vm13 = vcmp.eq.s32.totalorder %v23238_v31, %v23217_v41  ;;  %vm12542_vm11 = vmpackc.low %vm3284_vm12, %vm3281_vm14  ;;  %v23241_v24 = vld [vmem:[#allocation40_spill] sm:$0xff]  ;;  %vm3313_vm14 = vcmp.eq.s32.totalorder %v23239_v11, %v23219_v60  ;;  %v23242_v11 = vld [vmem:[#allocation55_spill] sm:$0xff] }
 0x2db   :  { %12537 = vmatpush2.bf16.msk.msra.mxu1 %vm12536_vm3, %v23092_v38  ;;  %vm3280_vm3 = vcmp.eq.s32.totalorder %v23236_v10, %v23219_v60  ;;  %vm12584_vm1 = vmpackc.low %vm3319_vm5, %vm3316_vm7  ;;  %vm3278_vm15 = vcmp.eq.s32.totalorder %v23241_v24, %v23217_v41  ;;  %vm3308_vm7 = vcmp.eq.s32.totalorder %v23204_v6, %v23217_v41 }
 0x2dc   :  { %12539 = vmatprep.subr.msk.bf16.mxu1 %vm12538_vm6, %v23092_v38  ;;  %vm3275_vm6 = vcmp.eq.s32.totalorder %v23240_v33, %v23217_v41  ;;  %vm12586_vm4 = vmpackc.low %vm3314_vm10, %vm3311_vm13  ;;  %vm3277_vm13 = vcmp.eq.s32.totalorder %v23241_v24, %v23219_v60 }
 0x2dd   :  { %12581 = vmatpush1.bf16.msk.msra.mxu0 %vm12580_vm8, %v23092_v38  ;;  %vm3310_vm8 = vcmp.eq.s32.totalorder %v23238_v31, %v23219_v60  ;;  %vm12544_vm12 = vmpackc.low %vm3283_vm0, %vm3280_vm3  ;;  %v23243_v31 = vld [vmem:[#allocation39_spill] sm:$0xff] }
 0x2de   :  { %12583 = vmatprep.subr.msk.bf16.mxu0 %vm12582_vm2, %v23092_v38  ;;  %vm3305_vm2 = vcmp.eq.s32.totalorder %v23203_v3, %v23217_v41  ;;  %vm12546_vm5 = vmpackc.low %vm3278_vm15, %vm3275_vm6  ;;  %vm3272_vm3 = vcmp.eq.s32.totalorder %v23243_v31, %v23217_v41  ;;  %vm3307_vm6 = vcmp.eq.s32.totalorder %v23204_v6, %v23219_v60  ;;  %v23244_v6 = vld [vmem:[#allocation34_spill] sm:$0xff] }
 0x2df   :  { %12541 = vmatpush2.bf16.msk.msra.mxu1 %vm12540_vm9, %v23092_v38  ;;  %vm3274_vm9 = vcmp.eq.s32.totalorder %v23240_v33, %v23219_v60  ;;  %vm12588_vm10 = vmpackc.low %vm3313_vm14, %vm3310_vm8  ;;  %vm3302_vm8 = vcmp.eq.s32.totalorder %v23213_v34, %v23217_v41 }
 0x2e0   :  { %12543 = vmatprep.subr.msk.bf16.mxu1 %vm12542_vm11, %v23092_v38  ;;  %vm3269_vm11 = vcmp.eq.s32.totalorder %v23242_v11, %v23217_v41  ;;  %vm12590_vm0 = vmpackc.low %vm3308_vm7, %vm3305_vm2  ;;  %vm3271_vm2 = vcmp.eq.s32.totalorder %v23243_v31, %v23219_v60 }
 0x2e1   :  { %12585 = vmatpush1.bf16.msk.msra.mxu0 %vm12584_vm1, %v23092_v38  ;;  %vm3304_vm1 = vcmp.eq.s32.totalorder %v23203_v3, %v23219_v60  ;;  %vm12548_vm15 = vmpackc.low %vm3277_vm13, %vm3274_vm9  ;;  %v23245_v3 = vld [vmem:[#allocation49_spill] sm:$0xff] }
 0x2e2   :  { %12587 = vmatprep.subr.msk.bf16.mxu0 %vm12586_vm4, %v23092_v38  ;;  %vm3299_vm4 = vcmp.eq.s32.totalorder %v23212_v39, %v23217_v41  ;;  %vm12550_vm14 = vmpackc.low %vm3272_vm3, %vm3269_vm11  ;;  %vm3266_vm9 = vcmp.eq.s32.totalorder %v23245_v3, %v23217_v41  ;;  %vm3301_vm11 = vcmp.eq.s32.totalorder %v23213_v34, %v23219_v60  ;;  %v23248_v34 = vld [vmem:[#allocation31_spill] sm:$0xff] }
 0x2e3   :  { %12545 = vmatpush2.bf16.msk.msra.mxu1 %vm12544_vm12, %v23092_v38  ;;  %vm3268_vm12 = vcmp.eq.s32.totalorder %v23242_v11, %v23219_v60  ;;  %vm12592_vm7 = vmpackc.low %vm3307_vm6, %vm3304_vm1  ;;  %vm3392_vm1 = vcmp.eq.s32.totalorder %v23247_v26, %v23217_v41 }
 0x2e4   :  { %12547 = vmatprep.subr.msk.bf16.mxu1 %vm12546_vm5, %v23092_v38  ;;  %vm3263_vm5 = vcmp.eq.s32.totalorder %v23244_v6, %v23217_v41  ;;  %vm12594_vm13 = vmpackc.low %vm3302_vm8, %vm3299_vm4  ;;  %vm3265_vm4 = vcmp.eq.s32.totalorder %v23245_v3, %v23219_v60 }
 0x2e5   :  { %12589 = vmatpush1.bf16.msk.msra.mxu0 %vm12588_vm10, %v23092_v38  ;;  %vm3298_vm10 = vcmp.eq.s32.totalorder %v23212_v39, %v23219_v60  ;;  %vm12552_vm3 = vmpackc.low %vm3271_vm2, %vm3268_vm12  ;;  %v23249_v39 = vld [vmem:[#allocation43_spill] sm:$0xff] }
 0x2e6   :  { %12591 = vmatprep.subr.msk.bf16.mxu0 %vm12590_vm0, %v23092_v38  ;;  %vm3389_vm0 = vcmp.eq.s32.totalorder %v23246_v56, %v23217_v41  ;;  %vm12554_vm6 = vmpackc.low %vm3266_vm9, %vm3263_vm5  ;;  %vm3260_vm12 = vcmp.eq.s32.totalorder %v23249_v39, %v23217_v41  ;;  %vm3391_vm5 = vcmp.eq.s32.totalorder %v23247_v26, %v23219_v60  ;;  %v23253_v26 = vld [vmem:[#allocation67_spill] sm:$0xff] }
 0x2e7   :  { %12549 = vmatpush2.bf16.msk.msra.mxu1 %vm12548_vm15, %v23092_v38  ;;  %vm3262_vm15 = vcmp.eq.s32.totalorder %v23244_v6, %v23219_v60  ;;  %vm12596_vm8 = vmpackc.low %vm3301_vm11, %vm3298_vm10  ;;  %vm3386_vm10 = vcmp.eq.s32.totalorder %v23251_v16, %v23217_v41 }
 0x2e8   :  { %12551 = vmatprep.subr.msk.bf16.mxu1 %vm12550_vm14, %v23092_v38  ;;  %vm3257_vm14 = vcmp.eq.s32.totalorder %v23248_v34, %v23217_v41  ;;  %vm12598_vm2 = vmpackc.low %vm3392_vm1, %vm3389_vm0  ;;  %vm3259_vm0 = vcmp.eq.s32.totalorder %v23249_v39, %v23219_v60 }
 0x2e9   :  { %12593 = vmatpush1.bf16.msk.msra.mxu0 %vm12592_vm7, %v23092_v38  ;;  %vm3388_vm7 = vcmp.eq.s32.totalorder %v23246_v56, %v23219_v60  ;;  %vm12556_vm9 = vmpackc.low %vm3265_vm4, %vm3262_vm15  ;;  %vm3254_vm15 = vcmp.eq.s32.totalorder %v23253_v26, %v23217_v41  ;;  %v23254_v56 = vld [vmem:[#allocation57_spill] sm:$0xff] }
 0x2ea   :  { %12595 = vmatprep.subr.msk.bf16.mxu0 %vm12594_vm13, %v23092_v38  ;;  %vm3383_vm13 = vcmp.eq.s32.totalorder %v23250_v9, %v23217_v41  ;;  %vm12558_vm11 = vmpackc.low %vm3260_vm12, %vm3257_vm14  ;;  %vm3385_vm14 = vcmp.eq.s32.totalorder %v23251_v16, %v23219_v60  ;;  %v23256_v16 = vld [vmem:[#allocation73_spill] sm:$0xff] }
 0x2eb   :  { %12553 = vmatpush2.bf16.msk.msra.mxu1 %vm12552_vm3, %v23092_v38  ;;  %vm3256_vm3 = vcmp.eq.s32.totalorder %v23248_v34, %v23219_v60  ;;  %vm12600_vm1 = vmpackc.low %vm3391_vm5, %vm3388_vm7  ;;  %vm3380_vm7 = vcmp.eq.s32.totalorder %v23255_v2, %v23217_v41 }
 0x2ec   :  { %12555 = vmatprep.subr.msk.bf16.mxu1 %vm12554_vm6, %v23092_v38  ;;  %vm3251_vm6 = vcmp.eq.s32.totalorder %v23252_v21, %v23217_v41  ;;  %vm12602_vm4 = vmpackc.low %vm3386_vm10, %vm3383_vm13  ;;  %vm3253_vm13 = vcmp.eq.s32.totalorder %v23253_v26, %v23219_v60 }
 0x2ed   :  { %12597 = vmatpush1.bf16.msk.msra.mxu0 %vm12596_vm8, %v23092_v38  ;;  %vm3382_vm8 = vcmp.eq.s32.totalorder %v23250_v9, %v23219_v60  ;;  %vm12560_vm12 = vmpackc.low %vm3259_vm0, %vm3256_vm3  ;;  %vm3440_vm3 = vcmp.eq.s32.totalorder %v23256_v16, %v23217_v41  ;;  %v23257_v9 = vld [vmem:[#allocation59_spill] sm:$0xff] }
 0x2ee   :  { %12599 = vmatprep.subr.msk.bf16.mxu0 %vm12598_vm2, %v23092_v38  ;;  %vm3377_vm2 = vcmp.eq.s32.totalorder %v23254_v56, %v23217_v41  ;;  %vm12562_vm5 = vmpackc.low %vm3254_vm15, %vm3251_vm6  ;;  %vm3379_vm6 = vcmp.eq.s32.totalorder %v23255_v2, %v23219_v60 }
 0x2ef   :  { %12557 = vmatpush2.bf16.msk.msra.mxu1 %vm12556_vm9, %v23092_v38  ;;  %vm3250_vm9 = vcmp.eq.s32.totalorder %v23252_v21, %v23219_v60  ;;  %vm12604_vm10 = vmpackc.low %vm3385_vm14, %vm3382_vm8  ;;  %vm3374_vm8 = vcmp.eq.s32.totalorder %v23258_v15, %v23217_v41 }
 0x2f0   :  { %12559 = vmatprep.subr.msk.bf16.mxu1 %vm12558_vm11, %v23092_v38  ;;  %vm3437_vm11 = vcmp.eq.s32.totalorder %v23206_v12, %v23217_v41  ;;  %vm12606_vm0 = vmpackc.low %vm3380_vm7, %vm3377_vm2  ;;  %vm3439_vm2 = vcmp.eq.s32.totalorder %v23256_v16, %v23219_v60  ;;  %v23259_v16 = vld [vmem:[#allocation16_spill] sm:$0xff] }
 0x2f1   :  { %12601 = vmatpush2.bf16.msk.msra.mxu0 %vm12600_vm1, %v23092_v38  ;;  %vm3376_vm1 = vcmp.eq.s32.totalorder %v23254_v56, %v23219_v60  ;;  %vm12564_vm15 = vmpackc.low %vm3253_vm13, %vm3250_vm9  ;;  %vm3434_vm9 = vcmp.eq.s32.totalorder %v17477_v5, %v23217_v41 }
 0x2f2   :  { %12603 = vmatprep.subr.msk.bf16.mxu0 %vm12602_vm4, %v23092_v38  ;;  %vm3371_vm4 = vcmp.eq.s32.totalorder %v23257_v9, %v23217_v41  ;;  %vm12630_vm14 = vmpackc.low %vm3440_vm3, %vm3437_vm11  ;;  %vm3373_vm11 = vcmp.eq.s32.totalorder %v23258_v15, %v23219_v60  ;;  %v23262_v15 = vld [vmem:[#allocation83_spill] sm:$0xff] }
 0x2f3   :  { %12561 = vmatpush2.bf16.msk.msra.mxu1 %vm12560_vm12, %v23092_v38  ;;  %vm3436_vm12 = vcmp.eq.s32.totalorder %v23206_v12, %v23219_v60  ;;  %vm12608_vm7 = vmpackc.low %vm3379_vm6, %vm3376_vm1  ;;  %v23260_v12 = vld [vmem:[#allocation14_spill] sm:$0xff] }
 0x2f4   :  { %12563 = vmatprep.subr.msk.bf16.mxu1 %vm12562_vm5, %v23092_v38  ;;  %vm3431_vm5 = vcmp.eq.s32.totalorder %v17474_v17, %v23217_v41  ;;  %vm12610_vm13 = vmpackc.low %vm3374_vm8, %vm3371_vm4  ;;  %vm3368_vm1 = vcmp.eq.s32.totalorder %v23260_v12, %v23217_v41  ;;  %vm3433_vm4 = vcmp.eq.s32.totalorder %v17477_v5, %v23219_v60  ;;  %v23263_v5 = vld [vmem:[#allocation68_spill] sm:$0xff] }
 0x2f5   :  { %12605 = vmatpush2.bf16.msk.msra.mxu0 %vm12604_vm10, %v23092_v38  ;;  %vm3370_vm10 = vcmp.eq.s32.totalorder %v23257_v9, %v23219_v60  ;;  %vm12632_vm3 = vmpackc.low %vm3439_vm2, %vm3436_vm12  ;;  %v23261_v9 = vld [vmem:[#allocation80_spill] sm:$0xff]  ;;  %vm3428_vm12 = vcmp.eq.s32.totalorder %v17491_v25, %v23217_v41 }
 0x2f6   :  { %12607 = vmatprep.subr.msk.bf16.mxu0 %vm12606_vm0, %v23092_v38  ;;  %vm3365_vm0 = vcmp.eq.s32.totalorder %v23259_v16, %v23217_v41  ;;  %vm12634_vm6 = vmpackc.low %vm3434_vm9, %vm3431_vm5  ;;  %vm3367_vm5 = vcmp.eq.s32.totalorder %v23260_v12, %v23219_v60 }
 0x2f7   :  { %12565 = vmatpush2.bf16.msk.msra.mxu1 %vm12564_vm15, %v23092_v38  ;;  %vm3430_vm15 = vcmp.eq.s32.totalorder %v17474_v17, %v23219_v60  ;;  %vm12612_vm8 = vmpackc.low %vm3373_vm11, %vm3370_vm10  ;;  %v23264_v17 = vld [vmem:[#allocation69_spill] sm:$0xff] }
 0x2f8   :  { %12631 = vmatprep.subr.msk.bf16.mxu1 %vm12630_vm14, %v23092_v38  ;;  %vm3425_vm14 = vcmp.eq.s32.totalorder %v17484_v35, %v23217_v41  ;;  %vm12614_vm2 = vmpackc.low %vm3368_vm1, %vm3365_vm0  ;;  %vm3362_vm10 = vcmp.eq.s32.totalorder %v23264_v17, %v23217_v41  ;;  %vm3427_vm0 = vcmp.eq.s32.totalorder %v17491_v25, %v23219_v60  ;;  %v23265_v25 = vld [vmem:[#allocation70_spill] sm:$0xff] }
 0x2f9   :  { %12609 = vmatpush2.bf16.msk.msra.mxu0 %vm12608_vm7, %v23092_v38  ;;  %vm3364_vm7 = vcmp.eq.s32.totalorder %v23259_v16, %v23219_v60  ;;  %vm12636_vm9 = vmpackc.low %vm3433_vm4, %vm3430_vm15  ;;  %vm3422_vm15 = vcmp.eq.s32.totalorder %v17508_v52, %v23217_v41 }
 0x2fa   :  { %3955 = vmatmul.mubr.bf16.vlgmr.msra.gmra.mxu1 %v23261_v9  ;;  %12611 = vmatprep.subr.msk.bf16.mxu0 %vm12610_vm13, %v23092_v38  ;;  %vm3359_vm13 = vcmp.eq.s32.totalorder %v23263_v5, %v23217_v41  ;;  %vm12638_vm11 = vmpackc.low %vm3428_vm12, %vm3425_vm14  ;;  %vm3361_vm14 = vcmp.eq.s32.totalorder %v23264_v17, %v23219_v60 }
 0x2fb   :  { %3964 = vmatprep.mubr.bf16.mxu1 %v23262_v15  ;;  %12633 = vmatpush1.bf16.msk.msra.mxu1 %vm12632_vm3, %v23092_v38  ;;  %vm3424_vm3 = vcmp.eq.s32.totalorder %v17484_v35, %v23219_v60  ;;  %vm12616_vm1 = vmpackc.low %vm3367_vm5, %vm3364_vm7  ;;  %v23266_v35 = vld [vmem:[#allocation71_spill] sm:$0xff] }
 0x2fc   :  { %12635 = vmatprep.subr.msk.bf16.mxu1 %vm12634_vm6, %v23092_v38  ;;  %vm3419_vm6 = vcmp.eq.s32.totalorder %v17505_v20, %v23217_v41  ;;  %vm12618_vm4 = vmpackc.low %vm3362_vm10, %vm3359_vm13  ;;  %vm3356_vm7 = vcmp.eq.s32.totalorder %v23266_v35, %v23217_v41  ;;  %vm3421_vm13 = vcmp.eq.s32.totalorder %v17508_v52, %v23219_v60  ;;  %v23268_v52 = vld [vmem:[#allocation17_spill] sm:$0xff] }
 0x2fd   :  { %12613 = vmatpush2.bf16.msk.msra.mxu0 %vm12612_vm8, %v23092_v38  ;;  %vm3358_vm8 = vcmp.eq.s32.totalorder %v23263_v5, %v23219_v60  ;;  %vm12640_vm12 = vmpackc.low %vm3427_vm0, %vm3424_vm3  ;;  %v23267_v5 = vld [vmem:[#allocation86_spill] sm:$0xff]  ;;  %vm3416_vm3 = vcmp.eq.s32.totalorder %v17541_v19, %v23217_v41 }
 0x2fe   :  { %12615 = vmatprep.subr.msk.bf16.mxu0 %vm12614_vm2, %v23092_v38  ;;  %vm3353_vm2 = vcmp.eq.s32.totalorder %v23265_v25, %v23217_v41  ;;  %vm12642_vm5 = vmpackc.low %vm3422_vm15, %vm3419_vm6  ;;  %vm3355_vm6 = vcmp.eq.s32.totalorder %v23266_v35, %v23219_v60 }
 0x2ff   :  { %12637 = vmatpush1.bf16.msk.msra.mxu1 %vm12636_vm9, %v23092_v38  ;;  %vm3418_vm9 = vcmp.eq.s32.totalorder %v17505_v20, %v23219_v60  ;;  %vm12620_vm10 = vmpackc.low %vm3361_vm14, %vm3358_vm8  ;;  %v23269_v20 = vld [vmem:[#allocation74_spill] sm:$0xff] }
 0x300   :  { %12639 = vmatprep.subr.msk.bf16.mxu1 %vm12638_vm11, %v23092_v38  ;;  %vm3413_vm11 = vcmp.eq.s32.totalorder %v17538_v43, %v23217_v41  ;;  %vm12622_vm0 = vmpackc.low %vm3356_vm7, %vm3353_vm2  ;;  %vm3350_vm8 = vcmp.eq.s32.totalorder %v23269_v20, %v23217_v41  ;;  %vm3415_vm2 = vcmp.eq.s32.totalorder %v17541_v19, %v23219_v60  ;;  %v23270_v19 = vld [vmem:[#allocation22_spill] sm:$0xff] }
 0x301   :  { %12617 = vmatpush2.bf16.msk.msra.mxu0 %vm12616_vm1, %v23092_v38  ;;  %vm3352_vm1 = vcmp.eq.s32.totalorder %v23265_v25, %v23219_v60  ;;  %vm12644_vm15 = vmpackc.low %vm3421_vm13, %vm3418_vm9  ;;  %vm3410_vm9 = vcmp.eq.s32.totalorder %v17638_v30, %v23217_v41 }
 0x302   :  { %3965 = vmatmul.mubr.bf16.gmra.mxu1 %v23267_v5  ;;  %12619 = vmatprep.subr.msk.bf16.mxu0 %vm12618_vm4, %v23092_v38  ;;  %vm3347_vm4 = vcmp.eq.s32.totalorder %v23268_v52, %v23217_v41  ;;  %vm12646_vm14 = vmpackc.low %vm3416_vm3, %vm3413_vm11  ;;  %vm3349_vm11 = vcmp.eq.s32.totalorder %v23269_v20, %v23219_v60 }
 0x303   :  { %12641 = vmatpush1.bf16.msk.msra.mxu1 %vm12640_vm12, %v23092_v38  ;;  %4056 = vmatprep.mubr.bf16.mxu1 %v17750_v57  ;;  %vm3412_vm12 = vcmp.eq.s32.totalorder %v17538_v43, %v23219_v60  ;;  %vm12624_vm7 = vmpackc.low %vm3355_vm6, %vm3352_vm1  ;;  %vm3297_vm1 = vcmp.eq.s32.totalorder %v23231_v36, %v23270_v19 }
 0x304   :  { %12643 = vmatprep.subr.msk.bf16.mxu1 %vm12642_vm5, %v23092_v38  ;;  %vm3407_vm5 = vcmp.eq.s32.totalorder %v17635_v29, %v23217_v41  ;;  %vm12626_vm13 = vmpackc.low %vm3350_vm8, %vm3347_vm4  ;;  %vm3409_vm4 = vcmp.eq.s32.totalorder %v17638_v30, %v23219_v60 }
 0x305   :  { %12621 = vmatpush2.bf16.msk.msra.mxu0 %vm12620_vm10, %v23092_v38  ;;  %vm3346_vm10 = vcmp.eq.s32.totalorder %v23268_v52, %v23219_v60  ;;  %vm12648_vm3 = vmpackc.low %vm3415_vm2, %vm3412_vm12  ;;  %vm3404_vm12 = vcmp.eq.s32.totalorder %v17732_v0, %v23217_v41 }
 0x306   :  { %12623 = vmatprep.subr.msk.bf16.mxu0 %vm12622_vm0, %v23092_v38  ;;  %vm3294_vm0 = vcmp.eq.s32.totalorder %v23230_v49, %v23270_v19  ;;  %vm12650_vm6 = vmpackc.low %vm3410_vm9, %vm3407_vm5  ;;  %vm3249_vm5 = vcmp.eq.s32.totalorder %v16823_v50, %v23270_v19  ;;  %v23306_v49 = vld [vmem:[#allocation76_spill] sm:$0xff] }
 0x307   :  { %12645 = vmatpush1.bf16.msk.msra.mxu1 %vm12644_vm15, %v23092_v38  ;;  %vm3406_vm15 = vcmp.eq.s32.totalorder %v17635_v29, %v23219_v60  ;;  %vm12628_vm8 = vmpackc.low %vm3349_vm11, %vm3346_vm10  ;;  %vm3291_vm10 = vcmp.eq.s32.totalorder %v23234_v37, %v23270_v19  ;;  %v23271_v37 = vld [vmem:[#allocation89_spill] sm:$0xff] }
 0x308   :  { %12647 = vmatprep.subr.msk.bf16.mxu1 %vm12646_vm14, %v23092_v38  ;;  %vm3401_vm14 = vcmp.eq.s32.totalorder %v17718_v58, %v23217_v41  ;;  %vm12710_vm2 = vmpackc.low %vm3297_vm1, %vm3294_vm0  ;;  %vm3403_vm0 = vcmp.eq.s32.totalorder %v17732_v0, %v23219_v60 }
 0x309   :  { %12625 = vmatpush2.bf16.msk.msra.mxu0 %vm12624_vm7, %v23092_v38  ;;  %vm3246_vm7 = vcmp.eq.s32.totalorder %v16820_v40, %v23270_v19  ;;  %vm12652_vm9 = vmpackc.low %vm3409_vm4, %vm3406_vm15  ;;  %vm3398_vm15 = vcmp.eq.s32.totalorder %v17813_v8, %v23217_v41 }
 0x30a   :  { %12627 = vmatprep.subr.msk.bf16.mxu0 %vm12626_vm13, %v23092_v38  ;;  %vm3288_vm13 = vcmp.eq.s32.totalorder %v23233_v54, %v23270_v19  ;;  %vm12654_vm11 = vmpackc.low %vm3404_vm12, %vm3401_vm14  ;;  %vm3243_vm14 = vcmp.eq.s32.totalorder %v16853_v47, %v23270_v19 }
 0x30b   :  { %12649 = vmatpush1.bf16.msk.msra.mxu1 %vm12648_vm3, %v23092_v38  ;;  %vm3400_vm3 = vcmp.eq.s32.totalorder %v17718_v58, %v23219_v60  ;;  %vm12694_vm1 = vmpackc.low %vm3249_vm5, %vm3246_vm7  ;;  %vm3285_vm7 = vcmp.eq.s32.totalorder %v23237_v53, %v23270_v19  ;;  %v23273_v53 = vld [vmem:[#allocation91_spill] sm:$0xff] }
 0x30c   :  { %12651 = vmatprep.subr.msk.bf16.mxu1 %vm12650_vm6, %v23092_v38  ;;  %vm3395_vm6 = vcmp.eq.s32.totalorder %v17810_v4, %v23217_v41  ;;  %vm12712_vm4 = vmpackc.low %vm3291_vm10, %vm3288_vm13  ;;  %vm3397_vm13 = vcmp.eq.s32.totalorder %v17813_v8, %v23219_v60 }
 0x30d   :  { %12629 = vmatpush2.bf16.msk.msra.mxu0 %vm12628_vm8, %v23092_v38  ;;  %vm3240_vm8 = vcmp.eq.s32.totalorder %v16850_v51, %v23270_v19  ;;  %vm12656_vm12 = vmpackc.low %vm3403_vm0, %vm3400_vm3 }
 0x30e   :  { %14310 = vmatprep.subr.msk.bf16.mxu0 %vm12710_vm2, %v23092_v38  ;;  %vm3282_vm2 = vcmp.eq.s32.totalorder %v23236_v10, %v23270_v19  ;;  %vm12658_vm5 = vmpackc.low %vm3398_vm15, %vm3395_vm6  ;;  %v23272_v10 = vld [vmem:[#allocation90_spill] sm:$0xff]  ;;  %vm3237_vm6 = vcmp.eq.s32.totalorder %v16881_v1, %v23270_v19 }
 0x30f   :  { %12653 = vmatpush1.bf16.msk.msra.mxu1 %vm12652_vm9, %v23092_v38  ;;  %vm3394_vm9 = vcmp.eq.s32.totalorder %v17810_v4, %v23219_v60  ;;  %vm12696_vm10 = vmpackc.low %vm3243_vm14, %vm3240_vm8  ;;  %vm3488_vm3 = vcmp.eq.s32.totalorder %v23272_v10, %v23217_v41  ;;  %vm3279_vm8 = vcmp.eq.s32.totalorder %v23241_v24, %v23270_v19  ;;  %v23275_v24 = vld [vmem:[#allocation93_spill] sm:$0xff] }
 0x310   :  { %4006 = vmatmul.mubr.bf16.vlgmr.msra.gmra.mxu0 %v23224_v63  ;;  %12655 = vmatprep.subr.msk.bf16.mxu1 %vm12654_vm11, %v23092_v38  ;;  %vm3485_vm11 = vcmp.eq.s32.totalorder %v23271_v37, %v23217_v41  ;;  %vm12714_vm0 = vmpackc.low %vm3285_vm7, %vm3282_vm2  ;;  %vm3487_vm2 = vcmp.eq.s32.totalorder %v23272_v10, %v23219_v60 }
 0x311   :  { %4015 = vmatprep.mubr.bf16.mxu0 %v17677_v18  ;;  %14311 = vmatpush3.bf16.msk.msra.mxu0 %vm12694_vm1, %v23092_v38  ;;  %vm3234_vm1 = vcmp.eq.s32.totalorder %v16878_v55, %v23270_v19  ;;  %vm12660_vm15 = vmpackc.low %vm3397_vm13, %vm3394_vm9 }
 0x312   :  { %14312 = vmatprep.subr.msk.bf16.mxu0 %vm12712_vm4, %v23092_v38  ;;  %vm3276_vm4 = vcmp.eq.s32.totalorder %v23240_v33, %v23270_v19  ;;  %vm12662_vm14 = vmpackc.low %vm3488_vm3, %vm3485_vm11  ;;  %v23274_v33 = vld [vmem:[#allocation92_spill] sm:$0xff]  ;;  %vm3231_vm11 = vcmp.eq.s32.totalorder %v16923_v59, %v23270_v19 }
 0x313   :  { %12657 = vmatpush1.bf16.msk.msra.mxu1 %vm12656_vm12, %v23092_v38  ;;  %vm3484_vm12 = vcmp.eq.s32.totalorder %v23271_v37, %v23219_v60  ;;  %vm12698_vm7 = vmpackc.low %vm3237_vm6, %vm3234_vm1  ;;  %vm3482_vm9 = vcmp.eq.s32.totalorder %v23274_v33, %v23217_v41  ;;  %vm3273_vm1 = vcmp.eq.s32.totalorder %v23243_v31, %v23270_v19  ;;  %v23286_v31 = vld [vmem:[#allocation38_spill] sm:$0xff] }
 0x314   :  { %12659 = vmatprep.subr.msk.bf16.mxu1 %vm12658_vm5, %v23092_v38  ;;  %vm3479_vm5 = vcmp.eq.s32.totalorder %v23273_v53, %v23217_v41  ;;  %vm12716_vm13 = vmpackc.low %vm3279_vm8, %vm3276_vm4  ;;  %vm3481_vm4 = vcmp.eq.s32.totalorder %v23274_v33, %v23219_v60 }
 0x315   :  { %14313 = vmatpush3.bf16.msk.msra.mxu0 %vm12696_vm10, %v23092_v38  ;;  %vm3228_vm10 = vcmp.eq.s32.totalorder %v16920_v61, %v23270_v19  ;;  %vm12664_vm3 = vmpackc.low %vm3487_vm2, %vm3484_vm12 }
 0x316   :  { %14314 = vmatprep.subr.msk.bf16.mxu0 %vm12714_vm0, %v23092_v38  ;;  %vm3270_vm0 = vcmp.eq.s32.totalorder %v23242_v11, %v23270_v19  ;;  %vm12666_vm6 = vmpackc.low %vm3482_vm9, %vm3479_vm5  ;;  %v23276_v11 = vld [vmem:[#allocation94_spill] sm:$0xff]  ;;  %vm3225_vm5 = vcmp.eq.s32.totalorder %v16971_v23, %v23270_v19 }
 0x317   :  { %12661 = vmatpush1.bf16.msk.msra.mxu1 %vm12660_vm15, %v23092_v38  ;;  %vm3478_vm15 = vcmp.eq.s32.totalorder %v23273_v53, %v23219_v60  ;;  %vm12700_vm8 = vmpackc.low %vm3231_vm11, %vm3228_vm10  ;;  %vm3476_vm12 = vcmp.eq.s32.totalorder %v23276_v11, %v23217_v41  ;;  %vm3267_vm10 = vcmp.eq.s32.totalorder %v23245_v3, %v23270_v19  ;;  %v23284_v3 = vld [vmem:[#allocation29_spill] sm:$0xff] }
 0x318   :  { %4016 = vmatmul.mubr.bf16.gmra.mxu0 %v17772_v48  ;;  %12663 = vmatprep.subr.msk.bf16.mxu1 %vm12662_vm14, %v23092_v38  ;;  %vm3473_vm14 = vcmp.eq.s32.totalorder %v23275_v24, %v23217_v41  ;;  %vm12718_vm2 = vmpackc.low %vm3273_vm1, %vm3270_vm0  ;;  %vm3475_vm0 = vcmp.eq.s32.totalorder %v23276_v11, %v23219_v60 }
 0x319   :  { %14315 = vmatpush3.bf16.msk.msra.mxu0 %vm12698_vm7, %v23092_v38  ;;  %4107 = vmatprep.mubr.bf16.mxu0 %v17493_v45  ;;  %vm3222_vm7 = vcmp.eq.s32.totalorder %v16968_v46, %v23270_v19  ;;  %vm12668_vm9 = vmpackc.low %vm3481_vm4, %vm3478_vm15  ;;  %vm3470_vm15 = vcmp.eq.s32.totalorder %v18015_v28, %v23217_v41  ;;  %v23277_v45 = vld [vmem:[#allocation56_spill] sm:$0xff] }
 0x31a   :  { %14316 = vmatprep.subr.msk.bf16.mxu0 %vm12716_vm13, %v23092_v38  ;;  %vm3264_vm13 = vcmp.eq.s32.totalorder %v23244_v6, %v23270_v19  ;;  %vm12670_vm11 = vmpackc.low %vm3476_vm12, %vm3473_vm14  ;;  %vm3219_vm14 = vcmp.eq.s32.totalorder %v17022_v62, %v23270_v19  ;;  %v23285_v6 = vld [vmem:[#allocation52_spill] sm:$0xff] }
 0x31b   :  { %12665 = vmatpush2.bf16.msk.msra.mxu1 %vm12664_vm3, %v23092_v38  ;;  %vm3472_vm3 = vcmp.eq.s32.totalorder %v23275_v24, %v23219_v60  ;;  %vm12702_vm1 = vmpackc.low %vm3225_vm5, %vm3222_vm7  ;;  %vm3261_vm7 = vcmp.eq.s32.totalorder %v23249_v39, %v23270_v19  ;;  %v23280_v39 = vld [vmem:[#allocation6_spill] sm:$0xff] }
 0x31c   :  { %12667 = vmatprep.subr.msk.bf16.mxu1 %vm12666_vm6, %v23092_v38  ;;  %vm3467_vm6 = vcmp.eq.s32.totalorder %v18012_v27, %v23217_v41  ;;  %vm12720_vm4 = vmpackc.low %vm3267_vm10, %vm3264_vm13  ;;  %vm3469_vm13 = vcmp.eq.s32.totalorder %v18015_v28, %v23219_v60 }
 0x31d   :  { %14317 = vmatpush3.bf16.msk.msra.mxu0 %vm12700_vm8, %v23092_v38  ;;  %vm3216_vm8 = vcmp.eq.s32.totalorder %v17019_v13, %v23270_v19  ;;  %vm12672_vm12 = vmpackc.low %vm3475_vm0, %vm3472_vm3  ;;  %vm3464_vm3 = vcmp.eq.s32.totalorder %v18041_v14, %v23217_v41 }
 0x31e   :  { %14318 = vmatprep.subr.msk.bf16.mxu0 %vm12718_vm2, %v23092_v38  ;;  %vm3258_vm2 = vcmp.eq.s32.totalorder %v23248_v34, %v23270_v19  ;;  %vm12674_vm5 = vmpackc.low %vm3470_vm15, %vm3467_vm6  ;;  %vm3213_vm6 = vcmp.eq.s32.totalorder %v17082_v7, %v23270_v19  ;;  %v23281_v34 = vld [vmem:[#allocation95_spill] sm:$0xff] }
 0x31f   :  { %12669 = vmatpush2.bf16.msk.msra.mxu1 %vm12668_vm9, %v23092_v38  ;;  %vm3466_vm9 = vcmp.eq.s32.totalorder %v18012_v27, %v23219_v60  ;;  %vm12704_vm10 = vmpackc.low %vm3219_vm14, %vm3216_vm8  ;;  %vm3255_vm8 = vcmp.eq.s32.totalorder %v23253_v26, %v23270_v19  ;;  %v23278_v26 = vld [vmem:[#allocation64_spill] sm:$0xff] }
 0x320   :  { %12671 = vmatprep.subr.msk.bf16.mxu1 %vm12670_vm11, %v23092_v38  ;;  %vm3461_vm11 = vcmp.eq.s32.totalorder %v18038_v22, %v23217_v41  ;;  %vm12722_vm0 = vmpackc.low %vm3261_vm7, %vm3258_vm2  ;;  %vm3463_vm2 = vcmp.eq.s32.totalorder %v18041_v14, %v23219_v60 }
 0x321   :  { %14319 = vmatpush3.bf16.msk.msra.mxu0 %vm12702_vm1, %v23092_v38  ;;  %vm3210_vm1 = vcmp.eq.s32.totalorder %v16670_v42, %v23270_v19  ;;  %vm12676_vm15 = vmpackc.low %vm3469_vm13, %vm3466_vm9  ;;  %vm3458_vm9 = vcmp.eq.s32.totalorder %v18078_v32, %v23217_v41  ;;  %v23315_v42 = vld [vmem:[#allocation28_spill] sm:$0xff] }
 0x322   :  { %14320 = vmatprep.subr.msk.bf16.mxu0 %vm12720_vm4, %v23092_v38  ;;  %vm3252_vm4 = vcmp.eq.s32.totalorder %v23252_v21, %v23270_v19  ;;  %vm12678_vm14 = vmpackc.low %vm3464_vm3, %vm3461_vm11  ;;  %vm3207_vm11 = vcmp.eq.s32.totalorder %v23278_v26, %v23270_v19  ;;  %v23279_v21 = vld [vmem:[#allocation53_spill] sm:$0xff] }
 0x323   :  { %12673 = vmatpush2.bf16.msk.msra.mxu1 %vm12672_vm12, %v23092_v38  ;;  %vm3460_vm12 = vcmp.eq.s32.totalorder %v18038_v22, %v23219_v60  ;;  %vm12706_vm7 = vmpackc.low %vm3213_vm6, %vm3210_vm1  ;;  %vm3393_vm1 = vcmp.eq.s32.totalorder %v23280_v39, %v23270_v19  ;;  %v23283_v39 = vld [vmem:[#allocation41_spill] sm:$0xff] }
 0x324   :  { %12675 = vmatprep.subr.msk.bf16.mxu1 %vm12674_vm5, %v23092_v38  ;;  %vm3455_vm5 = vcmp.eq.s32.totalorder %v18075_v44, %v23217_v41  ;;  %vm12724_vm13 = vmpackc.low %vm3255_vm8, %vm3252_vm4  ;;  %vm3457_vm4 = vcmp.eq.s32.totalorder %v18078_v32, %v23219_v60 }
 0x325   :  { %14321 = vmatpush3.bf16.msk.msra.mxu0 %vm12704_vm10, %v23092_v38  ;;  %vm3204_vm10 = vcmp.eq.s32.totalorder %v23277_v45, %v23270_v19  ;;  %vm12680_vm3 = vmpackc.low %vm3463_vm2, %vm3460_vm12 }
 0x326   :  { %14322 = vmatprep.subr.msk.bf16.mxu0 %vm12722_vm0, %v23092_v38  ;;  %vm3390_vm0 = vcmp.eq.s32.totalorder %v23279_v21, %v23270_v19  ;;  %vm12682_vm6 = vmpackc.low %vm3458_vm9, %vm3455_vm5  ;;  %v23282_v21 = vld [vmem:[#allocation96_spill] sm:$0xff]  ;;  %vm3345_vm5 = vcmp.eq.s32.totalorder %v23284_v3, %v23270_v19  ;;  %v23287_v3 = vld [vmem:[#allocation97_spill] sm:$0xff] }
 0x327   :  { %12677 = vmatpush2.bf16.msk.msra.mxu1 %vm12676_vm15, %v23092_v38  ;;  %vm3454_vm15 = vcmp.eq.s32.totalorder %v18075_v44, %v23219_v60  ;;  %vm12708_vm8 = vmpackc.low %vm3207_vm11, %vm3204_vm10  ;;  %vm3452_vm12 = vcmp.eq.s32.totalorder %v23282_v21, %v23217_v41  ;;  %vm3387_vm10 = vcmp.eq.s32.totalorder %v23286_v31, %v23270_v19  ;;  %v23289_v31 = vld [vmem:[#allocation30_spill] sm:$0xff] }
 0x328   :  { %12679 = vmatprep.subr.msk.bf16.mxu1 %vm12678_vm14, %v23092_v38  ;;  %vm3449_vm14 = vcmp.eq.s32.totalorder %v23281_v34, %v23217_v41  ;;  %vm12742_vm2 = vmpackc.low %vm3393_vm1, %vm3390_vm0  ;;  %vm3451_vm0 = vcmp.eq.s32.totalorder %v23282_v21, %v23219_v60 }
 0x329   :  { %14323 = vmatpush3.bf16.msk.msra.mxu0 %vm12706_vm7, %v23092_v38  ;;  %vm3342_vm7 = vcmp.eq.s32.totalorder %v23283_v39, %v23270_v19  ;;  %vm12684_vm9 = vmpackc.low %vm3457_vm4, %vm3454_vm15  ;;  %v23290_v39 = vld [vmem:[#allocation54_spill] sm:$0xff] }
 0x32a   :  { %14324 = vmatprep.subr.msk.bf16.mxu0 %vm12724_vm13, %v23092_v38  ;;  %vm3384_vm13 = vcmp.eq.s32.totalorder %v23285_v6, %v23270_v19  ;;  %vm12686_vm11 = vmpackc.low %vm3452_vm12, %vm3449_vm14  ;;  %v23288_v6 = vld [vmem:[#allocation98_spill] sm:$0xff]  ;;  %vm3339_vm14 = vcmp.eq.s32.totalorder %v23290_v39, %v23270_v19 }
 0x32b   :  { %12681 = vmatpush2.bf16.msk.msra.mxu1 %vm12680_vm3, %v23092_v38  ;;  %vm3448_vm3 = vcmp.eq.s32.totalorder %v23281_v34, %v23219_v60  ;;  %vm12726_vm1 = vmpackc.low %vm3345_vm5, %vm3342_vm7  ;;  %vm3446_vm15 = vcmp.eq.s32.totalorder %v23288_v6, %v23217_v41  ;;  %vm3381_vm7 = vcmp.eq.s32.totalorder %v23255_v2, %v23270_v19  ;;  %v23293_v2 = vld [vmem:[#allocation59_spill] sm:$0xff] }
 0x32c   :  { %12683 = vmatprep.subr.msk.bf16.mxu1 %vm12682_vm6, %v23092_v38  ;;  %vm3443_vm6 = vcmp.eq.s32.totalorder %v23287_v3, %v23217_v41  ;;  %vm12744_vm4 = vmpackc.low %vm3387_vm10, %vm3384_vm13  ;;  %vm3445_vm13 = vcmp.eq.s32.totalorder %v23288_v6, %v23219_v60 }
 0x32d   :  { %14325 = vmatpush3.bf16.msk.msra.mxu0 %vm12708_vm8, %v23092_v38  ;;  %vm3336_vm8 = vcmp.eq.s32.totalorder %v23289_v31, %v23270_v19  ;;  %vm12688_vm12 = vmpackc.low %vm3451_vm0, %vm3448_vm3  ;;  %vm3489_vm3 = vcmp.eq.s32.totalorder %v23272_v10, %v23270_v19  ;;  %v23295_v10 = vld [vmem:[#allocation72_spill] sm:$0xff] }
 0x32e   :  { %14338 = vmatprep.subr.msk.bf16.mxu0 %vm12742_vm2, %v23092_v38  ;;  %vm3378_vm2 = vcmp.eq.s32.totalorder %v23254_v56, %v23270_v19  ;;  %vm12690_vm5 = vmpackc.low %vm3446_vm15, %vm3443_vm6  ;;  %v23296_v56 = vld [vmem:[#allocation73_spill] sm:$0xff] }
 0x32f   :  { %12685 = vmatpush2.bf16.msk.msra.mxu1 %vm12684_vm9, %v23092_v38  ;;  %vm3442_vm9 = vcmp.eq.s32.totalorder %v23287_v3, %v23219_v60  ;;  %vm12728_vm10 = vmpackc.low %vm3339_vm14, %vm3336_vm8  ;;  %v23292_v60 = vld [vmem:[#allocation9_spill] sm:$0xff] }
 0x330   :  { %12687 = vmatprep.subr.msk.bf16.mxu1 %vm12686_vm11, %v23092_v38  ;;  %4108 = vmatmul.mubr.bf16.vlgmr.msra.gmra.mxu0 %v23261_v9  ;;  %v2930_v54 = vpop.f32.mrf.mxu0  ;;  %vm3486_vm11 = vcmp.eq.s32.totalorder %v23271_v37, %v23270_v19  ;;  %vm12746_vm0 = vmpackc.low %vm3381_vm7, %vm3378_vm2  ;;  %vm3333_vm6 = vcmp.eq.s32.totalorder %v23292_v60, %v23270_v19  ;;  %v23294_v37 = vld [vmem:[#allocation46_spill] sm:$0xff]  ;;  %vm3441_vm2 = vcmp.eq.s32.totalorder %v23296_v56, %v23270_v19  ;;  %v23300_v56 = vld [vmem:[#allocation27_spill] sm:$0xff] }
 0x331   :  { %4115 = vmatprep.mubr.bf16.mxu0 %v23262_v15  ;;  %14339 = vmatpush3.bf16.msk.msra.mxu0 %vm12726_vm1, %v23092_v38  ;;  %v23291_v15 = vld [vmem:[#allocation5_spill] sm:$0xff]  ;;  %vm12692_vm15 = vmpackc.low %vm3445_vm13, %vm3442_vm9  ;;  %vm3375_vm8 = vcmp.eq.s32.totalorder %v23294_v37, %v23270_v19  ;;  %vm3483_vm9 = vcmp.eq.s32.totalorder %v23274_v33, %v23270_v19  ;;  %v23311_v33 = vld [vmem:[#allocation75_spill] sm:$0xff] }
 0x332   :  { %v2932_v9 = vpop.f32.mrf.mxu0  ;;  %14340 = vmatprep.subr.msk.bf16.mxu0 %vm12744_vm4, %v23092_v38  ;;  %vm3330_vm1 = vcmp.eq.s32.totalorder %v23291_v15, %v23270_v19  ;;  %vm3372_vm4 = vcmp.eq.s32.totalorder %v23293_v2, %v23270_v19  ;;  %vm12774_vm14 = vmpackc.low %vm3489_vm3, %vm3486_vm11  ;;  %v23299_v2 = vld [vmem:[#allocation51_spill] sm:$0xff]  ;;  %vm3327_vm11 = vcmp.eq.s32.totalorder %v23300_v56, %v23270_v19 }
 0x333   :  { %12689 = vmatpush2.bf16.msk.msra.mxu1 %vm12688_vm12, %v23092_v38  ;;  %vm3438_vm12 = vcmp.eq.s32.totalorder %v23295_v10, %v23270_v19  ;;  %vm12730_vm7 = vmpackc.low %vm3333_vm6, %vm3330_vm1  ;;  %vm3369_vm1 = vcmp.eq.s32.totalorder %v23260_v12, %v23270_v19  ;;  %v23318_v10 = vld [vmem:[#allocation79_spill] sm:$0xff] }
 0x334   :  { %12691 = vmatprep.subr.msk.bf16.mxu1 %vm12690_vm5, %v23092_v38  ;;  %v2934_v41 = vpop.f32.mrf.mxu0  ;;  %vm3480_vm5 = vcmp.eq.s32.totalorder %v23273_v53, %v23270_v19  ;;  %vm18981_vm13 = vmpackc.low %vm3375_vm8, %vm3372_vm4  ;;  %v23322_v53 = vld [vmem:[#allocation82_spill] sm:$0xff] }
 0x335   :  { %14341 = vmatpush3.bf16.msk.msra.mxu0 %vm12728_vm10, %v23092_v38  ;;  %vm3324_vm10 = vcmp.eq.s32.totalorder %v23299_v2, %v23270_v19  ;;  %vm18994_vm3 = vmpackc.low %vm3441_vm2, %vm3438_vm12  ;;  %vm3477_vm12 = vcmp.eq.s32.totalorder %v23276_v11, %v23270_v19  ;;  %v23314_v2 = vld [vmem:[#allocation47_spill] sm:$0xff]  ;;  %v23319_v11 = vld [vmem:[#allocation48_spill] sm:$0xff] }
 0x336   :  { %v18973_v60 = vpop.f32.mrf.mxu0  ;;  %14342 = vmatprep.subr.msk.bf16.mxu0 %vm12746_vm0, %v23092_v38  ;;  %vm3366_vm0 = vcmp.eq.s32.totalorder %v23259_v16, %v23270_v19  ;;  %vm19012_vm6 = vmpackc.low %vm3483_vm9, %vm3480_vm5  ;;  %vm3321_vm5 = vcmp.eq.s32.totalorder %v23315_v42, %v23270_v19 }
 0x337   :  { %12693 = vmatpush2.bf16.msk.msra.mxu1 %vm12692_vm15, %v23092_v38  ;;  %vm3432_vm15 = vcmp.eq.s32.totalorder %v23306_v49, %v23270_v19  ;;  %vm19030_vm8 = vmpackc.low %vm3327_vm11, %vm3324_vm10  ;;  %vm3363_vm10 = vcmp.eq.s32.totalorder %v23264_v17, %v23270_v19  ;;  %v23317_v49 = vld [vmem:[#allocation78_spill] sm:$0xff]  ;;  %v4236_v17 = vand.u32 7, %v23277_v45 }
 0x338   :  { %4116 = vmatmul.mubr.bf16.gmra.mxu0 %v23267_v5  ;;  %14366 = vmatprep.subr.msk.bf16.mxu1 %vm12774_vm14, %v23092_v38  ;;  %v2940_v15 = vpop.f32.mrf.mxu0  ;;  %v2981_v39 = vpop.f32.mrf.mxu1  ;;  %v23303_v5 = vld [vmem:[#allocation85_spill] sm:$0xff]  ;;  %vm3474_vm14 = vcmp.eq.s32.totalorder %v23275_v24, %v23270_v19  ;;  %vm19050_vm2 = vmpackc.low %vm3369_vm1, %vm3366_vm0  ;;  %vm3429_vm0 = vcmp.eq.s32.totalorder %v23318_v10, %v23270_v19  ;;  %v23327_v10 = vld [vmem:[#allocation8_spill] sm:$0xff] }
 0x339   :  { %v19002_v36 = vadd.f32 %v2981_v39, %v2930_v54  ;;  %14343 = vmatpush3.bf16.msk.msra.mxu0 %vm12730_vm7, %v23092_v38  ;;  %4155 = vmatprep.mubr.bf16.mxu0 %v23303_v5  ;;  %v23307_v54 = vld [vmem:[#allocation77_spill] sm:$0xff]  ;;  %v23308_v39 = vld [vmem:[#allocation88_spill] sm:$0xff]  ;;  %vm3318_vm7 = vcmp.eq.s32.totalorder %v23314_v2, %v23270_v19  ;;  %vm12778_vm11 = vmpackc.low %vm3477_vm12, %vm3474_vm14 }
 0x33a   :  { %vm3435_vm4 = vcmp.eq.s32.totalorder %v23307_v54, %v23270_v19  ;;  %4057 = vmatmul.mubr.bf16.vlgmr.msra.gmra.mxu1 %v23308_v39  ;;  %v2942_v7 = vpop.f32.mrf.mxu0  ;;  %v2983_v5 = vpop.f32.mrf.mxu1  ;;  %14344 = vmatprep.subr.msk.bf16.mxu0 %vm18981_vm13, %v23092_v38  ;;  %vm12734_vm1 = vmpackc.low %vm3321_vm5, %vm3318_vm7  ;;  %v23320_v24 = vld [vmem:[#allocation45_spill] sm:$0xff]  ;;  %vm3357_vm7 = vcmp.eq.s32.totalorder %v23266_v35, %v23270_v19 }
 0x33b   :  { %4066 = vmatprep.mubr.bf16.mxu1 %v23311_v33  ;;  %14367 = vmatpush3.bf16.msk.msra.mxu1 %vm18994_vm3, %v23092_v38  ;;  %v19042_v37 = vadd.f32 %v2983_v5, %v2932_v9  ;;  %vm12760_vm9 = vmpackc.low %vm3435_vm4, %vm3432_vm15  ;;  %v23316_v5 = vld [vmem:[#allocation68_spill] sm:$0xff]  ;;  %vm3426_vm3 = vcmp.eq.s32.totalorder %v23317_v49, %v23270_v19  ;;  %vm3471_vm15 = vcmp.eq.s32.totalorder %v18015_v28, %v23270_v19  ;;  %v23321_v28 = vld [vmem:[#allocation81_spill] sm:$0xff] }
 0x33c   :  { %14368 = vmatprep.subr.msk.bf16.mxu1 %vm19012_vm6, %v23092_v38  ;;  %v2944_v31 = vpop.f32.mrf.mxu0  ;;  %v2985_v9 = vpop.f32.mrf.mxu1  ;;  %vm3360_vm13 = vcmp.eq.s32.totalorder %v23316_v5, %v23270_v19  ;;  %vm3468_vm6 = vcmp.eq.s32.totalorder %v18012_v27, %v23270_v19  ;;  %vm3315_vm14 = vcmp.eq.s32.totalorder %v23320_v24, %v23270_v19  ;;  %vm12762_vm12 = vmpackc.low %vm3429_vm0, %vm3426_vm3  ;;  %vm3465_vm3 = vcmp.eq.s32.totalorder %v18041_v14, %v23270_v19  ;;  %v23324_v49 = vld [vmem:[#allocation26_spill] sm:$0xff] }
 0x33d   :  { %v19071_v12 = vadd.f32 %v2985_v9, %v2934_v41  ;;  %14345 = vmatpush3.bf16.msk.msra.mxu0 %vm19030_vm8, %v23092_v38  ;;  %vm12752_vm4 = vmpackc.low %vm3363_vm10, %vm3360_vm13  ;;  %vm3312_vm8 = vcmp.eq.s32.totalorder %v23319_v11, %v23270_v19  ;;  %vm3423_vm13 = vcmp.eq.s32.totalorder %v23322_v53, %v23270_v19  ;;  %v23323_v31 = vld [vmem:[#allocation21_spill] sm:$0xff]  ;;  %v4237_v5 = vand.u32 7, %v23278_v26 }
 0x33e   :  { %v2945_v54 = vpop.f32.mrf.mxu0  ;;  %v19086_v41 = vpop.f32.mrf.mxu1  ;;  %14346 = vmatprep.subr.msk.bf16.mxu0 %vm19050_vm2, %v23092_v38  ;;  %vm3354_vm2 = vcmp.eq.s32.totalorder %v23265_v25, %v23270_v19  ;;  %vm12780_vm5 = vmpackc.low %vm3471_vm15, %vm3468_vm6 }
 0x33f   :  { %14369 = vmatpush3.bf16.msk.msra.mxu1 %vm12760_vm9, %v23092_v38  ;;  %vm3420_vm9 = vcmp.eq.s32.totalorder %v23321_v28, %v23270_v19  ;;  %vm12736_vm10 = vmpackc.low %vm3315_vm14, %vm3312_vm8  ;;  %vm3351_vm8 = vcmp.eq.s32.totalorder %v23269_v20, %v23270_v19 }
 0x340   :  { %14370 = vmatprep.subr.msk.bf16.mxu1 %vm12778_vm11, %v23092_v38  ;;  %v2991_v56 = vpop.f32.mrf.mxu1  ;;  %vm3462_vm11 = vcmp.eq.s32.totalorder %v18038_v22, %v23270_v19  ;;  %vm12754_vm0 = vmpackc.low %vm3357_vm7, %vm3354_vm2  ;;  %v23325_v22 = vld [vmem:[#allocation42_spill] sm:$0xff] }
 0x341   :  { %v19111_v27 = vadd.f32 %v2991_v56, %v2940_v15  ;;  %14347 = vmatpush3.bf16.msk.msra.mxu0 %vm12734_vm1, %v23092_v38  ;;  %vm3306_vm1 = vcmp.eq.s32.totalorder %v23324_v49, %v23270_v19  ;;  %vm3309_vm6 = vcmp.eq.s32.totalorder %v23325_v22, %v23270_v19  ;;  %vm12764_vm15 = vmpackc.low %vm3423_vm13, %vm3420_vm9  ;;  %vm3459_vm9 = vcmp.eq.s32.totalorder %v18078_v32, %v23270_v19 }
 0x342   :  { %4067 = vmatmul.mubr.bf16.gmra.mxu1 %v23323_v31  ;;  %v2993_v9 = vpop.f32.mrf.mxu1  ;;  %14348 = vmatprep.subr.msk.bf16.mxu0 %vm12752_vm4, %v23092_v38  ;;  %vm3348_vm4 = vcmp.eq.s32.totalorder %v23268_v52, %v23270_v19  ;;  %vm12782_vm14 = vmpackc.low %vm3465_vm3, %vm3462_vm11 }
 0x343   :  { %14371 = vmatpush3.bf16.msk.msra.mxu1 %vm12762_vm12, %v23092_v38  ;;  %4203 = vmatprep.mubr.bf16.mxu1 %v17750_v57  ;;  %v19129_v15 = vadd.f32 %v2993_v9, %v2942_v7  ;;  %vm3414_vm12 = vcmp.eq.s32.totalorder %v17538_v43, %v23270_v19  ;;  %v23326_v7 = vld [vmem:[#allocation84_spill] sm:$0xff]  ;;  %vm12738_vm7 = vmpackc.low %vm3309_vm6, %vm3306_vm1  ;;  %v23328_v43 = vld [vmem:[#allocation23_spill] sm:$0xff]  ;;  %vm3408_vm1 = vcmp.eq.s32.totalorder %v17635_v29, %v23270_v19 }
 0x344   :  { %14372 = vmatprep.subr.msk.bf16.mxu1 %vm12780_vm5, %v23092_v38  ;;  %v2995_v14 = vpop.f32.mrf.mxu1  ;;  %vm3417_vm2 = vcmp.eq.s32.totalorder %v23326_v7, %v23270_v19  ;;  %vm3456_vm5 = vcmp.eq.s32.totalorder %v18075_v44, %v23270_v19  ;;  %vm12756_vm13 = vmpackc.low %vm3351_vm8, %vm3348_vm4  ;;  %vm3303_vm11 = vcmp.eq.s32.totalorder %v23328_v43, %v23270_v19  ;;  %vm3411_vm6 = vcmp.eq.s32.totalorder %v17638_v30, %v23270_v19 }
 0x345   :  { %14349 = vmatpush3.bf16.msk.msra.mxu0 %vm12736_vm10, %v23092_v38  ;;  %vm3300_vm10 = vcmp.eq.s32.totalorder %v23327_v10, %v23270_v19  ;;  %vm12766_vm3 = vmpackc.low %vm3417_vm2, %vm3414_vm12  ;;  %vm3450_vm4 = vcmp.eq.s32.totalorder %v23281_v34, %v23270_v19  ;;  %vm3453_vm8 = vcmp.eq.s32.totalorder %v23282_v21, %v23270_v19  ;;  %vm3402_vm2 = vcmp.eq.s32.totalorder %v17718_v58, %v23270_v19 }
 0x346   :  { %v2996_v57 = vpop.f32.mrf.mxu1  ;;  %14350 = vmatprep.subr.msk.bf16.mxu0 %vm12754_vm0, %v23092_v38  ;;  %vm12784_vm0 = vmpackc.low %vm3459_vm9, %vm3456_vm5  ;;  %vm3444_vm5 = vcmp.eq.s32.totalorder %v23287_v3, %v23270_v19  ;;  %vm3447_vm9 = vcmp.eq.s32.totalorder %v23288_v6, %v23270_v19  ;;  %v23329_v44 = vmov 0  }
 0x347   :  { %14373 = vmatpush3.bf16.msk.msra.mxu1 %vm12764_vm15, %v23092_v38  ;;  %vm12740_vm15 = vmpackc.low %vm3303_vm11, %vm3300_vm10  ;;  %vm3396_vm11 = vcmp.eq.s32.totalorder %v17810_v4, %v23270_v19 }
 0x348   :  { %14374 = vmatprep.subr.msk.bf16.mxu1 %vm12782_vm14, %v23092_v38  ;;  %vm12768_vm14 = vmpackc.low %vm3411_vm6, %vm3408_vm1  ;;  %vm4251_vm1 = vcmask 1043456  }
 0x349   :  { %14351 = vmatpush3.bf16.msk.msra.mxu0 %vm12738_vm7, %v23092_v38  ;;  %vm12786_vm12 = vmpackc.low %vm3453_vm8, %vm3450_vm4  ;;  %vm3405_vm7 = vcmp.eq.s32.totalorder %v17732_v0, %v23270_v19 }
 0x34a   :  { %14352 = vmatprep.subr.msk.bf16.mxu0 %vm12756_vm13, %v23092_v38  ;;  %vm12770_vm13 = vmpackc.low %vm3405_vm7, %vm3402_vm2 }
 0x34b   :  { %14375 = vmatpush3.bf16.msk.msra.mxu1 %vm12766_vm3, %v23092_v38  ;;  %vm12788_vm10 = vmpackc.low %vm3447_vm9, %vm3444_vm5  ;;  %vm3399_vm3 = vcmp.eq.s32.totalorder %v17813_v8, %v23270_v19 }
 0x34c   :  { %14376 = vmatprep.subr.msk.bf16.mxu1 %vm12784_vm0, %v23092_v38  ;;  %vm12772_vm0 = vmpackc.low %vm3399_vm3, %vm3396_vm11 }
 0x34d   :  { %14353 = vmatpush3.bf16.msk.msra.mxu0 %vm12740_vm15, %v23092_v38 }
 0x34f   :  { %14377 = vmatpush3.bf16.msk.msra.mxu1 %vm12768_vm14, %v23092_v38  ;;  %vm4247_vm14 = vcmask 195584  }
 0x350   :  { %4156 = vmatmul.mubr.bf16.vlgmr.msra.gmra.mxu0 %v23224_v63  ;;  %14378 = vmatprep.subr.msk.bf16.mxu1 %vm12786_vm12, %v23092_v38  ;;  %vm15753_vm12 = vmmov 0  }
 0x351   :  { %4163 = vmatprep.mubr.bf16.mxu0 %v17677_v18 }
 0x353   :  { %14379 = vmatpush3.bf16.msk.msra.mxu1 %vm12770_vm13, %v23092_v38 }
 0x354   :  { %14380 = vmatprep.subr.msk.bf16.mxu1 %vm12788_vm10, %v23092_v38 }
 0x357   :  { %14381 = vmatpush3.bf16.msk.msra.mxu1 %vm12772_vm0, %v23092_v38  ;;  %vm8539_vm0 = vcmask 130048  }
 0x358   :  { %v14242_v32 = vpop.f32.mrf.mxu1  ;;  %4164 = vmatmul.mubr.bf16.gmra.mxu0 %v17772_v48 }
 0x359   :  { %4293 = vmatprep.mubr.bf16.mxu0 %v23329_v44 }
 0x35a   :  { %4204 = vmatmul.mubr.bf16.vlgmr.msra.gmra.mxu1 %v23308_v39  ;;  %v14243_v18 = vpop.f32.mrf.mxu1 }
 0x35b   :  { %4211 = vmatprep.mubr.bf16.mxu1 %v23311_v33  ;;  %v14244_v29 = vadd.f32 %v14243_v18, %v14242_v32 }
 0x35c   :  { %v14245_v30 = vpop.f32.mrf.mxu1 }
 0x35e   :  { %v14246_v19 = vpop.f32.mrf.mxu1 }
 0x360   :  { %v14248_v58 = vpop.f32.mrf.mxu1 }
 0x362   :  { %4212 = vmatmul.mubr.bf16.gmra.mxu1 %v23323_v31  ;;  %v14249_v0 = vpop.f32.mrf.mxu1 }
 0x363   :  { %v14250_v4 = vadd.f32 %v14249_v0, %v14248_v58  ;;  %4486 = vmatprep.mubr.bf16.mxu1 %v23329_v44 }
 0x364   :  { %v14251_v8 = vpop.f32.mrf.mxu1 }
 0x366   :  { %v14252_v3 = vpop.f32.mrf.mxu1 }
 0x370   :  { %v3032_v48 = vpop.f32.mrf.mxu0 }
 0x371   :  { %v19207_v6 = vadd.f32 %v3032_v48, %v19002_v36 }
 0x372   :  { %v3034_v21 = vpop.f32.mrf.mxu0 }
 0x373   :  { %v19210_v34 = vadd.f32 %v3034_v21, %v19042_v37 }
 0x374   :  { %v3036_v63 = vpop.f32.mrf.mxu0 }
 0x375   :  { %v19213_v39 = vadd.f32 %v3036_v63, %v19071_v12  ;;  %v14247_v12 = vadd.f32 %v14246_v19, %v14245_v30 }
 0x376   :  { %v19215_v33 = vpop.f32.mrf.mxu0 }
 0x378   :  { %v3042_v54 = vpop.f32.mrf.mxu0 }
 0x379   :  { %v19218_v56 = vadd.f32 %v3042_v54, %v19111_v27  ;;  %v14270_v28 = vpop.f32.mrf.mxu1 }
 0x37a   :  { %v3044_v53 = vpop.f32.mrf.mxu0 }
 0x37b   :  { %v19221_v31 = vadd.f32 %v3044_v53, %v19129_v15  ;;  %v14271_v36 = vpop.f32.mrf.mxu1 }
 0x37c   :  { %v14272_v9 = vadd.f32 %v14271_v36, %v14270_v28  ;;  %v3046_v14 = vpop.f32.mrf.mxu0 }
 0x37d   :  { %v14273_v37 = vpop.f32.mrf.mxu1 }
 0x37e   :  { %v3132_v7 = vadd.f32 %v14272_v9, %v14244_v29  ;;  %v3047_v57 = vpop.f32.mrf.mxu0 }
 0x37f   :  { %v14274_v32 = vpop.f32.mrf.mxu1 }
 0x380   :  { %v14275_v18 = vadd.f32 %v14274_v32, %v14273_v37 }
 0x381   :  { %v14276_v58 = vpop.f32.mrf.mxu1 }
 0x382   :  { %v3135_v0 = vadd.f32 %v14275_v18, %v14247_v12 }
 0x383   :  { %v14277_v8 = vpop.f32.mrf.mxu1 }
 0x384   :  { %v14278_v3 = vadd.f32 %v14277_v8, %v14276_v58 }
 0x385   :  { %v14279_v27 = vpop.f32.mrf.mxu1 }
 0x386   :  { %v3140_v48 = vadd.f32 %v14278_v3, %v14250_v4 }
 0x387   :  { %v14280_v21 = vpop.f32.mrf.mxu1 }
 0x390   :  { %v14298_v63 = vpop.f32.mrf.mxu0 }
 0x392   :  { %v14299_v54 = vpop.f32.mrf.mxu0 }
 0x393   :  { %v14300_v15 = vadd.f32 %v14299_v54, %v14298_v63 }
 0x394   :  { %v14301_v53 = vpop.f32.mrf.mxu0 }
 0x395   :  { %v19223_v20 = vadd.f32 %v14300_v15, %v3132_v7 }
 0x396   :  { %v14302_v28 = vpop.f32.mrf.mxu0 }
 0x397   :  { %v14303_v36 = vadd.f32 %v14302_v28, %v14301_v53 }
 0x398   :  { %v14304_v29 = vpop.f32.mrf.mxu0 }
 0x399   :  { %v19225_v9 = vadd.f32 %v14303_v36, %v3135_v0 }
 0x39a   :  { %v14305_v30 = vpop.f32.mrf.mxu0 }
 0x39b   :  { %v14306_v19 = vadd.f32 %v14305_v30, %v14304_v29 }
 0x39c   :  { %v14307_v14 = vpop.f32.mrf.mxu0 }
 0x39d   :  { %v19227_v37 = vadd.f32 %v14306_v19, %v3140_v48  ;;  %v4234_v14 = vshra.s32 %v23277_v45, 3 }
 0x39e   :  { %v14308_v57 = vpop.f32.mrf.mxu0 }
 0x39f   :  { %v4238_v16 = vmul.u32 12, %v4234_v14 }
 0x3ba   :  { %v3956_v32 = vpop.f32.mrf.mxu1 }
 0x3bc   :  { %v3958_v4 = vpop.f32.mrf.mxu1 }
 0x3be   :  { %v3960_v12 = vpop.f32.mrf.mxu1 }
 0x3c0   :  { %v3962_v18 = vpop.f32.mrf.mxu1 }
 0x3c2   :  { %v3966_v58 = vpop.f32.mrf.mxu1 }
 0x3c4   :  { %v3968_v8 = vpop.f32.mrf.mxu1 }
 0x3c6   :  { %v3970_v3 = vpop.f32.mrf.mxu1 }
 0x3c7   :  { %v4235_v3 = vshra.s32 %v23278_v26, 3 }
 0x3c8   :  { %v3971_v7 = vpop.f32.mrf.mxu1 }
 0x3c9   :  { %v4239_v49 = vmul.u32 12, %v4235_v3 }
 0x3d0   :  { %v4007_v27 = vpop.f32.mrf.mxu0 }
 0x3d1   :  { %v4008_v57 = vadd.f32 %v4007_v27, %v3956_v32 }
 0x3d2   :  { %v4009_v21 = vpop.f32.mrf.mxu0 }
 0x3d4   :  { %v4011_v63 = vpop.f32.mrf.mxu0 }
 0x3d5   :  { %v4012_v43 = vadd.f32 %v4011_v63, %v3960_v12  ;;  %v2988_v12 = vadd.f32 %v19086_v41, %v18973_v60 }
 0x3d6   :  { %v4013_v54 = vpop.f32.mrf.mxu0 }
 0x3d8   :  { %v4017_v0 = vpop.f32.mrf.mxu0 }
 0x3da   :  { %v4019_v15 = vpop.f32.mrf.mxu0 }
 0x3dc   :  { %v4021_v53 = vpop.f32.mrf.mxu0 }
 0x3dd   :  { %v4010_v53 = vadd.f32 %v4009_v21, %v3958_v4  ;;  %v19247_v4 = vadd.s32 %v4238_v16, %v4236_v17  ;;  %v4014_v21 = vadd.f32 %v4013_v54, %v3962_v18  ;;  %v3039_v16 = vadd.f32 %v19215_v33, %v2988_v12  ;;  %v14590_v54 = vld [vmem:[%s22613_s3 + $0x3e4] ss:$16 sps:$4 sm:$0xff]  }
 0x3de   :  { %v4022_v28 = vpop.f32.mrf.mxu0 }
 0x3f0   :  { %v19229_v36 = vpop.f32.mrf.mxu0 }
 0x3f2   :  { %v19231_v48 = vpop.f32.mrf.mxu0 }
 0x3f4   :  { %v19233_v29 = vpop.f32.mrf.mxu0 }
 0x3f6   :  { %v19235_v30 = vpop.f32.mrf.mxu0 }
 0x3f8   :  { %v19237_v19 = vpop.f32.mrf.mxu0 }
 0x3fa   :  { %v4058_v7 = vpop.f32.mrf.mxu1  ;;  %v19241_v52 = vpop.f32.mrf.mxu0 }
 0x3fb   :  { %v4059_v28 = vadd.f32 %v4058_v7, %v4008_v57  ;;  %v19250_v7 = vadd.s32 %v4239_v49, %v4237_v5 }
 0x3fc   :  { %v4060_v35 = vpop.f32.mrf.mxu1  ;;  %v14335_v25 = vpop.f32.mrf.mxu0 }
 0x3fd   :  { %v4219_v10 = vmax.f32 %v19207_v6, %v4059_v28  ;;  %v4061_v22 = vadd.f32 %v4060_v35, %v4010_v53  ;;  %v4018_v25 = vadd.f32 %v4017_v0, %v3966_v58  ;;  %v4020_v35 = vadd.f32 %v4019_v15, %v3968_v8  ;;  %v14588_v28 = vld [vmem:[%s22613_s3 + $0x3e0] ss:$16 sps:$4 sm:$0xff]  }
 0x3fe   :  { %v4062_v32 = vpop.f32.mrf.mxu1  ;;  %v14336_v27 = vpop.f32.mrf.mxu0  ;;  %v4445_v5 = vadd.s32 1, %v19250_v7 }
 0x3ff   :  { %v4220_v24 = vmax.f32 %v19210_v34, %v4061_v22  ;;  %v4063_v11 = vadd.f32 %v4062_v32, %v4012_v43  ;;  %v4444_v43 = vadd.s32 1, %v19247_v4  ;;  %v14593_v32 = vld [vmem:[%s22613_s3 + $0x3c4] ss:$16 sps:$4 sm:$0xff]  }
 0x400   :  { %v4064_v42 = vpop.f32.mrf.mxu1 }
 0x401   :  { %v4222_v57 = vmax.f32 %v19213_v39, %v4063_v11  ;;  %v4065_v14 = vadd.f32 %v4064_v42, %v4014_v21 }
 0x402   :  { %v4068_v6 = vpop.f32.mrf.mxu1 }
 0x403   :  { %v19254_v63 = vpack.c.bf16 %v4222_v57, %v4219_v10  ;;  %v4069_v3 = vadd.f32 %v4068_v6, %v4018_v25  ;;  %v4223_v49 = vmax.f32 %v3039_v16, %v4065_v14  ;;  %v23330_v10 = vld [vmem:[#allocation11_spill] sm:$0xff] }
 0x404   :  { %v4070_v22 = vpop.f32.mrf.mxu1  ;;  %vm4446_vm6 = vcmp.eq.s32.totalorder %v23330_v10, %v4444_v43  ;;  %vm4447_vm15 = vcmp.eq.s32.totalorder %v23330_v10, %v4445_v5  ;;  %vm4242_vm4 = vcmp.eq.s32.totalorder %v23330_v10, %v19247_v4  ;;  %vm4243_vm8 = vcmp.eq.s32.totalorder %v23330_v10, %v19250_v7  ;;  %v14591_v25 = vld [vmem:[%s22613_s3 + $0x3c0] ss:$16 sps:$4 sm:$0xff]   ;;  %v14596_v57 = vld [vmem:[%s22613_s3 + $0x3a4] ss:$16 sps:$4 sm:$0xff]  }
 0x405   :  { %v4225_v17 = vmax.f32 %v19218_v56, %v4069_v3  ;;  %v4071_v34 = vadd.f32 %v4070_v22, %v4020_v35  ;;  %v19269_v33 = vpack.c.bf16 %v4223_v49, %v4220_v24  ;;  %v14594_v35 = vld [vmem:[%s22613_s3 + $0x3a0] ss:$16 sps:$4 sm:$0xff]   ;;  %v14599_v14 = vld [vmem:[%s22613_s3 + $0x384] ss:$16 sps:$4 sm:$0xff]   ;;  %v14328_v5 = vadd.f32 %v19231_v48, %v19229_v36 }
 0x406   :  { %v4072_v11 = vpop.f32.mrf.mxu1 }
 0x407   :  { %v4231_v39 = vpack.c.bf16 %v4225_v17, %v4225_v17  ;;  %v4226_v60 = vmax.f32 %v19221_v31, %v4071_v34  ;;  %v23331_v31 = vmov 0.0   ;;  %v14597_v34 = vld [vmem:[%s22613_s3 + $0x380] ss:$16 sps:$4 sm:$0xff]  }
 0x408   :  { %v4073_v41 = vpop.f32.mrf.mxu1  ;;  %v4448_v18 = vsel %vm4446_vm6, 1.0, %v23331_v31  ;;  %v4449_v58 = vsel %vm4447_vm15, 1.0, %v23331_v31  ;;  %v4244_v24 = vsel %vm4242_vm4, 1.0, %v23331_v31  ;;  %v4245_v8 = vsel %vm4243_vm8, 1.0, %v23331_v31 }
 0x409   :  { %v19262_v42 = vpack.c.bf16 %v4226_v60, %v4226_v60  ;;  %v19272_v56 = vsel %vm4251_vm1, %v4231_v39, 0  ;;  %v19289_v0 = vpack.c.bf16 %v4449_v58, %v4448_v18  ;;  %v19291_v15 = vpack.c.bf16 %v4245_v8, %v4244_v24  ;;  %v14602_v39 = vld [vmem:[%s22613_s3 + $0x364] ss:$16 sps:$4 sm:$0xff]   ;;  %v14600_v8 = vld [vmem:[%s22613_s3 + $0x360] ss:$16 sps:$4 sm:$0xff]  }
 0x40a   :  { %v14331_v18 = vadd.f32 %v19235_v30, %v19233_v29  ;;  %v14334_v29 = vadd.f32 %v19241_v52, %v19237_v19 }
 0x40b   :  { %12790 = vmatprep.subr.msk.bf16.mxu0 %vm4251_vm1, %v19262_v42  ;;  %12793 = vmatprep.subr.msk.bf16.mxu1 %vm4251_vm1, %v19262_v42 }
 0x40c   :  { %4274 = vmatpush1.bf16.msra.mxu0 %v19272_v56  ;;  %4467 = vmatpush1.bf16.msra.mxu1 %v19272_v56 }
 0x40d   :  { %4275 = vmatprep.subr.bf16.mxu0 %v19269_v33  ;;  %4468 = vmatprep.subr.bf16.mxu1 %v19269_v33 }
 0x410   :  { %4276 = vmatpush1.bf16.msra.mxu0 %v19254_v63  ;;  %4469 = vmatpush1.bf16.msra.mxu1 %v19254_v63  ;;  %v14354_v53 = vpop.f32.mrf.mxu0 }
 0x411   :  { %14453 = vmatprep.subr.bf16.mxu0 %v23331_v31  ;;  %5118 = vmatprep.subr.bf16.mxu1 %v14590_v54 }
 0x412   :  { %v14355_v27 = vpop.f32.mrf.mxu0 }
 0x413   :  { %12794 = vmatmul.mubr.msk.bf16.vlgmr.msra.gmra.mxu1 %vm4247_vm14, %v19289_v0  ;;  %12791 = vmatmul.mubr.msk.bf16.vlgmr.msra.gmra.mxu0 %vm4247_vm14, %v19291_v15  ;;  %v14356_v43 = vadd.f32 %v14355_v27, %v14354_v53 }
 0x414   :  { %v14357_v21 = vpop.f32.mrf.mxu0  ;;  %14457 = vmatprep.mubr.msk.bf16.mxu0 %vm15753_vm12, %v23331_v31  ;;  %5119 = vmatpush1.bf16.msra.mxu1 %v14588_v28  ;;  %v14605_v28 = vld [vmem:[%s22613_s3 + $0x344] ss:$16 sps:$4 sm:$0xff]  }
 0x415   :  { %5120 = vmatprep.subr.bf16.mxu1 %v14593_v32  ;;  %v4158_v58 = vadd.f32 %v14356_v43, %v14328_v5  ;;  %v14617_v5 = vld [vmem:[%s22613_s3 + $0x4c4] ss:$16 sps:$4 sm:$0xff]  }
 0x416   :  { %v14358_v12 = vpop.f32.mrf.mxu0 }
 0x417   :  { %v14359_v11 = vadd.f32 %v14358_v12, %v14357_v21  ;;  %v14603_v21 = vld [vmem:[%s22613_s3 + $0x340] ss:$16 sps:$4 sm:$0xff]  }
 0x418   :  { %v14360_v6 = vpop.f32.mrf.mxu0  ;;  %5121 = vmatpush1.bf16.msra.mxu1 %v14591_v25 }
 0x419   :  { %5122 = vmatprep.subr.bf16.mxu1 %v14596_v57  ;;  %v4161_v36 = vadd.f32 %v14359_v11, %v14331_v18  ;;  %v14615_v11 = vld [vmem:[%s22613_s3 + $0x4c0] ss:$16 sps:$4 sm:$0xff]  }
 0x41a   :  { %v14382_v3 = vpop.f32.mrf.mxu1  ;;  %v14361_v22 = vpop.f32.mrf.mxu0  ;;  %v14624_v18 = vld [vmem:[%s22613_s3 + $0x460] ss:$16 sps:$4 sm:$0xff]  }
 0x41b   :  { %v14362_v48 = vadd.f32 %v14361_v22, %v14360_v6  ;;  %v14606_v22 = vld [vmem:[%s22613_s3 + $0x320] ss:$16 sps:$4 sm:$0xff]  }
 0x41c   :  { %v14383_v16 = vpop.f32.mrf.mxu1  ;;  %v14363_v17 = vpop.f32.mrf.mxu0  ;;  %5123 = vmatpush1.bf16.msra.mxu1 %v14594_v35  ;;  %v14608_v35 = vld [vmem:[%s22613_s3 + $0x324] ss:$16 sps:$4 sm:$0xff]  }
 0x41d   :  { %v14384_v49 = vadd.f32 %v14383_v16, %v14382_v3  ;;  %5124 = vmatprep.subr.bf16.mxu1 %v14599_v14  ;;  %v4166_v25 = vadd.f32 %v14362_v48, %v14334_v29  ;;  %v14609_v16 = vld [vmem:[%s22613_s3 + $0x300] ss:$16 sps:$4 sm:$0xff]   ;;  %v14635_v48 = vld [vmem:[%s22613_s3 + $0x404] ss:$16 sps:$4 sm:$0xff]  }
 0x41e   :  { %v14385_v60 = vpop.f32.mrf.mxu1  ;;  %v14364_v41 = vpop.f32.mrf.mxu0  ;;  %v14642_v29 = vld [vmem:[%s22613_s3 + $0x5c0] ss:$16 sps:$4 sm:$0xff]  }
 0x41f   :  { %v4206_v54 = vadd.f32 %v14384_v49, %v4158_v58  ;;  %v14620_v49 = vld [vmem:[%s22613_s3 + $0x4a4] ss:$16 sps:$4 sm:$0xff]  }
 0x420   :  { %v14386_v24 = vpop.f32.mrf.mxu1  ;;  %5125 = vmatpush1.bf16.msra.mxu1 %v14597_v34  ;;  %v14614_v34 = vld [vmem:[%s22613_s3 + $0x4e4] ss:$16 sps:$4 sm:$0xff]  }
 0x421   :  { %v14387_v53 = vadd.f32 %v14386_v24, %v14385_v60  ;;  %5126 = vmatprep.subr.bf16.mxu1 %v14602_v39  ;;  %v4221_v57 = vmax.f32 %v19223_v20, %v4206_v54  ;;  %v14618_v39 = vld [vmem:[%s22613_s3 + $0x4a0] ss:$16 sps:$4 sm:$0xff]   ;;  %v14626_v41 = vld [vmem:[%s22613_s3 + $0x464] ss:$16 sps:$4 sm:$0xff]  }
 0x422   :  { %v14388_v32 = vpop.f32.mrf.mxu1  ;;  %v14621_v60 = vld [vmem:[%s22613_s3 + $0x480] ss:$16 sps:$4 sm:$0xff]   ;;  %v14629_v58 = vld [vmem:[%s22613_s3 + $0x444] ss:$16 sps:$4 sm:$0xff]  }
 0x423   :  { %v4209_v30 = vadd.f32 %v14387_v53, %v4161_v36  ;;  %v14630_v24 = vld [vmem:[%s22613_s3 + $0x420] ss:$16 sps:$4 sm:$0xff]   ;;  %v14638_v53 = vld [vmem:[%s22613_s3 + $0x5e4] ss:$16 sps:$4 sm:$0xff]  }
 0x424   :  { %v14389_v27 = vpop.f32.mrf.mxu1  ;;  %5127 = vmatpush1.bf16.msra.mxu1 %v14600_v8  ;;  %v14632_v8 = vld [vmem:[%s22613_s3 + $0x424] ss:$16 sps:$4 sm:$0xff]   ;;  %v14633_v36 = vld [vmem:[%s22613_s3 + $0x400] ss:$16 sps:$4 sm:$0xff]  }
 0x425   :  { %v4224_v12 = vmax.f32 %v19225_v9, %v4209_v30  ;;  %v14390_v6 = vadd.f32 %v14389_v27, %v14388_v32  ;;  %5128 = vmatprep.subr.bf16.mxu1 %v14605_v28  ;;  %v14611_v9 = vld [vmem:[%s22613_s3 + $0x304] ss:$16 sps:$4 sm:$0xff]   ;;  %v14636_v54 = vld [vmem:[%s22613_s3 + $0x5e0] ss:$16 sps:$4 sm:$0xff]   ;;  %v14641_v28 = vld [vmem:[%s22613_s3 + $0x5ec] ss:$16 sps:$4 sm:$0xff]  }
 0x426   :  { %v14391_v14 = vpop.f32.mrf.mxu1  ;;  %v14644_v32 = vld [vmem:[%s22613_s3 + $0x5c4] ss:$16 sps:$4 sm:$0xff]   ;;  %v14648_v27 = vld [vmem:[%s22613_s3 + $0x5a0] ss:$16 sps:$4 sm:$0xff]  }
 0x427   :  { %v19346_v52 = vpack.c.bf16 %v4224_v12, %v4221_v57  ;;  %v4214_v19 = vadd.f32 %v14390_v6, %v4166_v25  ;;  %v14650_v30 = vld [vmem:[%s22613_s3 + $0x5a4] ss:$16 sps:$4 sm:$0xff]   ;;  %v14654_v25 = vld [vmem:[%s22613_s3 + $0x580] ss:$16 sps:$4 sm:$0xff]  }
 0x428   :  { %v14392_v3 = vpop.f32.mrf.mxu1  ;;  %5129 = vmatpush1.bf16.msra.mxu1 %v14603_v21  ;;  %v14656_v21 = vld [vmem:[%s22613_s3 + $0x584] ss:$16 sps:$4 sm:$0xff]   ;;  %v14660_v12 = vld [vmem:[%s22613_s3 + $0x560] ss:$16 sps:$4 sm:$0xff]  }
 0x429   :  { %v4227_v20 = vmax.f32 %v19227_v37, %v4214_v19  ;;  %5130 = vmatprep.subr.bf16.mxu1 %v14608_v35  ;;  %v14612_v37 = vld [vmem:[%s22613_s3 + $0x4e0] ss:$16 sps:$4 sm:$0xff]   ;;  %v14662_v57 = vld [vmem:[%s22613_s3 + $0x564] ss:$16 sps:$4 sm:$0xff]  }
 0x42a   :  { %v14668_v6 = vld [vmem:[%s22613_s3 + $0x544] ss:$16 sps:$4 sm:$0xff]   ;;  %v14666_v35 = vld [vmem:[%s22613_s3 + $0x540] ss:$16 sps:$4 sm:$0xff]  }
 0x42b   :  { %v4233_v43 = vpack.c.bf16 %v4227_v20, %v4227_v20  ;;  %v14674_v14 = vld [vmem:[%s22613_s3 + $0x524] ss:$16 sps:$4 sm:$0xff]   ;;  %v14672_v19 = vld [vmem:[%s22613_s3 + $0x520] ss:$16 sps:$4 sm:$0xff]   ;;  %v14686_v20 = vld [vmem:[%s22613_s3 + $0x3ec] ss:$16 sps:$4 sm:$0xff]  }
 0x42c   :  { %5131 = vmatpush1.bf16.msra.mxu1 %v14606_v22  ;;  %v14680_v3 = vld [vmem:[%s22613_s3 + $0x504] ss:$16 sps:$4 sm:$0xff]   ;;  %v14678_v22 = vld [vmem:[%s22613_s3 + $0x500] ss:$16 sps:$4 sm:$0xff]  }
 0x42d   :  { %v19359_v17 = vsel %vm4251_vm1, %v4233_v43, 0  ;;  %5132 = vmatprep.subr.bf16.mxu1 %v14611_v9 }
 0x42e   :  { %14454 = vmatpush3.bf16.msra.mxu0 %v19359_v17 }
 0x42f   :  { %14455 = vmatprep.subr.bf16.mxu0 %v23331_v31 }
 0x430   :  { %5133 = vmatpush1.bf16.msra.mxu1 %v14609_v16 }
 0x431   :  { %5134 = vmatprep.subr.bf16.mxu1 %v14614_v34 }
 0x432   :  { %14456 = vmatpush3.bf16.msra.mxu0 %v19346_v52 }
 0x433   :  { %14461 = vmatprep.subr.bf16.mxu0 %v23331_v31 }
 0x434   :  { %5135 = vmatpush2.bf16.msra.mxu1 %v14612_v37 }
 0x435   :  { %14458 = vmatmul.mubr.msk.bf16.vlgmr.msra.gmra.mxu0 %vm4247_vm14, %v19291_v15  ;;  %5136 = vmatprep.subr.bf16.mxu1 %v14617_v5  ;;  %v14623_v15 = vld [vmem:[%s22613_s3 + $0x484] ss:$16 sps:$4 sm:$0xff]  }
 0x436   :  { %14462 = vmatpush3.bf16.msra.mxu0 %v19359_v17  ;;  %14465 = vmatprep.mubr.msk.bf16.mxu0 %vm15753_vm12, %v23331_v31 }
 0x437   :  { %14463 = vmatprep.subr.bf16.mxu0 %v23331_v31 }
 0x438   :  { %5137 = vmatpush2.bf16.msra.mxu1 %v14615_v11 }
 0x439   :  { %5138 = vmatprep.subr.bf16.mxu1 %v14620_v49 }
 0x43a   :  { %14464 = vmatpush3.bf16.msra.mxu0 %v19346_v52 }
 0x43b   :  { %5161 = vmatprep.subr.bf16.mxu0 %v14638_v53  ;;  %v14669_v53 = vld [vmem:[%s22613_s3 + $0x548] ss:$16 sps:$4 sm:$0xff]  }
 0x43c   :  { %5139 = vmatpush2.bf16.msra.mxu1 %v14618_v39 }
 0x43d   :  { %14466 = vmatmul.mubr.msk.bf16.vlgmr.msra.gmra.mxu0 %vm4247_vm14, %v19289_v0  ;;  %5140 = vmatprep.subr.bf16.mxu1 %v14623_v15  ;;  %v14627_v0 = vld [vmem:[%s22613_s3 + $0x440] ss:$16 sps:$4 sm:$0xff]  }
 0x43e   :  { %5193 = vmatprep.mubr.bf16.mxu0 %v23329_v44  ;;  %5162 = vmatpush1.bf16.msra.mxu0 %v14636_v54  ;;  %v14671_v54 = vld [vmem:[%s22613_s3 + $0x54c] ss:$16 sps:$4 sm:$0xff]  }
 0x43f   :  { %5163 = vmatprep.subr.bf16.mxu0 %v14644_v32  ;;  %v14675_v32 = vld [vmem:[%s22613_s3 + $0x528] ss:$16 sps:$4 sm:$0xff]  }
 0x440   :  { %5141 = vmatpush2.bf16.msra.mxu1 %v14621_v60  ;;  %v14639_v60 = vld [vmem:[%s22613_s3 + $0x5e8] ss:$16 sps:$4 sm:$0xff]  }
 0x441   :  { %5142 = vmatprep.subr.bf16.mxu1 %v14626_v41  ;;  %v14647_v41 = vld [vmem:[%s22613_s3 + $0x5cc] ss:$16 sps:$4 sm:$0xff]  }
 0x442   :  { %5164 = vmatpush1.bf16.msra.mxu0 %v14642_v29 }
 0x443   :  { %5165 = vmatprep.subr.bf16.mxu0 %v14650_v30  ;;  %v14683_v30 = vld [vmem:[%s22613_s3 + $0x50c] ss:$16 sps:$4 sm:$0xff]  }
 0x444   :  { %5143 = vmatpush2.bf16.msra.mxu1 %v14624_v18  ;;  %v14645_v18 = vld [vmem:[%s22613_s3 + $0x5c8] ss:$16 sps:$4 sm:$0xff]  }
 0x445   :  { %5144 = vmatprep.subr.bf16.mxu1 %v14629_v58  ;;  %v14653_v58 = vld [vmem:[%s22613_s3 + $0x5ac] ss:$16 sps:$4 sm:$0xff]  }
 0x446   :  { %5166 = vmatpush1.bf16.msra.mxu0 %v14648_v27 }
 0x447   :  { %5167 = vmatprep.subr.bf16.mxu0 %v14656_v21  ;;  %v14681_v21 = vld [vmem:[%s22613_s3 + $0x508] ss:$16 sps:$4 sm:$0xff]  }
 0x448   :  { %5145 = vmatpush2.bf16.msra.mxu1 %v14627_v0  ;;  %v14651_v0 = vld [vmem:[%s22613_s3 + $0x5a8] ss:$16 sps:$4 sm:$0xff]  }
 0x449   :  { %5146 = vmatprep.subr.bf16.mxu1 %v14632_v8  ;;  %v14657_v8 = vld [vmem:[%s22613_s3 + $0x588] ss:$16 sps:$4 sm:$0xff]  }
 0x44a   :  { %5168 = vmatpush1.bf16.msra.mxu0 %v14654_v25 }
 0x44b   :  { %5169 = vmatprep.subr.bf16.mxu0 %v14662_v57  ;;  %v14689_v57 = vld [vmem:[%s22613_s3 + $0xe4] ss:$16 sps:$4 sm:$0xff]  }
 0x44c   :  { %5147 = vmatpush2.bf16.msra.mxu1 %v14630_v24  ;;  %v14659_v24 = vld [vmem:[%s22613_s3 + $0x58c] ss:$16 sps:$4 sm:$0xff]  }
 0x44d   :  { %5148 = vmatprep.subr.bf16.mxu1 %v14635_v48  ;;  %v14663_v48 = vld [vmem:[%s22613_s3 + $0x568] ss:$16 sps:$4 sm:$0xff]  }
 0x44e   :  { %5170 = vmatpush1.bf16.msra.mxu0 %v14660_v12 }
 0x44f   :  { %5171 = vmatprep.subr.bf16.mxu0 %v14668_v6 }
 0x450   :  { %5149 = vmatpush2.bf16.msra.mxu1 %v14633_v36  ;;  %v14665_v36 = vld [vmem:[%s22613_s3 + $0x56c] ss:$16 sps:$4 sm:$0xff]  }
 0x451   :  { %5247 = vmatprep.subr.bf16.mxu1 %v14641_v28  ;;  %v14677_v28 = vld [vmem:[%s22613_s3 + $0x52c] ss:$16 sps:$4 sm:$0xff]  }
 0x452   :  { %5172 = vmatpush1.bf16.msra.mxu0 %v14666_v35 }
 0x453   :  { %5173 = vmatprep.subr.bf16.mxu0 %v14674_v14 }
 0x456   :  { %5174 = vmatpush1.bf16.msra.mxu0 %v14672_v19 }
 0x457   :  { %5175 = vmatprep.subr.bf16.mxu0 %v14680_v3 }
 0x45a   :  { %5176 = vmatpush1.bf16.msra.mxu0 %v14678_v22  ;;  %v14684_v22 = vld [vmem:[%s22613_s3 + $0x3e8] ss:$16 sps:$4 sm:$0xff]  }
 0x45b   :  { %5204 = vmatprep.subr.bf16.mxu0 %v14686_v20  ;;  %v14687_v20 = vld [vmem:[%s22613_s3 + $0xe0] ss:$16 sps:$4 sm:$0xff]  }
 0x4d3   :  { %v4488_v9 = vpop.f32.mrf.mxu1  ;;  %v4295_v43 = vpop.f32.mrf.mxu0 }
 0x4d5   :  { %v4490_v16 = vpop.f32.mrf.mxu1  ;;  %v4297_v34 = vpop.f32.mrf.mxu0 }
 0x4d7   :  { %v4492_v37 = vpop.f32.mrf.mxu1  ;;  %v4299_v5 = vpop.f32.mrf.mxu0 }
 0x4d8   :  { %v19477_v11 = vpack.c.bf16 %v4299_v5, %v4295_v43  ;;  %v19479_v49 = vpack.c.bf16 %v4492_v37, %v4488_v9  ;;  %v14692_v43 = vld [vmem:[%s22613_s3 + $0x3cc] ss:$16 sps:$4 sm:$0xff]   ;;  %v14695_v37 = vld [vmem:[%s22613_s3 + $0xc4] ss:$16 sps:$4 sm:$0xff]  }
 0x4d9   :  { %v4494_v39 = vpop.f32.mrf.mxu1  ;;  %v4301_v29 = vpop.f32.mrf.mxu0 }
 0x4da   :  { %v4539_v15 = vpack.c.bf16 %v4494_v39, %v4490_v16  ;;  %v19545_v5 = vpack.c.bf16 %v4301_v29, %v4297_v34  ;;  %v14690_v39 = vld [vmem:[%s22613_s3 + $0x3c8] ss:$16 sps:$4 sm:$0xff]   ;;  %v14698_v34 = vld [vmem:[%s22613_s3 + $0x3ac] ss:$16 sps:$4 sm:$0xff]  }
 0x4db   :  { %v14714_v29 = vld [vmem:[%s22613_s3 + $0x348] ss:$16 sps:$4 sm:$0xff]  }
 0x4dc   :  { %5150 = vmatprep.mubr.bf16.mxu1 %v4539_v15 }
 0x4dd   :  { %5151 = vmatmul.mubr.bf16.vlgmr.msra.gmra.mxu1 %v19479_v49 }
 0x4de   :  { %5248 = vmatpush1.bf16.msra.mxu1 %v14639_v60  ;;  %5279 = vmatprep.mubr.bf16.mxu1 %v23329_v44  ;;  %v14693_v60 = vld [vmem:[%s22613_s3 + $0xc0] ss:$16 sps:$4 sm:$0xff]  }
 0x4df   :  { %5249 = vmatprep.subr.bf16.mxu1 %v14647_v41  ;;  %v14701_v41 = vld [vmem:[%s22613_s3 + $0xa4] ss:$16 sps:$4 sm:$0xff]  }
 0x4e2   :  { %5250 = vmatpush1.bf16.msra.mxu1 %v14645_v18  ;;  %v14696_v18 = vld [vmem:[%s22613_s3 + $0x3a8] ss:$16 sps:$4 sm:$0xff]  }
 0x4e3   :  { %5251 = vmatprep.subr.bf16.mxu1 %v14653_v58  ;;  %v14699_v58 = vld [vmem:[%s22613_s3 + $0xa0] ss:$16 sps:$4 sm:$0xff]  }
 0x4e6   :  { %5252 = vmatpush1.bf16.msra.mxu1 %v14651_v0  ;;  %v14704_v0 = vld [vmem:[%s22613_s3 + $0x38c] ss:$16 sps:$4 sm:$0xff]  }
 0x4e7   :  { %5253 = vmatprep.subr.bf16.mxu1 %v14659_v24  ;;  %v14702_v24 = vld [vmem:[%s22613_s3 + $0x388] ss:$16 sps:$4 sm:$0xff]  }
 0x4ea   :  { %5254 = vmatpush1.bf16.msra.mxu1 %v14657_v8  ;;  %v14705_v8 = vld [vmem:[%s22613_s3 + $0x80] ss:$16 sps:$4 sm:$0xff]  }
 0x4eb   :  { %5255 = vmatprep.subr.bf16.mxu1 %v14665_v36  ;;  %v14710_v36 = vld [vmem:[%s22613_s3 + $0x36c] ss:$16 sps:$4 sm:$0xff]  }
 0x4ee   :  { %5256 = vmatpush1.bf16.msra.mxu1 %v14663_v48  ;;  %v14713_v48 = vld [vmem:[%s22613_s3 + $0x64] ss:$16 sps:$4 sm:$0xff]  }
 0x4ef   :  { %5257 = vmatprep.subr.bf16.mxu1 %v14671_v54  ;;  %v14708_v54 = vld [vmem:[%s22613_s3 + $0x368] ss:$16 sps:$4 sm:$0xff]  }
 0x4f2   :  { %5258 = vmatpush1.bf16.msra.mxu1 %v14669_v53  ;;  %v14711_v53 = vld [vmem:[%s22613_s3 + $0x60] ss:$16 sps:$4 sm:$0xff]  }
 0x4f3   :  { %5259 = vmatprep.subr.bf16.mxu1 %v14677_v28  ;;  %v14716_v28 = vld [vmem:[%s22613_s3 + $0x34c] ss:$16 sps:$4 sm:$0xff]  }
 0x4f5   :  { %v4338_v27 = vpop.f32.mrf.mxu0 }
 0x4f6   :  { %5260 = vmatpush1.bf16.msra.mxu1 %v14675_v32  ;;  %v14719_v32 = vld [vmem:[%s22613_s3 + $0x44] ss:$16 sps:$4 sm:$0xff]  }
 0x4f7   :  { %v14459_v25 = vpop.f32.mrf.mxu0  ;;  %5261 = vmatprep.subr.bf16.mxu1 %v14683_v30  ;;  %v14717_v30 = vld [vmem:[%s22613_s3 + $0x40] ss:$16 sps:$4 sm:$0xff]  }
 0x4f8   :  { %v14720_v25 = vld [vmem:[%s22613_s3 + $0x328] ss:$16 sps:$4 sm:$0xff]  }
 0x4f9   :  { %v4341_v12 = vpop.f32.mrf.mxu0 }
 0x4fa   :  { %v19531_v6 = vpack.c.bf16 %v4341_v12, %v4338_v27  ;;  %5262 = vmatpush1.bf16.msra.mxu1 %v14681_v21  ;;  %v14722_v27 = vld [vmem:[%s22613_s3 + $0x32c] ss:$16 sps:$4 sm:$0xff]   ;;  %v14725_v21 = vld [vmem:[%s22613_s3 + $0x24] ss:$16 sps:$4 sm:$0xff]  }
 0x4fb   :  { %v14460_v35 = vpop.f32.mrf.mxu0  ;;  %5770 = vmatprep.subr.bf16.mxu1 %v14689_v57  ;;  %v14723_v57 = vld [vmem:[%s22613_s3 + $0x20] ss:$16 sps:$4 sm:$0xff]   ;;  %v14728_v12 = vld [vmem:[%s22613_s3 + $0x30c] ss:$16 sps:$4 sm:$0xff]  }
 0x4fc   :  { %v14731_v35 = vld [vmem:[%s22613_s3 + $0x4] ss:$16 sps:$4 sm:$0xff]  }
 0x4fd   :  { %v4531_v14 = vpop.f32.mrf.mxu0 }
 0x4ff   :  { %v14467_v19 = vpop.f32.mrf.mxu0 }
 0x500   :  { %v14729_v19 = vld [vmem:[%s22613_s3] ss:$16 sps:$4 sm:$0xff]  }
 0x501   :  { %v4534_v3 = vpop.f32.mrf.mxu0 }
 0x502   :  { %v4540_v9 = vpack.c.bf16 %v4534_v3, %v4531_v14  ;;  %v14726_v14 = vld [vmem:[%s22613_s3 + $0x308] ss:$16 sps:$4 sm:$0xff]   ;;  %v14734_v3 = vld [vmem:[%s22613_s3 + $0x4ec] ss:$16 sps:$4 sm:$0xff]  }
 0x503   :  { %v14468_v16 = vpop.f32.mrf.mxu0 }
 0x504   :  { %5194 = vmatmul.mubr.bf16.vlgmr.msra.gmra.mxu0 %v4540_v9  ;;  %5280 = vmatmul.mubr.bf16.vlgmr.msra.gmra.mxu1 %v4540_v9  ;;  %v14735_v9 = vld [vmem:[%s22613_s3 + $0x1e0] ss:$16 sps:$4 sm:$0xff]   ;;  %v14743_v16 = vld [vmem:[%s22613_s3 + $0x1c4] ss:$16 sps:$4 sm:$0xff]  }
 0x505   :  { %5205 = vmatpush1.bf16.msra.mxu0 %v14684_v22  ;;  %5771 = vmatpush1.bf16.msra.mxu1 %v14687_v20  ;;  %v14737_v22 = vld [vmem:[%s22613_s3 + $0x1e4] ss:$16 sps:$4 sm:$0xff]   ;;  %v14732_v20 = vld [vmem:[%s22613_s3 + $0x4e8] ss:$16 sps:$4 sm:$0xff]  }
 0x506   :  { %5802 = vmatprep.mubr.bf16.mxu1 %v19545_v5  ;;  %5206 = vmatprep.subr.bf16.mxu0 %v14692_v43  ;;  %v14740_v43 = vld [vmem:[%s22613_s3 + $0x4cc] ss:$16 sps:$4 sm:$0xff]  }
 0x507   :  { %5772 = vmatprep.subr.bf16.mxu1 %v14695_v37  ;;  %5236 = vmatprep.mubr.bf16.mxu0 %v4539_v15  ;;  %v14707_v15 = vld [vmem:[%s22613_s3 + $0x84] ss:$16 sps:$4 sm:$0xff]   ;;  %v14738_v37 = vld [vmem:[%s22613_s3 + $0x4c8] ss:$16 sps:$4 sm:$0xff]  }
 0x509   :  { %5207 = vmatpush1.bf16.msra.mxu0 %v14690_v39  ;;  %5773 = vmatpush1.bf16.msra.mxu1 %v14693_v60  ;;  %v14741_v39 = vld [vmem:[%s22613_s3 + $0x1c0] ss:$16 sps:$4 sm:$0xff]   ;;  %v14746_v60 = vld [vmem:[%s22613_s3 + $0x4ac] ss:$16 sps:$4 sm:$0xff]  }
 0x50a   :  { %5208 = vmatprep.subr.bf16.mxu0 %v14698_v34  ;;  %5774 = vmatprep.subr.bf16.mxu1 %v14701_v41  ;;  %v14749_v34 = vld [vmem:[%s22613_s3 + $0x1a4] ss:$16 sps:$4 sm:$0xff]   ;;  %v14744_v41 = vld [vmem:[%s22613_s3 + $0x4a8] ss:$16 sps:$4 sm:$0xff]  }
 0x50d   :  { %5209 = vmatpush1.bf16.msra.mxu0 %v14696_v18  ;;  %5775 = vmatpush1.bf16.msra.mxu1 %v14699_v58  ;;  %v14747_v18 = vld [vmem:[%s22613_s3 + $0x1a0] ss:$16 sps:$4 sm:$0xff]   ;;  %v14752_v58 = vld [vmem:[%s22613_s3 + $0x48c] ss:$16 sps:$4 sm:$0xff]  }
 0x50e   :  { %5210 = vmatprep.subr.bf16.mxu0 %v14704_v0  ;;  %5776 = vmatprep.subr.bf16.mxu1 %v14707_v15  ;;  %v14755_v0 = vld [vmem:[%s22613_s3 + $0x184] ss:$16 sps:$4 sm:$0xff]   ;;  %v14750_v15 = vld [vmem:[%s22613_s3 + $0x488] ss:$16 sps:$4 sm:$0xff]  }
 0x511   :  { %5211 = vmatpush1.bf16.msra.mxu0 %v14702_v24  ;;  %5777 = vmatpush1.bf16.msra.mxu1 %v14705_v8  ;;  %v14753_v24 = vld [vmem:[%s22613_s3 + $0x180] ss:$16 sps:$4 sm:$0xff]   ;;  %v14758_v8 = vld [vmem:[%s22613_s3 + $0x46c] ss:$16 sps:$4 sm:$0xff]  }
 0x512   :  { %5212 = vmatprep.subr.bf16.mxu0 %v14710_v36  ;;  %5778 = vmatprep.subr.bf16.mxu1 %v14713_v48  ;;  %v14761_v36 = vld [vmem:[%s22613_s3 + $0x164] ss:$16 sps:$4 sm:$0xff]   ;;  %v14756_v48 = vld [vmem:[%s22613_s3 + $0x468] ss:$16 sps:$4 sm:$0xff]  }
 0x515   :  { %5213 = vmatpush1.bf16.msra.mxu0 %v14708_v54  ;;  %5779 = vmatpush1.bf16.msra.mxu1 %v14711_v53  ;;  %v14759_v54 = vld [vmem:[%s22613_s3 + $0x160] ss:$16 sps:$4 sm:$0xff]   ;;  %v14764_v53 = vld [vmem:[%s22613_s3 + $0x44c] ss:$16 sps:$4 sm:$0xff]  }
 0x516   :  { %5214 = vmatprep.subr.bf16.mxu0 %v14716_v28  ;;  %5780 = vmatprep.subr.bf16.mxu1 %v14719_v32  ;;  %v14767_v28 = vld [vmem:[%s22613_s3 + $0x144] ss:$16 sps:$4 sm:$0xff]   ;;  %v14762_v32 = vld [vmem:[%s22613_s3 + $0x448] ss:$16 sps:$4 sm:$0xff]  }
 0x519   :  { %5215 = vmatpush1.bf16.msra.mxu0 %v14714_v29  ;;  %5781 = vmatpush1.bf16.msra.mxu1 %v14717_v30  ;;  %v14765_v29 = vld [vmem:[%s22613_s3 + $0x140] ss:$16 sps:$4 sm:$0xff]   ;;  %v14770_v30 = vld [vmem:[%s22613_s3 + $0x42c] ss:$16 sps:$4 sm:$0xff]  }
 0x51a   :  { %5216 = vmatprep.subr.bf16.mxu0 %v14722_v27  ;;  %5782 = vmatprep.subr.bf16.mxu1 %v14725_v21  ;;  %v14773_v27 = vld [vmem:[%s22613_s3 + $0x124] ss:$16 sps:$4 sm:$0xff]   ;;  %v14768_v21 = vld [vmem:[%s22613_s3 + $0x428] ss:$16 sps:$4 sm:$0xff]  }
 0x51d   :  { %5217 = vmatpush1.bf16.msra.mxu0 %v14720_v25  ;;  %5783 = vmatpush1.bf16.msra.mxu1 %v14723_v57  ;;  %v14771_v25 = vld [vmem:[%s22613_s3 + $0x120] ss:$16 sps:$4 sm:$0xff]   ;;  %v14776_v57 = vld [vmem:[%s22613_s3 + $0x40c] ss:$16 sps:$4 sm:$0xff]  }
 0x51e   :  { %5218 = vmatprep.subr.bf16.mxu0 %v14728_v12  ;;  %5784 = vmatprep.subr.bf16.mxu1 %v14731_v35  ;;  %v14779_v12 = vld [vmem:[%s22613_s3 + $0x104] ss:$16 sps:$4 sm:$0xff]   ;;  %v14774_v35 = vld [vmem:[%s22613_s3 + $0x408] ss:$16 sps:$4 sm:$0xff]  }
 0x521   :  { %5219 = vmatpush1.bf16.msra.mxu0 %v14726_v14  ;;  %5785 = vmatpush1.bf16.msra.mxu1 %v14729_v19  ;;  %v14777_v14 = vld [vmem:[%s22613_s3 + $0x100] ss:$16 sps:$4 sm:$0xff]   ;;  %v14782_v19 = vld [vmem:[%s22613_s3 + $0x2e4] ss:$16 sps:$4 sm:$0xff]  }
 0x522   :  { %5220 = vmatprep.subr.bf16.mxu0 %v14734_v3  ;;  %5786 = vmatprep.subr.bf16.mxu1 %v14737_v22  ;;  %v14785_v3 = vld [vmem:[%s22613_s3 + $0x2ec] ss:$16 sps:$4 sm:$0xff]   ;;  %v14780_v22 = vld [vmem:[%s22613_s3 + $0x2e0] ss:$16 sps:$4 sm:$0xff]  }
 0x525   :  { %5221 = vmatpush2.bf16.msra.mxu0 %v14732_v20  ;;  %5787 = vmatpush2.bf16.msra.mxu1 %v14735_v9  ;;  %v14783_v20 = vld [vmem:[%s22613_s3 + $0x2e8] ss:$16 sps:$4 sm:$0xff]   ;;  %v14788_v9 = vld [vmem:[%s22613_s3 + $0x2c4] ss:$16 sps:$4 sm:$0xff]  }
 0x526   :  { %5222 = vmatprep.subr.bf16.mxu0 %v14740_v43  ;;  %5788 = vmatprep.subr.bf16.mxu1 %v14743_v16  ;;  %v14791_v43 = vld [vmem:[%s22613_s3 + $0x2cc] ss:$16 sps:$4 sm:$0xff]   ;;  %v14786_v16 = vld [vmem:[%s22613_s3 + $0x2c0] ss:$16 sps:$4 sm:$0xff]  }
 0x529   :  { %5223 = vmatpush2.bf16.msra.mxu0 %v14738_v37  ;;  %5789 = vmatpush2.bf16.msra.mxu1 %v14741_v39  ;;  %v14789_v37 = vld [vmem:[%s22613_s3 + $0x2c8] ss:$16 sps:$4 sm:$0xff]   ;;  %v14794_v39 = vld [vmem:[%s22613_s3 + $0x2a4] ss:$16 sps:$4 sm:$0xff]  }
 0x52a   :  { %5224 = vmatprep.subr.bf16.mxu0 %v14746_v60  ;;  %5790 = vmatprep.subr.bf16.mxu1 %v14749_v34  ;;  %v14792_v60 = vld [vmem:[%s22613_s3 + $0x2a0] ss:$16 sps:$4 sm:$0xff]   ;;  %v14795_v34 = vld [vmem:[%s22613_s3 + $0x2a8] ss:$16 sps:$4 sm:$0xff]  }
 0x52d   :  { %5225 = vmatpush2.bf16.msra.mxu0 %v14744_v41  ;;  %5791 = vmatpush2.bf16.msra.mxu1 %v14747_v18  ;;  %v14800_v41 = vld [vmem:[%s22613_s3 + $0x284] ss:$16 sps:$4 sm:$0xff]   ;;  %v14803_v18 = vld [vmem:[%s22613_s3 + $0x28c] ss:$16 sps:$4 sm:$0xff]  }
 0x52e   :  { %5226 = vmatprep.subr.bf16.mxu0 %v14752_v58  ;;  %5792 = vmatprep.subr.bf16.mxu1 %v14755_v0  ;;  %v14798_v58 = vld [vmem:[%s22613_s3 + $0x280] ss:$16 sps:$4 sm:$0xff]   ;;  %v14801_v0 = vld [vmem:[%s22613_s3 + $0x288] ss:$16 sps:$4 sm:$0xff]  }
 0x531   :  { %5227 = vmatpush2.bf16.msra.mxu0 %v14750_v15  ;;  %5793 = vmatpush2.bf16.msra.mxu1 %v14753_v24  ;;  %v14806_v15 = vld [vmem:[%s22613_s3 + $0x264] ss:$16 sps:$4 sm:$0xff]   ;;  %v14809_v24 = vld [vmem:[%s22613_s3 + $0x26c] ss:$16 sps:$4 sm:$0xff]  }
 0x532   :  { %5228 = vmatprep.subr.bf16.mxu0 %v14758_v8  ;;  %5794 = vmatprep.subr.bf16.mxu1 %v14761_v36  ;;  %v14804_v8 = vld [vmem:[%s22613_s3 + $0x260] ss:$16 sps:$4 sm:$0xff]   ;;  %v14807_v36 = vld [vmem:[%s22613_s3 + $0x268] ss:$16 sps:$4 sm:$0xff]  }
 0x535   :  { %5229 = vmatpush2.bf16.msra.mxu0 %v14756_v48  ;;  %5795 = vmatpush2.bf16.msra.mxu1 %v14759_v54  ;;  %v14812_v48 = vld [vmem:[%s22613_s3 + $0x244] ss:$16 sps:$4 sm:$0xff]   ;;  %v14815_v54 = vld [vmem:[%s22613_s3 + $0x24c] ss:$16 sps:$4 sm:$0xff]  }
 0x536   :  { %5230 = vmatprep.subr.bf16.mxu0 %v14764_v53  ;;  %5796 = vmatprep.subr.bf16.mxu1 %v14767_v28  ;;  %v14810_v53 = vld [vmem:[%s22613_s3 + $0x240] ss:$16 sps:$4 sm:$0xff]   ;;  %v14813_v28 = vld [vmem:[%s22613_s3 + $0x248] ss:$16 sps:$4 sm:$0xff]  }
 0x539   :  { %5231 = vmatpush2.bf16.msra.mxu0 %v14762_v32  ;;  %5797 = vmatpush2.bf16.msra.mxu1 %v14765_v29  ;;  %v14818_v32 = vld [vmem:[%s22613_s3 + $0x224] ss:$16 sps:$4 sm:$0xff]   ;;  %v14821_v29 = vld [vmem:[%s22613_s3 + $0x22c] ss:$16 sps:$4 sm:$0xff]  }
 0x53a   :  { %5232 = vmatprep.subr.bf16.mxu0 %v14770_v30  ;;  %5798 = vmatprep.subr.bf16.mxu1 %v14773_v27  ;;  %v14816_v30 = vld [vmem:[%s22613_s3 + $0x220] ss:$16 sps:$4 sm:$0xff]   ;;  %v14819_v27 = vld [vmem:[%s22613_s3 + $0x228] ss:$16 sps:$4 sm:$0xff]  }
 0x53d   :  { %5233 = vmatpush2.bf16.msra.mxu0 %v14768_v21  ;;  %5799 = vmatpush2.bf16.msra.mxu1 %v14771_v25  ;;  %v14824_v21 = vld [vmem:[%s22613_s3 + $0x204] ss:$16 sps:$4 sm:$0xff]   ;;  %v14827_v25 = vld [vmem:[%s22613_s3 + $0x20c] ss:$16 sps:$4 sm:$0xff]  }
 0x53e   :  { %5234 = vmatprep.subr.bf16.mxu0 %v14776_v57  ;;  %5800 = vmatprep.subr.bf16.mxu1 %v14779_v12  ;;  %v14822_v57 = vld [vmem:[%s22613_s3 + $0x200] ss:$16 sps:$4 sm:$0xff]   ;;  %v14825_v12 = vld [vmem:[%s22613_s3 + $0x208] ss:$16 sps:$4 sm:$0xff]  }
 0x541   :  { %5235 = vmatpush2.bf16.msra.mxu0 %v14774_v35  ;;  %5801 = vmatpush2.bf16.msra.mxu1 %v14777_v14  ;;  %v14830_v35 = vld [vmem:[%s22613_s3 + $0xec] ss:$16 sps:$4 sm:$0xff]   ;;  %v5942_v14 = vadd.s32 2, %v19247_v4 }
 0x542   :  { %5813 = vmatprep.subr.bf16.mxu0 %v14782_v19  ;;  %5899 = vmatprep.subr.bf16.mxu1 %v14785_v3  ;;  %v5943_v19 = vadd.s32 2, %v19250_v7  ;;  %v14828_v3 = vld [vmem:[%s22613_s3 + $0xe8] ss:$16 sps:$4 sm:$0xff]  }
 0x543   :  { %vm5944_vm2 = vcmp.eq.s32.totalorder %v23330_v10, %v5942_v14  ;;  %v14858_v14 = vld [vmem:[%s22613_s3 + $0x1a8] ss:$16 sps:$4 sm:$0xff]  }
 0x544   :  { %5237 = vmatmul.mubr.bf16.vlgmr.msra.gmra.mxu0 %v19479_v49  ;;  %5803 = vmatmul.mubr.bf16.vlgmr.msra.gmra.mxu1 %v19477_v11  ;;  %v14797_v49 = vld [vmem:[%s22613_s3 + $0x2ac] ss:$16 sps:$4 sm:$0xff]   ;;  %vm5945_vm7 = vcmp.eq.s32.totalorder %v23330_v10, %v5943_v19  ;;  %v14891_v19 = vld [vmem:[%s22613_s3 + $0x640] ss:$16 sps:$4 sm:$0xff]  }
 0x545   :  { %5814 = vmatpush1.bf16.msra.mxu0 %v14780_v22  ;;  %5900 = vmatpush1.bf16.msra.mxu1 %v14783_v20  ;;  %v14833_v22 = vld [vmem:[%s22613_s3 + $0xcc] ss:$16 sps:$4 sm:$0xff]   ;;  %v14831_v20 = vld [vmem:[%s22613_s3 + $0xc8] ss:$16 sps:$4 sm:$0xff]  }
 0x546   :  { %5815 = vmatprep.subr.bf16.mxu0 %v14788_v9  ;;  %5901 = vmatprep.subr.bf16.mxu1 %v14791_v43  ;;  %v14836_v9 = vld [vmem:[%s22613_s3 + $0xac] ss:$16 sps:$4 sm:$0xff]   ;;  %v5946_v43 = vsel %vm5944_vm2, 1.0, %v23331_v31 }
 0x547   :  { %5845 = vmatprep.mubr.bf16.mxu0 %v23329_v44  ;;  %5931 = vmatprep.mubr.bf16.mxu1 %v23329_v44 }
 0x549   :  { %5816 = vmatpush1.bf16.msra.mxu0 %v14786_v16  ;;  %5902 = vmatpush1.bf16.msra.mxu1 %v14789_v37  ;;  %v5947_v16 = vsel %vm5945_vm7, 1.0, %v23331_v31 }
 0x54a   :  { %5817 = vmatprep.subr.bf16.mxu0 %v14794_v39  ;;  %5903 = vmatprep.subr.bf16.mxu1 %v14797_v49  ;;  %v19857_v37 = vpack.c.bf16 %v5947_v16, %v5946_v43  ;;  %v14839_v39 = vld [vmem:[%s22613_s3 + $0x8c] ss:$16 sps:$4 sm:$0xff]   ;;  %v14876_v49 = vld [vmem:[%s22613_s3 + $0x6e0] ss:$16 sps:$4 sm:$0xff]   ;;  %v14861_v43 = vld [vmem:[%s22613_s3 + $0x188] ss:$16 sps:$4 sm:$0xff]  }
 0x54b   :  { %v14866_v16 = vld [vmem:[%s22613_s3 + $0x16c] ss:$16 sps:$4 sm:$0xff]  }
 0x54d   :  { %5818 = vmatpush1.bf16.msra.mxu0 %v14792_v60  ;;  %5904 = vmatpush1.bf16.msra.mxu1 %v14795_v34  ;;  %v14881_v60 = vld [vmem:[%s22613_s3 + $0x6c4] ss:$16 sps:$4 sm:$0xff]   ;;  %v14837_v34 = vld [vmem:[%s22613_s3 + $0x88] ss:$16 sps:$4 sm:$0xff]  }
 0x54e   :  { %5819 = vmatprep.subr.bf16.mxu0 %v14800_v41  ;;  %5905 = vmatprep.subr.bf16.mxu1 %v14803_v18  ;;  %v14842_v41 = vld [vmem:[%s22613_s3 + $0x6c] ss:$16 sps:$4 sm:$0xff]   ;;  %v14879_v18 = vld [vmem:[%s22613_s3 + $0x6c0] ss:$16 sps:$4 sm:$0xff]  }
 0x551   :  { %5820 = vmatpush1.bf16.msra.mxu0 %v14798_v58  ;;  %5906 = vmatpush1.bf16.msra.mxu1 %v14801_v0  ;;  %v14884_v58 = vld [vmem:[%s22613_s3 + $0x6a4] ss:$16 sps:$4 sm:$0xff]   ;;  %v14840_v0 = vld [vmem:[%s22613_s3 + $0x68] ss:$16 sps:$4 sm:$0xff]  }
 0x552   :  { %5821 = vmatprep.subr.bf16.mxu0 %v14806_v15  ;;  %5907 = vmatprep.subr.bf16.mxu1 %v14809_v24  ;;  %v14845_v15 = vld [vmem:[%s22613_s3 + $0x4c] ss:$16 sps:$4 sm:$0xff]   ;;  %v14882_v24 = vld [vmem:[%s22613_s3 + $0x6a0] ss:$16 sps:$4 sm:$0xff]  }
 0x555   :  { %5822 = vmatpush1.bf16.msra.mxu0 %v14804_v8  ;;  %5908 = vmatpush1.bf16.msra.mxu1 %v14807_v36  ;;  %v14887_v8 = vld [vmem:[%s22613_s3 + $0x684] ss:$16 sps:$4 sm:$0xff]   ;;  %v14843_v36 = vld [vmem:[%s22613_s3 + $0x48] ss:$16 sps:$4 sm:$0xff]  }
 0x556   :  { %5823 = vmatprep.subr.bf16.mxu0 %v14812_v48  ;;  %5909 = vmatprep.subr.bf16.mxu1 %v14815_v54  ;;  %v14848_v48 = vld [vmem:[%s22613_s3 + $0x2c] ss:$16 sps:$4 sm:$0xff]   ;;  %v14885_v54 = vld [vmem:[%s22613_s3 + $0x680] ss:$16 sps:$4 sm:$0xff]  }
 0x559   :  { %5824 = vmatpush1.bf16.msra.mxu0 %v14810_v53  ;;  %5910 = vmatpush1.bf16.msra.mxu1 %v14813_v28  ;;  %v14846_v53 = vld [vmem:[%s22613_s3 + $0x28] ss:$16 sps:$4 sm:$0xff]   ;;  %v14851_v28 = vld [vmem:[%s22613_s3 + $0xc] ss:$16 sps:$4 sm:$0xff]  }
 0x55a   :  { %5825 = vmatprep.subr.bf16.mxu0 %v14818_v32  ;;  %5911 = vmatprep.subr.bf16.mxu1 %v14821_v29  ;;  %v14849_v32 = vld [vmem:[%s22613_s3 + $0x8] ss:$16 sps:$4 sm:$0xff]   ;;  %v14854_v29 = vld [vmem:[%s22613_s3 + $0x1ec] ss:$16 sps:$4 sm:$0xff]  }
 0x55d   :  { %5826 = vmatpush1.bf16.msra.mxu0 %v14816_v30  ;;  %5912 = vmatpush1.bf16.msra.mxu1 %v14819_v27  ;;  %v14852_v30 = vld [vmem:[%s22613_s3 + $0x1e8] ss:$16 sps:$4 sm:$0xff]   ;;  %v14857_v27 = vld [vmem:[%s22613_s3 + $0x1cc] ss:$16 sps:$4 sm:$0xff]  }
 0x55e   :  { %5827 = vmatprep.subr.bf16.mxu0 %v14824_v21  ;;  %5913 = vmatprep.subr.bf16.mxu1 %v14827_v25  ;;  %v14890_v21 = vld [vmem:[%s22613_s3 + $0x664] ss:$16 sps:$4 sm:$0xff]   ;;  %v14855_v25 = vld [vmem:[%s22613_s3 + $0x1c8] ss:$16 sps:$4 sm:$0xff]  }
 0x561   :  { %5828 = vmatpush1.bf16.msra.mxu0 %v14822_v57  ;;  %5914 = vmatpush1.bf16.msra.mxu1 %v14825_v12  ;;  %v14888_v57 = vld [vmem:[%s22613_s3 + $0x660] ss:$16 sps:$4 sm:$0xff]   ;;  %v14860_v12 = vld [vmem:[%s22613_s3 + $0x1ac] ss:$16 sps:$4 sm:$0xff]  }
 0x562   :  { %13084 = vmatprep.subr.msk.bf16.mxu1 %vm4251_vm1, %v19262_v42  ;;  %5856 = vmatprep.subr.bf16.mxu0 %v14830_v35  ;;  %v14893_v35 = vld [vmem:[%s22613_s3 + $0x644] ss:$16 sps:$4 sm:$0xff]  }
 0x564   :  { %5846 = vmatmul.mubr.bf16.vlgmr.msra.gmra.mxu0 %v19531_v6  ;;  %5932 = vmatmul.mubr.bf16.vlgmr.msra.gmra.mxu1 %v19531_v6  ;;  %v14878_v6 = vld [vmem:[%s22613_s3 + $0x6e4] ss:$16 sps:$4 sm:$0xff]  }
 0x565   :  { %5857 = vmatpush1.bf16.msra.mxu0 %v14828_v3  ;;  %5888 = vmatprep.mubr.bf16.mxu0 %v19545_v5  ;;  %v14834_v5 = vld [vmem:[%s22613_s3 + $0xa8] ss:$16 sps:$4 sm:$0xff]   ;;  %v14863_v3 = vld [vmem:[%s22613_s3 + $0x18c] ss:$16 sps:$4 sm:$0xff]  }
 0x566   :  { %5965 = vmatpush1.bf16.msra.mxu1 %v19272_v56  ;;  %5858 = vmatprep.subr.bf16.mxu0 %v14833_v22  ;;  %v14894_v22 = vld [vmem:[%s22613_s3 + $0x620] ss:$16 sps:$4 sm:$0xff]  }
 0x567   :  { %5966 = vmatprep.subr.bf16.mxu1 %v19269_v33  ;;  %5984 = vmatprep.mubr.bf16.mxu1 %v23329_v44 }
 0x569   :  { %5859 = vmatpush1.bf16.msra.mxu0 %v14831_v20  ;;  %v14896_v20 = vld [vmem:[%s22613_s3 + $0x624] ss:$16 sps:$4 sm:$0xff]  }
 0x56a   :  { %5967 = vmatpush1.bf16.msra.mxu1 %v19254_v63  ;;  %5860 = vmatprep.subr.bf16.mxu0 %v14836_v9  ;;  %v14899_v9 = vld [vmem:[%s22613_s3 + $0x604] ss:$16 sps:$4 sm:$0xff]  }
 0x56b   :  { %6616 = vmatprep.subr.bf16.mxu1 %v14878_v6  ;;  %v14897_v6 = vld [vmem:[%s22613_s3 + $0x600] ss:$16 sps:$4 sm:$0xff]  }
 0x56d   :  { %13085 = vmatmul.mubr.msk.bf16.vlgmr.msra.gmra.mxu1 %vm4247_vm14, %v19857_v37  ;;  %5861 = vmatpush1.bf16.msra.mxu0 %v14834_v5  ;;  %v14902_v5 = vld [vmem:[%s22613_s3 + $0x7e4] ss:$16 sps:$4 sm:$0xff]  }
 0x56e   :  { %5862 = vmatprep.subr.bf16.mxu0 %v14839_v39  ;;  %6617 = vmatpush1.bf16.msra.mxu1 %v14876_v49  ;;  %v14864_v39 = vld [vmem:[%s22613_s3 + $0x168] ss:$16 sps:$4 sm:$0xff]   ;;  %v14869_v49 = vld [vmem:[%s22613_s3 + $0x14c] ss:$16 sps:$4 sm:$0xff]  }
 0x56f   :  { %6618 = vmatprep.subr.bf16.mxu1 %v14881_v60  ;;  %v14900_v60 = vld [vmem:[%s22613_s3 + $0x7e0] ss:$16 sps:$4 sm:$0xff]  }
 0x571   :  { %5863 = vmatpush1.bf16.msra.mxu0 %v14837_v34  ;;  %v14905_v34 = vld [vmem:[%s22613_s3 + $0x7c4] ss:$16 sps:$4 sm:$0xff]  }
 0x572   :  { %5864 = vmatprep.subr.bf16.mxu0 %v14842_v41  ;;  %6619 = vmatpush1.bf16.msra.mxu1 %v14879_v18  ;;  %v14867_v41 = vld [vmem:[%s22613_s3 + $0x148] ss:$16 sps:$4 sm:$0xff]   ;;  %v14872_v18 = vld [vmem:[%s22613_s3 + $0x12c] ss:$16 sps:$4 sm:$0xff]  }
 0x573   :  { %6620 = vmatprep.subr.bf16.mxu1 %v14884_v58  ;;  %v14903_v58 = vld [vmem:[%s22613_s3 + $0x7c0] ss:$16 sps:$4 sm:$0xff]  }
 0x575   :  { %5865 = vmatpush1.bf16.msra.mxu0 %v14840_v0  ;;  %v14908_v0 = vld [vmem:[%s22613_s3 + $0x7a4] ss:$16 sps:$4 sm:$0xff]  }
 0x576   :  { %5866 = vmatprep.subr.bf16.mxu0 %v14845_v15  ;;  %6621 = vmatpush1.bf16.msra.mxu1 %v14882_v24  ;;  %v14870_v15 = vld [vmem:[%s22613_s3 + $0x128] ss:$16 sps:$4 sm:$0xff]   ;;  %v14875_v24 = vld [vmem:[%s22613_s3 + $0x10c] ss:$16 sps:$4 sm:$0xff]  }
 0x577   :  { %6622 = vmatprep.subr.bf16.mxu1 %v14887_v8  ;;  %v14906_v8 = vld [vmem:[%s22613_s3 + $0x7a0] ss:$16 sps:$4 sm:$0xff]  }
 0x579   :  { %5867 = vmatpush1.bf16.msra.mxu0 %v14843_v36  ;;  %v14911_v36 = vld [vmem:[%s22613_s3 + $0x784] ss:$16 sps:$4 sm:$0xff]  }
 0x57a   :  { %5868 = vmatprep.subr.bf16.mxu0 %v14848_v48  ;;  %6623 = vmatpush1.bf16.msra.mxu1 %v14885_v54  ;;  %v14873_v48 = vld [vmem:[%s22613_s3 + $0x108] ss:$16 sps:$4 sm:$0xff]   ;;  %v14909_v54 = vld [vmem:[%s22613_s3 + $0x780] ss:$16 sps:$4 sm:$0xff]  }
 0x57b   :  { %6624 = vmatprep.subr.bf16.mxu1 %v14890_v21  ;;  %v14926_v21 = vld [vmem:[%s22613_s3 + $0x8ec] ss:$16 sps:$4 sm:$0xff]  }
 0x57d   :  { %5869 = vmatpush1.bf16.msra.mxu0 %v14846_v53  ;;  %v14914_v53 = vld [vmem:[%s22613_s3 + $0x764] ss:$16 sps:$4 sm:$0xff]  }
 0x57e   :  { %5870 = vmatprep.subr.bf16.mxu0 %v14851_v28  ;;  %6625 = vmatpush1.bf16.msra.mxu1 %v14888_v57  ;;  %v14912_v28 = vld [vmem:[%s22613_s3 + $0x760] ss:$16 sps:$4 sm:$0xff]  }
 0x57f   :  { %6626 = vmatprep.subr.bf16.mxu1 %v14893_v35 }
 0x581   :  { %5871 = vmatpush1.bf16.msra.mxu0 %v14849_v32  ;;  %v14915_v32 = vld [vmem:[%s22613_s3 + $0x740] ss:$16 sps:$4 sm:$0xff]  }
 0x582   :  { %5872 = vmatprep.subr.bf16.mxu0 %v14854_v29  ;;  %6627 = vmatpush1.bf16.msra.mxu1 %v14891_v19  ;;  %v14920_v29 = vld [vmem:[%s22613_s3 + $0x724] ss:$16 sps:$4 sm:$0xff]  }
 0x583   :  { %6628 = vmatprep.subr.bf16.mxu1 %v14896_v20 }
 0x585   :  { %5873 = vmatpush2.bf16.msra.mxu0 %v14852_v30  ;;  %v14918_v30 = vld [vmem:[%s22613_s3 + $0x720] ss:$16 sps:$4 sm:$0xff]  }
 0x586   :  { %5874 = vmatprep.subr.bf16.mxu0 %v14857_v27  ;;  %6629 = vmatpush1.bf16.msra.mxu1 %v14894_v22  ;;  %v14923_v27 = vld [vmem:[%s22613_s3 + $0x704] ss:$16 sps:$4 sm:$0xff]  }
 0x587   :  { %6630 = vmatprep.subr.bf16.mxu1 %v14899_v9 }
 0x589   :  { %5875 = vmatpush2.bf16.msra.mxu0 %v14855_v25 }
 0x58a   :  { %5876 = vmatprep.subr.bf16.mxu0 %v14860_v12  ;;  %6631 = vmatpush1.bf16.msra.mxu1 %v14897_v6  ;;  %v14948_v6 = vld [vmem:[%s22613_s3 + $0x8e0] ss:$16 sps:$4 sm:$0xff]  }
 0x58b   :  { %6632 = vmatprep.subr.bf16.mxu1 %v14902_v5  ;;  %v14950_v5 = vld [vmem:[%s22613_s3 + $0x8e4] ss:$16 sps:$4 sm:$0xff]  }
 0x58d   :  { %5877 = vmatpush2.bf16.msra.mxu0 %v14858_v14 }
 0x58e   :  { %5878 = vmatprep.subr.bf16.mxu0 %v14863_v3  ;;  %6633 = vmatpush2.bf16.msra.mxu1 %v14900_v60  ;;  %v14956_v60 = vld [vmem:[%s22613_s3 + $0x8a4] ss:$16 sps:$4 sm:$0xff]  }
 0x58f   :  { %6634 = vmatprep.subr.bf16.mxu1 %v14905_v34  ;;  %v14954_v34 = vld [vmem:[%s22613_s3 + $0x8a0] ss:$16 sps:$4 sm:$0xff]  }
 0x591   :  { %5879 = vmatpush2.bf16.msra.mxu0 %v14861_v43 }
 0x592   :  { %5880 = vmatprep.subr.bf16.mxu0 %v14866_v16  ;;  %6635 = vmatpush2.bf16.msra.mxu1 %v14903_v58  ;;  %v14962_v58 = vld [vmem:[%s22613_s3 + $0x864] ss:$16 sps:$4 sm:$0xff]  }
 0x593   :  { %6636 = vmatprep.subr.bf16.mxu1 %v14908_v0  ;;  %v14960_v0 = vld [vmem:[%s22613_s3 + $0x860] ss:$16 sps:$4 sm:$0xff]  }
 0x595   :  { %5881 = vmatpush2.bf16.msra.mxu0 %v14864_v39  ;;  %v14951_v39 = vld [vmem:[%s22613_s3 + $0x8c0] ss:$16 sps:$4 sm:$0xff]  }
 0x596   :  { %5882 = vmatprep.subr.bf16.mxu0 %v14869_v49  ;;  %6637 = vmatpush2.bf16.msra.mxu1 %v14906_v8  ;;  %v14953_v49 = vld [vmem:[%s22613_s3 + $0x8c4] ss:$16 sps:$4 sm:$0xff]  }
 0x597   :  { %6638 = vmatprep.subr.bf16.mxu1 %v14911_v36  ;;  %v14968_v8 = vld [vmem:[%s22613_s3 + $0x824] ss:$16 sps:$4 sm:$0xff]   ;;  %v14966_v36 = vld [vmem:[%s22613_s3 + $0x820] ss:$16 sps:$4 sm:$0xff]  }
 0x599   :  { %5883 = vmatpush2.bf16.msra.mxu0 %v14867_v41  ;;  %v14959_v41 = vld [vmem:[%s22613_s3 + $0x884] ss:$16 sps:$4 sm:$0xff]  }
 0x59a   :  { %5884 = vmatprep.subr.bf16.mxu0 %v14872_v18  ;;  %6639 = vmatpush2.bf16.msra.mxu1 %v14909_v54  ;;  %v14957_v18 = vld [vmem:[%s22613_s3 + $0x880] ss:$16 sps:$4 sm:$0xff]   ;;  %v14971_v54 = vld [vmem:[%s22613_s3 + $0x804] ss:$16 sps:$4 sm:$0xff]  }
 0x59b   :  { %6640 = vmatprep.subr.bf16.mxu1 %v14914_v53  ;;  %v14974_v53 = vld [vmem:[%s22613_s3 + $0x6ec] ss:$16 sps:$4 sm:$0xff]  }
 0x59d   :  { %5885 = vmatpush2.bf16.msra.mxu0 %v14870_v15  ;;  %v5152_v25 = vpop.f32.mrf.mxu1  ;;  %v14965_v15 = vld [vmem:[%s22613_s3 + $0x844] ss:$16 sps:$4 sm:$0xff]  }
 0x59e   :  { %5886 = vmatprep.subr.bf16.mxu0 %v14875_v24  ;;  %6641 = vmatpush2.bf16.msra.mxu1 %v14912_v28  ;;  %v14963_v24 = vld [vmem:[%s22613_s3 + $0x840] ss:$16 sps:$4 sm:$0xff]  }
 0x59f   :  { %v5154_v57 = vpop.f32.mrf.mxu1 }
 0x5a1   :  { %5887 = vmatpush2.bf16.msra.mxu0 %v14873_v48  ;;  %v5156_v14 = vpop.f32.mrf.mxu1  ;;  %v14969_v48 = vld [vmem:[%s22613_s3 + $0x800] ss:$16 sps:$4 sm:$0xff]  }
 0x5a2   :  { %14469 = vmatprep.subr.bf16.mxu0 %v23331_v31 }
 0x5a3   :  { %v5158_v9 = vpop.f32.mrf.mxu1 }
 0x5a4   :  { %5889 = vmatmul.mubr.bf16.vlgmr.msra.gmra.mxu0 %v19477_v11  ;;  %v14917_v11 = vld [vmem:[%s22613_s3 + $0x744] ss:$16 sps:$4 sm:$0xff]  }
 0x5a5   :  { %14470 = vmatpush3.bf16.msra.mxu0 %v19359_v17  ;;  %14473 = vmatprep.mubr.msk.bf16.mxu0 %vm15753_vm12, %v23331_v31 }
 0x5a6   :  { %14471 = vmatprep.subr.bf16.mxu0 %v23331_v31  ;;  %6642 = vmatprep.subr.bf16.mxu1 %v14917_v11 }
 0x5a7   :  { %6643 = vmatpush2.bf16.msra.mxu1 %v14915_v32 }
 0x5a8   :  { %6644 = vmatprep.subr.bf16.mxu1 %v14920_v29 }
 0x5a9   :  { %14472 = vmatpush3.bf16.msra.mxu0 %v19346_v52 }
 0x5aa   :  { %6659 = vmatprep.subr.bf16.mxu0 %v14950_v5 }
 0x5ab   :  { %6645 = vmatpush2.bf16.msra.mxu1 %v14918_v30 }
 0x5ac   :  { %14474 = vmatmul.mubr.msk.bf16.vlgmr.msra.gmra.mxu0 %vm4247_vm14, %v19857_v37  ;;  %v14921_v37 = vld [vmem:[%s22613_s3 + $0x700] ss:$16 sps:$4 sm:$0xff]   ;;  %6646 = vmatprep.subr.bf16.mxu1 %v14923_v27 }
 0x5ad   :  { %6691 = vmatprep.mubr.bf16.mxu0 %v23329_v44  ;;  %6660 = vmatpush1.bf16.msra.mxu0 %v14948_v6 }
 0x5ae   :  { %6661 = vmatprep.subr.bf16.mxu0 %v14953_v49 }
 0x5af   :  { %6647 = vmatpush2.bf16.msra.mxu1 %v14921_v37 }
 0x5b0   :  { %6745 = vmatprep.subr.bf16.mxu1 %v14926_v21 }
 0x5b1   :  { %6662 = vmatpush1.bf16.msra.mxu0 %v14951_v39 }
 0x5b2   :  { %6663 = vmatprep.subr.bf16.mxu0 %v14956_v60 }
 0x5b5   :  { %6664 = vmatpush1.bf16.msra.mxu0 %v14954_v34 }
 0x5b6   :  { %6665 = vmatprep.subr.bf16.mxu0 %v14959_v41 }
 0x5b9   :  { %6666 = vmatpush1.bf16.msra.mxu0 %v14957_v18 }
 0x5ba   :  { %6667 = vmatprep.subr.bf16.mxu0 %v14962_v58 }
 0x5bd   :  { %6668 = vmatpush1.bf16.msra.mxu0 %v14960_v0 }
 0x5be   :  { %6669 = vmatprep.subr.bf16.mxu0 %v14965_v15 }
 0x5c1   :  { %6670 = vmatpush1.bf16.msra.mxu0 %v14963_v24 }
 0x5c2   :  { %6671 = vmatprep.subr.bf16.mxu0 %v14968_v8 }
 0x5c4   :  { %v5195_v12 = vpop.f32.mrf.mxu0  ;;  %v5281_v28 = vpop.f32.mrf.mxu1 }
 0x5c5   :  { %v5196_v35 = vadd.f32 %v5195_v12, %v5152_v25  ;;  %6672 = vmatpush1.bf16.msra.mxu0 %v14966_v36 }
 0x5c6   :  { %v5197_v19 = vpop.f32.mrf.mxu0  ;;  %6673 = vmatprep.subr.bf16.mxu0 %v14971_v54  ;;  %v5283_v11 = vpop.f32.mrf.mxu1 }
 0x5c7   :  { %v5198_v3 = vadd.f32 %v5197_v19, %v5154_v57 }
 0x5c8   :  { %v5199_v22 = vpop.f32.mrf.mxu0  ;;  %v5285_v32 = vpop.f32.mrf.mxu1 }
 0x5c9   :  { %v5200_v20 = vadd.f32 %v5199_v22, %v5156_v14  ;;  %6674 = vmatpush1.bf16.msra.mxu0 %v14969_v48 }
 0x5ca   :  { %v5201_v43 = vpop.f32.mrf.mxu0  ;;  %6702 = vmatprep.subr.bf16.mxu0 %v14974_v53  ;;  %v5287_v29 = vpop.f32.mrf.mxu1 }
 0x5cb   :  { %v5202_v16 = vadd.f32 %v5201_v43, %v5158_v9 }
 0x604   :  { %v5238_v30 = vpop.f32.mrf.mxu0  ;;  %v5804_v27 = vpop.f32.mrf.mxu1 }
 0x605   :  { %v20097_v37 = vadd.f32 %v5281_v28, %v5238_v30  ;;  %v5805_v21 = vadd.f32 %v5804_v27, %v5196_v35  ;;  %v14932_v30 = vld [vmem:[%s22613_s3 + $0x8ac] ss:$16 sps:$4 sm:$0xff]   ;;  %v14930_v27 = vld [vmem:[%s22613_s3 + $0x8a8] ss:$16 sps:$4 sm:$0xff]  }
 0x606   :  { %v5240_v25 = vpop.f32.mrf.mxu0  ;;  %v5806_v57 = vpop.f32.mrf.mxu1 }
 0x607   :  { %v20099_v12 = vadd.f32 %v5283_v11, %v5240_v25  ;;  %v5807_v14 = vadd.f32 %v5806_v57, %v5198_v3  ;;  %v14924_v11 = vld [vmem:[%s22613_s3 + $0x8e8] ss:$16 sps:$4 sm:$0xff]   ;;  %v14938_v57 = vld [vmem:[%s22613_s3 + $0x86c] ss:$16 sps:$4 sm:$0xff]  }
 0x608   :  { %v5242_v19 = vpop.f32.mrf.mxu0  ;;  %v5808_v22 = vpop.f32.mrf.mxu1  ;;  %v14933_v25 = vld [vmem:[%s22613_s3 + $0x888] ss:$16 sps:$4 sm:$0xff]  }
 0x609   :  { %v20101_v9 = vadd.f32 %v5285_v32, %v5242_v19  ;;  %v5809_v43 = vadd.f32 %v5808_v22, %v5200_v20  ;;  %v14929_v32 = vld [vmem:[%s22613_s3 + $0x8cc] ss:$16 sps:$4 sm:$0xff]   ;;  %v14939_v22 = vld [vmem:[%s22613_s3 + $0x848] ss:$16 sps:$4 sm:$0xff]  }
 0x60a   :  { %v5244_v6 = vpop.f32.mrf.mxu0  ;;  %v5810_v5 = vpop.f32.mrf.mxu1  ;;  %v14941_v19 = vld [vmem:[%s22613_s3 + $0x84c] ss:$16 sps:$4 sm:$0xff]  }
 0x60b   :  { %v5288_v39 = vadd.f32 %v5287_v29, %v5244_v6  ;;  %v5811_v49 = vadd.f32 %v5810_v5, %v5202_v16  ;;  %v14927_v29 = vld [vmem:[%s22613_s3 + $0x8c8] ss:$16 sps:$4 sm:$0xff]   ;;  %v14947_v5 = vld [vmem:[%s22613_s3 + $0x80c] ss:$16 sps:$4 sm:$0xff]  }
 0x60c   :  { %v14942_v6 = vld [vmem:[%s22613_s3 + $0x828] ss:$16 sps:$4 sm:$0xff]  }
 0x624   :  { %v5847_v60 = vpop.f32.mrf.mxu0  ;;  %v20103_v34 = vpop.f32.mrf.mxu1 }
 0x625   :  { %v20105_v41 = vadd.f32 %v5847_v60, %v5805_v21  ;;  %v14935_v21 = vld [vmem:[%s22613_s3 + $0x88c] ss:$16 sps:$4 sm:$0xff]  }
 0x626   :  { %v5849_v35 = vpop.f32.mrf.mxu0  ;;  %v20107_v18 = vpop.f32.mrf.mxu1 }
 0x627   :  { %v20109_v58 = vadd.f32 %v5849_v35, %v5807_v14  ;;  %v14936_v14 = vld [vmem:[%s22613_s3 + $0x868] ss:$16 sps:$4 sm:$0xff]  }
 0x628   :  { %v5851_v3 = vpop.f32.mrf.mxu0  ;;  %v20111_v0 = vpop.f32.mrf.mxu1 }
 0x629   :  { %v20113_v15 = vadd.f32 %v5851_v3, %v5809_v43  ;;  %v14944_v43 = vld [vmem:[%s22613_s3 + $0x82c] ss:$16 sps:$4 sm:$0xff]  }
 0x62a   :  { %v5853_v20 = vpop.f32.mrf.mxu0  ;;  %v5939_v24 = vpop.f32.mrf.mxu1 }
 0x62b   :  { %v20115_v8 = vadd.f32 %v5853_v20, %v5811_v49  ;;  %v14945_v49 = vld [vmem:[%s22613_s3 + $0x808] ss:$16 sps:$4 sm:$0xff]  }
 0x62d   :  { %v5986_v16 = vpop.f32.mrf.mxu1 }
 0x62f   :  { %v5988_v36 = vpop.f32.mrf.mxu1 }
 0x631   :  { %v5990_v48 = vpop.f32.mrf.mxu1 }
 0x632   :  { %v20117_v54 = vpack.c.bf16 %v5990_v48, %v5986_v16 }
 0x633   :  { %v5992_v53 = vpop.f32.mrf.mxu1 }
 0x634   :  { %v20119_v28 = vpack.c.bf16 %v5992_v53, %v5988_v36 }
 0x636   :  { %6648 = vmatprep.mubr.bf16.mxu1 %v20119_v28 }
 0x637   :  { %6649 = vmatmul.mubr.bf16.vlgmr.msra.gmra.mxu1 %v20117_v54 }
 0x638   :  { %6746 = vmatpush1.bf16.msra.mxu1 %v14924_v11  ;;  %6777 = vmatprep.mubr.bf16.mxu1 %v23329_v44 }
 0x639   :  { %6747 = vmatprep.subr.bf16.mxu1 %v14929_v32 }
 0x63c   :  { %6748 = vmatpush1.bf16.msra.mxu1 %v14927_v29  ;;  %v6796_v29 = vadd.s32 3, %v19247_v4 }
 0x63d   :  { %6749 = vmatprep.subr.bf16.mxu1 %v14932_v30  ;;  %v6797_v30 = vadd.s32 3, %v19250_v7 }
 0x63e   :  { %vm6798_vm5 = vcmp.eq.s32.totalorder %v23330_v10, %v6796_v29  ;;  %v15031_v29 = vld [vmem:[%s22613_s3 + $0x984] ss:$16 sps:$4 sm:$0xff]  }
 0x63f   :  { %vm6799_vm9 = vcmp.eq.s32.totalorder %v23330_v10, %v6797_v30  ;;  %v14987_v30 = vld [vmem:[%s22613_s3 + $0x648] ss:$16 sps:$4 sm:$0xff]  }
 0x640   :  { %6750 = vmatpush1.bf16.msra.mxu1 %v14930_v27 }
 0x641   :  { %6751 = vmatprep.subr.bf16.mxu1 %v14935_v21 }
 0x644   :  { %6752 = vmatpush1.bf16.msra.mxu1 %v14933_v25  ;;  %v6800_v25 = vsel %vm6798_vm5, 1.0, %v23331_v31 }
 0x645   :  { %6753 = vmatprep.subr.bf16.mxu1 %v14938_v57  ;;  %v6801_v57 = vsel %vm6799_vm9, 1.0, %v23331_v31 }
 0x648   :  { %6754 = vmatpush1.bf16.msra.mxu1 %v14936_v14  ;;  %v14980_v14 = vld [vmem:[%s22613_s3 + $0x6ac] ss:$16 sps:$4 sm:$0xff]  }
 0x649   :  { %6755 = vmatprep.subr.bf16.mxu1 %v14941_v19  ;;  %v15022_v19 = vld [vmem:[%s22613_s3 + $0x9e4] ss:$16 sps:$4 sm:$0xff]  }
 0x64c   :  { %6756 = vmatpush1.bf16.msra.mxu1 %v14939_v22  ;;  %v20207_v22 = vpack.c.bf16 %v6801_v57, %v6800_v25  ;;  %v14993_v25 = vld [vmem:[%s22613_s3 + $0x608] ss:$16 sps:$4 sm:$0xff]   ;;  %v15035_v57 = vld [vmem:[%s22613_s3 + $0x940] ss:$16 sps:$4 sm:$0xff]  }
 0x64d   :  { %6757 = vmatprep.subr.bf16.mxu1 %v14944_v43  ;;  %v14978_v43 = vld [vmem:[%s22613_s3 + $0x6a8] ss:$16 sps:$4 sm:$0xff]  }
 0x650   :  { %6758 = vmatpush1.bf16.msra.mxu1 %v14942_v6  ;;  %v15020_v6 = vld [vmem:[%s22613_s3 + $0x9e0] ss:$16 sps:$4 sm:$0xff]  }
 0x651   :  { %6759 = vmatprep.subr.bf16.mxu1 %v14947_v5  ;;  %v14983_v5 = vld [vmem:[%s22613_s3 + $0x68c] ss:$16 sps:$4 sm:$0xff]  }
 0x654   :  { %6760 = vmatpush1.bf16.msra.mxu1 %v14945_v49  ;;  %v14981_v49 = vld [vmem:[%s22613_s3 + $0x688] ss:$16 sps:$4 sm:$0xff]  }
 0x655   :  { %13279 = vmatprep.subr.msk.bf16.mxu1 %vm4251_vm1, %v19262_v42 }
 0x664   :  { %v5890_v60 = vpop.f32.mrf.mxu0 }
 0x665   :  { %v20172_v35 = vadd.f32 %v5890_v60, %v20097_v37  ;;  %v15023_v60 = vld [vmem:[%s22613_s3 + $0x9c0] ss:$16 sps:$4 sm:$0xff]  }
 0x666   :  { %v5892_v3 = vpop.f32.mrf.mxu0 }
 0x667   :  { %v20175_v20 = vadd.f32 %v5892_v3, %v20099_v12  ;;  %v14972_v12 = vld [vmem:[%s22613_s3 + $0x6e8] ss:$16 sps:$4 sm:$0xff]   ;;  %v14986_v3 = vld [vmem:[%s22613_s3 + $0x66c] ss:$16 sps:$4 sm:$0xff]  }
 0x668   :  { %v5894_v16 = vpop.f32.mrf.mxu0 }
 0x669   :  { %v20178_v36 = vadd.f32 %v5894_v16, %v20101_v9  ;;  %v14977_v9 = vld [vmem:[%s22613_s3 + $0x6cc] ss:$16 sps:$4 sm:$0xff]   ;;  %v15028_v16 = vld [vmem:[%s22613_s3 + $0x9a4] ss:$16 sps:$4 sm:$0xff]  }
 0x66a   :  { %v5896_v48 = vpop.f32.mrf.mxu0 }
 0x66b   :  { %v5897_v53 = vadd.f32 %v5896_v48, %v5288_v39  ;;  %v14984_v48 = vld [vmem:[%s22613_s3 + $0x668] ss:$16 sps:$4 sm:$0xff]  }
 0x66c   :  { %v6029_v11 = vpop.f32.mrf.mxu0 }
 0x66d   :  { %v20180_v32 = vadd.f32 %v5939_v24, %v5897_v53  ;;  %v14975_v24 = vld [vmem:[%s22613_s3 + $0x6c8] ss:$16 sps:$4 sm:$0xff]   ;;  %v15026_v53 = vld [vmem:[%s22613_s3 + $0x9a0] ss:$16 sps:$4 sm:$0xff]  }
 0x66e   :  { %v14475_v27 = vpop.f32.mrf.mxu0 }
 0x66f   :  { %v15029_v27 = vld [vmem:[%s22613_s3 + $0x980] ss:$16 sps:$4 sm:$0xff]  }
 0x670   :  { %v6032_v37 = vpop.f32.mrf.mxu0 }
 0x671   :  { %v6038_v21 = vpack.c.bf16 %v6032_v37, %v6029_v11  ;;  %v14989_v11 = vld [vmem:[%s22613_s3 + $0x64c] ss:$16 sps:$4 sm:$0xff]  }
 0x672   :  { %v14476_v39 = vpop.f32.mrf.mxu0  ;;  %v14992_v37 = vld [vmem:[%s22613_s3 + $0x62c] ss:$16 sps:$4 sm:$0xff]  }
 0x673   :  { %6692 = vmatmul.mubr.bf16.vlgmr.msra.gmra.mxu0 %v6038_v21  ;;  %6778 = vmatmul.mubr.bf16.vlgmr.msra.gmra.mxu1 %v6038_v21  ;;  %v14990_v21 = vld [vmem:[%s22613_s3 + $0x628] ss:$16 sps:$4 sm:$0xff]   ;;  %v14995_v39 = vld [vmem:[%s22613_s3 + $0x60c] ss:$16 sps:$4 sm:$0xff]  }
 0x674   :  { %6703 = vmatpush1.bf16.msra.mxu0 %v14972_v12  ;;  %6819 = vmatpush1.bf16.msra.mxu1 %v19272_v56  ;;  %v15034_v12 = vld [vmem:[%s22613_s3 + $0x964] ss:$16 sps:$4 sm:$0xff]  }
 0x675   :  { %6820 = vmatprep.subr.bf16.mxu1 %v19269_v33  ;;  %6704 = vmatprep.subr.bf16.mxu0 %v14977_v9  ;;  %v15032_v9 = vld [vmem:[%s22613_s3 + $0x960] ss:$16 sps:$4 sm:$0xff]  }
 0x676   :  { %6838 = vmatprep.mubr.bf16.mxu1 %v23329_v44  ;;  %6734 = vmatprep.mubr.bf16.mxu0 %v20119_v28  ;;  %v15025_v28 = vld [vmem:[%s22613_s3 + $0x9c4] ss:$16 sps:$4 sm:$0xff]  }
 0x678   :  { %6705 = vmatpush1.bf16.msra.mxu0 %v14975_v24  ;;  %6821 = vmatpush1.bf16.msra.mxu1 %v19254_v63  ;;  %v15037_v24 = vld [vmem:[%s22613_s3 + $0x944] ss:$16 sps:$4 sm:$0xff]  }
 0x679   :  { %6706 = vmatprep.subr.bf16.mxu0 %v14980_v14  ;;  %7470 = vmatprep.subr.bf16.mxu1 %v15022_v19  ;;  %v14998_v14 = vld [vmem:[%s22613_s3 + $0x7ec] ss:$16 sps:$4 sm:$0xff]   ;;  %v15040_v19 = vld [vmem:[%s22613_s3 + $0x924] ss:$16 sps:$4 sm:$0xff]  }
 0x67b   :  { %13280 = vmatmul.mubr.msk.bf16.vlgmr.msra.gmra.mxu1 %vm4247_vm14, %v20207_v22 }
 0x67c   :  { %6707 = vmatpush1.bf16.msra.mxu0 %v14978_v43  ;;  %7471 = vmatpush1.bf16.msra.mxu1 %v15020_v6  ;;  %v14996_v43 = vld [vmem:[%s22613_s3 + $0x7e8] ss:$16 sps:$4 sm:$0xff]   ;;  %v15038_v6 = vld [vmem:[%s22613_s3 + $0x920] ss:$16 sps:$4 sm:$0xff]  }
 0x67d   :  { %6708 = vmatprep.subr.bf16.mxu0 %v14983_v5  ;;  %7472 = vmatprep.subr.bf16.mxu1 %v15025_v28  ;;  %v15001_v5 = vld [vmem:[%s22613_s3 + $0x7cc] ss:$16 sps:$4 sm:$0xff]   ;;  %v15043_v28 = vld [vmem:[%s22613_s3 + $0x904] ss:$16 sps:$4 sm:$0xff]  }
 0x680   :  { %6709 = vmatpush1.bf16.msra.mxu0 %v14981_v49  ;;  %7473 = vmatpush1.bf16.msra.mxu1 %v15023_v60  ;;  %v14999_v49 = vld [vmem:[%s22613_s3 + $0x7c8] ss:$16 sps:$4 sm:$0xff]   ;;  %v15041_v60 = vld [vmem:[%s22613_s3 + $0x900] ss:$16 sps:$4 sm:$0xff]  }
 0x681   :  { %6710 = vmatprep.subr.bf16.mxu0 %v14986_v3  ;;  %7474 = vmatprep.subr.bf16.mxu1 %v15028_v16  ;;  %v15004_v3 = vld [vmem:[%s22613_s3 + $0x7ac] ss:$16 sps:$4 sm:$0xff]   ;;  %v15046_v16 = vld [vmem:[%s22613_s3 + $0xae4] ss:$16 sps:$4 sm:$0xff]  }
 0x684   :  { %6711 = vmatpush1.bf16.msra.mxu0 %v14984_v48  ;;  %7475 = vmatpush1.bf16.msra.mxu1 %v15026_v53  ;;  %v15002_v48 = vld [vmem:[%s22613_s3 + $0x7a8] ss:$16 sps:$4 sm:$0xff]   ;;  %v15044_v53 = vld [vmem:[%s22613_s3 + $0xae0] ss:$16 sps:$4 sm:$0xff]  }
 0x685   :  { %6712 = vmatprep.subr.bf16.mxu0 %v14989_v11  ;;  %7476 = vmatprep.subr.bf16.mxu1 %v15031_v29  ;;  %v15007_v11 = vld [vmem:[%s22613_s3 + $0x78c] ss:$16 sps:$4 sm:$0xff]   ;;  %v15049_v29 = vld [vmem:[%s22613_s3 + $0xac4] ss:$16 sps:$4 sm:$0xff]  }
 0x688   :  { %6713 = vmatpush1.bf16.msra.mxu0 %v14987_v30  ;;  %7477 = vmatpush1.bf16.msra.mxu1 %v15029_v27  ;;  %v15005_v30 = vld [vmem:[%s22613_s3 + $0x788] ss:$16 sps:$4 sm:$0xff]   ;;  %v15047_v27 = vld [vmem:[%s22613_s3 + $0xac0] ss:$16 sps:$4 sm:$0xff]  }
 0x689   :  { %6714 = vmatprep.subr.bf16.mxu0 %v14992_v37  ;;  %7478 = vmatprep.subr.bf16.mxu1 %v15034_v12  ;;  %v15010_v37 = vld [vmem:[%s22613_s3 + $0x76c] ss:$16 sps:$4 sm:$0xff]   ;;  %v15052_v12 = vld [vmem:[%s22613_s3 + $0xaa4] ss:$16 sps:$4 sm:$0xff]  }
 0x68c   :  { %6715 = vmatpush1.bf16.msra.mxu0 %v14990_v21  ;;  %7479 = vmatpush1.bf16.msra.mxu1 %v15032_v9  ;;  %v15008_v21 = vld [vmem:[%s22613_s3 + $0x768] ss:$16 sps:$4 sm:$0xff]   ;;  %v15050_v9 = vld [vmem:[%s22613_s3 + $0xaa0] ss:$16 sps:$4 sm:$0xff]  }
 0x68d   :  { %6716 = vmatprep.subr.bf16.mxu0 %v14995_v39  ;;  %7480 = vmatprep.subr.bf16.mxu1 %v15037_v24  ;;  %v15013_v39 = vld [vmem:[%s22613_s3 + $0x74c] ss:$16 sps:$4 sm:$0xff]   ;;  %v15055_v24 = vld [vmem:[%s22613_s3 + $0xa84] ss:$16 sps:$4 sm:$0xff]  }
 0x690   :  { %6717 = vmatpush1.bf16.msra.mxu0 %v14993_v25  ;;  %7481 = vmatpush1.bf16.msra.mxu1 %v15035_v57  ;;  %v15011_v25 = vld [vmem:[%s22613_s3 + $0x748] ss:$16 sps:$4 sm:$0xff]   ;;  %v15053_v57 = vld [vmem:[%s22613_s3 + $0xa80] ss:$16 sps:$4 sm:$0xff]  }
 0x691   :  { %6718 = vmatprep.subr.bf16.mxu0 %v14998_v14  ;;  %7482 = vmatprep.subr.bf16.mxu1 %v15040_v19  ;;  %v15016_v14 = vld [vmem:[%s22613_s3 + $0x72c] ss:$16 sps:$4 sm:$0xff]   ;;  %v15014_v19 = vld [vmem:[%s22613_s3 + $0x728] ss:$16 sps:$4 sm:$0xff]  }
 0x694   :  { %6719 = vmatpush2.bf16.msra.mxu0 %v14996_v43  ;;  %7483 = vmatpush1.bf16.msra.mxu1 %v15038_v6  ;;  %v15019_v43 = vld [vmem:[%s22613_s3 + $0x70c] ss:$16 sps:$4 sm:$0xff]   ;;  %v15017_v6 = vld [vmem:[%s22613_s3 + $0x708] ss:$16 sps:$4 sm:$0xff]  }
 0x695   :  { %6720 = vmatprep.subr.bf16.mxu0 %v15001_v5  ;;  %7484 = vmatprep.subr.bf16.mxu1 %v15043_v28  ;;  %v15058_v5 = vld [vmem:[%s22613_s3 + $0xa64] ss:$16 sps:$4 sm:$0xff]   ;;  %v15056_v28 = vld [vmem:[%s22613_s3 + $0xa60] ss:$16 sps:$4 sm:$0xff]  }
 0x698   :  { %6721 = vmatpush2.bf16.msra.mxu0 %v14999_v49  ;;  %7485 = vmatpush1.bf16.msra.mxu1 %v15041_v60  ;;  %v15059_v49 = vld [vmem:[%s22613_s3 + $0xa40] ss:$16 sps:$4 sm:$0xff]  }
 0x699   :  { %6722 = vmatprep.subr.bf16.mxu0 %v15004_v3  ;;  %7486 = vmatprep.subr.bf16.mxu1 %v15046_v16  ;;  %v15062_v60 = vld [vmem:[%s22613_s3 + $0xa20] ss:$16 sps:$4 sm:$0xff]   ;;  %v15064_v3 = vld [vmem:[%s22613_s3 + $0xa24] ss:$16 sps:$4 sm:$0xff]  }
 0x69a   :  { %v15065_v16 = vld [vmem:[%s22613_s3 + $0xa00] ss:$16 sps:$4 sm:$0xff]  }
 0x69c   :  { %6723 = vmatpush2.bf16.msra.mxu0 %v15002_v48  ;;  %7487 = vmatpush2.bf16.msra.mxu1 %v15044_v53  ;;  %v15070_v48 = vld [vmem:[%s22613_s3 + $0xbec] ss:$16 sps:$4 sm:$0xff]   ;;  %v15089_v53 = vld [vmem:[%s22613_s3 + $0xbe0] ss:$16 sps:$4 sm:$0xff]  }
 0x69d   :  { %6724 = vmatprep.subr.bf16.mxu0 %v15007_v11  ;;  %7488 = vmatprep.subr.bf16.mxu1 %v15049_v29  ;;  %v15091_v11 = vld [vmem:[%s22613_s3 + $0xbe4] ss:$16 sps:$4 sm:$0xff]   ;;  %v15095_v29 = vld [vmem:[%s22613_s3 + $0xbc0] ss:$16 sps:$4 sm:$0xff]  }
 0x6a0   :  { %6725 = vmatpush2.bf16.msra.mxu0 %v15005_v30  ;;  %7489 = vmatpush2.bf16.msra.mxu1 %v15047_v27  ;;  %v15097_v30 = vld [vmem:[%s22613_s3 + $0xbc4] ss:$16 sps:$4 sm:$0xff]  }
 0x6a1   :  { %6726 = vmatprep.subr.bf16.mxu0 %v15010_v37  ;;  %7490 = vmatprep.subr.bf16.mxu1 %v15052_v12  ;;  %v15100_v27 = vld [vmem:[%s22613_s3 + $0xba4] ss:$16 sps:$4 sm:$0xff]   ;;  %v15098_v37 = vld [vmem:[%s22613_s3 + $0xba0] ss:$16 sps:$4 sm:$0xff]  }
 0x6a2   :  { %v15103_v12 = vld [vmem:[%s22613_s3 + $0xb84] ss:$16 sps:$4 sm:$0xff]  }
 0x6a4   :  { %6727 = vmatpush2.bf16.msra.mxu0 %v15008_v21  ;;  %7491 = vmatpush2.bf16.msra.mxu1 %v15050_v9  ;;  %v15101_v21 = vld [vmem:[%s22613_s3 + $0xb80] ss:$16 sps:$4 sm:$0xff]   ;;  %v15106_v9 = vld [vmem:[%s22613_s3 + $0xb64] ss:$16 sps:$4 sm:$0xff]  }
 0x6a5   :  { %6728 = vmatprep.subr.bf16.mxu0 %v15013_v39  ;;  %7492 = vmatprep.subr.bf16.mxu1 %v15055_v24  ;;  %v15104_v39 = vld [vmem:[%s22613_s3 + $0xb60] ss:$16 sps:$4 sm:$0xff]   ;;  %v15109_v24 = vld [vmem:[%s22613_s3 + $0xb44] ss:$16 sps:$4 sm:$0xff]  }
 0x6a8   :  { %6729 = vmatpush2.bf16.msra.mxu0 %v15011_v25  ;;  %7493 = vmatpush2.bf16.msra.mxu1 %v15053_v57  ;;  %v15107_v25 = vld [vmem:[%s22613_s3 + $0xb40] ss:$16 sps:$4 sm:$0xff]   ;;  %v15112_v57 = vld [vmem:[%s22613_s3 + $0xb24] ss:$16 sps:$4 sm:$0xff]  }
 0x6a9   :  { %6730 = vmatprep.subr.bf16.mxu0 %v15016_v14  ;;  %7494 = vmatprep.subr.bf16.mxu1 %v15058_v5  ;;  %v15110_v14 = vld [vmem:[%s22613_s3 + $0xb20] ss:$16 sps:$4 sm:$0xff]  }
 0x6ac   :  { %6731 = vmatpush2.bf16.msra.mxu0 %v15014_v19  ;;  %7495 = vmatpush2.bf16.msra.mxu1 %v15056_v28  ;;  %v15115_v19 = vld [vmem:[%s22613_s3 + $0xb04] ss:$16 sps:$4 sm:$0xff]  }
 0x6ad   :  { %6732 = vmatprep.subr.bf16.mxu0 %v15019_v43  ;;  %v15113_v43 = vld [vmem:[%s22613_s3 + $0xb00] ss:$16 sps:$4 sm:$0xff]  }
 0x6b0   :  { %6733 = vmatpush2.bf16.msra.mxu0 %v15017_v6  ;;  %v15118_v6 = vld [vmem:[%s22613_s3 + $0x9ec] ss:$16 sps:$4 sm:$0xff]  }
 0x6b1   :  { %14477 = vmatprep.subr.bf16.mxu0 %v23331_v31 }
 0x6b3   :  { %6735 = vmatmul.mubr.bf16.vlgmr.msra.gmra.mxu0 %v20117_v54  ;;  %v15061_v54 = vld [vmem:[%s22613_s3 + $0xa44] ss:$16 sps:$4 sm:$0xff]  }
 0x6b4   :  { %14478 = vmatpush3.bf16.msra.mxu0 %v19359_v17  ;;  %14481 = vmatprep.mubr.msk.bf16.mxu0 %vm15753_vm12, %v23331_v31 }
 0x6b5   :  { %14479 = vmatprep.subr.bf16.mxu0 %v23331_v31  ;;  %7496 = vmatprep.subr.bf16.mxu1 %v15061_v54 }
 0x6b6   :  { %7497 = vmatpush2.bf16.msra.mxu1 %v15059_v49 }
 0x6b7   :  { %7498 = vmatprep.subr.bf16.mxu1 %v15064_v3 }
 0x6b8   :  { %14480 = vmatpush3.bf16.msra.mxu0 %v19346_v52 }
 0x6b9   :  { %7513 = vmatprep.subr.bf16.mxu0 %v15091_v11 }
 0x6ba   :  { %7499 = vmatpush2.bf16.msra.mxu1 %v15062_v60 }
 0x6bb   :  { %14482 = vmatmul.mubr.msk.bf16.vlgmr.msra.gmra.mxu0 %vm4247_vm14, %v20207_v22  ;;  %v15067_v22 = vld [vmem:[%s22613_s3 + $0xa04] ss:$16 sps:$4 sm:$0xff]  }
 0x6bc   :  { %7545 = vmatprep.mubr.bf16.mxu0 %v23329_v44  ;;  %7500 = vmatprep.subr.bf16.mxu1 %v15067_v22 }
 0x6bd   :  { %7514 = vmatpush1.bf16.msra.mxu0 %v15089_v53 }
 0x6be   :  { %7501 = vmatpush2.bf16.msra.mxu1 %v15065_v16  ;;  %7515 = vmatprep.subr.bf16.mxu0 %v15097_v30 }
 0x6bf   :  { %7599 = vmatprep.subr.bf16.mxu1 %v15070_v48 }
 0x6c1   :  { %7516 = vmatpush1.bf16.msra.mxu0 %v15095_v29 }
 0x6c2   :  { %7517 = vmatprep.subr.bf16.mxu0 %v15100_v27 }
 0x6c5   :  { %7518 = vmatpush1.bf16.msra.mxu0 %v15098_v37 }
 0x6c6   :  { %7519 = vmatprep.subr.bf16.mxu0 %v15103_v12 }
 0x6c9   :  { %7520 = vmatpush1.bf16.msra.mxu0 %v15101_v21 }
 0x6ca   :  { %7521 = vmatprep.subr.bf16.mxu0 %v15106_v9 }
 0x6cd   :  { %7522 = vmatpush1.bf16.msra.mxu0 %v15104_v39 }
 0x6ce   :  { %7523 = vmatprep.subr.bf16.mxu0 %v15109_v24 }
 0x6d1   :  { %7524 = vmatpush1.bf16.msra.mxu0 %v15107_v25 }
 0x6d2   :  { %7525 = vmatprep.subr.bf16.mxu0 %v15112_v57 }
 0x6d5   :  { %7526 = vmatpush1.bf16.msra.mxu0 %v15110_v14 }
 0x6d6   :  { %7527 = vmatprep.subr.bf16.mxu0 %v15115_v19 }
 0x6d9   :  { %7528 = vmatpush1.bf16.msra.mxu0 %v15113_v43 }
 0x6da   :  { %7556 = vmatprep.subr.bf16.mxu0 %v15118_v6  ;;  %v15076_v6 = vld [vmem:[%s22613_s3 + $0xbac] ss:$16 sps:$4 sm:$0xff]  }
 0x6f7   :  { %v6650_v5 = vpop.f32.mrf.mxu1 }
 0x6f9   :  { %v6652_v28 = vpop.f32.mrf.mxu1 }
 0x6fb   :  { %v6654_v54 = vpop.f32.mrf.mxu1 }
 0x6fd   :  { %v6656_v49 = vpop.f32.mrf.mxu1 }
 0x733   :  { %v6693_v60 = vpop.f32.mrf.mxu0  ;;  %v6779_v3 = vpop.f32.mrf.mxu1 }
 0x734   :  { %v6694_v16 = vadd.f32 %v6693_v60, %v6650_v5  ;;  %v15074_v5 = vld [vmem:[%s22613_s3 + $0xba8] ss:$16 sps:$4 sm:$0xff]  }
 0x735   :  { %v6695_v22 = vpop.f32.mrf.mxu0  ;;  %v6781_v48 = vpop.f32.mrf.mxu1  ;;  %v15080_v60 = vld [vmem:[%s22613_s3 + $0xb68] ss:$16 sps:$4 sm:$0xff]  }
 0x736   :  { %v20451_v53 = vadd.f32 %v6694_v16, %v20105_v41  ;;  %v6696_v11 = vadd.f32 %v6695_v22, %v6652_v28  ;;  %v15079_v28 = vld [vmem:[%s22613_s3 + $0xb8c] ss:$16 sps:$4 sm:$0xff]   ;;  %v15083_v22 = vld [vmem:[%s22613_s3 + $0xb48] ss:$16 sps:$4 sm:$0xff]  }
 0x737   :  { %v6697_v29 = vpop.f32.mrf.mxu0  ;;  %v6783_v30 = vpop.f32.mrf.mxu1  ;;  %v15085_v16 = vld [vmem:[%s22613_s3 + $0xb4c] ss:$16 sps:$4 sm:$0xff]  }
 0x738   :  { %v20454_v27 = vadd.f32 %v6696_v11, %v20109_v58  ;;  %v6698_v37 = vadd.f32 %v6697_v29, %v6654_v54  ;;  %v15068_v58 = vld [vmem:[%s22613_s3 + $0xbe8] ss:$16 sps:$4 sm:$0xff]   ;;  %v15088_v11 = vld [vmem:[%s22613_s3 + $0xb2c] ss:$16 sps:$4 sm:$0xff]  }
 0x739   :  { %v6699_v12 = vpop.f32.mrf.mxu0  ;;  %v6785_v21 = vpop.f32.mrf.mxu1  ;;  %v15077_v54 = vld [vmem:[%s22613_s3 + $0xb88] ss:$16 sps:$4 sm:$0xff]  }
 0x73a   :  { %v20457_v9 = vadd.f32 %v6698_v37, %v20113_v15  ;;  %v6700_v39 = vadd.f32 %v6699_v12, %v6656_v49  ;;  %v15073_v15 = vld [vmem:[%s22613_s3 + $0xbcc] ss:$16 sps:$4 sm:$0xff]   ;;  %v15086_v29 = vld [vmem:[%s22613_s3 + $0xb28] ss:$16 sps:$4 sm:$0xff]  }
 0x73b   :  { %v6840_v24 = vpop.f32.mrf.mxu1  ;;  %v15082_v49 = vld [vmem:[%s22613_s3 + $0xb6c] ss:$16 sps:$4 sm:$0xff]   ;;  %v15092_v12 = vld [vmem:[%s22613_s3 + $0xb08] ss:$16 sps:$4 sm:$0xff]  }
 0x73c   :  { %v20460_v25 = vadd.f32 %v6700_v39, %v20115_v8  ;;  %v15071_v8 = vld [vmem:[%s22613_s3 + $0xbc8] ss:$16 sps:$4 sm:$0xff]   ;;  %v15094_v37 = vld [vmem:[%s22613_s3 + $0xb0c] ss:$16 sps:$4 sm:$0xff]  }
 0x73d   :  { %v6842_v57 = vpop.f32.mrf.mxu1 }
 0x73f   :  { %v6844_v41 = vpop.f32.mrf.mxu1 }
 0x740   :  { %v20462_v14 = vpack.c.bf16 %v6844_v41, %v6840_v24  ;;  %v5934_v24 = vadd.f32 %v20103_v34, %v20172_v35 }
 0x741   :  { %v6846_v19 = vpop.f32.mrf.mxu1 }
 0x742   :  { %v20464_v43 = vpack.c.bf16 %v6846_v19, %v6842_v57  ;;  %v5936_v19 = vadd.f32 %v20107_v18, %v20175_v20  ;;  %v7650_v18 = vadd.s32 4, %v19247_v4  ;;  %v7651_v20 = vadd.s32 4, %v19250_v7  ;;  %v15119_v4 = vld [vmem:[%s22613_s3 + $0x9c8] ss:$16 sps:$4 sm:$0xff]  }
 0x744   :  { %7502 = vmatprep.mubr.bf16.mxu1 %v20464_v43  ;;  %vm7652_vm13 = vcmp.eq.s32.totalorder %v23330_v10, %v7650_v18  ;;  %vm7653_vm10 = vcmp.eq.s32.totalorder %v23330_v10, %v7651_v20  ;;  %v15142_v18 = vld [vmem:[%s22613_s3 + $0xaec] ss:$16 sps:$4 sm:$0xff]   ;;  %v15140_v20 = vld [vmem:[%s22613_s3 + $0xae8] ss:$16 sps:$4 sm:$0xff]  }
 0x745   :  { %7503 = vmatmul.mubr.bf16.vlgmr.msra.gmra.mxu1 %v20462_v14  ;;  %v7654_v7 = vsel %vm7652_vm13, 1.0, %v23331_v31 }
 0x746   :  { %7600 = vmatpush1.bf16.msra.mxu1 %v15068_v58  ;;  %7631 = vmatprep.mubr.bf16.mxu1 %v23329_v44 }
 0x747   :  { %7601 = vmatprep.subr.bf16.mxu1 %v15073_v15 }
 0x74a   :  { %7602 = vmatpush1.bf16.msra.mxu1 %v15071_v8 }
 0x74b   :  { %7603 = vmatprep.subr.bf16.mxu1 %v15076_v6  ;;  %v5938_v6 = vadd.f32 %v20111_v0, %v20178_v36  ;;  %v15116_v0 = vld [vmem:[%s22613_s3 + $0x9e8] ss:$16 sps:$4 sm:$0xff]  }
 0x74e   :  { %7604 = vmatpush1.bf16.msra.mxu1 %v15074_v5 }
 0x74f   :  { %7605 = vmatprep.subr.bf16.mxu1 %v15079_v28 }
 0x752   :  { %7606 = vmatpush1.bf16.msra.mxu1 %v15077_v54 }
 0x753   :  { %7607 = vmatprep.subr.bf16.mxu1 %v15082_v49 }
 0x756   :  { %7608 = vmatpush1.bf16.msra.mxu1 %v15080_v60  ;;  %v15124_v60 = vld [vmem:[%s22613_s3 + $0x9ac] ss:$16 sps:$4 sm:$0xff]  }
 0x757   :  { %7609 = vmatprep.subr.bf16.mxu1 %v15085_v16  ;;  %v15166_v16 = vld [vmem:[%s22613_s3 + $0xce4] ss:$16 sps:$4 sm:$0xff]  }
 0x75a   :  { %7610 = vmatpush1.bf16.msra.mxu1 %v15083_v22  ;;  %v15164_v22 = vld [vmem:[%s22613_s3 + $0xce0] ss:$16 sps:$4 sm:$0xff]  }
 0x75b   :  { %7611 = vmatprep.subr.bf16.mxu1 %v15088_v11  ;;  %v15127_v11 = vld [vmem:[%s22613_s3 + $0x98c] ss:$16 sps:$4 sm:$0xff]  }
 0x75e   :  { %7612 = vmatpush1.bf16.msra.mxu1 %v15086_v29  ;;  %v15167_v29 = vld [vmem:[%s22613_s3 + $0xcc0] ss:$16 sps:$4 sm:$0xff]  }
 0x75f   :  { %7613 = vmatprep.subr.bf16.mxu1 %v15094_v37  ;;  %v15130_v37 = vld [vmem:[%s22613_s3 + $0x96c] ss:$16 sps:$4 sm:$0xff]  }
 0x762   :  { %7614 = vmatpush1.bf16.msra.mxu1 %v15092_v12  ;;  %v15172_v12 = vld [vmem:[%s22613_s3 + $0xca4] ss:$16 sps:$4 sm:$0xff]  }
 0x763   :  { %13474 = vmatprep.subr.msk.bf16.mxu1 %vm4251_vm1, %v19262_v42 }
 0x773   :  { %v6736_v39 = vpop.f32.mrf.mxu0 }
 0x774   :  { %v6780_v57 = vadd.f32 %v6779_v3, %v6736_v39  ;;  %v15128_v39 = vld [vmem:[%s22613_s3 + $0x968] ss:$16 sps:$4 sm:$0xff]  }
 0x775   :  { %v6738_v41 = vpop.f32.mrf.mxu0 }
 0x776   :  { %v20520_v58 = vadd.f32 %v6780_v57, %v5934_v24  ;;  %v6782_v15 = vadd.f32 %v6781_v48, %v6738_v41  ;;  %v15170_v24 = vld [vmem:[%s22613_s3 + $0xca0] ss:$16 sps:$4 sm:$0xff]   ;;  %v15133_v57 = vld [vmem:[%s22613_s3 + $0x94c] ss:$16 sps:$4 sm:$0xff]   ;;  %v15175_v41 = vld [vmem:[%s22613_s3 + $0xc84] ss:$16 sps:$4 sm:$0xff]  }
 0x777   :  { %v6740_v8 = vpop.f32.mrf.mxu0 }
 0x778   :  { %v20524_v5 = vadd.f32 %v6782_v15, %v5936_v19  ;;  %v6784_v28 = vadd.f32 %v6783_v30, %v6740_v8  ;;  %v15121_v30 = vld [vmem:[%s22613_s3 + $0x9cc] ss:$16 sps:$4 sm:$0xff]   ;;  %v15131_v19 = vld [vmem:[%s22613_s3 + $0x948] ss:$16 sps:$4 sm:$0xff]   ;;  %v15173_v15 = vld [vmem:[%s22613_s3 + $0xc80] ss:$16 sps:$4 sm:$0xff]  }
 0x779   :  { %v6742_v42 = vpop.f32.mrf.mxu0  ;;  %v15136_v8 = vld [vmem:[%s22613_s3 + $0x92c] ss:$16 sps:$4 sm:$0xff]  }
 0x77a   :  { %v20526_v54 = vadd.f32 %v6784_v28, %v5938_v6  ;;  %v6786_v49 = vadd.f32 %v6785_v21, %v6742_v42  ;;  %v7655_v21 = vsel %vm7653_vm10, 1.0, %v23331_v31  ;;  %v15178_v6 = vld [vmem:[%s22613_s3 + $0xc64] ss:$16 sps:$4 sm:$0xff]   ;;  %v15134_v28 = vld [vmem:[%s22613_s3 + $0x928] ss:$16 sps:$4 sm:$0xff]  }
 0x77b   :  { %v6883_v34 = vpop.f32.mrf.mxu0  ;;  %v15176_v42 = vld [vmem:[%s22613_s3 + $0xc60] ss:$16 sps:$4 sm:$0xff]  }
 0x77c   :  { %v20529_v35 = vadd.f32 %v6786_v49, %v20180_v32  ;;  %v15139_v49 = vld [vmem:[%s22613_s3 + $0x90c] ss:$16 sps:$4 sm:$0xff]  }
 0x77d   :  { %v14483_v3 = vpop.f32.mrf.mxu0 }
 0x77e   :  { %v15145_v3 = vld [vmem:[%s22613_s3 + $0xacc] ss:$16 sps:$4 sm:$0xff]  }
 0x77f   :  { %v6886_v48 = vpop.f32.mrf.mxu0 }
 0x780   :  { %v6892_v36 = vpack.c.bf16 %v6886_v48, %v6883_v34  ;;  %v15137_v34 = vld [vmem:[%s22613_s3 + $0x908] ss:$16 sps:$4 sm:$0xff]  }
 0x781   :  { %v14484_v32 = vpop.f32.mrf.mxu0  ;;  %v15143_v48 = vld [vmem:[%s22613_s3 + $0xac8] ss:$16 sps:$4 sm:$0xff]  }
 0x782   :  { %7546 = vmatmul.mubr.bf16.vlgmr.msra.gmra.mxu0 %v6892_v36  ;;  %7632 = vmatmul.mubr.bf16.vlgmr.msra.gmra.mxu1 %v6892_v36  ;;  %v15146_v36 = vld [vmem:[%s22613_s3 + $0xaa8] ss:$16 sps:$4 sm:$0xff]  }
 0x783   :  { %7557 = vmatpush1.bf16.msra.mxu0 %v15116_v0  ;;  %7673 = vmatpush1.bf16.msra.mxu1 %v19272_v56  ;;  %v20556_v56 = vpack.c.bf16 %v7655_v21, %v7654_v7  ;;  %v15148_v0 = vld [vmem:[%s22613_s3 + $0xaac] ss:$16 sps:$4 sm:$0xff]   ;;  %v15149_v32 = vld [vmem:[%s22613_s3 + $0xa88] ss:$16 sps:$4 sm:$0xff]  }
 0x784   :  { %7674 = vmatprep.subr.bf16.mxu1 %v19269_v33  ;;  %7558 = vmatprep.subr.bf16.mxu0 %v15121_v30  ;;  %v15122_v33 = vld [vmem:[%s22613_s3 + $0x9a8] ss:$16 sps:$4 sm:$0xff]   ;;  %v15151_v30 = vld [vmem:[%s22613_s3 + $0xa8c] ss:$16 sps:$4 sm:$0xff]  }
 0x785   :  { %7692 = vmatprep.mubr.bf16.mxu1 %v23329_v44  ;;  %7588 = vmatprep.mubr.bf16.mxu0 %v20464_v43  ;;  %v15169_v43 = vld [vmem:[%s22613_s3 + $0xcc4] ss:$16 sps:$4 sm:$0xff]   ;;  %v15152_v7 = vld [vmem:[%s22613_s3 + $0xa68] ss:$16 sps:$4 sm:$0xff]   ;;  %v15157_v21 = vld [vmem:[%s22613_s3 + $0xa4c] ss:$16 sps:$4 sm:$0xff]  }
 0x787   :  { %7559 = vmatpush1.bf16.msra.mxu0 %v15119_v4  ;;  %7675 = vmatpush1.bf16.msra.mxu1 %v19254_v63  ;;  %v15125_v63 = vld [vmem:[%s22613_s3 + $0x988] ss:$16 sps:$4 sm:$0xff]   ;;  %v15154_v4 = vld [vmem:[%s22613_s3 + $0xa6c] ss:$16 sps:$4 sm:$0xff]  }
 0x788   :  { %7560 = vmatprep.subr.bf16.mxu0 %v15124_v60  ;;  %8324 = vmatprep.subr.bf16.mxu1 %v15166_v16  ;;  %v15155_v60 = vld [vmem:[%s22613_s3 + $0xa48] ss:$16 sps:$4 sm:$0xff]   ;;  %v15160_v16 = vld [vmem:[%s22613_s3 + $0xa2c] ss:$16 sps:$4 sm:$0xff]  }
 0x78a   :  { %13475 = vmatmul.mubr.msk.bf16.vlgmr.msra.gmra.mxu1 %vm4247_vm14, %v20556_v56 }
 0x78b   :  { %7561 = vmatpush1.bf16.msra.mxu0 %v15122_v33  ;;  %8325 = vmatpush1.bf16.msra.mxu1 %v15164_v22  ;;  %v15158_v33 = vld [vmem:[%s22613_s3 + $0xa28] ss:$16 sps:$4 sm:$0xff]   ;;  %v15163_v22 = vld [vmem:[%s22613_s3 + $0xa0c] ss:$16 sps:$4 sm:$0xff]  }
 0x78c   :  { %7562 = vmatprep.subr.bf16.mxu0 %v15127_v11  ;;  %8326 = vmatprep.subr.bf16.mxu1 %v15169_v43  ;;  %v15161_v11 = vld [vmem:[%s22613_s3 + $0xa08] ss:$16 sps:$4 sm:$0xff]   ;;  %v15181_v43 = vld [vmem:[%s22613_s3 + $0xc44] ss:$16 sps:$4 sm:$0xff]  }
 0x78f   :  { %7563 = vmatpush1.bf16.msra.mxu0 %v15125_v63  ;;  %8327 = vmatpush1.bf16.msra.mxu1 %v15167_v29  ;;  %v15179_v63 = vld [vmem:[%s22613_s3 + $0xc40] ss:$16 sps:$4 sm:$0xff]  }
 0x790   :  { %7564 = vmatprep.subr.bf16.mxu0 %v15130_v37  ;;  %8328 = vmatprep.subr.bf16.mxu1 %v15172_v12  ;;  %v15185_v29 = vld [vmem:[%s22613_s3 + $0xc00] ss:$16 sps:$4 sm:$0xff]   ;;  %v15190_v37 = vld [vmem:[%s22613_s3 + $0xde4] ss:$16 sps:$4 sm:$0xff]  }
 0x791   :  { %v15193_v12 = vld [vmem:[%s22613_s3 + $0xdc4] ss:$16 sps:$4 sm:$0xff]  }
 0x793   :  { %7565 = vmatpush1.bf16.msra.mxu0 %v15128_v39  ;;  %8329 = vmatpush1.bf16.msra.mxu1 %v15170_v24  ;;  %v15212_v39 = vld [vmem:[%s22613_s3 + $0xee0] ss:$16 sps:$4 sm:$0xff]   ;;  %v15214_v24 = vld [vmem:[%s22613_s3 + $0xee4] ss:$16 sps:$4 sm:$0xff]  }
 0x794   :  { %7566 = vmatprep.subr.bf16.mxu0 %v15133_v57  ;;  %8330 = vmatprep.subr.bf16.mxu1 %v15175_v41  ;;  %v15191_v57 = vld [vmem:[%s22613_s3 + $0xdc0] ss:$16 sps:$4 sm:$0xff]   ;;  %v15196_v41 = vld [vmem:[%s22613_s3 + $0xda4] ss:$16 sps:$4 sm:$0xff]  }
 0x797   :  { %7567 = vmatpush1.bf16.msra.mxu0 %v15131_v19  ;;  %8331 = vmatpush1.bf16.msra.mxu1 %v15173_v15  ;;  %v15218_v19 = vld [vmem:[%s22613_s3 + $0xec0] ss:$16 sps:$4 sm:$0xff]   ;;  %v15220_v15 = vld [vmem:[%s22613_s3 + $0xec4] ss:$16 sps:$4 sm:$0xff]  }
 0x798   :  { %7568 = vmatprep.subr.bf16.mxu0 %v15136_v8  ;;  %8332 = vmatprep.subr.bf16.mxu1 %v15178_v6  ;;  %v15194_v8 = vld [vmem:[%s22613_s3 + $0xda0] ss:$16 sps:$4 sm:$0xff]   ;;  %v15199_v6 = vld [vmem:[%s22613_s3 + $0xd84] ss:$16 sps:$4 sm:$0xff]  }
 0x79b   :  { %7569 = vmatpush1.bf16.msra.mxu0 %v15134_v28  ;;  %8333 = vmatpush1.bf16.msra.mxu1 %v15176_v42  ;;  %v15224_v28 = vld [vmem:[%s22613_s3 + $0xea0] ss:$16 sps:$4 sm:$0xff]   ;;  %v15226_v42 = vld [vmem:[%s22613_s3 + $0xea4] ss:$16 sps:$4 sm:$0xff]  }
 0x79c   :  { %7570 = vmatprep.subr.bf16.mxu0 %v15139_v49  ;;  %8334 = vmatprep.subr.bf16.mxu1 %v15181_v43  ;;  %v15197_v49 = vld [vmem:[%s22613_s3 + $0xd80] ss:$16 sps:$4 sm:$0xff]   ;;  %v15256_v43 = vld [vmem:[%s22613_s3 + $0xe04] ss:$16 sps:$4 sm:$0xff]  }
 0x79f   :  { %7571 = vmatpush1.bf16.msra.mxu0 %v15137_v34  ;;  %8335 = vmatpush1.bf16.msra.mxu1 %v15179_v63  ;;  %v15202_v34 = vld [vmem:[%s22613_s3 + $0xd64] ss:$16 sps:$4 sm:$0xff]   ;;  %v15254_v63 = vld [vmem:[%s22613_s3 + $0xe00] ss:$16 sps:$4 sm:$0xff]  }
 0x7a0   :  { %7572 = vmatprep.subr.bf16.mxu0 %v15142_v18  ;;  %v15230_v18 = vld [vmem:[%s22613_s3 + $0xe80] ss:$16 sps:$4 sm:$0xff]  }
 0x7a3   :  { %7573 = vmatpush2.bf16.msra.mxu0 %v15140_v20  ;;  %v15232_v20 = vld [vmem:[%s22613_s3 + $0xe84] ss:$16 sps:$4 sm:$0xff]  }
 0x7a4   :  { %7574 = vmatprep.subr.bf16.mxu0 %v15145_v3  ;;  %v15200_v3 = vld [vmem:[%s22613_s3 + $0xd60] ss:$16 sps:$4 sm:$0xff]  }
 0x7a7   :  { %7575 = vmatpush2.bf16.msra.mxu0 %v15143_v48  ;;  %v15205_v48 = vld [vmem:[%s22613_s3 + $0xd44] ss:$16 sps:$4 sm:$0xff]  }
 0x7a8   :  { %7576 = vmatprep.subr.bf16.mxu0 %v15148_v0  ;;  %v15236_v0 = vld [vmem:[%s22613_s3 + $0xe60] ss:$16 sps:$4 sm:$0xff]  }
 0x7ab   :  { %7577 = vmatpush2.bf16.msra.mxu0 %v15146_v36  ;;  %v15238_v36 = vld [vmem:[%s22613_s3 + $0xe64] ss:$16 sps:$4 sm:$0xff]  }
 0x7ac   :  { %7578 = vmatprep.subr.bf16.mxu0 %v15151_v30  ;;  %v15203_v30 = vld [vmem:[%s22613_s3 + $0xd40] ss:$16 sps:$4 sm:$0xff]  }
 0x7af   :  { %7579 = vmatpush2.bf16.msra.mxu0 %v15149_v32  ;;  %v15208_v32 = vld [vmem:[%s22613_s3 + $0xd24] ss:$16 sps:$4 sm:$0xff]  }
 0x7b0   :  { %7580 = vmatprep.subr.bf16.mxu0 %v15154_v4  ;;  %v15206_v4 = vld [vmem:[%s22613_s3 + $0xd20] ss:$16 sps:$4 sm:$0xff]  }
 0x7b3   :  { %7581 = vmatpush2.bf16.msra.mxu0 %v15152_v7  ;;  %v15211_v7 = vld [vmem:[%s22613_s3 + $0xd04] ss:$16 sps:$4 sm:$0xff]  }
 0x7b4   :  { %7582 = vmatprep.subr.bf16.mxu0 %v15157_v21  ;;  %v15209_v21 = vld [vmem:[%s22613_s3 + $0xd00] ss:$16 sps:$4 sm:$0xff]  }
 0x7b7   :  { %7583 = vmatpush2.bf16.msra.mxu0 %v15155_v60  ;;  %v15217_v60 = vld [vmem:[%s22613_s3 + $0xeec] ss:$16 sps:$4 sm:$0xff]  }
 0x7b8   :  { %7584 = vmatprep.subr.bf16.mxu0 %v15160_v16  ;;  %v15244_v16 = vld [vmem:[%s22613_s3 + $0xe44] ss:$16 sps:$4 sm:$0xff]  }
 0x7bb   :  { %7585 = vmatpush2.bf16.msra.mxu0 %v15158_v33  ;;  %v15242_v33 = vld [vmem:[%s22613_s3 + $0xe40] ss:$16 sps:$4 sm:$0xff]  }
 0x7bc   :  { %7586 = vmatprep.subr.bf16.mxu0 %v15163_v22  ;;  %v15250_v22 = vld [vmem:[%s22613_s3 + $0xe24] ss:$16 sps:$4 sm:$0xff]  }
 0x7bf   :  { %7587 = vmatpush2.bf16.msra.mxu0 %v15161_v11  ;;  %v15248_v11 = vld [vmem:[%s22613_s3 + $0xe20] ss:$16 sps:$4 sm:$0xff]  }
 0x7c0   :  { %14485 = vmatprep.subr.bf16.mxu0 %v23331_v31 }
 0x7c2   :  { %7589 = vmatmul.mubr.bf16.vlgmr.msra.gmra.mxu0 %v20462_v14  ;;  %v15182_v14 = vld [vmem:[%s22613_s3 + $0xc20] ss:$16 sps:$4 sm:$0xff]  }
 0x7c3   :  { %14486 = vmatpush3.bf16.msra.mxu0 %v19359_v17  ;;  %14489 = vmatprep.mubr.msk.bf16.mxu0 %vm15753_vm12, %v23331_v31  ;;  %v15184_v17 = vld [vmem:[%s22613_s3 + $0xc24] ss:$16 sps:$4 sm:$0xff]  }
 0x7c4   :  { %14487 = vmatprep.subr.bf16.mxu0 %v23331_v31  ;;  %8336 = vmatprep.subr.bf16.mxu1 %v15184_v17  ;;  %v15262_v17 = vld [vmem:[%s22613_s3 + $0xcec] ss:$16 sps:$4 sm:$0xff]  }
 0x7c5   :  { %8337 = vmatpush1.bf16.msra.mxu1 %v15182_v14  ;;  %v23386_v31 = vld [vmem:[#allocation14_spill] sm:$0xff] }
 0x7c7   :  { %14488 = vmatpush3.bf16.msra.mxu0 %v19346_v52  ;;  %v15187_v52 = vld [vmem:[%s22613_s3 + $0xc04] ss:$16 sps:$4 sm:$0xff]  }
 0x7c8   :  { %8338 = vmatprep.subr.bf16.mxu1 %v15187_v52  ;;  %8367 = vmatprep.subr.bf16.mxu0 %v15214_v24 }
 0x7c9   :  { %8339 = vmatpush1.bf16.msra.mxu1 %v15185_v29 }
 0x7ca   :  { %14490 = vmatmul.mubr.msk.bf16.vlgmr.msra.gmra.mxu0 %vm4247_vm14, %v20556_v56  ;;  %v15188_v56 = vld [vmem:[%s22613_s3 + $0xde0] ss:$16 sps:$4 sm:$0xff]   ;;  %8340 = vmatprep.subr.bf16.mxu1 %v15190_v37 }
 0x7cb   :  { %8399 = vmatprep.mubr.bf16.mxu0 %v23329_v44  ;;  %8368 = vmatpush1.bf16.msra.mxu0 %v15212_v39 }
 0x7cc   :  { %8369 = vmatprep.subr.bf16.mxu0 %v15220_v15 }
 0x7cd   :  { %8341 = vmatpush2.bf16.msra.mxu1 %v15188_v56 }
 0x7ce   :  { %8342 = vmatprep.subr.bf16.mxu1 %v15193_v12 }
 0x7cf   :  { %8370 = vmatpush1.bf16.msra.mxu0 %v15218_v19 }
 0x7d0   :  { %8371 = vmatprep.subr.bf16.mxu0 %v15226_v42 }
 0x7d1   :  { %8343 = vmatpush2.bf16.msra.mxu1 %v15191_v57 }
 0x7d2   :  { %8344 = vmatprep.subr.bf16.mxu1 %v15196_v41 }
 0x7d3   :  { %8372 = vmatpush1.bf16.msra.mxu0 %v15224_v28 }
 0x7d4   :  { %8373 = vmatprep.subr.bf16.mxu0 %v15232_v20 }
 0x7d5   :  { %8345 = vmatpush2.bf16.msra.mxu1 %v15194_v8 }
 0x7d6   :  { %8346 = vmatprep.subr.bf16.mxu1 %v15199_v6 }
 0x7d7   :  { %8374 = vmatpush1.bf16.msra.mxu0 %v15230_v18 }
 0x7d8   :  { %8375 = vmatprep.subr.bf16.mxu0 %v15238_v36 }
 0x7d9   :  { %8347 = vmatpush2.bf16.msra.mxu1 %v15197_v49 }
 0x7da   :  { %8348 = vmatprep.subr.bf16.mxu1 %v15202_v34 }
 0x7db   :  { %8376 = vmatpush1.bf16.msra.mxu0 %v15236_v0 }
 0x7dc   :  { %8377 = vmatprep.subr.bf16.mxu0 %v15244_v16  ;;  %v15239_v16 = vld [vmem:[%s22613_s3 + $0xe68] ss:$16 sps:$4 sm:$0xff]  }
 0x7dd   :  { %8349 = vmatpush2.bf16.msra.mxu1 %v15200_v3 }
 0x7de   :  { %8350 = vmatprep.subr.bf16.mxu1 %v15205_v48 }
 0x7df   :  { %8378 = vmatpush1.bf16.msra.mxu0 %v15242_v33  ;;  %v15247_v33 = vld [vmem:[%s22613_s3 + $0xe4c] ss:$16 sps:$4 sm:$0xff]  }
 0x7e0   :  { %8379 = vmatprep.subr.bf16.mxu0 %v15250_v22  ;;  %v15245_v22 = vld [vmem:[%s22613_s3 + $0xe48] ss:$16 sps:$4 sm:$0xff]  }
 0x7e1   :  { %8351 = vmatpush2.bf16.msra.mxu1 %v15203_v30 }
 0x7e2   :  { %8352 = vmatprep.subr.bf16.mxu1 %v15208_v32  ;;  %v15229_v32 = vld [vmem:[%s22613_s3 + $0xeac] ss:$16 sps:$4 sm:$0xff]  }
 0x7e3   :  { %8380 = vmatpush1.bf16.msra.mxu0 %v15248_v11  ;;  %v15253_v11 = vld [vmem:[%s22613_s3 + $0xe2c] ss:$16 sps:$4 sm:$0xff]  }
 0x7e4   :  { %8381 = vmatprep.subr.bf16.mxu0 %v15256_v43  ;;  %v15251_v43 = vld [vmem:[%s22613_s3 + $0xe28] ss:$16 sps:$4 sm:$0xff]  }
 0x7e5   :  { %8353 = vmatpush2.bf16.msra.mxu1 %v15206_v4  ;;  %v15227_v4 = vld [vmem:[%s22613_s3 + $0xea8] ss:$16 sps:$4 sm:$0xff]  }
 0x7e6   :  { %8354 = vmatprep.subr.bf16.mxu1 %v15211_v7  ;;  %v15235_v7 = vld [vmem:[%s22613_s3 + $0xe8c] ss:$16 sps:$4 sm:$0xff]  }
 0x7e7   :  { %8382 = vmatpush1.bf16.msra.mxu0 %v15254_v63  ;;  %v15259_v63 = vld [vmem:[%s22613_s3 + $0xe0c] ss:$16 sps:$4 sm:$0xff]  }
 0x7e8   :  { %8410 = vmatprep.subr.bf16.mxu0 %v15262_v17  ;;  %v15257_v17 = vld [vmem:[%s22613_s3 + $0xe08] ss:$16 sps:$4 sm:$0xff]  }
 0x7e9   :  { %8355 = vmatpush2.bf16.msra.mxu1 %v15209_v21  ;;  %v15233_v21 = vld [vmem:[%s22613_s3 + $0xe88] ss:$16 sps:$4 sm:$0xff]  }
 0x7ea   :  { %8453 = vmatprep.subr.bf16.mxu1 %v15217_v60  ;;  %v15241_v60 = vld [vmem:[%s22613_s3 + $0xe6c] ss:$16 sps:$4 sm:$0xff]  }
 0x805   :  { %v7504_v14 = vpop.f32.mrf.mxu1 }
 0x807   :  { %v7506_v29 = vpop.f32.mrf.mxu1 }
 0x809   :  { %v7508_v52 = vpop.f32.mrf.mxu1 }
 0x80b   :  { %v7510_v37 = vpop.f32.mrf.mxu1 }
 0x842   :  { %v7547_v56 = vpop.f32.mrf.mxu0  ;;  %v7633_v12 = vpop.f32.mrf.mxu1 }
 0x843   :  { %v7548_v39 = vadd.f32 %v7547_v56, %v7504_v14 }
 0x844   :  { %v7549_v24 = vpop.f32.mrf.mxu0  ;;  %v7635_v57 = vpop.f32.mrf.mxu1 }
 0x845   :  { %v20800_v41 = vadd.f32 %v7548_v39, %v20451_v53  ;;  %v7550_v19 = vadd.f32 %v7549_v24, %v7506_v29 }
 0x846   :  { %v7551_v15 = vpop.f32.mrf.mxu0  ;;  %v7637_v8 = vpop.f32.mrf.mxu1 }
 0x847   :  { %v20803_v6 = vadd.f32 %v7550_v19, %v20454_v27  ;;  %v7552_v28 = vadd.f32 %v7551_v15, %v7508_v52  ;;  %v15215_v27 = vld [vmem:[%s22613_s3 + $0xee8] ss:$16 sps:$4 sm:$0xff]  }
 0x848   :  { %v7553_v42 = vpop.f32.mrf.mxu0  ;;  %v7639_v49 = vpop.f32.mrf.mxu1 }
 0x849   :  { %v20806_v34 = vadd.f32 %v7552_v28, %v20457_v9  ;;  %v7554_v18 = vadd.f32 %v7553_v42, %v7510_v37  ;;  %v15223_v9 = vld [vmem:[%s22613_s3 + $0xecc] ss:$16 sps:$4 sm:$0xff]  }
 0x84a   :  { %v7694_v20 = vpop.f32.mrf.mxu1 }
 0x84b   :  { %v20809_v3 = vadd.f32 %v7554_v18, %v20460_v25  ;;  %v15221_v25 = vld [vmem:[%s22613_s3 + $0xec8] ss:$16 sps:$4 sm:$0xff]  }
 0x84c   :  { %v7696_v48 = vpop.f32.mrf.mxu1 }
 0x84e   :  { %v7698_v53 = vpop.f32.mrf.mxu1 }
 0x84f   :  { %v20811_v0 = vpack.c.bf16 %v7698_v53, %v7694_v20  ;;  %v15271_v53 = vld [vmem:[%s22613_s3 + $0xc8c] ss:$16 sps:$4 sm:$0xff]  }
 0x850   :  { %v7700_v36 = vpop.f32.mrf.mxu1 }
 0x851   :  { %v7745_v30 = vpack.c.bf16 %v7700_v36, %v7696_v48  ;;  %v15269_v36 = vld [vmem:[%s22613_s3 + $0xc88] ss:$16 sps:$4 sm:$0xff]  }
 0x853   :  { %8356 = vmatprep.mubr.bf16.mxu1 %v7745_v30 }
 0x854   :  { %8357 = vmatmul.mubr.bf16.vlgmr.msra.gmra.mxu1 %v20811_v0 }
 0x855   :  { %8454 = vmatpush1.bf16.msra.mxu1 %v15215_v27  ;;  %8485 = vmatprep.mubr.bf16.mxu1 %v23329_v44  ;;  %v15272_v27 = vld [vmem:[%s22613_s3 + $0xc68] ss:$16 sps:$4 sm:$0xff]  }
 0x856   :  { %8455 = vmatprep.subr.bf16.mxu1 %v15223_v9  ;;  %v15277_v9 = vld [vmem:[%s22613_s3 + $0xc4c] ss:$16 sps:$4 sm:$0xff]  }
 0x859   :  { %8456 = vmatpush1.bf16.msra.mxu1 %v15221_v25  ;;  %v15275_v25 = vld [vmem:[%s22613_s3 + $0xc48] ss:$16 sps:$4 sm:$0xff]  }
 0x85a   :  { %8457 = vmatprep.subr.bf16.mxu1 %v15229_v32  ;;  %v15280_v32 = vld [vmem:[%s22613_s3 + $0xc2c] ss:$16 sps:$4 sm:$0xff]  }
 0x85d   :  { %8458 = vmatpush1.bf16.msra.mxu1 %v15227_v4  ;;  %v15278_v4 = vld [vmem:[%s22613_s3 + $0xc28] ss:$16 sps:$4 sm:$0xff]  }
 0x85e   :  { %8459 = vmatprep.subr.bf16.mxu1 %v15235_v7  ;;  %v15283_v7 = vld [vmem:[%s22613_s3 + $0xc0c] ss:$16 sps:$4 sm:$0xff]  }
 0x861   :  { %8460 = vmatpush1.bf16.msra.mxu1 %v15233_v21  ;;  %v15281_v21 = vld [vmem:[%s22613_s3 + $0xc08] ss:$16 sps:$4 sm:$0xff]  }
 0x862   :  { %8461 = vmatprep.subr.bf16.mxu1 %v15241_v60  ;;  %v15286_v60 = vld [vmem:[%s22613_s3 + $0xdec] ss:$16 sps:$4 sm:$0xff]  }
 0x865   :  { %8462 = vmatpush1.bf16.msra.mxu1 %v15239_v16  ;;  %v15284_v16 = vld [vmem:[%s22613_s3 + $0xde8] ss:$16 sps:$4 sm:$0xff]  }
 0x866   :  { %8463 = vmatprep.subr.bf16.mxu1 %v15247_v33  ;;  %v15289_v33 = vld [vmem:[%s22613_s3 + $0xdcc] ss:$16 sps:$4 sm:$0xff]  }
 0x869   :  { %8464 = vmatpush1.bf16.msra.mxu1 %v15245_v22  ;;  %v15287_v22 = vld [vmem:[%s22613_s3 + $0xdc8] ss:$16 sps:$4 sm:$0xff]  }
 0x86a   :  { %8465 = vmatprep.subr.bf16.mxu1 %v15253_v11  ;;  %v15292_v11 = vld [vmem:[%s22613_s3 + $0xdac] ss:$16 sps:$4 sm:$0xff]  }
 0x86d   :  { %8466 = vmatpush1.bf16.msra.mxu1 %v15251_v43  ;;  %v15290_v43 = vld [vmem:[%s22613_s3 + $0xda8] ss:$16 sps:$4 sm:$0xff]  }
 0x86e   :  { %8467 = vmatprep.subr.bf16.mxu1 %v15259_v63  ;;  %v15295_v63 = vld [vmem:[%s22613_s3 + $0xd8c] ss:$16 sps:$4 sm:$0xff]  }
 0x871   :  { %8468 = vmatpush1.bf16.msra.mxu1 %v15257_v17  ;;  %v15293_v17 = vld [vmem:[%s22613_s3 + $0xd88] ss:$16 sps:$4 sm:$0xff]  }
 0x882   :  { %v7590_v14 = vpop.f32.mrf.mxu0 }
 0x883   :  { %v7634_v29 = vadd.f32 %v7633_v12, %v7590_v14  ;;  %v15298_v14 = vld [vmem:[%s22613_s3 + $0xd6c] ss:$16 sps:$4 sm:$0xff]  }
 0x884   :  { %v7592_v52 = vpop.f32.mrf.mxu0 }
 0x885   :  { %v20861_v37 = vadd.f32 %v7634_v29, %v20520_v58  ;;  %v7636_v56 = vadd.f32 %v7635_v57, %v7592_v52  ;;  %v15260_v58 = vld [vmem:[%s22613_s3 + $0xce8] ss:$16 sps:$4 sm:$0xff]   ;;  %v15301_v52 = vld [vmem:[%s22613_s3 + $0xd4c] ss:$16 sps:$4 sm:$0xff]  }
 0x886   :  { %v7594_v39 = vpop.f32.mrf.mxu0  ;;  %v15296_v29 = vld [vmem:[%s22613_s3 + $0xd68] ss:$16 sps:$4 sm:$0xff]  }
 0x887   :  { %v20864_v24 = vadd.f32 %v7636_v56, %v20524_v5  ;;  %v7638_v19 = vadd.f32 %v7637_v8, %v7594_v39  ;;  %v15265_v5 = vld [vmem:[%s22613_s3 + $0xccc] ss:$16 sps:$4 sm:$0xff]   ;;  %v15299_v56 = vld [vmem:[%s22613_s3 + $0xd48] ss:$16 sps:$4 sm:$0xff]  }
 0x888   :  { %v7596_v15 = vpop.f32.mrf.mxu0  ;;  %v15304_v39 = vld [vmem:[%s22613_s3 + $0xd2c] ss:$16 sps:$4 sm:$0xff]  }
 0x889   :  { %v20867_v28 = vadd.f32 %v7638_v19, %v20526_v54  ;;  %v7640_v42 = vadd.f32 %v7639_v49, %v7596_v15  ;;  %v15263_v54 = vld [vmem:[%s22613_s3 + $0xcc8] ss:$16 sps:$4 sm:$0xff]   ;;  %v15307_v15 = vld [vmem:[%s22613_s3 + $0xd0c] ss:$16 sps:$4 sm:$0xff]  }
 0x88a   :  { %v7737_v18 = vpop.f32.mrf.mxu0  ;;  %v15266_v49 = vld [vmem:[%s22613_s3 + $0xca8] ss:$16 sps:$4 sm:$0xff]  }
 0x88b   :  { %v20870_v20 = vadd.f32 %v7640_v42, %v20529_v35  ;;  %v15268_v35 = vld [vmem:[%s22613_s3 + $0xcac] ss:$16 sps:$4 sm:$0xff]   ;;  %v15302_v19 = vld [vmem:[%s22613_s3 + $0xd28] ss:$16 sps:$4 sm:$0xff]  }
 0x88c   :  { %v14491_v12 = vpop.f32.mrf.mxu0  ;;  %v15305_v42 = vld [vmem:[%s22613_s3 + $0xd08] ss:$16 sps:$4 sm:$0xff]  }
 0x88e   :  { %v7740_v48 = vpop.f32.mrf.mxu0 }
 0x88f   :  { %v7746_v57 = vpack.c.bf16 %v7740_v48, %v7737_v18 }
 0x890   :  { %v14492_v8 = vpop.f32.mrf.mxu0 }
 0x891   :  { %8400 = vmatmul.mubr.bf16.vlgmr.msra.gmra.mxu0 %v7746_v57  ;;  %8486 = vmatmul.mubr.bf16.vlgmr.msra.gmra.mxu1 %v7746_v57 }
 0x892   :  { %8411 = vmatpush1.bf16.msra.mxu0 %v15260_v58  ;;  %8442 = vmatprep.mubr.bf16.mxu0 %v7745_v30  ;;  %v15274_v30 = vld [vmem:[%s22613_s3 + $0xc6c] ss:$16 sps:$4 sm:$0xff]  }
 0x893   :  { %8412 = vmatprep.subr.bf16.mxu0 %v15265_v5  ;;  %8575 = vmatprep.mubr.bf16.mxu1 %v23329_v44  ;;  %v20971_v5 = vld [vmem:[%s22614_s4] sm:$0xf] }
 0x896   :  { %8413 = vmatpush1.bf16.msra.mxu0 %v15263_v54 }
 0x897   :  { %8414 = vmatprep.subr.bf16.mxu0 %v15268_v35 }
 0x89a   :  { %8415 = vmatpush1.bf16.msra.mxu0 %v15266_v49 }
 0x89b   :  { %8416 = vmatprep.subr.bf16.mxu0 %v15271_v53  ;;  %v23332_v53 = vld [vmem:[#allocation60_spill] sm:$0xff] }
 0x89e   :  { %8417 = vmatpush1.bf16.msra.mxu0 %v15269_v36 }
 0x89f   :  { %8418 = vmatprep.subr.bf16.mxu0 %v15274_v30  ;;  %v23333_v30 = vld [vmem:[#allocation20_spill] sm:$0xff] }
 0x8a2   :  { %8419 = vmatpush1.bf16.msra.mxu0 %v15272_v27  ;;  %v8724_v27 = vmul.u32 64, %v23333_v30 }
 0x8a3   :  { %8420 = vmatprep.subr.bf16.mxu0 %v15277_v9 }
 0x8a6   :  { %8421 = vmatpush1.bf16.msra.mxu0 %v15275_v25 }
 0x8a7   :  { %8422 = vmatprep.subr.bf16.mxu0 %v15280_v32 }
 0x8aa   :  { %8423 = vmatpush1.bf16.msra.mxu0 %v15278_v4  ;;  %v23334_v4 = vld [vmem:[#allocation63_spill] sm:$0xff] }
 0x8ab   :  { %8424 = vmatprep.subr.bf16.mxu0 %v15283_v7  ;;  %v8513_v7 = vrot.slane %v20971_v5, %v23334_v4  ;;  %v23383_v4 = vld [vmem:[#allocation59_spill] sm:$0xff] }
 0x8ae   :  { %8425 = vmatpush1.bf16.msra.mxu0 %v15281_v21 }
 0x8af   :  { %8426 = vmatprep.subr.bf16.mxu0 %v15286_v60 }
 0x8b2   :  { %8427 = vmatpush2.bf16.msra.mxu0 %v15284_v16 }
 0x8b3   :  { %8428 = vmatprep.subr.bf16.mxu0 %v15289_v33 }
 0x8b6   :  { %8429 = vmatpush2.bf16.msra.mxu0 %v15287_v22  ;;  %v23335_v22 = vld [vmem:[#allocation12_spill] sm:$0xff] }
 0x8b7   :  { %8430 = vmatprep.subr.bf16.mxu0 %v15292_v11  ;;  %v23336_v11 = vand.u32 63, %v23335_v22 }
 0x8ba   :  { %8431 = vmatpush2.bf16.msra.mxu0 %v15290_v43  ;;  %v20984_v43 = vadd.s32 %v23336_v11, %v8724_v27 }
 0x8bb   :  { %8432 = vmatprep.subr.bf16.mxu0 %v15295_v63 }
 0x8bc   :  { %vm8758_vm11 = vcmp.eq.s32.totalorder %v16820_v40, %v20984_v43  ;;  %vm8760_vm3 = vcmp.eq.s32.totalorder %v16823_v50, %v20984_v43  ;;  %vm8754_vm8 = vcmp.eq.s32.totalorder %v16850_v51, %v20984_v43  ;;  %vm8756_vm14 = vcmp.eq.s32.totalorder %v16853_v47, %v20984_v43 }
 0x8bd   :  { %vm13673_vm6 = vmpackc.low %vm8760_vm3, %vm8758_vm11  ;;  %vm8750_vm9 = vcmp.eq.s32.totalorder %v16878_v55, %v20984_v43  ;;  %vm8752_vm13 = vcmp.eq.s32.totalorder %v16881_v1, %v20984_v43 }
 0x8be   :  { %8433 = vmatpush2.bf16.msra.mxu0 %v15293_v17  ;;  %vm13677_vm2 = vmpackc.low %vm8756_vm14, %vm8754_vm8 }
 0x8bf   :  { %8434 = vmatprep.subr.bf16.mxu0 %v15298_v14  ;;  %vm13681_vm11 = vmpackc.low %vm8752_vm13, %vm8750_vm9 }
 0x8c2   :  { %8435 = vmatpush2.bf16.msra.mxu0 %v15296_v29 }
 0x8c3   :  { %8436 = vmatprep.subr.bf16.mxu0 %v15301_v52  ;;  %v23337_v52 = vld [vmem:[#allocation18_spill] sm:$0xff] }
 0x8c6   :  { %8437 = vmatpush2.bf16.msra.mxu0 %v15299_v56  ;;  %v23338_v56 = vld [vmem:[#allocation58_spill] sm:$0xff] }
 0x8c7   :  { %8438 = vmatprep.subr.bf16.mxu0 %v15304_v39  ;;  %v20989_v39 = vpack.c.bf16 %v23338_v56, %v23338_v56 }
 0x8ca   :  { %8439 = vmatpush2.bf16.msra.mxu0 %v15302_v19  ;;  %v23340_v19 = vld [vmem:[#allocation62_spill] sm:$0xff] }
 0x8cb   :  { %8440 = vmatprep.subr.bf16.mxu0 %v15307_v15  ;;  %v21009_v15 = vpack.c.bf16 %v23340_v19, %v23340_v19 }
 0x8ce   :  { %8441 = vmatpush2.bf16.msra.mxu0 %v15305_v42  ;;  %v23341_v42 = vld [vmem:[#allocation44_spill] sm:$0xff] }
 0x8d1   :  { %8443 = vmatmul.mubr.bf16.vlgmr.msra.gmra.mxu0 %v20811_v0  ;;  %v8509_v0 = vrot.slane %v20971_v5, %v23332_v53  ;;  %v23385_v53 = vld [vmem:[#allocation16_spill] sm:$0xff] }
 0x8d2   :  { %8616 = vmatprep.mubr.bf16.mxu0 %v23329_v44 }
 0x914   :  { %v8358_v18 = vpop.f32.mrf.mxu1 }
 0x916   :  { %v8360_v12 = vpop.f32.mrf.mxu1 }
 0x918   :  { %v8362_v57 = vpop.f32.mrf.mxu1 }
 0x91a   :  { %v8364_v9 = vpop.f32.mrf.mxu1 }
 0x951   :  { %v8401_v48 = vpop.f32.mrf.mxu0 }
 0x952   :  { %v8402_v58 = vadd.f32 %v8401_v48, %v8358_v18  ;;  %v23342_v18 = vld [vmem:[#allocation33_spill] sm:$0xff]  ;;  %v23344_v48 = vld [vmem:[#allocation50_spill] sm:$0xff] }
 0x953   :  { %v8403_v8 = vpop.f32.mrf.mxu0 }
 0x954   :  { %v8404_v54 = vadd.f32 %v8403_v8, %v8360_v12  ;;  %v8496_v49 = vadd.f32 %v8402_v58, %v20800_v41  ;;  %v23343_v12 = vld [vmem:[#allocation35_spill] sm:$0xff]  ;;  %v8487_v8 = vpop.f32.mrf.mxu1 }
 0x955   :  { %v8405_v35 = vpop.f32.mrf.mxu0  ;;  %v23345_v58 = vld [vmem:[#allocation7_spill] sm:$0xff] }
 0x956   :  { %v8406_v36 = vadd.f32 %v8405_v35, %v8362_v57  ;;  %v8497_v32 = vadd.f32 %v8404_v54, %v20803_v6  ;;  %v8526_v16 = vadd.f32 %v8509_v0, %v8496_v49  ;;  %v8723_v6 = vmul.u32 64, %v23337_v52  ;;  %v23346_v57 = vld [vmem:[#allocation15_spill] sm:$0xff]  ;;  %v23347_v54 = vld [vmem:[#allocation36_spill] sm:$0xff]  ;;  %v23348_v35 = vld [vmem:[#allocation37_spill] sm:$0xff]  ;;  %v8489_v49 = vpop.f32.mrf.mxu1 }
 0x957   :  { %v8407_v25 = vpop.f32.mrf.mxu0 }
 0x958   :  { %v8500_v21 = vadd.f32 %v8406_v36, %v20806_v34  ;;  %v8408_v60 = vadd.f32 %v8407_v25, %v8364_v9  ;;  %v8527_v63 = vadd.f32 %v8513_v7, %v8497_v32  ;;  %v23339_v34 = vand.u32 63, %v23330_v10  ;;  %v23350_v36 = vld [vmem:[#allocation40_spill] sm:$0xff]  ;;  %v8491_v9 = vpop.f32.mrf.mxu1 }
 0x959   :  { %v23387_v10 = vld [vmem:[#allocation68_spill] sm:$0xff] }
 0x95a   :  { %v8530_v33 = vadd.f32 %v8509_v0, %v8500_v21  ;;  %v8501_v41 = vadd.f32 %v8408_v60, %v20809_v3  ;;  %v20997_v3 = vadd.s32 %v23339_v34, %v8723_v6  ;;  %v23349_v0 = vld [vmem:[#allocation10_spill] sm:$0xff]  ;;  %v23352_v21 = vld [vmem:[#allocation39_spill] sm:$0xff]  ;;  %v8493_v11 = vpop.f32.mrf.mxu1 }
 0x95c   :  { %v8534_v17 = vpack.c.bf16 %v8530_v33, %v8526_v16  ;;  %v8531_v14 = vadd.f32 %v8513_v7, %v8501_v41  ;;  %vm8757_vm15 = vcmp.eq.s32.totalorder %v16820_v40, %v20997_v3  ;;  %vm8759_vm4 = vcmp.eq.s32.totalorder %v16823_v50, %v20997_v3  ;;  %v23351_v7 = vld [vmem:[#allocation55_spill] sm:$0xff]  ;;  %v23353_v33 = vld [vmem:[#allocation61_spill] sm:$0xff] }
 0x95d   :  { %vm13675_vm12 = vmpackc.low %vm8759_vm4, %vm8757_vm15  ;;  %vm8753_vm7 = vcmp.eq.s32.totalorder %v16850_v51, %v20997_v3  ;;  %vm8755_vm5 = vcmp.eq.s32.totalorder %v16853_v47, %v20997_v3  ;;  %vm8749_vm3 = vcmp.eq.s32.totalorder %v16878_v55, %v20997_v3  ;;  %vm8746_vm15 = vcmp.eq.s32.totalorder %v16920_v61, %v20984_v43 }
 0x95e   :  { %v8535_v29 = vpack.c.bf16 %v8531_v14, %v8527_v63  ;;  %vm13679_vm10 = vmpackc.low %vm8755_vm5, %vm8753_vm7  ;;  %vm8748_vm4 = vcmp.eq.s32.totalorder %v16923_v59, %v20984_v43  ;;  %vm8742_vm7 = vcmp.eq.s32.totalorder %v16968_v46, %v20984_v43  ;;  %vm8744_vm5 = vcmp.eq.s32.totalorder %v16971_v23, %v20984_v43  ;;  %v23354_v14 = vld [vmem:[#allocation65_spill] sm:$0xff] }
 0x95f   :  { %vm13685_vm14 = vmpackc.low %vm8748_vm4, %vm8746_vm15  ;;  %v8517_v41 = vrot.slane %v20971_v5, %v23353_v33  ;;  %v23384_v33 = vld [vmem:[#allocation46_spill] sm:$0xff] }
 0x960   :  { %8557 = vmatprep.subr.bf16.mxu1 %v8535_v29  ;;  %vm13689_vm13 = vmpackc.low %vm8744_vm5, %vm8742_vm7 }
 0x961   :  { %8558 = vmatpush1.bf16.msra.mxu1 %v8534_v17 }
 0x962   :  { %8643 = vmatprep.subr.bf16.mxu1 %v8535_v29  ;;  %v8521_v29 = vrot.slane %v20971_v5, %v23354_v14  ;;  %v23358_v5 = vld [vmem:[#allocation43_spill] sm:$0xff]  ;;  %v23382_v14 = vld [vmem:[#allocation32_spill] sm:$0xff] }
 0x964   :  { %13669 = vmatmul.mubr.msk.bf16.vlgmr.msra.gmra.mxu1 %vm8539_vm0, %v20989_v39 }
 0x965   :  { %8644 = vmatpush1.bf16.msra.mxu1 %v8534_v17  ;;  %8661 = vmatprep.mubr.bf16.mxu1 %v23329_v44 }
 0x966   :  { %13674 = vmatprep.subr.msk.bf16.mxu1 %vm13673_vm6, %v23092_v38  ;;  %vm8751_vm6 = vcmp.eq.s32.totalorder %v16881_v1, %v20997_v3 }
 0x967   :  { %vm13683_vm8 = vmpackc.low %vm8751_vm6, %vm8749_vm3  ;;  %vm8738_vm3 = vcmp.eq.s32.totalorder %v17019_v13, %v20984_v43  ;;  %vm8740_vm6 = vcmp.eq.s32.totalorder %v17022_v62, %v20984_v43 }
 0x968   :  { %vm13693_vm4 = vmpackc.low %vm8740_vm6, %vm8738_vm3 }
 0x96c   :  { %13671 = vmatmul.mubr.msk.bf16.vlgmr.msra.gmra.mxu1 %vm8539_vm0, %v21009_v15 }
 0x96d   :  { %13676 = vmatpush1.bf16.msk.msra.mxu1 %vm13675_vm12, %v23092_v38  ;;  %vm8745_vm12 = vcmp.eq.s32.totalorder %v16920_v61, %v20997_v3 }
 0x96e   :  { %13678 = vmatprep.subr.msk.bf16.mxu1 %vm13677_vm2, %v23092_v38  ;;  %vm8747_vm2 = vcmp.eq.s32.totalorder %v16923_v59, %v20997_v3 }
 0x96f   :  { %vm13687_vm9 = vmpackc.low %vm8747_vm2, %vm8745_vm12  ;;  %vm8734_vm12 = vcmp.eq.s32.totalorder %v23341_v42, %v20984_v43  ;;  %vm8736_vm2 = vcmp.eq.s32.totalorder %v23342_v18, %v20984_v43 }
 0x970   :  { %vm13697_vm5 = vmpackc.low %vm8736_vm2, %vm8734_vm12 }
 0x971   :  { %13680 = vmatpush1.bf16.msk.msra.mxu1 %vm13679_vm10, %v23092_v38  ;;  %vm8741_vm10 = vcmp.eq.s32.totalorder %v16968_v46, %v20997_v3 }
 0x972   :  { %13682 = vmatprep.subr.msk.bf16.mxu1 %vm13681_vm11, %v23092_v38  ;;  %vm8743_vm11 = vcmp.eq.s32.totalorder %v16971_v23, %v20997_v3 }
 0x973   :  { %vm13691_vm15 = vmpackc.low %vm8743_vm11, %vm8741_vm10  ;;  %vm8730_vm10 = vcmp.eq.s32.totalorder %v23277_v45, %v20984_v43  ;;  %vm8732_vm11 = vcmp.eq.s32.totalorder %v23278_v26, %v20984_v43 }
 0x974   :  { %vm13701_vm6 = vmpackc.low %vm8732_vm11, %vm8730_vm10 }
 0x975   :  { %13684 = vmatpush1.bf16.msk.msra.mxu1 %vm13683_vm8, %v23092_v38  ;;  %vm8737_vm8 = vcmp.eq.s32.totalorder %v17019_v13, %v20997_v3 }
 0x976   :  { %13686 = vmatprep.subr.msk.bf16.mxu1 %vm13685_vm14, %v23092_v38  ;;  %vm8739_vm14 = vcmp.eq.s32.totalorder %v17022_v62, %v20997_v3 }
 0x977   :  { %vm13695_vm7 = vmpackc.low %vm8739_vm14, %vm8737_vm8  ;;  %vm8790_vm8 = vcmp.eq.s32.totalorder %v23343_v12, %v20984_v43  ;;  %vm8792_vm14 = vcmp.eq.s32.totalorder %v23344_v48, %v20984_v43 }
 0x978   :  { %vm13705_vm2 = vmpackc.low %vm8792_vm14, %vm8790_vm8 }
 0x979   :  { %13688 = vmatpush1.bf16.msk.msra.mxu1 %vm13687_vm9, %v23092_v38  ;;  %vm8733_vm9 = vcmp.eq.s32.totalorder %v23341_v42, %v20997_v3 }
 0x97a   :  { %13690 = vmatprep.subr.msk.bf16.mxu1 %vm13689_vm13, %v23092_v38  ;;  %vm8735_vm13 = vcmp.eq.s32.totalorder %v23342_v18, %v20997_v3 }
 0x97b   :  { %vm13699_vm3 = vmpackc.low %vm8735_vm13, %vm8733_vm9  ;;  %vm8786_vm9 = vcmp.eq.s32.totalorder %v23345_v58, %v20984_v43  ;;  %vm8788_vm13 = vcmp.eq.s32.totalorder %v23346_v57, %v20984_v43 }
 0x97c   :  { %vm13709_vm11 = vmpackc.low %vm8788_vm13, %vm8786_vm9 }
 0x97d   :  { %13692 = vmatpush1.bf16.msk.msra.mxu1 %vm13691_vm15, %v23092_v38  ;;  %vm8729_vm15 = vcmp.eq.s32.totalorder %v23277_v45, %v20997_v3 }
 0x97e   :  { %13694 = vmatprep.subr.msk.bf16.mxu1 %vm13693_vm4, %v23092_v38  ;;  %vm8731_vm4 = vcmp.eq.s32.totalorder %v23278_v26, %v20997_v3 }
 0x97f   :  { %vm13703_vm12 = vmpackc.low %vm8731_vm4, %vm8729_vm15  ;;  %vm8782_vm15 = vcmp.eq.s32.totalorder %v23347_v54, %v20984_v43  ;;  %vm8784_vm4 = vcmp.eq.s32.totalorder %v23348_v35, %v20984_v43 }
 0x980   :  { %vm13713_vm14 = vmpackc.low %vm8784_vm4, %vm8782_vm15 }
 0x981   :  { %13696 = vmatpush1.bf16.msk.msra.mxu1 %vm13695_vm7, %v23092_v38  ;;  %vm8789_vm7 = vcmp.eq.s32.totalorder %v23343_v12, %v20997_v3 }
 0x982   :  { %13698 = vmatprep.subr.msk.bf16.mxu1 %vm13697_vm5, %v23092_v38  ;;  %vm8791_vm5 = vcmp.eq.s32.totalorder %v23344_v48, %v20997_v3 }
 0x983   :  { %vm13707_vm10 = vmpackc.low %vm8791_vm5, %vm8789_vm7  ;;  %vm8778_vm7 = vcmp.eq.s32.totalorder %v23349_v0, %v20984_v43  ;;  %vm8780_vm5 = vcmp.eq.s32.totalorder %v23350_v36, %v20984_v43 }
 0x984   :  { %vm13717_vm13 = vmpackc.low %vm8780_vm5, %vm8778_vm7 }
 0x985   :  { %13700 = vmatpush1.bf16.msk.msra.mxu1 %vm13699_vm3, %v23092_v38  ;;  %vm8785_vm3 = vcmp.eq.s32.totalorder %v23345_v58, %v20997_v3 }
 0x986   :  { %13702 = vmatprep.subr.msk.bf16.mxu1 %vm13701_vm6, %v23092_v38  ;;  %vm8787_vm6 = vcmp.eq.s32.totalorder %v23346_v57, %v20997_v3 }
 0x987   :  { %vm13711_vm8 = vmpackc.low %vm8787_vm6, %vm8785_vm3  ;;  %vm8774_vm3 = vcmp.eq.s32.totalorder %v23351_v7, %v20984_v43  ;;  %vm8776_vm6 = vcmp.eq.s32.totalorder %v23352_v21, %v20984_v43 }
 0x988   :  { %vm13721_vm4 = vmpackc.low %vm8776_vm6, %vm8774_vm3  ;;  %vm8768_vm3 = vcmp.eq.s32.totalorder %v23358_v5, %v20984_v43 }
 0x989   :  { %13704 = vmatpush1.bf16.msk.msra.mxu1 %vm13703_vm12, %v23092_v38  ;;  %vm8781_vm12 = vcmp.eq.s32.totalorder %v23347_v54, %v20997_v3 }
 0x98a   :  { %13706 = vmatprep.subr.msk.bf16.mxu1 %vm13705_vm2, %v23092_v38  ;;  %vm8783_vm2 = vcmp.eq.s32.totalorder %v23348_v35, %v20997_v3 }
 0x98b   :  { %vm13715_vm9 = vmpackc.low %vm8783_vm2, %vm8781_vm12 }
 0x98d   :  { %13708 = vmatpush2.bf16.msk.msra.mxu1 %vm13707_vm10, %v23092_v38  ;;  %vm8777_vm10 = vcmp.eq.s32.totalorder %v23349_v0, %v20997_v3 }
 0x98e   :  { %13710 = vmatprep.subr.msk.bf16.mxu1 %vm13709_vm11, %v23092_v38  ;;  %vm8779_vm11 = vcmp.eq.s32.totalorder %v23350_v36, %v20997_v3 }
 0x98f   :  { %vm13719_vm15 = vmpackc.low %vm8779_vm11, %vm8777_vm10 }
 0x991   :  { %v8444_v30 = vpop.f32.mrf.mxu0  ;;  %13712 = vmatpush2.bf16.msk.msra.mxu1 %vm13711_vm8, %v23092_v38  ;;  %vm8773_vm8 = vcmp.eq.s32.totalorder %v23351_v7, %v20997_v3 }
 0x992   :  { %v8488_v27 = vadd.f32 %v8487_v8, %v8444_v30  ;;  %13714 = vmatprep.subr.msk.bf16.mxu1 %vm13713_vm14, %v23092_v38  ;;  %vm8775_vm14 = vcmp.eq.s32.totalorder %v23352_v21, %v20997_v3 }
 0x993   :  { %v8446_v25 = vpop.f32.mrf.mxu0  ;;  %vm13723_vm12 = vmpackc.low %vm8775_vm14, %vm8773_vm8 }
 0x994   :  { %v8490_v32 = vadd.f32 %v8489_v49, %v8446_v25  ;;  %v8498_v16 = vadd.f32 %v8488_v27, %v20861_v37  ;;  %v23360_v27 = vld [vmem:[#allocation67_spill] sm:$0xff]  ;;  %v23363_v25 = vld [vmem:[#allocation25_spill] sm:$0xff] }
 0x995   :  { %v8448_v60 = vpop.f32.mrf.mxu0  ;;  %13716 = vmatpush2.bf16.msk.msra.mxu1 %vm13715_vm9, %v23092_v38 }
 0x996   :  { %v8492_v22 = vadd.f32 %v8491_v9, %v8448_v60  ;;  %13718 = vmatprep.subr.msk.bf16.mxu1 %vm13717_vm13, %v23092_v38  ;;  %v8499_v17 = vadd.f32 %v8490_v32, %v20864_v24  ;;  %v8528_v37 = vadd.f32 %v8517_v41, %v8498_v16  ;;  %v23355_v24 = vld [vmem:[#allocation34_spill] sm:$0xff]  ;;  %v23362_v9 = vld [vmem:[#allocation29_spill] sm:$0xff] }
 0x997   :  { %v8450_v63 = vpop.f32.mrf.mxu0  ;;  %vm8770_vm2 = vcmp.eq.s32.totalorder %v23355_v24, %v20984_v43  ;;  %vm8769_vm9 = vcmp.eq.s32.totalorder %v23355_v24, %v20997_v3  ;;  %v23364_v32 = vld [vmem:[#allocation30_spill] sm:$0xff]  ;;  %v23366_v16 = vld [vmem:[#allocation5_spill] sm:$0xff] }
 0x998   :  { %v8502_v52 = vadd.f32 %v8492_v22, %v20867_v28  ;;  %v8494_v6 = vadd.f32 %v8493_v11, %v8450_v63  ;;  %v8529_v19 = vadd.f32 %v8521_v29, %v8499_v17  ;;  %v23356_v28 = vld [vmem:[#allocation49_spill] sm:$0xff]  ;;  %v23365_v60 = vld [vmem:[#allocation54_spill] sm:$0xff]  ;;  %v23368_v22 = vld [vmem:[#allocation51_spill] sm:$0xff] }
 0x999   :  { %13720 = vmatpush2.bf16.msk.msra.mxu1 %vm13719_vm15, %v23092_v38  ;;  %vm8772_vm7 = vcmp.eq.s32.totalorder %v23356_v28, %v20984_v43  ;;  %vm8771_vm13 = vcmp.eq.s32.totalorder %v23356_v28, %v20997_v3  ;;  %v23369_v11 = vld [vmem:[#allocation27_spill] sm:$0xff]  ;;  %v23370_v63 = vld [vmem:[#allocation28_spill] sm:$0xff] }
 0x99a   :  { %v8532_v56 = vadd.f32 %v8517_v41, %v8502_v52  ;;  %v8503_v34 = vadd.f32 %v8494_v6, %v20870_v20  ;;  %13722 = vmatprep.subr.msk.bf16.mxu1 %vm13721_vm4, %v23092_v38  ;;  %vm13725_vm5 = vmpackc.low %vm8772_vm7, %vm8770_vm2  ;;  %v23357_v20 = vld [vmem:[#allocation31_spill] sm:$0xff]  ;;  %vm8767_vm4 = vcmp.eq.s32.totalorder %v23358_v5, %v20997_v3  ;;  %v23367_v41 = vld [vmem:[#allocation9_spill] sm:$0xff] }
 0x99b   :  { %vm13727_vm10 = vmpackc.low %vm8771_vm13, %vm8769_vm9  ;;  %vm8766_vm11 = vcmp.eq.s32.totalorder %v23357_v20, %v20984_v43  ;;  %vm8765_vm15 = vcmp.eq.s32.totalorder %v23357_v20, %v20997_v3  ;;  %vm8824_vm13 = vcmp.eq.s32.totalorder %v23362_v9, %v20984_v43  ;;  %v23371_v17 = vld [vmem:[#allocation48_spill] sm:$0xff]  ;;  %v23373_v52 = vld [vmem:[#allocation26_spill] sm:$0xff] }
 0x99c   :  { %v8536_v8 = vpack.c.bf16 %v8532_v56, %v8528_v37  ;;  %v8533_v49 = vadd.f32 %v8521_v29, %v8503_v34  ;;  %vm13729_vm6 = vmpackc.low %vm8768_vm3, %vm8766_vm11  ;;  %vm8823_vm3 = vcmp.eq.s32.totalorder %v23362_v9, %v20997_v3  ;;  %v23372_v29 = vld [vmem:[#allocation45_spill] sm:$0xff]  ;;  %v23374_v6 = vld [vmem:[#allocation42_spill] sm:$0xff] }
 0x99d   :  { %13724 = vmatpush2.bf16.msk.msra.mxu1 %vm13723_vm12, %v23092_v38  ;;  %vm13731_vm8 = vmpackc.low %vm8767_vm4, %vm8765_vm15  ;;  %vm8764_vm12 = vcmp.eq.s32.totalorder %v23360_v27, %v20984_v43  ;;  %vm9168_vm15 = vcmp.eq.s32.totalorder %v16823_v50, %v23363_v25  ;;  %v23375_v37 = vld [vmem:[#allocation8_spill] sm:$0xff]  ;;  %v23376_v56 = vld [vmem:[#allocation23_spill] sm:$0xff] }
 0x99e   :  { %v8537_v30 = vpack.c.bf16 %v8533_v49, %v8529_v19  ;;  %13726 = vmatprep.subr.msk.bf16.mxu1 %vm13725_vm5, %v23092_v38  ;;  %vm8763_vm5 = vcmp.eq.s32.totalorder %v23360_v27, %v20997_v3  ;;  %v23377_v34 = vld [vmem:[#allocation53_spill] sm:$0xff]  ;;  %v23378_v19 = vld [vmem:[#allocation6_spill] sm:$0xff] }
 0x99f   :  { %v23380_v49 = vld [vmem:[#allocation38_spill] sm:$0xff] }
 0x9a0   :  { %8598 = vmatprep.subr.bf16.mxu0 %v8537_v30 }
 0x9a1   :  { %8599 = vmatpush1.bf16.msra.mxu0 %v8536_v8  ;;  %13728 = vmatpush2.bf16.msk.msra.mxu1 %vm13727_vm10, %v23092_v38 }
 0x9a2   :  { %8684 = vmatprep.subr.bf16.mxu0 %v8537_v30  ;;  %13730 = vmatprep.subr.msk.bf16.mxu1 %vm13729_vm6, %v23092_v38  ;;  %vm9166_vm6 = vcmp.eq.s32.totalorder %v16820_v40, %v23363_v25  ;;  %v23381_v30 = vld [vmem:[#allocation57_spill] sm:$0xff] }
 0x9a4   :  { %13670 = vmatmul.mubr.msk.bf16.vlgmr.msra.gmra.mxu0 %vm8539_vm0, %v20989_v39  ;;  %v23359_v39 = vld [vmem:[#allocation66_spill] sm:$0xff] }
 0x9a5   :  { %8685 = vmatpush1.bf16.msra.mxu0 %v8536_v8  ;;  %8702 = vmatprep.mubr.bf16.mxu0 %v23329_v44  ;;  %vm8762_vm14 = vcmp.eq.s32.totalorder %v23359_v39, %v20984_v43  ;;  %vm8761_vm7 = vcmp.eq.s32.totalorder %v23359_v39, %v20997_v3  ;;  %v23379_v8 = vld [vmem:[#allocation52_spill] sm:$0xff] }
 0x9a6   :  { %13732 = vmatpush2.bf16.msk.msra.mxu1 %vm13731_vm8, %v23092_v38  ;;  %vm13733_vm2 = vmpackc.low %vm8764_vm12, %vm8762_vm14  ;;  %vm8818_vm14 = vcmp.eq.s32.totalorder %v23364_v32, %v20984_v43  ;;  %vm8820_vm12 = vcmp.eq.s32.totalorder %v23365_v60, %v20984_v43 }
 0x9a7   :  { %13734 = vmatprep.subr.msk.bf16.mxu1 %vm13733_vm2, %v23092_v38  ;;  %vm13801_vm8 = vmpackc.low %vm9168_vm15, %vm9166_vm6  ;;  %vm8817_vm2 = vcmp.eq.s32.totalorder %v23364_v32, %v20997_v3  ;;  %vm8810_vm15 = vcmp.eq.s32.totalorder %v23368_v22, %v20984_v43 }
 0x9ac   :  { %13672 = vmatmul.mubr.msk.bf16.vlgmr.msra.gmra.mxu0 %vm8539_vm0, %v21009_v15  ;;  %vm13735_vm0 = vmpackc.low %vm8763_vm5, %vm8761_vm7  ;;  %v23361_v15 = vld [vmem:[#allocation41_spill] sm:$0xff]  ;;  %vm8819_vm7 = vcmp.eq.s32.totalorder %v23365_v60, %v20997_v3 }
 0x9ad   :  { %vm8822_vm9 = vcmp.eq.s32.totalorder %v23361_v15, %v20984_v43  ;;  %13736 = vmatpush2.bf16.msk.msra.mxu1 %vm13735_vm0, %v23092_v38  ;;  %vm8821_vm11 = vcmp.eq.s32.totalorder %v23361_v15, %v20997_v3  ;;  %vm13741_vm5 = vmpackc.low %vm8820_vm12, %vm8818_vm14  ;;  %vm8811_vm14 = vcmp.eq.s32.totalorder %v23369_v11, %v20997_v3 }
 0x9ae   :  { %vm13737_vm10 = vmpackc.low %vm8824_vm13, %vm8822_vm9  ;;  %13802 = vmatprep.subr.msk.bf16.mxu1 %vm13801_vm8, %v23092_v38  ;;  %vm8814_vm9 = vcmp.eq.s32.totalorder %v23366_v16, %v20984_v43  ;;  %vm8816_vm13 = vcmp.eq.s32.totalorder %v23367_v41, %v20984_v43  ;;  %vm8809_vm8 = vcmp.eq.s32.totalorder %v23368_v22, %v20997_v3 }
 0x9af   :  { %13738 = vmatprep.subr.msk.bf16.mxu0 %vm13737_vm10, %v23092_v38  ;;  %vm13739_vm4 = vmpackc.low %vm8823_vm3, %vm8821_vm11  ;;  %vm8813_vm10 = vcmp.eq.s32.totalorder %v23366_v16, %v20997_v3  ;;  %vm8815_vm11 = vcmp.eq.s32.totalorder %v23367_v41, %v20997_v3 }
 0x9b0   :  { %13740 = vmatpush1.bf16.msk.msra.mxu0 %vm13739_vm4, %v23092_v38  ;;  %vm13743_vm0 = vmpackc.low %vm8819_vm7, %vm8817_vm2  ;;  %vm8812_vm4 = vcmp.eq.s32.totalorder %v23369_v11, %v20984_v43  ;;  %vm8806_vm7 = vcmp.eq.s32.totalorder %v23314_v2, %v20984_v43 }
 0x9b1   :  { %13742 = vmatprep.subr.msk.bf16.mxu0 %vm13741_vm5, %v23092_v38  ;;  %vm13745_vm3 = vmpackc.low %vm8816_vm13, %vm8814_vm9  ;;  %vm8808_vm5 = vcmp.eq.s32.totalorder %v23370_v63, %v20984_v43  ;;  %vm8807_vm9 = vcmp.eq.s32.totalorder %v23370_v63, %v20997_v3 }
 0x9b2   :  { %vm13747_vm6 = vmpackc.low %vm8815_vm11, %vm8813_vm10  ;;  %vm8802_vm11 = vcmp.eq.s32.totalorder %v23371_v17, %v20984_v43 }
 0x9b3   :  { %vm13749_vm12 = vmpackc.low %vm8812_vm4, %vm8810_vm15  ;;  %vm8803_vm15 = vcmp.eq.s32.totalorder %v23372_v29, %v20997_v3 }
 0x9b4   :  { %13744 = vmatpush1.bf16.msk.msra.mxu0 %vm13743_vm0, %v23092_v38  ;;  %vm13751_vm2 = vmpackc.low %vm8811_vm14, %vm8809_vm8  ;;  %vm8805_vm0 = vcmp.eq.s32.totalorder %v23314_v2, %v20997_v3  ;;  %vm8798_vm14 = vcmp.eq.s32.totalorder %v23373_v52, %v20984_v43 }
 0x9b5   :  { %13746 = vmatprep.subr.msk.bf16.mxu0 %vm13745_vm3, %v23092_v38  ;;  %vm13753_vm13 = vmpackc.low %vm8808_vm5, %vm8806_vm7  ;;  %vm8804_vm3 = vcmp.eq.s32.totalorder %v23372_v29, %v20984_v43  ;;  %vm8799_vm7 = vcmp.eq.s32.totalorder %v23374_v6, %v20997_v3 }
 0x9b6   :  { %vm13755_vm10 = vmpackc.low %vm8807_vm9, %vm8805_vm0  ;;  %vm8794_vm9 = vcmp.eq.s32.totalorder %v23375_v37, %v20984_v43 }
 0x9b7   :  { %vm13757_vm4 = vmpackc.low %vm8804_vm3, %vm8802_vm11  ;;  %vm8795_vm11 = vcmp.eq.s32.totalorder %v23376_v56, %v20997_v3 }
 0x9b8   :  { %13748 = vmatpush1.bf16.msk.msra.mxu0 %vm13747_vm6, %v23092_v38  ;;  %vm8801_vm6 = vcmp.eq.s32.totalorder %v23371_v17, %v20997_v3 }
 0x9b9   :  { %13750 = vmatprep.subr.msk.bf16.mxu0 %vm13749_vm12, %v23092_v38  ;;  %vm13759_vm8 = vmpackc.low %vm8803_vm15, %vm8801_vm6  ;;  %vm8800_vm12 = vcmp.eq.s32.totalorder %v23374_v6, %v20984_v43  ;;  %vm8854_vm15 = vcmp.eq.s32.totalorder %v23377_v34, %v20984_v43 }
 0x9ba   :  { %vm13761_vm5 = vmpackc.low %vm8800_vm12, %vm8798_vm14  ;;  %vm8855_vm14 = vcmp.eq.s32.totalorder %v23378_v19, %v20997_v3 }
 0x9bc   :  { %13752 = vmatpush1.bf16.msk.msra.mxu0 %vm13751_vm2, %v23092_v38  ;;  %vm8797_vm2 = vcmp.eq.s32.totalorder %v23373_v52, %v20997_v3 }
 0x9bd   :  { %13754 = vmatprep.subr.msk.bf16.mxu0 %vm13753_vm13, %v23092_v38  ;;  %vm13763_vm0 = vmpackc.low %vm8799_vm7, %vm8797_vm2  ;;  %vm8796_vm13 = vcmp.eq.s32.totalorder %v23376_v56, %v20984_v43  ;;  %vm8850_vm7 = vcmp.eq.s32.totalorder %v23379_v8, %v20984_v43 }
 0x9be   :  { %vm13765_vm3 = vmpackc.low %vm8796_vm13, %vm8794_vm9  ;;  %vm8851_vm9 = vcmp.eq.s32.totalorder %v23380_v49, %v20997_v3 }
 0x9c0   :  { %13756 = vmatpush1.bf16.msk.msra.mxu0 %vm13755_vm10, %v23092_v38  ;;  %vm8793_vm10 = vcmp.eq.s32.totalorder %v23375_v37, %v20997_v3 }
 0x9c1   :  { %13758 = vmatprep.subr.msk.bf16.mxu0 %vm13757_vm4, %v23092_v38  ;;  %vm13767_vm6 = vmpackc.low %vm8795_vm11, %vm8793_vm10  ;;  %vm8856_vm4 = vcmp.eq.s32.totalorder %v23378_v19, %v20984_v43  ;;  %vm8846_vm11 = vcmp.eq.s32.totalorder %v23381_v30, %v20984_v43 }
 0x9c2   :  { %vm13769_vm12 = vmpackc.low %vm8856_vm4, %vm8854_vm15  ;;  %vm8847_vm15 = vcmp.eq.s32.totalorder %v23382_v14, %v20997_v3 }
 0x9c4   :  { %13760 = vmatpush1.bf16.msk.msra.mxu0 %vm13759_vm8, %v23092_v38  ;;  %vm8853_vm8 = vcmp.eq.s32.totalorder %v23377_v34, %v20997_v3 }
 0x9c5   :  { %13762 = vmatprep.subr.msk.bf16.mxu0 %vm13761_vm5, %v23092_v38  ;;  %vm13771_vm2 = vmpackc.low %vm8855_vm14, %vm8853_vm8  ;;  %vm8852_vm5 = vcmp.eq.s32.totalorder %v23380_v49, %v20984_v43  ;;  %vm8842_vm14 = vcmp.eq.s32.totalorder %v23383_v4, %v20984_v43 }
 0x9c6   :  { %vm13773_vm13 = vmpackc.low %vm8852_vm5, %vm8850_vm7  ;;  %vm8843_vm7 = vcmp.eq.s32.totalorder %v23384_v33, %v20997_v3 }
 0x9c8   :  { %13764 = vmatpush1.bf16.msk.msra.mxu0 %vm13763_vm0, %v23092_v38  ;;  %vm8849_vm0 = vcmp.eq.s32.totalorder %v23379_v8, %v20997_v3 }
 0x9c9   :  { %13766 = vmatprep.subr.msk.bf16.mxu0 %vm13765_vm3, %v23092_v38  ;;  %vm13775_vm10 = vmpackc.low %vm8851_vm9, %vm8849_vm0  ;;  %vm8848_vm3 = vcmp.eq.s32.totalorder %v23382_v14, %v20984_v43  ;;  %vm8838_vm9 = vcmp.eq.s32.totalorder %v23385_v53, %v20984_v43 }
 0x9ca   :  { %vm13777_vm4 = vmpackc.low %vm8848_vm3, %vm8846_vm11  ;;  %vm8837_vm11 = vcmp.eq.s32.totalorder %v23385_v53, %v20997_v3  ;;  %vm8839_vm3 = vcmp.eq.s32.totalorder %v23386_v31, %v20997_v3  ;;  %v23390_v53 = vld [vmem:[#allocation71_spill] sm:$0xff] }
 0x9cc   :  { %13768 = vmatpush1.bf16.msk.msra.mxu0 %vm13767_vm6, %v23092_v38  ;;  %vm8845_vm6 = vcmp.eq.s32.totalorder %v23381_v30, %v20997_v3  ;;  %v23393_v30 = vld [vmem:[#allocation24_spill] sm:$0xff] }
 0x9cd   :  { %13770 = vmatprep.subr.msk.bf16.mxu0 %vm13769_vm12, %v23092_v38  ;;  %vm13779_vm8 = vmpackc.low %vm8847_vm15, %vm8845_vm6  ;;  %vm8844_vm12 = vcmp.eq.s32.totalorder %v23384_v33, %v20984_v43  ;;  %vm8834_vm15 = vcmp.eq.s32.totalorder %v23387_v10, %v20984_v43  ;;  %v23388_v33 = vld [vmem:[#allocation69_spill] sm:$0xff] }
 0x9ce   :  { %vm13781_vm5 = vmpackc.low %vm8844_vm12, %vm8842_vm14  ;;  %vm8833_vm14 = vcmp.eq.s32.totalorder %v23387_v10, %v20997_v3  ;;  %vm8835_vm12 = vcmp.eq.s32.totalorder %v23388_v33, %v20997_v3  ;;  %v23392_v10 = vld [vmem:[#allocation74_spill] sm:$0xff] }
 0x9cf   :  { %vm13787_vm6 = vmpackc.low %vm8839_vm3, %vm8837_vm11  ;;  %vm8828_vm3 = vcmp.eq.s32.totalorder %v23392_v10, %v20984_v43 }
 0x9d0   :  { %13772 = vmatpush2.bf16.msk.msra.mxu0 %vm13771_vm2, %v23092_v38  ;;  %vm8841_vm2 = vcmp.eq.s32.totalorder %v23383_v4, %v20997_v3 }
 0x9d1   :  { %13774 = vmatprep.subr.msk.bf16.mxu0 %vm13773_vm13, %v23092_v38  ;;  %vm13783_vm0 = vmpackc.low %vm8843_vm7, %vm8841_vm2  ;;  %vm8840_vm13 = vcmp.eq.s32.totalorder %v23386_v31, %v20984_v43  ;;  %v23389_v31 = vld [vmem:[#allocation70_spill] sm:$0xff] }
 0x9d2   :  { %vm13791_vm2 = vmpackc.low %vm8835_vm12, %vm8833_vm14  ;;  %vm8830_vm7 = vcmp.eq.s32.totalorder %v23389_v31, %v20984_v43  ;;  %vm9230_vm14 = vcmp.eq.s32.totalorder %v23361_v15, %v23363_v25  ;;  %vm9232_vm12 = vcmp.eq.s32.totalorder %v23362_v9, %v23363_v25 }
 0x9d4   :  { %13776 = vmatpush2.bf16.msk.msra.mxu0 %vm13775_vm10, %v23092_v38  ;;  %vm13785_vm10 = vmpackc.low %vm8840_vm13, %vm8838_vm9  ;;  %vm8829_vm9 = vcmp.eq.s32.totalorder %v23389_v31, %v20997_v3  ;;  %vm8831_vm13 = vcmp.eq.s32.totalorder %v23390_v53, %v20997_v3 }
 0x9d5   :  { %13778 = vmatprep.subr.msk.bf16.mxu0 %vm13777_vm4, %v23092_v38  ;;  %vm8836_vm4 = vcmp.eq.s32.totalorder %v23388_v33, %v20984_v43  ;;  %v23391_v33 = vld [vmem:[#allocation17_spill] sm:$0xff] }
 0x9d6   :  { %vm8826_vm11 = vcmp.eq.s32.totalorder %v23391_v33, %v20984_v43 }
 0x9d8   :  { %13780 = vmatpush2.bf16.msk.msra.mxu0 %vm13779_vm8, %v23092_v38  ;;  %vm13789_vm8 = vmpackc.low %vm8836_vm4, %vm8834_vm15  ;;  %vm8825_vm15 = vcmp.eq.s32.totalorder %v23391_v33, %v20997_v3  ;;  %vm8827_vm4 = vcmp.eq.s32.totalorder %v23392_v10, %v20997_v3 }
 0x9d9   :  { %13782 = vmatprep.subr.msk.bf16.mxu0 %vm13781_vm5, %v23092_v38  ;;  %vm8832_vm5 = vcmp.eq.s32.totalorder %v23390_v53, %v20984_v43 }
 0x9dc   :  { %13784 = vmatpush2.bf16.msk.msra.mxu0 %vm13783_vm0, %v23092_v38  ;;  %vm13793_vm0 = vmpackc.low %vm8832_vm5, %vm8830_vm7  ;;  %vm9165_vm7 = vcmp.eq.s32.totalorder %v16820_v40, %v23393_v30  ;;  %vm9167_vm5 = vcmp.eq.s32.totalorder %v16823_v50, %v23393_v30 }
 0x9dd   :  { %13786 = vmatprep.subr.msk.bf16.mxu0 %vm13785_vm10, %v23092_v38  ;;  %vm13795_vm10 = vmpackc.low %vm8831_vm13, %vm8829_vm9  ;;  %vm9164_vm9 = vcmp.eq.s32.totalorder %v16853_v47, %v23363_v25 }
 0x9de   :  { %vm13803_vm13 = vmpackc.low %vm9167_vm5, %vm9165_vm7  ;;  %vm9156_vm7 = vcmp.eq.s32.totalorder %v16923_v59, %v23363_v25 }
 0x9e0   :  { %13788 = vmatpush2.bf16.msk.msra.mxu0 %vm13787_vm6, %v23092_v38  ;;  %vm13797_vm6 = vmpackc.low %vm8828_vm3, %vm8826_vm11  ;;  %vm9161_vm11 = vcmp.eq.s32.totalorder %v16850_v51, %v23393_v30  ;;  %vm9163_vm3 = vcmp.eq.s32.totalorder %v16853_v47, %v23393_v30 }
 0x9e1   :  { %13790 = vmatprep.subr.msk.bf16.mxu0 %vm13789_vm8, %v23092_v38  ;;  %vm13799_vm8 = vmpackc.low %vm8827_vm4, %vm8825_vm15  ;;  %vm9160_vm15 = vcmp.eq.s32.totalorder %v16881_v1, %v23363_v25 }
 0x9e2   :  { %vm13807_vm4 = vmpackc.low %vm9163_vm3, %vm9161_vm11  ;;  %vm9152_vm11 = vcmp.eq.s32.totalorder %v16971_v23, %v23363_v25 }
 0x9e4   :  { %13792 = vmatpush2.bf16.msk.msra.mxu0 %vm13791_vm2, %v23092_v38  ;;  %vm13865_vm2 = vmpackc.low %vm9232_vm12, %vm9230_vm14  ;;  %vm9157_vm14 = vcmp.eq.s32.totalorder %v16878_v55, %v23393_v30  ;;  %vm9159_vm12 = vcmp.eq.s32.totalorder %v16881_v1, %v23393_v30 }
 0x9e5   :  { %13794 = vmatprep.subr.msk.bf16.mxu0 %vm13793_vm0, %v23092_v38  ;;  %vm9162_vm0 = vcmp.eq.s32.totalorder %v16850_v51, %v23363_v25  ;;  %vm13811_vm5 = vmpackc.low %vm9159_vm12, %vm9157_vm14  ;;  %vm9148_vm14 = vcmp.eq.s32.totalorder %v17022_v62, %v23363_v25 }
 0x9e8   :  { %13796 = vmatpush2.bf16.msk.msra.mxu0 %vm13795_vm10, %v23092_v38  ;;  %vm13805_vm10 = vmpackc.low %vm9164_vm9, %vm9162_vm0  ;;  %vm9153_vm9 = vcmp.eq.s32.totalorder %v16920_v61, %v23393_v30 }
 0x9e9   :  { %13798 = vmatprep.subr.msk.bf16.mxu0 %vm13797_vm6, %v23092_v38  ;;  %vm9158_vm6 = vcmp.eq.s32.totalorder %v16878_v55, %v23363_v25 }
 0x9ec   :  { %13800 = vmatpush2.bf16.msk.msra.mxu0 %vm13799_vm8, %v23092_v38  ;;  %vm13809_vm8 = vmpackc.low %vm9160_vm15, %vm9158_vm6  ;;  %vm9149_vm15 = vcmp.eq.s32.totalorder %v16968_v46, %v23393_v30 }
 0x9ed   :  { %13866 = vmatprep.subr.msk.bf16.mxu0 %vm13865_vm2, %v23092_v38  ;;  %vm9154_vm2 = vcmp.eq.s32.totalorder %v16920_v61, %v23363_v25 }
 0x9ee   :  { %vm13813_vm0 = vmpackc.low %vm9156_vm7, %vm9154_vm2  ;;  %vm9145_vm7 = vcmp.eq.s32.totalorder %v17019_v13, %v23393_v30 }
 0xa24   :  { %v8577_v43 = vpop.f32.mrf.mxu1 }
 0xa26   :  { %v8579_v53 = vpop.f32.mrf.mxu1 }
 0xa28   :  { %v8581_v33 = vpop.f32.mrf.mxu1 }
 0xa2a   :  { %v8582_v31 = vpop.f32.mrf.mxu1 }
 0xa2c   :  { %v8663_v4 = vpop.f32.mrf.mxu1 }
 0xa2d   :  { %v8711_v3 = vmax.f32 %v8577_v43, %v8663_v4 }
 0xa2e   :  { %v8665_v10 = vpop.f32.mrf.mxu1 }
 0xa2f   :  { %v8712_v14 = vmax.f32 %v8579_v53, %v8665_v10  ;;  %v21351_v49 = vpack.c.bf16 %v8711_v3, %v8711_v3  ;;  %v23396_v10 = vld [vmem:[#allocation32_spill] sm:$0xff]  ;;  %v23397_v53 = vld [vmem:[#allocation59_spill] sm:$0xff] }
 0xa30   :  { %v8667_v33 = vpop.f32.mrf.mxu1 }
 0xa31   :  { %v8716_v31 = vpack.c.bf16 %v8712_v14, %v8712_v14  ;;  %v15308_v33 = vld [vmem:[%s22615_s5 + $0x2e0] ss:$16 sps:$4 sm:$0xff]  }
 0xa32   :  { %v8668_v4 = vpop.f32.mrf.mxu1 }
 0xa33   :  { %9081 = vmatprep.mubr.bf16.mxu1 %v8716_v31  ;;  %v15316_v4 = vld [vmem:[%s22615_s5 + $0x2c4] ss:$16 sps:$4 sm:$0xff]  }
 0xa34   :  { %9082 = vmatmul.mubr.bf16.vlgmr.msra.gmra.mxu1 %v21351_v49 }
 0xa35   :  { %13804 = vmatpush1.bf16.msk.msra.mxu1 %vm13803_vm13, %v23092_v38  ;;  %9489 = vmatprep.mubr.bf16.mxu1 %v8716_v31  ;;  %vm9155_vm13 = vcmp.eq.s32.totalorder %v16923_v59, %v23393_v30  ;;  %v15311_v31 = vld [vmem:[%s22615_s5 + $0x2e8] ss:$16 sps:$4 sm:$0xff]  }
 0xa36   :  { %13806 = vmatprep.subr.msk.bf16.mxu1 %vm13805_vm10, %v23092_v38  ;;  %vm9150_vm10 = vcmp.eq.s32.totalorder %v16968_v46, %v23363_v25  ;;  %vm13815_vm3 = vmpackc.low %vm9155_vm13, %vm9153_vm9  ;;  %vm9144_vm9 = vcmp.eq.s32.totalorder %v23342_v18, %v23363_v25 }
 0xa37   :  { %vm13817_vm6 = vmpackc.low %vm9152_vm11, %vm9150_vm10  ;;  %vm9141_vm11 = vcmp.eq.s32.totalorder %v23341_v42, %v23393_v30 }
 0xa39   :  { %13808 = vmatpush1.bf16.msk.msra.mxu1 %vm13807_vm4, %v23092_v38  ;;  %vm9151_vm4 = vcmp.eq.s32.totalorder %v16971_v23, %v23393_v30 }
 0xa3a   :  { %13810 = vmatprep.subr.msk.bf16.mxu1 %vm13809_vm8, %v23092_v38  ;;  %vm9146_vm8 = vcmp.eq.s32.totalorder %v17019_v13, %v23363_v25  ;;  %vm13819_vm12 = vmpackc.low %vm9151_vm4, %vm9149_vm15  ;;  %vm9140_vm15 = vcmp.eq.s32.totalorder %v23278_v26, %v23363_v25 }
 0xa3b   :  { %vm13821_vm2 = vmpackc.low %vm9148_vm14, %vm9146_vm8  ;;  %vm9137_vm14 = vcmp.eq.s32.totalorder %v23277_v45, %v23393_v30 }
 0xa3d   :  { %13812 = vmatpush1.bf16.msk.msra.mxu1 %vm13811_vm5, %v23092_v38  ;;  %vm9147_vm5 = vcmp.eq.s32.totalorder %v17022_v62, %v23393_v30  ;;  %v23394_v62 = vld [vmem:[#allocation38_spill] sm:$0xff] }
 0xa3e   :  { %13814 = vmatprep.subr.msk.bf16.mxu1 %vm13813_vm0, %v23092_v38  ;;  %vm9142_vm0 = vcmp.eq.s32.totalorder %v23341_v42, %v23363_v25  ;;  %vm13823_vm13 = vmpackc.low %vm9147_vm5, %vm9145_vm7  ;;  %vm9200_vm7 = vcmp.eq.s32.totalorder %v23344_v48, %v23363_v25  ;;  %v23398_v42 = vld [vmem:[#allocation46_spill] sm:$0xff] }
 0xa3f   :  { %vm13825_vm10 = vmpackc.low %vm9144_vm9, %vm9142_vm0  ;;  %vm9197_vm9 = vcmp.eq.s32.totalorder %v23343_v12, %v23393_v30 }
 0xa41   :  { %13816 = vmatpush1.bf16.msk.msra.mxu1 %vm13815_vm3, %v23092_v38  ;;  %vm9143_vm3 = vcmp.eq.s32.totalorder %v23342_v18, %v23393_v30  ;;  %v23399_v18 = vld [vmem:[#allocation16_spill] sm:$0xff] }
 0xa42   :  { %13818 = vmatprep.subr.msk.bf16.mxu1 %vm13817_vm6, %v23092_v38  ;;  %vm9138_vm6 = vcmp.eq.s32.totalorder %v23277_v45, %v23363_v25  ;;  %vm13827_vm4 = vmpackc.low %vm9143_vm3, %vm9141_vm11  ;;  %vm9196_vm11 = vcmp.eq.s32.totalorder %v23346_v57, %v23363_v25 }
 0xa43   :  { %vm13829_vm8 = vmpackc.low %vm9140_vm15, %vm9138_vm6  ;;  %vm9193_vm15 = vcmp.eq.s32.totalorder %v23345_v58, %v23393_v30 }
 0xa45   :  { %13820 = vmatpush1.bf16.msk.msra.mxu1 %vm13819_vm12, %v23092_v38  ;;  %vm9139_vm12 = vcmp.eq.s32.totalorder %v23278_v26, %v23393_v30 }
 0xa46   :  { %13822 = vmatprep.subr.msk.bf16.mxu1 %vm13821_vm2, %v23092_v38  ;;  %vm9198_vm2 = vcmp.eq.s32.totalorder %v23343_v12, %v23363_v25  ;;  %vm13831_vm5 = vmpackc.low %vm9139_vm12, %vm9137_vm14  ;;  %vm9192_vm14 = vcmp.eq.s32.totalorder %v23348_v35, %v23363_v25  ;;  %v23400_v12 = vld [vmem:[#allocation14_spill] sm:$0xff] }
 0xa47   :  { %vm13833_vm0 = vmpackc.low %vm9200_vm7, %vm9198_vm2  ;;  %vm9189_vm7 = vcmp.eq.s32.totalorder %v23347_v54, %v23393_v30 }
 0xa49   :  { %13824 = vmatpush1.bf16.msk.msra.mxu1 %vm13823_vm13, %v23092_v38  ;;  %vm9199_vm13 = vcmp.eq.s32.totalorder %v23344_v48, %v23393_v30  ;;  %v23401_v48 = vld [vmem:[#allocation68_spill] sm:$0xff] }
 0xa4a   :  { %13826 = vmatprep.subr.msk.bf16.mxu1 %vm13825_vm10, %v23092_v38  ;;  %vm9194_vm10 = vcmp.eq.s32.totalorder %v23345_v58, %v23363_v25  ;;  %vm13835_vm3 = vmpackc.low %vm9199_vm13, %vm9197_vm9  ;;  %vm9188_vm9 = vcmp.eq.s32.totalorder %v23350_v36, %v23363_v25  ;;  %v23402_v58 = vld [vmem:[#allocation69_spill] sm:$0xff] }
 0xa4b   :  { %vm13837_vm6 = vmpackc.low %vm9196_vm11, %vm9194_vm10  ;;  %vm9185_vm11 = vcmp.eq.s32.totalorder %v23349_v0, %v23393_v30 }
 0xa4d   :  { %13828 = vmatpush1.bf16.msk.msra.mxu1 %vm13827_vm4, %v23092_v38  ;;  %vm9195_vm4 = vcmp.eq.s32.totalorder %v23346_v57, %v23393_v30  ;;  %v23403_v57 = vld [vmem:[#allocation70_spill] sm:$0xff] }
 0xa4e   :  { %13830 = vmatprep.subr.msk.bf16.mxu1 %vm13829_vm8, %v23092_v38  ;;  %vm9190_vm8 = vcmp.eq.s32.totalorder %v23347_v54, %v23363_v25  ;;  %vm13839_vm12 = vmpackc.low %vm9195_vm4, %vm9193_vm15  ;;  %vm9184_vm15 = vcmp.eq.s32.totalorder %v23352_v21, %v23363_v25  ;;  %v23404_v54 = vld [vmem:[#allocation71_spill] sm:$0xff] }
 0xa4f   :  { %vm13841_vm2 = vmpackc.low %vm9192_vm14, %vm9190_vm8  ;;  %vm9181_vm14 = vcmp.eq.s32.totalorder %v23351_v7, %v23393_v30 }
 0xa51   :  { %13832 = vmatpush1.bf16.msk.msra.mxu1 %vm13831_vm5, %v23092_v38  ;;  %vm9191_vm5 = vcmp.eq.s32.totalorder %v23348_v35, %v23393_v30  ;;  %v23405_v35 = vld [vmem:[#allocation17_spill] sm:$0xff] }
 0xa52   :  { %13834 = vmatprep.subr.msk.bf16.mxu1 %vm13833_vm0, %v23092_v38  ;;  %vm9186_vm0 = vcmp.eq.s32.totalorder %v23349_v0, %v23363_v25  ;;  %vm13843_vm13 = vmpackc.low %vm9191_vm5, %vm9189_vm7  ;;  %vm9180_vm7 = vcmp.eq.s32.totalorder %v23356_v28, %v23363_v25  ;;  %v23406_v0 = vld [vmem:[#allocation74_spill] sm:$0xff] }
 0xa53   :  { %vm13845_vm10 = vmpackc.low %vm9188_vm9, %vm9186_vm0  ;;  %vm9177_vm9 = vcmp.eq.s32.totalorder %v23355_v24, %v23393_v30 }
 0xa55   :  { %13836 = vmatpush2.bf16.msk.msra.mxu1 %vm13835_vm3, %v23092_v38  ;;  %vm9187_vm3 = vcmp.eq.s32.totalorder %v23350_v36, %v23393_v30 }
 0xa56   :  { %13838 = vmatprep.subr.msk.bf16.mxu1 %vm13837_vm6, %v23092_v38  ;;  %vm9182_vm6 = vcmp.eq.s32.totalorder %v23351_v7, %v23363_v25  ;;  %vm13847_vm4 = vmpackc.low %vm9187_vm3, %vm9185_vm11  ;;  %vm9176_vm11 = vcmp.eq.s32.totalorder %v23358_v5, %v23363_v25 }
 0xa57   :  { %vm13849_vm8 = vmpackc.low %vm9184_vm15, %vm9182_vm6  ;;  %vm9173_vm15 = vcmp.eq.s32.totalorder %v23357_v20, %v23393_v30 }
 0xa59   :  { %13840 = vmatpush2.bf16.msk.msra.mxu1 %vm13839_vm12, %v23092_v38  ;;  %vm9183_vm12 = vcmp.eq.s32.totalorder %v23352_v21, %v23393_v30 }
 0xa5a   :  { %13842 = vmatprep.subr.msk.bf16.mxu1 %vm13841_vm2, %v23092_v38  ;;  %vm9178_vm2 = vcmp.eq.s32.totalorder %v23355_v24, %v23363_v25  ;;  %vm13851_vm5 = vmpackc.low %vm9183_vm12, %vm9181_vm14  ;;  %vm9172_vm14 = vcmp.eq.s32.totalorder %v23360_v27, %v23363_v25 }
 0xa5b   :  { %vm13853_vm0 = vmpackc.low %vm9180_vm7, %vm9178_vm2  ;;  %vm9169_vm7 = vcmp.eq.s32.totalorder %v23359_v39, %v23393_v30 }
 0xa5d   :  { %13844 = vmatpush2.bf16.msk.msra.mxu1 %vm13843_vm13, %v23092_v38  ;;  %vm9179_vm13 = vcmp.eq.s32.totalorder %v23356_v28, %v23393_v30 }
 0xa5e   :  { %13846 = vmatprep.subr.msk.bf16.mxu1 %vm13845_vm10, %v23092_v38  ;;  %vm9174_vm10 = vcmp.eq.s32.totalorder %v23357_v20, %v23363_v25  ;;  %vm13855_vm3 = vmpackc.low %vm9179_vm13, %vm9177_vm9  ;;  %vm9229_vm9 = vcmp.eq.s32.totalorder %v23361_v15, %v23393_v30  ;;  %vm9231_vm13 = vcmp.eq.s32.totalorder %v23362_v9, %v23393_v30 }
 0xa5f   :  { %vm13857_vm6 = vmpackc.low %vm9176_vm11, %vm9174_vm10  ;;  %vm9226_vm10 = vcmp.eq.s32.totalorder %v23364_v32, %v23363_v25  ;;  %vm9228_vm11 = vcmp.eq.s32.totalorder %v23365_v60, %v23363_v25 }
 0xa61   :  { %13848 = vmatpush2.bf16.msk.msra.mxu1 %vm13847_vm4, %v23092_v38  ;;  %vm9175_vm4 = vcmp.eq.s32.totalorder %v23358_v5, %v23393_v30 }
 0xa62   :  { %13850 = vmatprep.subr.msk.bf16.mxu1 %vm13849_vm8, %v23092_v38  ;;  %vm9170_vm8 = vcmp.eq.s32.totalorder %v23359_v39, %v23363_v25  ;;  %vm13859_vm12 = vmpackc.low %vm9175_vm4, %vm9173_vm15  ;;  %vm9225_vm15 = vcmp.eq.s32.totalorder %v23364_v32, %v23393_v30  ;;  %vm9227_vm4 = vcmp.eq.s32.totalorder %v23365_v60, %v23393_v30 }
 0xa63   :  { %vm13861_vm2 = vmpackc.low %vm9172_vm14, %vm9170_vm8  ;;  %vm9222_vm8 = vcmp.eq.s32.totalorder %v23366_v16, %v23363_v25  ;;  %vm9224_vm14 = vcmp.eq.s32.totalorder %v23367_v41, %v23363_v25 }
 0xa64   :  { %v8618_v26 = vpop.f32.mrf.mxu0 }
 0xa65   :  { %13852 = vmatpush2.bf16.msk.msra.mxu1 %vm13851_vm5, %v23092_v38  ;;  %vm9171_vm5 = vcmp.eq.s32.totalorder %v23360_v27, %v23393_v30 }
 0xa66   :  { %v8620_v40 = vpop.f32.mrf.mxu0  ;;  %13854 = vmatprep.subr.msk.bf16.mxu1 %vm13853_vm0, %v23092_v38  ;;  %vm13863_vm0 = vmpackc.low %vm9171_vm5, %vm9169_vm7  ;;  %vm9221_vm7 = vcmp.eq.s32.totalorder %v23366_v16, %v23393_v30  ;;  %vm9223_vm5 = vcmp.eq.s32.totalorder %v23367_v41, %v23393_v30 }
 0xa68   :  { %v8622_v50 = vpop.f32.mrf.mxu0 }
 0xa69   :  { %13856 = vmatpush2.bf16.msk.msra.mxu1 %vm13855_vm3, %v23092_v38  ;;  %vm13867_vm3 = vmpackc.low %vm9231_vm13, %vm9229_vm9  ;;  %vm9220_vm9 = vcmp.eq.s32.totalorder %v23369_v11, %v23363_v25  ;;  %v15317_v50 = vld [vmem:[%s22615_s5 + $0x2c8] ss:$16 sps:$4 sm:$0xff]  }
 0xa6a   :  { %v8623_v51 = vpop.f32.mrf.mxu0  ;;  %13858 = vmatprep.subr.msk.bf16.mxu1 %vm13857_vm6, %v23092_v38  ;;  %vm13869_vm6 = vmpackc.low %vm9228_vm11, %vm9226_vm10  ;;  %vm9217_vm11 = vcmp.eq.s32.totalorder %v23368_v22, %v23393_v30 }
 0xa6b   :  { %vm13875_vm13 = vmpackc.low %vm9223_vm5, %vm9221_vm7  ;;  %vm9212_vm7 = vcmp.eq.s32.totalorder %v23372_v29, %v23363_v25  ;;  %v15322_v51 = vld [vmem:[%s22615_s5 + $0x2a4] ss:$16 sps:$4 sm:$0xff]  }
 0xa6c   :  { %v8704_v47 = vpop.f32.mrf.mxu0 }
 0xa6d   :  { %13860 = vmatpush2.bf16.msk.msra.mxu1 %vm13859_vm12, %v23092_v38  ;;  %v8713_v55 = vmax.f32 %v8618_v26, %v8704_v47  ;;  %vm13871_vm12 = vmpackc.low %vm9227_vm4, %vm9225_vm15  ;;  %vm9216_vm15 = vcmp.eq.s32.totalorder %v23370_v63, %v23363_v25  ;;  %v15319_v26 = vld [vmem:[%s22615_s5 + $0x2cc] ss:$16 sps:$4 sm:$0xff]  }
 0xa6e   :  { %v8706_v1 = vpop.f32.mrf.mxu0  ;;  %13862 = vmatprep.subr.msk.bf16.mxu1 %vm13861_vm2, %v23092_v38  ;;  %vm13873_vm2 = vmpackc.low %vm9224_vm14, %vm9222_vm8  ;;  %vm9213_vm14 = vcmp.eq.s32.totalorder %v23314_v2, %v23393_v30  ;;  %v15325_v47 = vld [vmem:[%s22615_s5 + $0x2ac] ss:$16 sps:$4 sm:$0xff]  }
 0xa6f   :  { %v8714_v61 = vmax.f32 %v8620_v40, %v8706_v1  ;;  %v21513_v23 = vpack.c.bf16 %v8713_v55, %v8713_v55  ;;  %v15314_v40 = vld [vmem:[%s22615_s5 + $0x2c0] ss:$16 sps:$4 sm:$0xff]   ;;  %v15323_v1 = vld [vmem:[%s22615_s5 + $0x2a8] ss:$16 sps:$4 sm:$0xff]  }
 0xa70   :  { %v8708_v59 = vpop.f32.mrf.mxu0  ;;  %v15320_v55 = vld [vmem:[%s22615_s5 + $0x2a0] ss:$16 sps:$4 sm:$0xff]  }
 0xa71   :  { %v8718_v46 = vpack.c.bf16 %v8714_v61, %v8714_v61  ;;  %13864 = vmatpush2.bf16.msk.msra.mxu1 %vm13863_vm0, %v23092_v38  ;;  %vm9218_vm0 = vcmp.eq.s32.totalorder %v23368_v22, %v23363_v25  ;;  %v15328_v61 = vld [vmem:[%s22615_s5 + $0x284] ss:$16 sps:$4 sm:$0xff]   ;;  %v15331_v59 = vld [vmem:[%s22615_s5 + $0x28c] ss:$16 sps:$4 sm:$0xff]  }
 0xa72   :  { %v8709_v13 = vpop.f32.mrf.mxu0  ;;  %vm13877_vm10 = vmpackc.low %vm9220_vm9, %vm9218_vm0  ;;  %vm9209_vm9 = vcmp.eq.s32.totalorder %v23371_v17, %v23393_v30 }
 0xa73   :  { %9122 = vmatprep.mubr.bf16.mxu0 %v8718_v46  ;;  %v15334_v13 = vld [vmem:[%s22615_s5 + $0x264] ss:$16 sps:$4 sm:$0xff]  }
 0xa74   :  { %9123 = vmatmul.mubr.bf16.vlgmr.msra.gmra.mxu0 %v21513_v23  ;;  %9490 = vmatmul.mubr.bf16.vlgmr.msra.gmra.mxu1 %v21351_v49  ;;  %v15313_v49 = vld [vmem:[%s22615_s5 + $0x2ec] ss:$16 sps:$4 sm:$0xff]  }
 0xa75   :  { %13868 = vmatpush1.bf16.msk.msra.mxu0 %vm13867_vm3, %v23092_v38  ;;  %9530 = vmatprep.mubr.bf16.mxu0 %v8718_v46  ;;  %vm9219_vm3 = vcmp.eq.s32.totalorder %v23369_v11, %v23393_v30  ;;  %v15326_v46 = vld [vmem:[%s22615_s5 + $0x280] ss:$16 sps:$4 sm:$0xff]  }
 0xa76   :  { %13870 = vmatprep.subr.msk.bf16.mxu0 %vm13869_vm6, %v23092_v38  ;;  %9589 = vmatprep.mubr.bf16.mxu1 %v23329_v44  ;;  %vm9214_vm6 = vcmp.eq.s32.totalorder %v23314_v2, %v23363_v25  ;;  %vm13879_vm4 = vmpackc.low %vm9219_vm3, %vm9217_vm11  ;;  %vm9208_vm11 = vcmp.eq.s32.totalorder %v23374_v6, %v23363_v25  ;;  %v23395_v2 = vld [vmem:[#allocation57_spill] sm:$0xff] }
 0xa77   :  { %vm13881_vm8 = vmpackc.low %vm9216_vm15, %vm9214_vm6  ;;  %vm9205_vm15 = vcmp.eq.s32.totalorder %v23373_v52, %v23393_v30 }
 0xa79   :  { %13872 = vmatpush1.bf16.msk.msra.mxu0 %vm13871_vm12, %v23092_v38  ;;  %vm9215_vm12 = vcmp.eq.s32.totalorder %v23370_v63, %v23393_v30 }
 0xa7a   :  { %13874 = vmatprep.subr.msk.bf16.mxu0 %vm13873_vm2, %v23092_v38  ;;  %vm9210_vm2 = vcmp.eq.s32.totalorder %v23371_v17, %v23363_v25  ;;  %vm13883_vm5 = vmpackc.low %vm9215_vm12, %vm9213_vm14  ;;  %vm9204_vm14 = vcmp.eq.s32.totalorder %v23376_v56, %v23363_v25  ;;  %v23407_v17 = vld [vmem:[#allocation11_spill] sm:$0xff] }
 0xa7b   :  { %vm13885_vm0 = vmpackc.low %vm9212_vm7, %vm9210_vm2  ;;  %vm9201_vm7 = vcmp.eq.s32.totalorder %v23375_v37, %v23393_v30 }
 0xa7d   :  { %13876 = vmatpush1.bf16.msk.msra.mxu0 %vm13875_vm13, %v23092_v38  ;;  %vm9211_vm13 = vcmp.eq.s32.totalorder %v23372_v29, %v23393_v30 }
 0xa7e   :  { %13878 = vmatprep.subr.msk.bf16.mxu0 %vm13877_vm10, %v23092_v38  ;;  %vm9206_vm10 = vcmp.eq.s32.totalorder %v23373_v52, %v23363_v25  ;;  %vm13887_vm3 = vmpackc.low %vm9211_vm13, %vm9209_vm9  ;;  %vm9264_vm9 = vcmp.eq.s32.totalorder %v23378_v19, %v23363_v25 }
 0xa7f   :  { %vm13889_vm6 = vmpackc.low %vm9208_vm11, %vm9206_vm10  ;;  %vm9261_vm11 = vcmp.eq.s32.totalorder %v23377_v34, %v23393_v30 }
 0xa81   :  { %13880 = vmatpush1.bf16.msk.msra.mxu0 %vm13879_vm4, %v23092_v38  ;;  %vm9207_vm4 = vcmp.eq.s32.totalorder %v23374_v6, %v23393_v30 }
 0xa82   :  { %13882 = vmatprep.subr.msk.bf16.mxu0 %vm13881_vm8, %v23092_v38  ;;  %vm9202_vm8 = vcmp.eq.s32.totalorder %v23375_v37, %v23363_v25  ;;  %vm13891_vm12 = vmpackc.low %vm9207_vm4, %vm9205_vm15  ;;  %vm9260_vm15 = vcmp.eq.s32.totalorder %v23394_v62, %v23363_v25 }
 0xa83   :  { %vm13893_vm2 = vmpackc.low %vm9204_vm14, %vm9202_vm8  ;;  %vm9257_vm14 = vcmp.eq.s32.totalorder %v23379_v8, %v23393_v30 }
 0xa85   :  { %13884 = vmatpush1.bf16.msk.msra.mxu0 %vm13883_vm5, %v23092_v38  ;;  %vm9203_vm5 = vcmp.eq.s32.totalorder %v23376_v56, %v23393_v30  ;;  %v23408_v56 = vmov 0.0  }
 0xa86   :  { %13886 = vmatprep.subr.msk.bf16.mxu0 %vm13885_vm0, %v23092_v38  ;;  %vm9262_vm0 = vcmp.eq.s32.totalorder %v23377_v34, %v23363_v25  ;;  %vm13895_vm13 = vmpackc.low %vm9203_vm5, %vm9201_vm7  ;;  %vm9256_vm7 = vcmp.eq.s32.totalorder %v23396_v10, %v23363_v25 }
 0xa87   :  { %vm13897_vm10 = vmpackc.low %vm9264_vm9, %vm9262_vm0  ;;  %vm9253_vm9 = vcmp.eq.s32.totalorder %v23395_v2, %v23393_v30 }
 0xa89   :  { %13888 = vmatpush1.bf16.msk.msra.mxu0 %vm13887_vm3, %v23092_v38  ;;  %vm9263_vm3 = vcmp.eq.s32.totalorder %v23378_v19, %v23393_v30 }
 0xa8a   :  { %13890 = vmatprep.subr.msk.bf16.mxu0 %vm13889_vm6, %v23092_v38  ;;  %vm9258_vm6 = vcmp.eq.s32.totalorder %v23379_v8, %v23363_v25  ;;  %vm13899_vm4 = vmpackc.low %vm9263_vm3, %vm9261_vm11  ;;  %vm9252_vm11 = vcmp.eq.s32.totalorder %v23398_v42, %v23363_v25  ;;  %v15310_v8 = vld [vmem:[%s22615_s5 + $0x2e4] ss:$16 sps:$4 sm:$0xff]  }
 0xa8b   :  { %vm13901_vm8 = vmpackc.low %vm9260_vm15, %vm9258_vm6  ;;  %vm9249_vm15 = vcmp.eq.s32.totalorder %v23397_v53, %v23393_v30 }
 0xa8d   :  { %13892 = vmatpush1.bf16.msk.msra.mxu0 %vm13891_vm12, %v23092_v38  ;;  %vm9259_vm12 = vcmp.eq.s32.totalorder %v23394_v62, %v23393_v30  ;;  %v15337_v62 = vld [vmem:[%s22615_s5 + $0x26c] ss:$16 sps:$4 sm:$0xff]  }
 0xa8e   :  { %13894 = vmatprep.subr.msk.bf16.mxu0 %vm13893_vm2, %v23092_v38  ;;  %vm9254_vm2 = vcmp.eq.s32.totalorder %v23395_v2, %v23363_v25  ;;  %vm13903_vm5 = vmpackc.low %vm9259_vm12, %vm9257_vm14  ;;  %vm9248_vm14 = vcmp.eq.s32.totalorder %v23400_v12, %v23363_v25  ;;  %v15332_v2 = vld [vmem:[%s22615_s5 + $0x260] ss:$16 sps:$4 sm:$0xff]  }
 0xa8f   :  { %vm13905_vm0 = vmpackc.low %vm9256_vm7, %vm9254_vm2  ;;  %vm9245_vm7 = vcmp.eq.s32.totalorder %v23399_v18, %v23393_v30 }
 0xa91   :  { %13896 = vmatpush1.bf16.msk.msra.mxu0 %vm13895_vm13, %v23092_v38  ;;  %vm9255_vm13 = vcmp.eq.s32.totalorder %v23396_v10, %v23393_v30  ;;  %v15335_v10 = vld [vmem:[%s22615_s5 + $0x268] ss:$16 sps:$4 sm:$0xff]  }
 0xa92   :  { %13898 = vmatprep.subr.msk.bf16.mxu0 %vm13897_vm10, %v23092_v38  ;;  %vm9250_vm10 = vcmp.eq.s32.totalorder %v23397_v53, %v23363_v25  ;;  %vm13907_vm3 = vmpackc.low %vm9255_vm13, %vm9253_vm9  ;;  %vm9244_vm9 = vcmp.eq.s32.totalorder %v23402_v58, %v23363_v25  ;;  %v15340_v53 = vld [vmem:[%s22615_s5 + $0x244] ss:$16 sps:$4 sm:$0xff]  }
 0xa93   :  { %vm13909_vm6 = vmpackc.low %vm9252_vm11, %vm9250_vm10  ;;  %vm9241_vm11 = vcmp.eq.s32.totalorder %v23401_v48, %v23393_v30 }
 0xa95   :  { %13900 = vmatpush2.bf16.msk.msra.mxu0 %vm13899_vm4, %v23092_v38  ;;  %vm9251_vm4 = vcmp.eq.s32.totalorder %v23398_v42, %v23393_v30  ;;  %v15343_v42 = vld [vmem:[%s22615_s5 + $0x24c] ss:$16 sps:$4 sm:$0xff]  }
 0xa96   :  { %13902 = vmatprep.subr.msk.bf16.mxu0 %vm13901_vm8, %v23092_v38  ;;  %vm9246_vm8 = vcmp.eq.s32.totalorder %v23399_v18, %v23363_v25  ;;  %vm13911_vm12 = vmpackc.low %vm9251_vm4, %vm9249_vm15  ;;  %vm9240_vm15 = vcmp.eq.s32.totalorder %v23404_v54, %v23363_v25  ;;  %v15338_v18 = vld [vmem:[%s22615_s5 + $0x240] ss:$16 sps:$4 sm:$0xff]  }
 0xa97   :  { %vm13913_vm2 = vmpackc.low %vm9248_vm14, %vm9246_vm8  ;;  %vm9237_vm14 = vcmp.eq.s32.totalorder %v23403_v57, %v23393_v30 }
 0xa99   :  { %13904 = vmatpush2.bf16.msk.msra.mxu0 %vm13903_vm5, %v23092_v38  ;;  %vm9247_vm5 = vcmp.eq.s32.totalorder %v23400_v12, %v23393_v30  ;;  %v15341_v12 = vld [vmem:[%s22615_s5 + $0x248] ss:$16 sps:$4 sm:$0xff]  }
 0xa9a   :  { %13906 = vmatprep.subr.msk.bf16.mxu0 %vm13905_vm0, %v23092_v38  ;;  %vm9242_vm0 = vcmp.eq.s32.totalorder %v23401_v48, %v23363_v25  ;;  %vm13915_vm13 = vmpackc.low %vm9247_vm5, %vm9245_vm7  ;;  %vm9236_vm7 = vcmp.eq.s32.totalorder %v23406_v0, %v23363_v25  ;;  %v15346_v48 = vld [vmem:[%s22615_s5 + $0x224] ss:$16 sps:$4 sm:$0xff]  }
 0xa9b   :  { %vm13917_vm10 = vmpackc.low %vm9244_vm9, %vm9242_vm0  ;;  %vm9233_vm9 = vcmp.eq.s32.totalorder %v23405_v35, %v23393_v30 }
 0xa9d   :  { %13908 = vmatpush2.bf16.msk.msra.mxu0 %vm13907_vm3, %v23092_v38  ;;  %vm9243_vm3 = vcmp.eq.s32.totalorder %v23402_v58, %v23393_v30  ;;  %v15349_v58 = vld [vmem:[%s22615_s5 + $0x22c] ss:$16 sps:$4 sm:$0xff]  }
 0xa9e   :  { %13910 = vmatprep.subr.msk.bf16.mxu0 %vm13909_vm6, %v23092_v38  ;;  %vm9238_vm6 = vcmp.eq.s32.totalorder %v23403_v57, %v23363_v25  ;;  %vm13919_vm4 = vmpackc.low %vm9243_vm3, %vm9241_vm11  ;;  %v15344_v57 = vld [vmem:[%s22615_s5 + $0x220] ss:$16 sps:$4 sm:$0xff]  }
 0xa9f   :  { %vm13921_vm8 = vmpackc.low %vm9240_vm15, %vm9238_vm6  ;;  %vm9547_vm6 = vcmask 64512  }
 0xaa1   :  { %13912 = vmatpush2.bf16.msk.msra.mxu0 %vm13911_vm12, %v23092_v38  ;;  %vm9239_vm12 = vcmp.eq.s32.totalorder %v23404_v54, %v23393_v30  ;;  %v15347_v54 = vld [vmem:[%s22615_s5 + $0x228] ss:$16 sps:$4 sm:$0xff]  }
 0xaa2   :  { %13914 = vmatprep.subr.msk.bf16.mxu0 %vm13913_vm2, %v23092_v38  ;;  %vm9234_vm2 = vcmp.eq.s32.totalorder %v23405_v35, %v23363_v25  ;;  %vm13923_vm5 = vmpackc.low %vm9239_vm12, %vm9237_vm14  ;;  %v15352_v35 = vld [vmem:[%s22615_s5 + $0x204] ss:$16 sps:$4 sm:$0xff]  }
 0xaa3   :  { %vm13925_vm0 = vmpackc.low %vm9236_vm7, %vm9234_vm2 }
 0xaa5   :  { %13916 = vmatpush2.bf16.msk.msra.mxu0 %vm13915_vm13, %v23092_v38  ;;  %vm9235_vm13 = vcmp.eq.s32.totalorder %v23406_v0, %v23393_v30  ;;  %v15355_v0 = vld [vmem:[%s22615_s5 + $0x20c] ss:$16 sps:$4 sm:$0xff]  }
 0xaa6   :  { %13918 = vmatprep.subr.msk.bf16.mxu0 %vm13917_vm10, %v23092_v38  ;;  %vm13927_vm10 = vmpackc.low %vm9235_vm13, %vm9233_vm9 }
 0xaa9   :  { %13920 = vmatpush2.bf16.msk.msra.mxu0 %vm13919_vm4, %v23092_v38  ;;  %vm11999_vm4 = vcmask 1041408  }
 0xaaa   :  { %13922 = vmatprep.subr.msk.bf16.mxu0 %vm13921_vm8, %v23092_v38 }
 0xaad   :  { %13924 = vmatpush2.bf16.msk.msra.mxu0 %vm13923_vm5, %v23092_v38 }
 0xaae   :  { %13926 = vmatprep.subr.msk.bf16.mxu0 %vm13925_vm0, %v23092_v38 }
 0xab1   :  { %13928 = vmatpush2.bf16.msk.msra.mxu0 %vm13927_vm10, %v23092_v38  ;;  %v21668_v38 = vmul.u32 4, %v23277_v45 }
 0xab3   :  { %v9664_v60 = vadd.s32 1, %v21668_v38  ;;  %vm9544_vm3 = vcmp.eq.s32.totalorder %v23407_v17, %v21668_v38 }
 0xab4   :  { %9531 = vmatmul.mubr.bf16.vlgmr.msra.gmra.mxu0 %v21513_v23  ;;  %v9545_v45 = vsel %vm9544_vm3, 1.0, %v23408_v56  ;;  %v15329_v23 = vld [vmem:[%s22615_s5 + $0x288] ss:$16 sps:$4 sm:$0xff]  }
 0xab5   :  { %9703 = vmatprep.mubr.bf16.mxu0 %v23329_v44  ;;  %vm9665_vm11 = vcmp.eq.s32.totalorder %v23407_v17, %v9664_v60  ;;  %v9546_v3 = vpack.c.bf16 %v9545_v45, %v9545_v45  ;;  %v15376_v60 = vld [vmem:[%s22615_s5 + $0x384] ss:$16 sps:$4 sm:$0xff]   ;;  %v15389_v45 = vld [vmem:[%s22615_s5 + $0x348] ss:$16 sps:$4 sm:$0xff]  }
 0xab6   :  { %v9666_v34 = vsel %vm9665_vm11, 1.0, %v23408_v56 }
 0xab7   :  { %v9667_v43 = vpack.c.bf16 %v9666_v34, %v9666_v34  ;;  %v15386_v34 = vld [vmem:[%s22615_s5 + $0x340] ss:$16 sps:$4 sm:$0xff]  }
 0xaf4   :  { %v9083_v36 = vpop.f32.mrf.mxu1 }
 0xaf6   :  { %v9085_v7 = vpop.f32.mrf.mxu1 }
 0xaf8   :  { %v9087_v21 = vpop.f32.mrf.mxu1 }
 0xaf9   :  { %v15358_v21 = vld [vmem:[%s22615_s5 + $0x3e4] ss:$16 sps:$4 sm:$0xff]  }
 0xafa   :  { %v9088_v14 = vpop.f32.mrf.mxu1 }
 0xafb   :  { %v15361_v14 = vld [vmem:[%s22615_s5 + $0x3ec] ss:$16 sps:$4 sm:$0xff]  }
 0xb34   :  { %v9124_v24 = vpop.f32.mrf.mxu0  ;;  %v9491_v28 = vpop.f32.mrf.mxu1 }
 0xb35   :  { %v9125_v20 = vadd.f32 %v9124_v24, %v9083_v36  ;;  %v15350_v36 = vld [vmem:[%s22615_s5 + $0x200] ss:$16 sps:$4 sm:$0xff]  }
 0xb36   :  { %v9126_v5 = vpop.f32.mrf.mxu0  ;;  %v9493_v39 = vpop.f32.mrf.mxu1  ;;  %v15356_v24 = vld [vmem:[%s22615_s5 + $0x3e0] ss:$16 sps:$4 sm:$0xff]  }
 0xb37   :  { %v9127_v27 = vadd.f32 %v9126_v5, %v9085_v7  ;;  %v15353_v7 = vld [vmem:[%s22615_s5 + $0x208] ss:$16 sps:$4 sm:$0xff]   ;;  %v15367_v5 = vld [vmem:[%s22615_s5 + $0x3cc] ss:$16 sps:$4 sm:$0xff]  }
 0xb38   :  { %v9128_v15 = vpop.f32.mrf.mxu0  ;;  %v9495_v9 = vpop.f32.mrf.mxu1 }
 0xb39   :  { %v15370_v15 = vld [vmem:[%s22615_s5 + $0x3a4] ss:$16 sps:$4 sm:$0xff]   ;;  %v15373_v9 = vld [vmem:[%s22615_s5 + $0x3ac] ss:$16 sps:$4 sm:$0xff]  }
 0xb3a   :  { %v9129_v25 = vpop.f32.mrf.mxu0  ;;  %v9496_v32 = vpop.f32.mrf.mxu1 }
 0xb3b   :  { %v15368_v25 = vld [vmem:[%s22615_s5 + $0x3a0] ss:$16 sps:$4 sm:$0xff]   ;;  %v15371_v32 = vld [vmem:[%s22615_s5 + $0x3a8] ss:$16 sps:$4 sm:$0xff]  }
 0xb74   :  { %v9532_v16 = vpop.f32.mrf.mxu0 }
 0xb75   :  { %v9533_v41 = vadd.f32 %v9532_v16, %v9491_v28  ;;  %v15359_v28 = vld [vmem:[%s22615_s5 + $0x3e8] ss:$16 sps:$4 sm:$0xff]   ;;  %v15379_v16 = vld [vmem:[%s22615_s5 + $0x38c] ss:$16 sps:$4 sm:$0xff]  }
 0xb76   :  { %v9534_v22 = vpop.f32.mrf.mxu0 }
 0xb77   :  { %v9539_v11 = vmax.f32 %v9125_v20, %v9533_v41  ;;  %v9535_v63 = vadd.f32 %v9534_v22, %v9493_v39  ;;  %v15364_v20 = vld [vmem:[%s22615_s5 + $0x3c4] ss:$16 sps:$4 sm:$0xff]   ;;  %v15362_v39 = vld [vmem:[%s22615_s5 + $0x3c0] ss:$16 sps:$4 sm:$0xff]   ;;  %v15377_v22 = vld [vmem:[%s22615_s5 + $0x388] ss:$16 sps:$4 sm:$0xff]  }
 0xb78   :  { %v9536_v29 = vpop.f32.mrf.mxu0  ;;  %v15374_v41 = vld [vmem:[%s22615_s5 + $0x380] ss:$16 sps:$4 sm:$0xff]  }
 0xb79   :  { %v9541_v52 = vpack.c.bf16 %v9539_v11, %v9539_v11  ;;  %v9540_v6 = vmax.f32 %v9127_v27, %v9535_v63  ;;  %v15365_v27 = vld [vmem:[%s22615_s5 + $0x3c8] ss:$16 sps:$4 sm:$0xff]   ;;  %v15382_v11 = vld [vmem:[%s22615_s5 + $0x364] ss:$16 sps:$4 sm:$0xff]   ;;  %v15385_v63 = vld [vmem:[%s22615_s5 + $0x36c] ss:$16 sps:$4 sm:$0xff]  }
 0xb7a   :  { %v9537_v37 = vpop.f32.mrf.mxu0  ;;  %v15380_v29 = vld [vmem:[%s22615_s5 + $0x360] ss:$16 sps:$4 sm:$0xff]  }
 0xb7b   :  { %v21676_v19 = vpack.c.bf16 %v9540_v6, %v9540_v6  ;;  %v21689_v30 = vsel %vm4251_vm1, %v9541_v52, 0  ;;  %v15383_v52 = vld [vmem:[%s22615_s5 + $0x368] ss:$16 sps:$4 sm:$0xff]   ;;  %v15388_v6 = vld [vmem:[%s22615_s5 + $0x344] ss:$16 sps:$4 sm:$0xff]  }
 0xb7c   :  { %v15391_v37 = vld [vmem:[%s22615_s5 + $0x34c] ss:$16 sps:$4 sm:$0xff]  }
 0xb7d   :  { %13929 = vmatprep.subr.msk.bf16.mxu1 %vm4251_vm1, %v21676_v19  ;;  %13931 = vmatprep.subr.msk.bf16.mxu0 %vm4251_vm1, %v21676_v19 }
 0xb7e   :  { %9572 = vmatpush1.bf16.msra.mxu1 %v21689_v30  ;;  %9686 = vmatpush1.bf16.msra.mxu0 %v21689_v30 }
 0xb7f   :  { %10098 = vmatprep.subr.bf16.mxu1 %v15310_v8  ;;  %10139 = vmatprep.subr.bf16.mxu0 %v15313_v49  ;;  %v15394_v8 = vld [vmem:[%s22615_s5 + $0x324] ss:$16 sps:$4 sm:$0xff]   ;;  %v15397_v49 = vld [vmem:[%s22615_s5 + $0x32c] ss:$16 sps:$4 sm:$0xff]  }
 0xb81   :  { %13932 = vmatmul.mubr.msk.bf16.vlgmr.msra.gmra.mxu0 %vm9547_vm6, %v9667_v43  ;;  %13930 = vmatmul.mubr.msk.bf16.vlgmr.msra.gmra.mxu1 %vm9547_vm6, %v9546_v3  ;;  %v15392_v43 = vld [vmem:[%s22615_s5 + $0x320] ss:$16 sps:$4 sm:$0xff]   ;;  %v15395_v3 = vld [vmem:[%s22615_s5 + $0x328] ss:$16 sps:$4 sm:$0xff]  }
 0xb82   :  { %10099 = vmatpush1.bf16.msra.mxu1 %v15308_v33  ;;  %10140 = vmatpush1.bf16.msra.mxu0 %v15311_v31  ;;  %v15400_v33 = vld [vmem:[%s22615_s5 + $0x304] ss:$16 sps:$4 sm:$0xff]   ;;  %v15403_v31 = vld [vmem:[%s22615_s5 + $0x30c] ss:$16 sps:$4 sm:$0xff]  }
 0xb83   :  { %10100 = vmatprep.subr.bf16.mxu1 %v15316_v4  ;;  %10141 = vmatprep.subr.bf16.mxu0 %v15319_v26  ;;  %v15398_v4 = vld [vmem:[%s22615_s5 + $0x300] ss:$16 sps:$4 sm:$0xff]   ;;  %v15401_v26 = vld [vmem:[%s22615_s5 + $0x308] ss:$16 sps:$4 sm:$0xff]  }
 0xb86   :  { %10101 = vmatpush1.bf16.msra.mxu1 %v15314_v40  ;;  %10142 = vmatpush1.bf16.msra.mxu0 %v15317_v50  ;;  %v15406_v40 = vld [vmem:[%s22615_s5 + $0xe4] ss:$16 sps:$4 sm:$0xff]   ;;  %v15409_v50 = vld [vmem:[%s22615_s5 + $0xec] ss:$16 sps:$4 sm:$0xff]  }
 0xb87   :  { %10102 = vmatprep.subr.bf16.mxu1 %v15322_v51  ;;  %10143 = vmatprep.subr.bf16.mxu0 %v15325_v47 }
 0xb8a   :  { %10103 = vmatpush1.bf16.msra.mxu1 %v15320_v55  ;;  %10144 = vmatpush1.bf16.msra.mxu0 %v15323_v1 }
 0xb8b   :  { %10104 = vmatprep.subr.bf16.mxu1 %v15328_v61  ;;  %10145 = vmatprep.subr.bf16.mxu0 %v15331_v59  ;;  %v15404_v59 = vld [vmem:[%s22615_s5 + $0xe0] ss:$16 sps:$4 sm:$0xff]  }
 0xb8e   :  { %10105 = vmatpush1.bf16.msra.mxu1 %v15326_v46  ;;  %10146 = vmatpush1.bf16.msra.mxu0 %v15329_v23  ;;  %v15407_v46 = vld [vmem:[%s22615_s5 + $0xe8] ss:$16 sps:$4 sm:$0xff]  }
 0xb8f   :  { %10106 = vmatprep.subr.bf16.mxu1 %v15334_v13  ;;  %10147 = vmatprep.subr.bf16.mxu0 %v15337_v62  ;;  %v15412_v13 = vld [vmem:[%s22615_s5 + $0xc4] ss:$16 sps:$4 sm:$0xff]   ;;  %v15415_v62 = vld [vmem:[%s22615_s5 + $0xcc] ss:$16 sps:$4 sm:$0xff]  }
 0xb92   :  { %10107 = vmatpush1.bf16.msra.mxu1 %v15332_v2  ;;  %10148 = vmatpush1.bf16.msra.mxu0 %v15335_v10 }
 0xb93   :  { %10108 = vmatprep.subr.bf16.mxu1 %v15340_v53  ;;  %10149 = vmatprep.subr.bf16.mxu0 %v15343_v42 }
 0xb96   :  { %10109 = vmatpush1.bf16.msra.mxu1 %v15338_v18  ;;  %10150 = vmatpush1.bf16.msra.mxu0 %v15341_v12  ;;  %v15410_v12 = vld [vmem:[%s22615_s5 + $0xc0] ss:$16 sps:$4 sm:$0xff]  }
 0xb97   :  { %10110 = vmatprep.subr.bf16.mxu1 %v15346_v48  ;;  %10151 = vmatprep.subr.bf16.mxu0 %v15349_v58  ;;  %v15413_v48 = vld [vmem:[%s22615_s5 + $0xc8] ss:$16 sps:$4 sm:$0xff]   ;;  %v15418_v58 = vld [vmem:[%s22615_s5 + $0xa4] ss:$16 sps:$4 sm:$0xff]  }
 0xb9a   :  { %10111 = vmatpush1.bf16.msra.mxu1 %v15344_v57  ;;  %10152 = vmatpush1.bf16.msra.mxu0 %v15347_v54  ;;  %v15421_v57 = vld [vmem:[%s22615_s5 + $0xac] ss:$16 sps:$4 sm:$0xff]   ;;  %v15416_v54 = vld [vmem:[%s22615_s5 + $0xa0] ss:$16 sps:$4 sm:$0xff]  }
 0xb9b   :  { %10112 = vmatprep.subr.bf16.mxu1 %v15352_v35  ;;  %10153 = vmatprep.subr.bf16.mxu0 %v15355_v0  ;;  %v15419_v35 = vld [vmem:[%s22615_s5 + $0xa8] ss:$16 sps:$4 sm:$0xff]   ;;  %v15424_v0 = vld [vmem:[%s22615_s5 + $0x84] ss:$16 sps:$4 sm:$0xff]  }
 0xb9e   :  { %10113 = vmatpush1.bf16.msra.mxu1 %v15350_v36  ;;  %10154 = vmatpush1.bf16.msra.mxu0 %v15353_v7  ;;  %v15427_v36 = vld [vmem:[%s22615_s5 + $0x8c] ss:$16 sps:$4 sm:$0xff]   ;;  %v15422_v7 = vld [vmem:[%s22615_s5 + $0x80] ss:$16 sps:$4 sm:$0xff]  }
 0xb9f   :  { %10114 = vmatprep.subr.bf16.mxu1 %v15358_v21  ;;  %10155 = vmatprep.subr.bf16.mxu0 %v15361_v14  ;;  %v15425_v21 = vld [vmem:[%s22615_s5 + $0x88] ss:$16 sps:$4 sm:$0xff]   ;;  %v15430_v14 = vld [vmem:[%s22615_s5 + $0x64] ss:$16 sps:$4 sm:$0xff]  }
 0xba2   :  { %10115 = vmatpush2.bf16.msra.mxu1 %v15356_v24  ;;  %10156 = vmatpush2.bf16.msra.mxu0 %v15359_v28  ;;  %v15433_v24 = vld [vmem:[%s22615_s5 + $0x6c] ss:$16 sps:$4 sm:$0xff]   ;;  %v15428_v28 = vld [vmem:[%s22615_s5 + $0x60] ss:$16 sps:$4 sm:$0xff]  }
 0xba3   :  { %10116 = vmatprep.subr.bf16.mxu1 %v15364_v20  ;;  %10157 = vmatprep.subr.bf16.mxu0 %v15367_v5  ;;  %v15431_v20 = vld [vmem:[%s22615_s5 + $0x68] ss:$16 sps:$4 sm:$0xff]   ;;  %v15436_v5 = vld [vmem:[%s22615_s5 + $0x44] ss:$16 sps:$4 sm:$0xff]  }
 0xba6   :  { %10117 = vmatpush2.bf16.msra.mxu1 %v15362_v39  ;;  %10158 = vmatpush2.bf16.msra.mxu0 %v15365_v27  ;;  %v15439_v39 = vld [vmem:[%s22615_s5 + $0x4c] ss:$16 sps:$4 sm:$0xff]   ;;  %v15434_v27 = vld [vmem:[%s22615_s5 + $0x40] ss:$16 sps:$4 sm:$0xff]  }
 0xba7   :  { %10118 = vmatprep.subr.bf16.mxu1 %v15370_v15  ;;  %10159 = vmatprep.subr.bf16.mxu0 %v15373_v9  ;;  %v15437_v15 = vld [vmem:[%s22615_s5 + $0x48] ss:$16 sps:$4 sm:$0xff]   ;;  %v15442_v9 = vld [vmem:[%s22615_s5 + $0x24] ss:$16 sps:$4 sm:$0xff]  }
 0xbaa   :  { %10119 = vmatpush2.bf16.msra.mxu1 %v15368_v25  ;;  %10160 = vmatpush2.bf16.msra.mxu0 %v15371_v32  ;;  %v15445_v25 = vld [vmem:[%s22615_s5 + $0x2c] ss:$16 sps:$4 sm:$0xff]   ;;  %v15440_v32 = vld [vmem:[%s22615_s5 + $0x20] ss:$16 sps:$4 sm:$0xff]  }
 0xbab   :  { %10120 = vmatprep.subr.bf16.mxu1 %v15376_v60  ;;  %10161 = vmatprep.subr.bf16.mxu0 %v15379_v16  ;;  %v15443_v60 = vld [vmem:[%s22615_s5 + $0x28] ss:$16 sps:$4 sm:$0xff]   ;;  %v15448_v16 = vld [vmem:[%s22615_s5 + $0x4] ss:$16 sps:$4 sm:$0xff]  }
 0xbae   :  { %10121 = vmatpush2.bf16.msra.mxu1 %v15374_v41  ;;  %10162 = vmatpush2.bf16.msra.mxu0 %v15377_v22  ;;  %v15451_v41 = vld [vmem:[%s22615_s5 + $0xc] ss:$16 sps:$4 sm:$0xff]   ;;  %v15446_v22 = vld [vmem:[%s22615_s5] ss:$16 sps:$4 sm:$0xff]  }
 0xbaf   :  { %10122 = vmatprep.subr.bf16.mxu1 %v15382_v11  ;;  %10163 = vmatprep.subr.bf16.mxu0 %v15385_v63  ;;  %v15449_v11 = vld [vmem:[%s22615_s5 + $0x8] ss:$16 sps:$4 sm:$0xff]   ;;  %v15454_v63 = vld [vmem:[%s22615_s5 + $0x1e4] ss:$16 sps:$4 sm:$0xff]  }
 0xbb2   :  { %10123 = vmatpush2.bf16.msra.mxu1 %v15380_v29  ;;  %10164 = vmatpush2.bf16.msra.mxu0 %v15383_v52  ;;  %v15457_v29 = vld [vmem:[%s22615_s5 + $0x1ec] ss:$16 sps:$4 sm:$0xff]   ;;  %v15452_v52 = vld [vmem:[%s22615_s5 + $0x1e0] ss:$16 sps:$4 sm:$0xff]  }
 0xbb3   :  { %10124 = vmatprep.subr.bf16.mxu1 %v15388_v6  ;;  %10165 = vmatprep.subr.bf16.mxu0 %v15391_v37  ;;  %v15455_v6 = vld [vmem:[%s22615_s5 + $0x1e8] ss:$16 sps:$4 sm:$0xff]   ;;  %v15460_v37 = vld [vmem:[%s22615_s5 + $0x1c4] ss:$16 sps:$4 sm:$0xff]  }
 0xbb6   :  { %10125 = vmatpush2.bf16.msra.mxu1 %v15386_v34  ;;  %10166 = vmatpush2.bf16.msra.mxu0 %v15389_v45  ;;  %v15463_v34 = vld [vmem:[%s22615_s5 + $0x1cc] ss:$16 sps:$4 sm:$0xff]   ;;  %v15458_v45 = vld [vmem:[%s22615_s5 + $0x1c0] ss:$16 sps:$4 sm:$0xff]  }
 0xbb7   :  { %10126 = vmatprep.subr.bf16.mxu1 %v15394_v8  ;;  %10167 = vmatprep.subr.bf16.mxu0 %v15397_v49  ;;  %v15461_v8 = vld [vmem:[%s22615_s5 + $0x1c8] ss:$16 sps:$4 sm:$0xff]   ;;  %v15466_v49 = vld [vmem:[%s22615_s5 + $0x1a4] ss:$16 sps:$4 sm:$0xff]  }
 0xbba   :  { %10127 = vmatpush2.bf16.msra.mxu1 %v15392_v43  ;;  %10168 = vmatpush2.bf16.msra.mxu0 %v15395_v3  ;;  %v15469_v43 = vld [vmem:[%s22615_s5 + $0x1ac] ss:$16 sps:$4 sm:$0xff]   ;;  %v15464_v3 = vld [vmem:[%s22615_s5 + $0x1a0] ss:$16 sps:$4 sm:$0xff]  }
 0xbbb   :  { %10128 = vmatprep.subr.bf16.mxu1 %v15400_v33  ;;  %10169 = vmatprep.subr.bf16.mxu0 %v15403_v31  ;;  %v15467_v33 = vld [vmem:[%s22615_s5 + $0x1a8] ss:$16 sps:$4 sm:$0xff]   ;;  %v15472_v31 = vld [vmem:[%s22615_s5 + $0x184] ss:$16 sps:$4 sm:$0xff]  }
 0xbbe   :  { %10129 = vmatpush2.bf16.msra.mxu1 %v15398_v4  ;;  %10170 = vmatpush2.bf16.msra.mxu0 %v15401_v26  ;;  %v15475_v4 = vld [vmem:[%s22615_s5 + $0x18c] ss:$16 sps:$4 sm:$0xff]   ;;  %v15470_v26 = vld [vmem:[%s22615_s5 + $0x180] ss:$16 sps:$4 sm:$0xff]  }
 0xbbf   :  { %10500 = vmatprep.subr.bf16.mxu1 %v15406_v40  ;;  %10541 = vmatprep.subr.bf16.mxu0 %v15409_v50  ;;  %v15473_v40 = vld [vmem:[%s22615_s5 + $0x188] ss:$16 sps:$4 sm:$0xff]   ;;  %v15478_v50 = vld [vmem:[%s22615_s5 + $0x164] ss:$16 sps:$4 sm:$0xff]  }
 0xc41   :  { %v9705_v51 = vpop.f32.mrf.mxu0  ;;  %v21887_v47 = vpop.f32.mrf.mxu1 }
 0xc42   :  { %v9712_v23 = vpack.c.bf16 %v9705_v51, %v9705_v51  ;;  %v15481_v51 = vld [vmem:[%s22615_s5 + $0x16c] ss:$16 sps:$4 sm:$0xff]  }
 0xc43   :  { %v9707_v55 = vpop.f32.mrf.mxu0  ;;  %v9593_v1 = vpop.f32.mrf.mxu1 }
 0xc44   :  { %v9713_v61 = vpack.c.bf16 %v9707_v55, %v9707_v55  ;;  %v9599_v53 = vpack.c.bf16 %v9593_v1, %v9593_v1  ;;  %v15476_v55 = vld [vmem:[%s22615_s5 + $0x160] ss:$16 sps:$4 sm:$0xff]   ;;  %v15479_v1 = vld [vmem:[%s22615_s5 + $0x168] ss:$16 sps:$4 sm:$0xff]  }
 0xc45   :  { %v9709_v2 = vpop.f32.mrf.mxu0  ;;  %v9595_v10 = vpop.f32.mrf.mxu1 }
 0xc46   :  { %10130 = vmatprep.mubr.bf16.mxu1 %v9713_v61  ;;  %10171 = vmatprep.mubr.bf16.mxu0 %v9713_v61  ;;  %v15484_v61 = vld [vmem:[%s22615_s5 + $0x144] ss:$16 sps:$4 sm:$0xff]   ;;  %v15488_v2 = vld [vmem:[%s22615_s5 + $0x120] ss:$16 sps:$4 sm:$0xff]   ;;  %v15491_v10 = vld [vmem:[%s22615_s5 + $0x128] ss:$16 sps:$4 sm:$0xff]  }
 0xc47   :  { %10131 = vmatmul.mubr.bf16.vlgmr.msra.gmra.mxu1 %v9712_v23  ;;  %10172 = vmatmul.mubr.bf16.vlgmr.msra.gmra.mxu0 %v9712_v23  ;;  %v9710_v42 = vpop.f32.mrf.mxu0  ;;  %v9596_v18 = vpop.f32.mrf.mxu1  ;;  %v15485_v23 = vld [vmem:[%s22615_s5 + $0x148] ss:$16 sps:$4 sm:$0xff]  }
 0xc48   :  { %10501 = vmatpush1.bf16.msra.mxu1 %v15404_v59  ;;  %10542 = vmatpush1.bf16.msra.mxu0 %v15407_v46  ;;  %v15487_v59 = vld [vmem:[%s22615_s5 + $0x14c] ss:$16 sps:$4 sm:$0xff]   ;;  %v15482_v46 = vld [vmem:[%s22615_s5 + $0x140] ss:$16 sps:$4 sm:$0xff]  }
 0xc49   :  { %10502 = vmatprep.subr.bf16.mxu1 %v15412_v13  ;;  %10543 = vmatprep.subr.bf16.mxu0 %v15415_v62  ;;  %v15490_v13 = vld [vmem:[%s22615_s5 + $0x124] ss:$16 sps:$4 sm:$0xff]   ;;  %v15493_v62 = vld [vmem:[%s22615_s5 + $0x12c] ss:$16 sps:$4 sm:$0xff]   ;;  %v15494_v18 = vld [vmem:[%s22615_s5 + $0x100] ss:$16 sps:$4 sm:$0xff]  }
 0xc4a   :  { %10532 = vmatprep.mubr.bf16.mxu1 %v9599_v53  ;;  %10573 = vmatprep.mubr.bf16.mxu0 %v9599_v53  ;;  %v15496_v53 = vld [vmem:[%s22615_s5 + $0x104] ss:$16 sps:$4 sm:$0xff]   ;;  %v15499_v42 = vld [vmem:[%s22615_s5 + $0x10c] ss:$16 sps:$4 sm:$0xff]  }
 0xc4c   :  { %10503 = vmatpush1.bf16.msra.mxu1 %v15410_v12  ;;  %10544 = vmatpush1.bf16.msra.mxu0 %v15413_v48  ;;  %v15497_v12 = vld [vmem:[%s22615_s5 + $0x108] ss:$16 sps:$4 sm:$0xff]   ;;  %v15502_v48 = vld [vmem:[%s22615_s5 + $0x4e4] ss:$16 sps:$4 sm:$0xff]  }
 0xc4d   :  { %10504 = vmatprep.subr.bf16.mxu1 %v15418_v58  ;;  %10545 = vmatprep.subr.bf16.mxu0 %v15421_v57  ;;  %v10582_v58 = vadd.s32 2, %v21668_v38  ;;  %v15500_v57 = vld [vmem:[%s22615_s5 + $0x4e0] ss:$16 sps:$4 sm:$0xff]  }
 0xc4f   :  { %vm10583_vm15 = vcmp.eq.s32.totalorder %v23407_v17, %v10582_v58  ;;  %v15584_v58 = vld [vmem:[%s22615_s5 + $0x568] ss:$16 sps:$4 sm:$0xff]  }
 0xc50   :  { %10505 = vmatpush1.bf16.msra.mxu1 %v15416_v54  ;;  %10546 = vmatpush1.bf16.msra.mxu0 %v15419_v35  ;;  %v9598_v54 = vpack.c.bf16 %v21887_v47, %v21887_v47  ;;  %v15505_v35 = vld [vmem:[%s22615_s5 + $0x4c4] ss:$16 sps:$4 sm:$0xff]   ;;  %v10584_v47 = vsel %vm10583_vm15, 1.0, %v23408_v56 }
 0xc51   :  { %10506 = vmatprep.subr.bf16.mxu1 %v15424_v0  ;;  %10547 = vmatprep.subr.bf16.mxu0 %v15427_v36  ;;  %v15503_v0 = vld [vmem:[%s22615_s5 + $0x4c0] ss:$16 sps:$4 sm:$0xff]   ;;  %v15508_v36 = vld [vmem:[%s22615_s5 + $0x4a4] ss:$16 sps:$4 sm:$0xff]  }
 0xc54   :  { %10507 = vmatpush1.bf16.msra.mxu1 %v15422_v7  ;;  %10548 = vmatpush1.bf16.msra.mxu0 %v15425_v21  ;;  %v10585_v7 = vpack.c.bf16 %v10584_v47, %v10584_v47  ;;  %v15506_v21 = vld [vmem:[%s22615_s5 + $0x4a0] ss:$16 sps:$4 sm:$0xff]   ;;  %v15592_v47 = vld [vmem:[%s22615_s5 + $0x52c] ss:$16 sps:$4 sm:$0xff]  }
 0xc55   :  { %10508 = vmatprep.subr.bf16.mxu1 %v15430_v14  ;;  %10549 = vmatprep.subr.bf16.mxu0 %v15433_v24  ;;  %v15511_v14 = vld [vmem:[%s22615_s5 + $0x484] ss:$16 sps:$4 sm:$0xff]   ;;  %v15548_v24 = vld [vmem:[%s22615_s5 + $0x4e8] ss:$16 sps:$4 sm:$0xff]  }
 0xc58   :  { %10509 = vmatpush1.bf16.msra.mxu1 %v15428_v28  ;;  %10550 = vmatpush1.bf16.msra.mxu0 %v15431_v20  ;;  %v15550_v28 = vld [vmem:[%s22615_s5 + $0x4ec] ss:$16 sps:$4 sm:$0xff]  }
 0xc59   :  { %10510 = vmatprep.subr.bf16.mxu1 %v15436_v5  ;;  %10551 = vmatprep.subr.bf16.mxu0 %v15439_v39  ;;  %v15553_v20 = vld [vmem:[%s22615_s5 + $0x4cc] ss:$16 sps:$4 sm:$0xff]   ;;  %v15509_v5 = vld [vmem:[%s22615_s5 + $0x480] ss:$16 sps:$4 sm:$0xff]   ;;  %v15551_v39 = vld [vmem:[%s22615_s5 + $0x4c8] ss:$16 sps:$4 sm:$0xff]  }
 0xc5c   :  { %10511 = vmatpush1.bf16.msra.mxu1 %v15434_v27  ;;  %10552 = vmatpush1.bf16.msra.mxu0 %v15437_v15  ;;  %v15514_v27 = vld [vmem:[%s22615_s5 + $0x464] ss:$16 sps:$4 sm:$0xff]   ;;  %v15556_v15 = vld [vmem:[%s22615_s5 + $0x4ac] ss:$16 sps:$4 sm:$0xff]  }
 0xc5d   :  { %10512 = vmatprep.subr.bf16.mxu1 %v15442_v9  ;;  %10553 = vmatprep.subr.bf16.mxu0 %v15445_v25  ;;  %v15512_v9 = vld [vmem:[%s22615_s5 + $0x460] ss:$16 sps:$4 sm:$0xff]   ;;  %v15554_v25 = vld [vmem:[%s22615_s5 + $0x4a8] ss:$16 sps:$4 sm:$0xff]  }
 0xc60   :  { %10513 = vmatpush1.bf16.msra.mxu1 %v15440_v32  ;;  %10554 = vmatpush1.bf16.msra.mxu0 %v15443_v60  ;;  %v15517_v32 = vld [vmem:[%s22615_s5 + $0x444] ss:$16 sps:$4 sm:$0xff]   ;;  %v15559_v60 = vld [vmem:[%s22615_s5 + $0x48c] ss:$16 sps:$4 sm:$0xff]  }
 0xc61   :  { %10514 = vmatprep.subr.bf16.mxu1 %v15448_v16  ;;  %10555 = vmatprep.subr.bf16.mxu0 %v15451_v41  ;;  %v15515_v16 = vld [vmem:[%s22615_s5 + $0x440] ss:$16 sps:$4 sm:$0xff]   ;;  %v15557_v41 = vld [vmem:[%s22615_s5 + $0x488] ss:$16 sps:$4 sm:$0xff]  }
 0xc64   :  { %10515 = vmatpush1.bf16.msra.mxu1 %v15446_v22  ;;  %10556 = vmatpush1.bf16.msra.mxu0 %v15449_v11  ;;  %v15520_v22 = vld [vmem:[%s22615_s5 + $0x424] ss:$16 sps:$4 sm:$0xff]   ;;  %v15562_v11 = vld [vmem:[%s22615_s5 + $0x46c] ss:$16 sps:$4 sm:$0xff]  }
 0xc65   :  { %10516 = vmatprep.subr.bf16.mxu1 %v15454_v63  ;;  %10557 = vmatprep.subr.bf16.mxu0 %v15457_v29  ;;  %v15518_v63 = vld [vmem:[%s22615_s5 + $0x420] ss:$16 sps:$4 sm:$0xff]   ;;  %v15560_v29 = vld [vmem:[%s22615_s5 + $0x468] ss:$16 sps:$4 sm:$0xff]  }
 0xc68   :  { %10517 = vmatpush2.bf16.msra.mxu1 %v15452_v52  ;;  %10558 = vmatpush2.bf16.msra.mxu0 %v15455_v6  ;;  %v15523_v52 = vld [vmem:[%s22615_s5 + $0x404] ss:$16 sps:$4 sm:$0xff]   ;;  %v15565_v6 = vld [vmem:[%s22615_s5 + $0x44c] ss:$16 sps:$4 sm:$0xff]  }
 0xc69   :  { %10518 = vmatprep.subr.bf16.mxu1 %v15460_v37  ;;  %10559 = vmatprep.subr.bf16.mxu0 %v15463_v34  ;;  %v15521_v37 = vld [vmem:[%s22615_s5 + $0x400] ss:$16 sps:$4 sm:$0xff]   ;;  %v15563_v34 = vld [vmem:[%s22615_s5 + $0x448] ss:$16 sps:$4 sm:$0xff]  }
 0xc6c   :  { %10519 = vmatpush2.bf16.msra.mxu1 %v15458_v45  ;;  %10560 = vmatpush2.bf16.msra.mxu0 %v15461_v8  ;;  %v15526_v45 = vld [vmem:[%s22615_s5 + $0x5e4] ss:$16 sps:$4 sm:$0xff]   ;;  %v15568_v8 = vld [vmem:[%s22615_s5 + $0x42c] ss:$16 sps:$4 sm:$0xff]  }
 0xc6d   :  { %10520 = vmatprep.subr.bf16.mxu1 %v15466_v49  ;;  %10561 = vmatprep.subr.bf16.mxu0 %v15469_v43  ;;  %v15524_v49 = vld [vmem:[%s22615_s5 + $0x5e0] ss:$16 sps:$4 sm:$0xff]   ;;  %v15566_v43 = vld [vmem:[%s22615_s5 + $0x428] ss:$16 sps:$4 sm:$0xff]  }
 0xc70   :  { %10521 = vmatpush2.bf16.msra.mxu1 %v15464_v3  ;;  %10562 = vmatpush2.bf16.msra.mxu0 %v15467_v33  ;;  %v15529_v3 = vld [vmem:[%s22615_s5 + $0x5c4] ss:$16 sps:$4 sm:$0xff]   ;;  %v15571_v33 = vld [vmem:[%s22615_s5 + $0x40c] ss:$16 sps:$4 sm:$0xff]  }
 0xc71   :  { %10522 = vmatprep.subr.bf16.mxu1 %v15472_v31  ;;  %10563 = vmatprep.subr.bf16.mxu0 %v15475_v4  ;;  %v15527_v31 = vld [vmem:[%s22615_s5 + $0x5c0] ss:$16 sps:$4 sm:$0xff]   ;;  %v15569_v4 = vld [vmem:[%s22615_s5 + $0x408] ss:$16 sps:$4 sm:$0xff]  }
 0xc74   :  { %10523 = vmatpush2.bf16.msra.mxu1 %v15470_v26  ;;  %10564 = vmatpush2.bf16.msra.mxu0 %v15473_v40  ;;  %v15532_v26 = vld [vmem:[%s22615_s5 + $0x5a4] ss:$16 sps:$4 sm:$0xff]   ;;  %v15574_v40 = vld [vmem:[%s22615_s5 + $0x5ec] ss:$16 sps:$4 sm:$0xff]  }
 0xc75   :  { %10524 = vmatprep.subr.bf16.mxu1 %v15478_v50  ;;  %10565 = vmatprep.subr.bf16.mxu0 %v15481_v51  ;;  %v15530_v50 = vld [vmem:[%s22615_s5 + $0x5a0] ss:$16 sps:$4 sm:$0xff]   ;;  %v15572_v51 = vld [vmem:[%s22615_s5 + $0x5e8] ss:$16 sps:$4 sm:$0xff]  }
 0xc78   :  { %10525 = vmatpush2.bf16.msra.mxu1 %v15476_v55  ;;  %10566 = vmatpush2.bf16.msra.mxu0 %v15479_v1  ;;  %v15535_v55 = vld [vmem:[%s22615_s5 + $0x584] ss:$16 sps:$4 sm:$0xff]   ;;  %v15577_v1 = vld [vmem:[%s22615_s5 + $0x5cc] ss:$16 sps:$4 sm:$0xff]  }
 0xc79   :  { %10526 = vmatprep.subr.bf16.mxu1 %v15484_v61  ;;  %10567 = vmatprep.subr.bf16.mxu0 %v15487_v59  ;;  %v15533_v61 = vld [vmem:[%s22615_s5 + $0x580] ss:$16 sps:$4 sm:$0xff]   ;;  %v15575_v59 = vld [vmem:[%s22615_s5 + $0x5c8] ss:$16 sps:$4 sm:$0xff]  }
 0xc7c   :  { %10527 = vmatpush2.bf16.msra.mxu1 %v15482_v46  ;;  %10568 = vmatpush2.bf16.msra.mxu0 %v15485_v23  ;;  %v15538_v46 = vld [vmem:[%s22615_s5 + $0x564] ss:$16 sps:$4 sm:$0xff]   ;;  %v15580_v23 = vld [vmem:[%s22615_s5 + $0x5ac] ss:$16 sps:$4 sm:$0xff]  }
 0xc7d   :  { %10528 = vmatprep.subr.bf16.mxu1 %v15490_v13  ;;  %10569 = vmatprep.subr.bf16.mxu0 %v15493_v62  ;;  %v15536_v13 = vld [vmem:[%s22615_s5 + $0x560] ss:$16 sps:$4 sm:$0xff]   ;;  %v15578_v62 = vld [vmem:[%s22615_s5 + $0x5a8] ss:$16 sps:$4 sm:$0xff]  }
 0xc80   :  { %10529 = vmatpush2.bf16.msra.mxu1 %v15488_v2  ;;  %10570 = vmatpush2.bf16.msra.mxu0 %v15491_v10  ;;  %v15541_v2 = vld [vmem:[%s22615_s5 + $0x544] ss:$16 sps:$4 sm:$0xff]   ;;  %v15583_v10 = vld [vmem:[%s22615_s5 + $0x58c] ss:$16 sps:$4 sm:$0xff]  }
 0xc81   :  { %10530 = vmatprep.subr.bf16.mxu1 %v15496_v53  ;;  %10571 = vmatprep.subr.bf16.mxu0 %v15499_v42  ;;  %v15539_v53 = vld [vmem:[%s22615_s5 + $0x540] ss:$16 sps:$4 sm:$0xff]   ;;  %v15581_v42 = vld [vmem:[%s22615_s5 + $0x588] ss:$16 sps:$4 sm:$0xff]  }
 0xc84   :  { %10531 = vmatpush2.bf16.msra.mxu1 %v15494_v18  ;;  %10572 = vmatpush2.bf16.msra.mxu0 %v15497_v12  ;;  %v15544_v18 = vld [vmem:[%s22615_s5 + $0x524] ss:$16 sps:$4 sm:$0xff]   ;;  %v15586_v12 = vld [vmem:[%s22615_s5 + $0x56c] ss:$16 sps:$4 sm:$0xff]  }
 0xc85   :  { %14061 = vmatprep.subr.msk.bf16.mxu1 %vm4251_vm1, %v21676_v19  ;;  %11016 = vmatprep.subr.bf16.mxu0 %v15502_v48  ;;  %v15542_v48 = vld [vmem:[%s22615_s5 + $0x520] ss:$16 sps:$4 sm:$0xff]  }
 0xc87   :  { %10533 = vmatmul.mubr.bf16.vlgmr.msra.gmra.mxu1 %v9598_v54  ;;  %10574 = vmatmul.mubr.bf16.vlgmr.msra.gmra.mxu0 %v9598_v54  ;;  %v15545_v54 = vld [vmem:[%s22615_s5 + $0x500] ss:$16 sps:$4 sm:$0xff]  }
 0xc88   :  { %10604 = vmatpush1.bf16.msra.mxu1 %v21689_v30  ;;  %11017 = vmatpush1.bf16.msra.mxu0 %v15500_v57  ;;  %v15547_v57 = vld [vmem:[%s22615_s5 + $0x504] ss:$16 sps:$4 sm:$0xff]  }
 0xc89   :  { %11018 = vmatprep.subr.bf16.mxu0 %v15505_v35  ;;  %10621 = vmatprep.mubr.bf16.mxu1 %v23329_v44  ;;  %v15589_v35 = vld [vmem:[%s22615_s5 + $0x54c] ss:$16 sps:$4 sm:$0xff]  }
 0xc8a   :  { %11057 = vmatprep.subr.bf16.mxu1 %v15550_v28 }
 0xc8c   :  { %11019 = vmatpush1.bf16.msra.mxu0 %v15503_v0  ;;  %v15587_v0 = vld [vmem:[%s22615_s5 + $0x548] ss:$16 sps:$4 sm:$0xff]  }
 0xc8d   :  { %11020 = vmatprep.subr.bf16.mxu0 %v15508_v36  ;;  %v15590_v36 = vld [vmem:[%s22615_s5 + $0x528] ss:$16 sps:$4 sm:$0xff]  }
 0xc8f   :  { %14062 = vmatmul.mubr.msk.bf16.vlgmr.msra.gmra.mxu1 %vm9547_vm6, %v10585_v7  ;;  %v15593_v7 = vld [vmem:[%s22615_s5 + $0x508] ss:$16 sps:$4 sm:$0xff]  }
 0xc90   :  { %11021 = vmatpush1.bf16.msra.mxu0 %v15506_v21  ;;  %11058 = vmatpush1.bf16.msra.mxu1 %v15548_v24  ;;  %v15598_v21 = vld [vmem:[%s22615_s5 + $0x6e4] ss:$16 sps:$4 sm:$0xff]  }
 0xc91   :  { %11022 = vmatprep.subr.bf16.mxu0 %v15511_v14  ;;  %11059 = vmatprep.subr.bf16.mxu1 %v15553_v20 }
 0xc94   :  { %11023 = vmatpush1.bf16.msra.mxu0 %v15509_v5  ;;  %11060 = vmatpush1.bf16.msra.mxu1 %v15551_v39 }
 0xc95   :  { %11024 = vmatprep.subr.bf16.mxu0 %v15514_v27  ;;  %11061 = vmatprep.subr.bf16.mxu1 %v15556_v15 }
 0xc98   :  { %11025 = vmatpush1.bf16.msra.mxu0 %v15512_v9  ;;  %11062 = vmatpush1.bf16.msra.mxu1 %v15554_v25 }
 0xc99   :  { %11026 = vmatprep.subr.bf16.mxu0 %v15517_v32  ;;  %11063 = vmatprep.subr.bf16.mxu1 %v15559_v60 }
 0xc9c   :  { %11027 = vmatpush1.bf16.msra.mxu0 %v15515_v16  ;;  %11064 = vmatpush1.bf16.msra.mxu1 %v15557_v41 }
 0xc9d   :  { %11028 = vmatprep.subr.bf16.mxu0 %v15520_v22  ;;  %11065 = vmatprep.subr.bf16.mxu1 %v15562_v11 }
 0xca0   :  { %11029 = vmatpush1.bf16.msra.mxu0 %v15518_v63  ;;  %11066 = vmatpush1.bf16.msra.mxu1 %v15560_v29 }
 0xca1   :  { %11030 = vmatprep.subr.bf16.mxu0 %v15523_v52  ;;  %11067 = vmatprep.subr.bf16.mxu1 %v15565_v6 }
 0xca4   :  { %11031 = vmatpush1.bf16.msra.mxu0 %v15521_v37  ;;  %11068 = vmatpush1.bf16.msra.mxu1 %v15563_v34  ;;  %v11102_v34 = vadd.s32 3, %v21668_v38  ;;  %v15604_v38 = vld [vmem:[%s22615_s5 + $0x6c4] ss:$16 sps:$4 sm:$0xff]  }
 0xca5   :  { %11032 = vmatprep.subr.bf16.mxu0 %v15526_v45  ;;  %11069 = vmatprep.subr.bf16.mxu1 %v15568_v8 }
 0xca8   :  { %11033 = vmatpush2.bf16.msra.mxu0 %v15524_v49  ;;  %11070 = vmatpush1.bf16.msra.mxu1 %v15566_v43 }
 0xca9   :  { %11034 = vmatprep.subr.bf16.mxu0 %v15529_v3  ;;  %11071 = vmatprep.subr.bf16.mxu1 %v15571_v33  ;;  %v15596_v3 = vld [vmem:[%s22615_s5 + $0x6e0] ss:$16 sps:$4 sm:$0xff]   ;;  %v15601_v33 = vld [vmem:[%s22615_s5 + $0x6ec] ss:$16 sps:$4 sm:$0xff]  }
 0xcac   :  { %11035 = vmatpush2.bf16.msra.mxu0 %v15527_v31  ;;  %11072 = vmatpush1.bf16.msra.mxu1 %v15569_v4  ;;  %v15602_v4 = vld [vmem:[%s22615_s5 + $0x6c0] ss:$16 sps:$4 sm:$0xff]  }
 0xcad   :  { %11036 = vmatprep.subr.bf16.mxu0 %v15532_v26  ;;  %11073 = vmatprep.subr.bf16.mxu1 %v15574_v40  ;;  %v15610_v26 = vld [vmem:[%s22615_s5 + $0x6a4] ss:$16 sps:$4 sm:$0xff]  }
 0xcb0   :  { %11037 = vmatpush2.bf16.msra.mxu0 %v15530_v50  ;;  %11074 = vmatpush2.bf16.msra.mxu1 %v15572_v51  ;;  %v15616_v50 = vld [vmem:[%s22615_s5 + $0x684] ss:$16 sps:$4 sm:$0xff]   ;;  %v15605_v51 = vld [vmem:[%s22615_s5 + $0x6c8] ss:$16 sps:$4 sm:$0xff]  }
 0xcb1   :  { %11038 = vmatprep.subr.bf16.mxu0 %v15535_v55  ;;  %11075 = vmatprep.subr.bf16.mxu1 %v15577_v1  ;;  %v15613_v55 = vld [vmem:[%s22615_s5 + $0x6ac] ss:$16 sps:$4 sm:$0xff]   ;;  %v15614_v1 = vld [vmem:[%s22615_s5 + $0x680] ss:$16 sps:$4 sm:$0xff]  }
 0xcb4   :  { %11039 = vmatpush2.bf16.msra.mxu0 %v15533_v61  ;;  %11076 = vmatpush2.bf16.msra.mxu1 %v15575_v59  ;;  %v15622_v61 = vld [vmem:[%s22615_s5 + $0x664] ss:$16 sps:$4 sm:$0xff]   ;;  %v15611_v59 = vld [vmem:[%s22615_s5 + $0x6a8] ss:$16 sps:$4 sm:$0xff]  }
 0xcb5   :  { %11040 = vmatprep.subr.bf16.mxu0 %v15538_v46  ;;  %11077 = vmatprep.subr.bf16.mxu1 %v15580_v23  ;;  %v15619_v46 = vld [vmem:[%s22615_s5 + $0x68c] ss:$16 sps:$4 sm:$0xff]   ;;  %v15620_v23 = vld [vmem:[%s22615_s5 + $0x660] ss:$16 sps:$4 sm:$0xff]  }
 0xcb8   :  { %11041 = vmatpush2.bf16.msra.mxu0 %v15536_v13  ;;  %11078 = vmatpush2.bf16.msra.mxu1 %v15578_v62  ;;  %v15628_v13 = vld [vmem:[%s22615_s5 + $0x644] ss:$16 sps:$4 sm:$0xff]   ;;  %v15617_v62 = vld [vmem:[%s22615_s5 + $0x688] ss:$16 sps:$4 sm:$0xff]  }
 0xcb9   :  { %11042 = vmatprep.subr.bf16.mxu0 %v15541_v2  ;;  %11079 = vmatprep.subr.bf16.mxu1 %v15583_v10  ;;  %v15625_v2 = vld [vmem:[%s22615_s5 + $0x66c] ss:$16 sps:$4 sm:$0xff]   ;;  %v15626_v10 = vld [vmem:[%s22615_s5 + $0x640] ss:$16 sps:$4 sm:$0xff]  }
 0xcbc   :  { %11043 = vmatpush2.bf16.msra.mxu0 %v15539_v53  ;;  %11080 = vmatpush2.bf16.msra.mxu1 %v15581_v42  ;;  %v15634_v53 = vld [vmem:[%s22615_s5 + $0x624] ss:$16 sps:$4 sm:$0xff]   ;;  %v15623_v42 = vld [vmem:[%s22615_s5 + $0x668] ss:$16 sps:$4 sm:$0xff]  }
 0xcbd   :  { %11044 = vmatprep.subr.bf16.mxu0 %v15544_v18  ;;  %11081 = vmatprep.subr.bf16.mxu1 %v15586_v12  ;;  %v15631_v18 = vld [vmem:[%s22615_s5 + $0x64c] ss:$16 sps:$4 sm:$0xff]   ;;  %v15632_v12 = vld [vmem:[%s22615_s5 + $0x620] ss:$16 sps:$4 sm:$0xff]  }
 0xcc0   :  { %11045 = vmatpush2.bf16.msra.mxu0 %v15542_v48  ;;  %11082 = vmatpush2.bf16.msra.mxu1 %v15584_v58  ;;  %v15640_v48 = vld [vmem:[%s22615_s5 + $0x604] ss:$16 sps:$4 sm:$0xff]   ;;  %v15629_v58 = vld [vmem:[%s22615_s5 + $0x648] ss:$16 sps:$4 sm:$0xff]  }
 0xcc1   :  { %11046 = vmatprep.subr.bf16.mxu0 %v15547_v57  ;;  %11083 = vmatprep.subr.bf16.mxu1 %v15589_v35  ;;  %v15637_v57 = vld [vmem:[%s22615_s5 + $0x62c] ss:$16 sps:$4 sm:$0xff]   ;;  %v15646_v35 = vld [vmem:[%s22615_s5 + $0x7e4] ss:$16 sps:$4 sm:$0xff]  }
 0xcc4   :  { %11047 = vmatpush2.bf16.msra.mxu0 %v15545_v54  ;;  %11084 = vmatpush2.bf16.msra.mxu1 %v15587_v0  ;;  %v15638_v54 = vld [vmem:[%s22615_s5 + $0x600] ss:$16 sps:$4 sm:$0xff]   ;;  %v15635_v0 = vld [vmem:[%s22615_s5 + $0x628] ss:$16 sps:$4 sm:$0xff]  }
 0xcc5   :  { %14127 = vmatprep.subr.msk.bf16.mxu0 %vm4251_vm1, %v21676_v19  ;;  %11085 = vmatprep.subr.bf16.mxu1 %v15592_v47  ;;  %v15595_v19 = vld [vmem:[%s22615_s5 + $0x50c] ss:$16 sps:$4 sm:$0xff]   ;;  %vm11103_vm1 = vcmp.eq.s32.totalorder %v23407_v17, %v11102_v34 }
 0xcc6   :  { %v11104_v17 = vsel %vm11103_vm1, 1.0, %v23408_v56  ;;  %v15608_v56 = vld [vmem:[%s22615_s5 + $0x6a0] ss:$16 sps:$4 sm:$0xff]   ;;  %v15643_v47 = vld [vmem:[%s22615_s5 + $0x60c] ss:$16 sps:$4 sm:$0xff]  }
 0xcc7   :  { %v11105_v40 = vpack.c.bf16 %v11104_v17, %v11104_v17  ;;  %v15679_v34 = vld [vmem:[%s22615_s5 + $0x74c] ss:$16 sps:$4 sm:$0xff]   ;;  %v15686_v17 = vld [vmem:[%s22615_s5 + $0x700] ss:$16 sps:$4 sm:$0xff]  }
 0xcc8   :  { %11086 = vmatpush2.bf16.msra.mxu1 %v15590_v36  ;;  %v15644_v36 = vld [vmem:[%s22615_s5 + $0x7e0] ss:$16 sps:$4 sm:$0xff]  }
 0xcc9   :  { %11087 = vmatprep.subr.bf16.mxu1 %v15595_v19  ;;  %v15652_v19 = vld [vmem:[%s22615_s5 + $0x7c4] ss:$16 sps:$4 sm:$0xff]  }
 0xccc   :  { %11088 = vmatpush2.bf16.msra.mxu1 %v15593_v7  ;;  %v15641_v7 = vld [vmem:[%s22615_s5 + $0x608] ss:$16 sps:$4 sm:$0xff]  }
 0xccd   :  { %11536 = vmatprep.subr.bf16.mxu1 %v15598_v21  ;;  %v15649_v21 = vld [vmem:[%s22615_s5 + $0x7ec] ss:$16 sps:$4 sm:$0xff]  }
 0xd07   :  { %v10132_v14 = vpop.f32.mrf.mxu1  ;;  %v10173_v24 = vpop.f32.mrf.mxu0 }
 0xd09   :  { %v10134_v28 = vpop.f32.mrf.mxu1  ;;  %v10175_v20 = vpop.f32.mrf.mxu0 }
 0xd0b   :  { %v10136_v5 = vpop.f32.mrf.mxu1  ;;  %v10177_v39 = vpop.f32.mrf.mxu0 }
 0xd0c   :  { %v15656_v5 = vld [vmem:[%s22615_s5 + $0x7a0] ss:$16 sps:$4 sm:$0xff]   ;;  %v15664_v39 = vld [vmem:[%s22615_s5 + $0x784] ss:$16 sps:$4 sm:$0xff]  }
 0xd0d   :  { %v10137_v27 = vpop.f32.mrf.mxu1  ;;  %v10178_v15 = vpop.f32.mrf.mxu0 }
 0xd0e   :  { %v15653_v27 = vld [vmem:[%s22615_s5 + $0x7c8] ss:$16 sps:$4 sm:$0xff]   ;;  %v15661_v15 = vld [vmem:[%s22615_s5 + $0x7ac] ss:$16 sps:$4 sm:$0xff]  }
 0xd47   :  { %v10534_v9 = vpop.f32.mrf.mxu1  ;;  %v10575_v25 = vpop.f32.mrf.mxu0 }
 0xd48   :  { %v22282_v32 = vadd.f32 %v10534_v9, %v10132_v14  ;;  %v22284_v60 = vadd.f32 %v10575_v25, %v10173_v24  ;;  %v15650_v14 = vld [vmem:[%s22615_s5 + $0x7c0] ss:$16 sps:$4 sm:$0xff]   ;;  %v15658_v24 = vld [vmem:[%s22615_s5 + $0x7a4] ss:$16 sps:$4 sm:$0xff]  }
 0xd49   :  { %v10536_v16 = vpop.f32.mrf.mxu1  ;;  %v10577_v41 = vpop.f32.mrf.mxu0  ;;  %v15662_v9 = vld [vmem:[%s22615_s5 + $0x780] ss:$16 sps:$4 sm:$0xff]   ;;  %v15670_v25 = vld [vmem:[%s22615_s5 + $0x764] ss:$16 sps:$4 sm:$0xff]  }
 0xd4a   :  { %v22286_v22 = vadd.f32 %v10536_v16, %v10134_v28  ;;  %v22288_v11 = vadd.f32 %v10577_v41, %v10175_v20  ;;  %v15647_v28 = vld [vmem:[%s22615_s5 + $0x7e8] ss:$16 sps:$4 sm:$0xff]   ;;  %v15655_v20 = vld [vmem:[%s22615_s5 + $0x7cc] ss:$16 sps:$4 sm:$0xff]  }
 0xd4b   :  { %v10538_v63 = vpop.f32.mrf.mxu1  ;;  %v10579_v29 = vpop.f32.mrf.mxu0  ;;  %v15659_v16 = vld [vmem:[%s22615_s5 + $0x7a8] ss:$16 sps:$4 sm:$0xff]   ;;  %v15667_v41 = vld [vmem:[%s22615_s5 + $0x78c] ss:$16 sps:$4 sm:$0xff]  }
 0xd4c   :  { %v15668_v63 = vld [vmem:[%s22615_s5 + $0x760] ss:$16 sps:$4 sm:$0xff]   ;;  %v15665_v29 = vld [vmem:[%s22615_s5 + $0x788] ss:$16 sps:$4 sm:$0xff]  }
 0xd4d   :  { %v10539_v52 = vpop.f32.mrf.mxu1  ;;  %v10580_v6 = vpop.f32.mrf.mxu0 }
 0xd4e   :  { %v15673_v52 = vld [vmem:[%s22615_s5 + $0x76c] ss:$16 sps:$4 sm:$0xff]   ;;  %v15671_v6 = vld [vmem:[%s22615_s5 + $0x768] ss:$16 sps:$4 sm:$0xff]  }
 0xd4f   :  { %v10623_v37 = vpop.f32.mrf.mxu1 }
 0xd50   :  { %v10630_v49 = vpack.c.bf16 %v10623_v37, %v10623_v37  ;;  %v15676_v37 = vld [vmem:[%s22615_s5 + $0x744] ss:$16 sps:$4 sm:$0xff]  }
 0xd51   :  { %v10625_v45 = vpop.f32.mrf.mxu1 }
 0xd52   :  { %v10631_v8 = vpack.c.bf16 %v10625_v45, %v10625_v45  ;;  %v15674_v45 = vld [vmem:[%s22615_s5 + $0x740] ss:$16 sps:$4 sm:$0xff]  }
 0xd53   :  { %v10627_v43 = vpop.f32.mrf.mxu1 }
 0xd54   :  { %11048 = vmatprep.mubr.bf16.mxu0 %v10631_v8  ;;  %11089 = vmatprep.mubr.bf16.mxu1 %v10631_v8  ;;  %v15677_v8 = vld [vmem:[%s22615_s5 + $0x748] ss:$16 sps:$4 sm:$0xff]   ;;  %v15685_v43 = vld [vmem:[%s22615_s5 + $0x72c] ss:$16 sps:$4 sm:$0xff]  }
 0xd55   :  { %11049 = vmatmul.mubr.bf16.vlgmr.msra.gmra.mxu0 %v10630_v49  ;;  %11090 = vmatmul.mubr.bf16.vlgmr.msra.gmra.mxu1 %v10630_v49  ;;  %v10628_v31 = vpop.f32.mrf.mxu1  ;;  %v15682_v49 = vld [vmem:[%s22615_s5 + $0x724] ss:$16 sps:$4 sm:$0xff]  }
 0xd56   :  { %11124 = vmatpush1.bf16.msra.mxu0 %v21689_v30  ;;  %11141 = vmatprep.mubr.bf16.mxu0 %v23329_v44  ;;  %v15599_v30 = vld [vmem:[%s22615_s5 + $0x6e8] ss:$16 sps:$4 sm:$0xff]   ;;  %v15607_v44 = vld [vmem:[%s22615_s5 + $0x6cc] ss:$16 sps:$4 sm:$0xff]  }
 0xd57   :  { %11577 = vmatprep.subr.bf16.mxu0 %v15601_v33  ;;  %11537 = vmatpush1.bf16.msra.mxu1 %v15596_v3  ;;  %v15680_v3 = vld [vmem:[%s22615_s5 + $0x720] ss:$16 sps:$4 sm:$0xff]   ;;  %v15683_v33 = vld [vmem:[%s22615_s5 + $0x728] ss:$16 sps:$4 sm:$0xff]   ;;  %v15691_v31 = vld [vmem:[%s22615_s5 + $0x70c] ss:$16 sps:$4 sm:$0xff]  }
 0xd58   :  { %11538 = vmatprep.subr.bf16.mxu1 %v15604_v38  ;;  %v15688_v38 = vld [vmem:[%s22615_s5 + $0x704] ss:$16 sps:$4 sm:$0xff]  }
 0xd5b   :  { %11539 = vmatpush1.bf16.msra.mxu1 %v15602_v4  ;;  %v15689_v4 = vld [vmem:[%s22615_s5 + $0x708] ss:$16 sps:$4 sm:$0xff]  }
 0xd5c   :  { %11540 = vmatprep.subr.bf16.mxu1 %v15610_v26  ;;  %v15692_v26 = vld [vmem:[%s22617_s7 + $0x78] sm:$0xff]  }
 0xd5d   :  { %14128 = vmatmul.mubr.msk.bf16.vlgmr.msra.gmra.mxu0 %vm9547_vm6, %v11105_v40  ;;  %v15693_v40 = vld [vmem:[%s22617_s7 + $0xf8] sm:$0xff]  }
 0xd5e   :  { %11578 = vmatpush1.bf16.msra.mxu0 %v15599_v30 }
 0xd5f   :  { %11579 = vmatprep.subr.bf16.mxu0 %v15607_v44  ;;  %11541 = vmatpush1.bf16.msra.mxu1 %v15608_v56 }
 0xd60   :  { %11542 = vmatprep.subr.bf16.mxu1 %v15616_v50 }
 0xd62   :  { %11580 = vmatpush1.bf16.msra.mxu0 %v15605_v51 }
 0xd63   :  { %11581 = vmatprep.subr.bf16.mxu0 %v15613_v55  ;;  %11543 = vmatpush1.bf16.msra.mxu1 %v15614_v1 }
 0xd64   :  { %11544 = vmatprep.subr.bf16.mxu1 %v15622_v61 }
 0xd66   :  { %11582 = vmatpush1.bf16.msra.mxu0 %v15611_v59 }
 0xd67   :  { %11583 = vmatprep.subr.bf16.mxu0 %v15619_v46  ;;  %11545 = vmatpush1.bf16.msra.mxu1 %v15620_v23 }
 0xd68   :  { %11546 = vmatprep.subr.bf16.mxu1 %v15628_v13 }
 0xd6a   :  { %11584 = vmatpush1.bf16.msra.mxu0 %v15617_v62 }
 0xd6b   :  { %11585 = vmatprep.subr.bf16.mxu0 %v15625_v2  ;;  %11547 = vmatpush1.bf16.msra.mxu1 %v15626_v10 }
 0xd6c   :  { %11548 = vmatprep.subr.bf16.mxu1 %v15634_v53 }
 0xd6e   :  { %11586 = vmatpush1.bf16.msra.mxu0 %v15623_v42  ;;  %v15697_v42 = vld [vmem:[%s22617_s7 + $0xf0] sm:$0xff]  }
 0xd6f   :  { %11587 = vmatprep.subr.bf16.mxu0 %v15631_v18  ;;  %11549 = vmatpush1.bf16.msra.mxu1 %v15632_v12  ;;  %v15698_v12 = vld [vmem:[%s22617_s7 + $0x30] sm:$0xff]  }
 0xd70   :  { %11550 = vmatprep.subr.bf16.mxu1 %v15640_v48  ;;  %v15699_v48 = vld [vmem:[%s22617_s7 + $0xb0] sm:$0xff]  }
 0xd72   :  { %11588 = vmatpush1.bf16.msra.mxu0 %v15629_v58  ;;  %v15700_v58 = vld [vmem:[%s22617_s7 + $0x68] sm:$0xff]  }
 0xd73   :  { %11589 = vmatprep.subr.bf16.mxu0 %v15637_v57  ;;  %11551 = vmatpush1.bf16.msra.mxu1 %v15638_v54  ;;  %v15701_v57 = vld [vmem:[%s22617_s7 + $0xe8] sm:$0xff]  }
 0xd74   :  { %11552 = vmatprep.subr.bf16.mxu1 %v15646_v35  ;;  %v15702_v54 = vld [vmem:[%s22617_s7 + $0x28] sm:$0xff]  }
 0xd75   :  { %v15703_v35 = vld [vmem:[%s22617_s7 + $0xa8] sm:$0xff]  }
 0xd76   :  { %11590 = vmatpush1.bf16.msra.mxu0 %v15635_v0  ;;  %v15704_v0 = vld [vmem:[%s22617_s7 + $0x60] sm:$0xff]  }
 0xd77   :  { %11591 = vmatprep.subr.bf16.mxu0 %v15643_v47  ;;  %11553 = vmatpush2.bf16.msra.mxu1 %v15644_v36  ;;  %v15705_v47 = vld [vmem:[%s22617_s7 + $0xe0] sm:$0xff]  }
 0xd78   :  { %11554 = vmatprep.subr.bf16.mxu1 %v15652_v19  ;;  %v15706_v36 = vld [vmem:[%s22617_s7 + $0x20] sm:$0xff]  }
 0xd79   :  { %v15707_v19 = vld [vmem:[%s22617_s7 + $0xa0] sm:$0xff]  }
 0xd7a   :  { %11592 = vmatpush1.bf16.msra.mxu0 %v15641_v7  ;;  %v15708_v7 = vld [vmem:[%s22617_s7 + $0x58] sm:$0xff]  }
 0xd7b   :  { %11593 = vmatprep.subr.bf16.mxu0 %v15649_v21  ;;  %11555 = vmatpush2.bf16.msra.mxu1 %v15650_v14  ;;  %v15709_v21 = vld [vmem:[%s22617_s7 + $0xd8] sm:$0xff]  }
 0xd7c   :  { %11556 = vmatprep.subr.bf16.mxu1 %v15658_v24  ;;  %v15710_v14 = vld [vmem:[%s22617_s7 + $0x18] sm:$0xff]  }
 0xd7d   :  { %v15711_v24 = vld [vmem:[%s22617_s7 + $0x98] sm:$0xff]  }
 0xd7e   :  { %11594 = vmatpush2.bf16.msra.mxu0 %v15647_v28  ;;  %v15712_v28 = vld [vmem:[%s22617_s7 + $0x50] sm:$0xff]  }
 0xd7f   :  { %11595 = vmatprep.subr.bf16.mxu0 %v15655_v20  ;;  %11557 = vmatpush2.bf16.msra.mxu1 %v15656_v5  ;;  %v15713_v20 = vld [vmem:[%s22617_s7 + $0xd0] sm:$0xff]  }
 0xd80   :  { %11558 = vmatprep.subr.bf16.mxu1 %v15664_v39  ;;  %v15714_v5 = vld [vmem:[%s22617_s7 + $0x10] sm:$0xff]  }
 0xd81   :  { %v15715_v39 = vld [vmem:[%s22617_s7 + $0x90] sm:$0xff]  }
 0xd82   :  { %11596 = vmatpush2.bf16.msra.mxu0 %v15653_v27  ;;  %v15716_v27 = vld [vmem:[%s22617_s7 + $0x48] sm:$0xff]  }
 0xd83   :  { %11597 = vmatprep.subr.bf16.mxu0 %v15661_v15  ;;  %11559 = vmatpush2.bf16.msra.mxu1 %v15662_v9  ;;  %v15717_v15 = vld [vmem:[%s22617_s7 + $0xc8] sm:$0xff]  }
 0xd84   :  { %11560 = vmatprep.subr.bf16.mxu1 %v15670_v25  ;;  %v15718_v9 = vld [vmem:[%s22617_s7 + $0x8] sm:$0xff]  }
 0xd85   :  { %v15719_v25 = vld [vmem:[%s22617_s7 + $0x88] sm:$0xff]  }
 0xd86   :  { %11598 = vmatpush2.bf16.msra.mxu0 %v15659_v16  ;;  %v15720_v16 = vld [vmem:[%s22617_s7 + $0x40] sm:$0xff]  }
 0xd87   :  { %11599 = vmatprep.subr.bf16.mxu0 %v15667_v41  ;;  %11561 = vmatpush2.bf16.msra.mxu1 %v15668_v63  ;;  %v15721_v41 = vld [vmem:[%s22617_s7 + $0xc0] sm:$0xff]  }
 0xd88   :  { %11562 = vmatprep.subr.bf16.mxu1 %v15676_v37  ;;  %v15722_v63 = vld [vmem:[%s22617_s7] sm:$0xff]  }
 0xd8a   :  { %11600 = vmatpush2.bf16.msra.mxu0 %v15665_v29  ;;  %v15723_v29 = vld [vmem:[%s22617_s7 + $0x80] sm:$0xff]  }
 0xd8b   :  { %11601 = vmatprep.subr.bf16.mxu0 %v15673_v52  ;;  %11563 = vmatpush2.bf16.msra.mxu1 %v15674_v45  ;;  %v11622_v52 = vld [vmem:[%s22616_s6] sm:$0xf] }
 0xd8c   :  { %11564 = vmatprep.subr.bf16.mxu1 %v15682_v49 }
 0xd8e   :  { %11602 = vmatpush2.bf16.msra.mxu0 %v15671_v6  ;;  %v23409_v6 = vld [vmem:[#allocation60_spill] sm:$0xff] }
 0xd8f   :  { %11603 = vmatprep.subr.bf16.mxu0 %v15679_v34  ;;  %11565 = vmatpush2.bf16.msra.mxu1 %v15680_v3  ;;  %v11627_v37 = vrot.slane %v11622_v52, %v23409_v6  ;;  %v23410_v34 = vld [vmem:[#allocation61_spill] sm:$0xff] }
 0xd90   :  { %11566 = vmatprep.subr.bf16.mxu1 %v15688_v38  ;;  %v11635_v45 = vrot.slane %v11622_v52, %v23410_v34 }
 0xd92   :  { %11604 = vmatpush2.bf16.msra.mxu0 %v15677_v8 }
 0xd93   :  { %11605 = vmatprep.subr.bf16.mxu0 %v15685_v43  ;;  %11567 = vmatpush2.bf16.msra.mxu1 %v15686_v17 }
 0xd94   :  { %14409 = vmatprep.subr.bf16.mxu1 %v15692_v26 }
 0xd96   :  { %11606 = vmatpush2.bf16.msra.mxu0 %v15683_v33  ;;  %v23411_v33 = vld [vmem:[#allocation63_spill] sm:$0xff] }
 0xd97   :  { %11607 = vmatprep.subr.bf16.mxu0 %v15691_v31  ;;  %v11631_v38 = vrot.slane %v11622_v52, %v23411_v33  ;;  %v23412_v31 = vld [vmem:[#allocation65_spill] sm:$0xff] }
 0xd98   :  { %v11639_v17 = vrot.slane %v11622_v52, %v23412_v31 }
 0xd9a   :  { %11608 = vmatpush2.bf16.msra.mxu0 %v15689_v4 }
 0xd9b   :  { %14431 = vmatprep.subr.bf16.mxu0 %v15693_v40 }
 0xe15   :  { %v11050_v30 = vpop.f32.mrf.mxu0  ;;  %v11091_v44 = vpop.f32.mrf.mxu1 }
 0xe16   :  { %v22492_v56 = vadd.f32 %v11050_v30, %v22282_v32  ;;  %v22495_v50 = vadd.f32 %v11091_v44, %v22284_v60  ;;  %v15694_v32 = vld [vmem:[%s22617_s7 + $0x38] sm:$0xff]  }
 0xe17   :  { %v11052_v51 = vpop.f32.mrf.mxu0  ;;  %v11093_v55 = vpop.f32.mrf.mxu1  ;;  %v15695_v60 = vld [vmem:[%s22617_s7 + $0xb8] sm:$0xff]  }
 0xe18   :  { %v22498_v1 = vadd.f32 %v11052_v51, %v22286_v22  ;;  %v22501_v61 = vadd.f32 %v11093_v55, %v22288_v11  ;;  %v15696_v11 = vld [vmem:[%s22617_s7 + $0x70] sm:$0xff]  }
 0xe19   :  { %v11054_v59 = vpop.f32.mrf.mxu0  ;;  %v11095_v46 = vpop.f32.mrf.mxu1 }
 0xe1b   :  { %v11055_v23 = vpop.f32.mrf.mxu0  ;;  %v11096_v13 = vpop.f32.mrf.mxu1 }
 0xe1d   :  { %v11143_v62 = vpop.f32.mrf.mxu0 }
 0xe1e   :  { %v11150_v22 = vpack.c.bf16 %v11143_v62, %v11143_v62 }
 0xe1f   :  { %v11145_v2 = vpop.f32.mrf.mxu0 }
 0xe20   :  { %v11151_v10 = vpack.c.bf16 %v11145_v2, %v11145_v2 }
 0xe21   :  { %v11147_v53 = vpop.f32.mrf.mxu0 }
 0xe22   :  { %11568 = vmatprep.mubr.bf16.mxu1 %v11151_v10  ;;  %11609 = vmatprep.mubr.bf16.mxu0 %v11151_v10 }
 0xe23   :  { %11569 = vmatmul.mubr.bf16.vlgmr.msra.gmra.mxu1 %v11150_v22  ;;  %11610 = vmatmul.mubr.bf16.vlgmr.msra.gmra.mxu0 %v11150_v22  ;;  %v11148_v18 = vpop.f32.mrf.mxu0 }
 0xe24   :  { %14410 = vmatpush3.bf16.msra.mxu1 %v15694_v32  ;;  %14432 = vmatpush3.bf16.msra.mxu0 %v15695_v60 }
 0xe25   :  { %14411 = vmatprep.subr.bf16.mxu1 %v15696_v11  ;;  %14433 = vmatprep.subr.bf16.mxu0 %v15697_v42  ;;  %v14193_v11 = vld [vmem:[%s22618_s8] ss:$0 sm:$0xff]  ;;  %s15754_s8 = smov [#allocation2]  }
 0xe26   :  { %s12026_s23 = sshll.u32 %s15754_s8, 4  ;;  %s12027_s23 = int_to_ptr.vmem [resolvable:$true] %s12026_s23 }
 0xe27   :  { %s15728_s24 = scalar_lea.vmem %s12027_s23, 32  ;;  %p15733_p1 = scmp.lt.s32.totalorder %s12027_s23, %s12027_s23 }
 0xe28   :  { %14412 = vmatpush3.bf16.msra.mxu1 %v15698_v12  ;;  %14434 = vmatpush3.bf16.msra.mxu0 %v15699_v48  ;;  %p15729_p0 = scmp.ne.s32.totalorder %s12027_s23, %s15728_s24  ;;  %p15734_p2 = scmp.lt.s32.totalorder %s15728_s24, %s15728_s24 }
 0xe29   :  { %14413 = vmatprep.subr.bf16.mxu1 %v15700_v58  ;;  %14435 = vmatprep.subr.bf16.mxu0 %v15701_v57 }
 0xe2a   :  { %p15735_p3 = por %p15734_p2, %p15733_p1 }
 0xe2c   :  { %14414 = vmatpush3.bf16.msra.mxu1 %v15702_v54  ;;  %14436 = vmatpush3.bf16.msra.mxu0 %v15703_v35  ;;  %p15736_p4 = pnand %p15735_p3, %p15729_p0 }
 0xe2d   :  { %14415 = vmatprep.subr.bf16.mxu1 %v15704_v0  ;;  %14437 = vmatprep.subr.bf16.mxu0 %v15705_v47 }
 0xe30   :  { %14416 = vmatpush3.bf16.msra.mxu1 %v15706_v36  ;;  %14438 = vmatpush3.bf16.msra.mxu0 %v15707_v19 }
 0xe31   :  { %14417 = vmatprep.subr.bf16.mxu1 %v15708_v7  ;;  %14439 = vmatprep.subr.bf16.mxu0 %v15709_v21 }
 0xe34   :  { %14418 = vmatpush3.bf16.msra.mxu1 %v15710_v14  ;;  %14440 = vmatpush3.bf16.msra.mxu0 %v15711_v24 }
 0xe35   :  { %14419 = vmatprep.subr.bf16.mxu1 %v15712_v28  ;;  %14441 = vmatprep.subr.bf16.mxu0 %v15713_v20 }
 0xe38   :  { %14420 = vmatpush3.bf16.msra.mxu1 %v15714_v5  ;;  %14442 = vmatpush3.bf16.msra.mxu0 %v15715_v39 }
 0xe39   :  { %14421 = vmatprep.subr.bf16.mxu1 %v15716_v27  ;;  %14443 = vmatprep.subr.bf16.mxu0 %v15717_v15 }
 0xe3c   :  { %14422 = vmatpush3.bf16.msra.mxu1 %v15718_v9  ;;  %14444 = vmatpush3.bf16.msra.mxu0 %v15719_v25 }
 0xe3d   :  { %14423 = vmatprep.subr.bf16.mxu1 %v15720_v16  ;;  %14445 = vmatprep.subr.bf16.mxu0 %v15721_v41 }
 0xe40   :  { %14424 = vmatpush3.bf16.msra.mxu1 %v15722_v63  ;;  %14446 = vmatpush3.bf16.msra.mxu0 %v15723_v29 }
 0xee3   :  { %v11570_v8 = vpop.f32.mrf.mxu1  ;;  %v11611_v49 = vpop.f32.mrf.mxu0 }
 0xee4   :  { %v11618_v43 = vadd.f32 %v11570_v8, %v22492_v56  ;;  %v11620_v3 = vadd.f32 %v11611_v49, %v22495_v50 }
 0xee5   :  { %v11572_v4 = vpop.f32.mrf.mxu1  ;;  %v11613_v26 = vpop.f32.mrf.mxu0 }
 0xee6   :  { %v11644_v40 = vadd.f32 %v11627_v37, %v11618_v43  ;;  %v11646_v30 = vadd.f32 %v11635_v45, %v11620_v3  ;;  %v11619_v44 = vadd.f32 %v11572_v4, %v22498_v1  ;;  %v11621_v51 = vadd.f32 %v11613_v26, %v22501_v61 }
 0xee7   :  { %v11574_v55 = vpop.f32.mrf.mxu1  ;;  %v11615_v59 = vpop.f32.mrf.mxu0 }
 0xee8   :  { %v11645_v46 = vadd.f32 %v11631_v38, %v11619_v44  ;;  %v11647_v23 = vadd.f32 %v11639_v17, %v11621_v51  ;;  %v11648_v13 = vmax.f32 %v11644_v40, 0.0  ;;  %v11650_v56 = vmax.f32 %v11646_v30, 0.0 }
 0xee9   :  { %v11575_v62 = vpop.f32.mrf.mxu1  ;;  %v11616_v50 = vpop.f32.mrf.mxu0 }
 0xeea   :  { %v11649_v2 = vmax.f32 %v11645_v46, 0.0  ;;  %v11651_v10 = vmax.f32 %v11647_v23, 0.0  ;;  %v11652_v22 = vpack.c.bf16 %v11648_v13, %v11648_v13  ;;  %v11654_v53 = vpack.c.bf16 %v11650_v56, %v11650_v56 }
 0xeec   :  { %v11653_v32 = vpack.c.bf16 %v11649_v2, %v11649_v2  ;;  %v11655_v60 = vpack.c.bf16 %v11651_v10, %v11651_v10 }
 0xeee   :  { %11951 = vmatprep.mubr.bf16.mxu1 %v11653_v32  ;;  %11991 = vmatprep.mubr.bf16.mxu0 %v11655_v60 }
 0xeef   :  { %11952 = vmatmul.mubr.bf16.vlgmr.msra.gmra.mxu1 %v11652_v22  ;;  %11992 = vmatmul.mubr.bf16.vlgmr.msra.gmra.mxu0 %v11654_v53 }
 0xfaf   :  { %v14425_v1 = vpop.f32.mrf.mxu1  ;;  %v14447_v61 = vpop.f32.mrf.mxu0 }
 0xfb1   :  { %v14426_v42 = vpop.f32.mrf.mxu1  ;;  %v14448_v18 = vpop.f32.mrf.mxu0 }
 0xfb2   :  { %v14427_v12 = vadd.f32 %v14426_v42, %v14425_v1  ;;  %v14449_v54 = vadd.f32 %v14448_v18, %v14447_v61 }
 0xfb3   :  { %v14428_v48 = vpop.f32.mrf.mxu1  ;;  %v14450_v58 = vpop.f32.mrf.mxu0 }
 0xfb4   :  { %v11954_v57 = vadd.f32 %v14427_v12, %v14193_v11 }
 0xfb5   :  { %v14429_v35 = vpop.f32.mrf.mxu1  ;;  %v14451_v0 = vpop.f32.mrf.mxu0 }
 0xfb6   :  { %v11994_v47 = vadd.f32 %v14449_v54, %v11954_v57 }
 0xfb8   :  { %v12000_v36 = vsel %vm11999_vm4, %v11994_v47, -inf }
 0xfb9   :  { %v12001_v19 = vrot.slane %v12000_v36, 4 }
 0xfbb   :  { %v12002_v7 = vmax.f32 %v12000_v36, %v12001_v19 }
 0xfbd   :  { %v12003_v21 = vrot.slane %v12002_v7, 2 }
 0xfbf   :  { %v12004_v14 = vmax.f32 %v12002_v7, %v12003_v21 }
 0xfc1   :  { %v12005_v24 = vrot.slane %v12004_v14, 1 }
 0xfc3   :  { %v12006_v28 = vmax.f32 %v12004_v14, %v12005_v24 }
 0xfc5   :  { %v12007_v20 = vsub.f32 %v11994_v47, %v12006_v28 }
 0xfc7   :  { %v12008_v5 = vmul.f32 1.442695, %v12007_v20 }
 0xfc9   :  { %15724 = vpow2.f32 %v12008_v5 }
 0xfd6   :  { %v15725_v39 = vpop.eup %15724 }
 0xfd7   :  { %v12010_v27 = vsel %vm11999_vm4, %v15725_v39, 0.0 }
 0xfd8   :  { %v12011_v15 = vrot.slane %v12010_v27, 4 }
 0xfda   :  { %v12012_v9 = vadd.f32 %v12011_v15, %v12010_v27 }
 0xfdc   :  { %v12013_v25 = vrot.slane %v12012_v9, 2 }
 0xfde   :  { %v12014_v16 = vadd.f32 %v12013_v25, %v12012_v9 }
 0xfe0   :  { %v12015_v41 = vrot.slane %v12014_v16, 1 }
 0xfe2   :  { %v12016_v63 = vadd.f32 %v12015_v41, %v12014_v16 }
 0xfe4   :  { %15726 = vrcp.f32 %v12016_v63 }
 0xff1   :  { %v15727_v29 = vpop.eup %15726 }
 0xff2   :  { %v12018_v52 = vmul.f32 %v15727_v29, %v15725_v39 }
 0xff4   :  { %12019 = vst [vmem:[#allocation2] sm:$0x3] %v12018_v52 }
 0xff5   :  { %15739 = shalt.err (!%p15736_p4)
}
 0xff6   :  { %12029 = dma.vmem_to_hbm [thread:$0]  %s12027_s23, 32, %s22619_s9, [#allocation3]  }
 0xff7   :  { %15748 = dma.done.wait [#allocation3], 32  }
 0xff8   :  { %15749 = vsyncadd [#allocation3], 4294967264 }
 0xff9   :  { %12033 = vsyncpa [#allocation3], 1 }

</bundles_post_ra>
